<compile_context>
chip_gen: v5e
topology: v5e:2x2
jax: 0.10.0
libtpu: 0.0.40
codegen_flags: <defaults>
</compile_context>

<pallas_src>
import math
import numpy as np
import jax
import jax.numpy as jnp
from jax import lax
from jax.experimental import pallas as pl
from jax.experimental.pallas import tpu as pltpu

# ----------------------------- hyper-parameters ------------------------------
LATENT_DIM = 8
D_MODEL = 32
NHEAD = 4
NUM_ENC_LAYERS = 2
ODE_NHIDDEN = 32
DEC_NHIDDEN = 32
OBS_DIM = 4
NOISE_STD = 0.1
ODE_LAYERS = 3            # fc1 + 1 middle layer + fc_final (num_layers=3)
N_SUB = 8                 # RK4 substeps per unique-time interval (static, unrolled)

LANE = 128                # TPU lane width; slab / padded-output width
SUBLANE = 8
POS_PACKED = 64           # positions packed into the slab (PyTorch table has 500;
                          # only the first seq_len rows are ever read)

# MXU operand dtype for the latent-ODE matmul chain (the only serial matmul chain).
# Kept bf16 on ALL TPU generations (f32 operands would run multi-pass on the MXU and
# roughly double the latency of the dominant serial chain).
ODE_MM_DTYPE = jnp.bfloat16

B = 2
T_OBS = 8
T_TARGET = 8


# ----------------------------- parameter packing ------------------------------
class _ParamPacker:
    """Packs many small (r, c<=128) f32 arrays into one (rows, 128) slab.

    Every entry starts on an 8-row (sublane) boundary and is zero-padded to 128 lanes,
    so ONE DMA moves all parameters and in-kernel slices stay tile aligned."""

    def __init__(self):
        self.entries = {}
        self.pieces = []
        self.rows = 0

    def add(self, name, arr):
        arr = np.asarray(arr, np.float32)
        if arr.ndim == 1:
            arr = arr.reshape(1, -1)
        r, c = arr.shape
        assert c <= LANE, (name, arr.shape)
        rp = ((r + SUBLANE - 1) // SUBLANE) * SUBLANE
        buf = np.zeros((rp, LANE), np.float32)
        buf[:r, :c] = arr
        self.entries[name] = (self.rows, r, c)
        self.pieces.append(buf)
        self.rows += rp

    def finish(self):
        return jnp.asarray(np.concatenate(self.pieces, axis=0)), self.entries


def _sinusoidal_table(n_pos, dim):
    position_enc = np.array(
        [[pos / np.power(10000, 2 * (j // 2) / dim) for j in range(dim)]
         for pos in range(n_pos)], dtype=np.float64)
    out = np.zeros((n_pos, dim), dtype=np.float32)
    sentinel = dim // 2 if dim % 2 == 0 else dim // 2 + 1
    out[:, :sentinel] = np.sin(position_enc[:, 0::2])
    out[:, sentinel:] = np.cos(position_enc[:, 1::2])
    return out


def init_params(key):
    keys = iter(jax.random.split(key, 64))

    def lin_t(fan_in, fan_out):
        w = jax.random.normal(next(keys), (fan_out, fan_in), jnp.float32) / np.sqrt(fan_in)
        b = jax.random.normal(next(keys), (fan_out,), jnp.float32) * 0.02
        return np.asarray(w).T, np.asarray(b).reshape(1, -1)   # stored pre-transposed

    pk = _ParamPacker()
    w, bb = lin_t(OBS_DIM, D_MODEL)
    pk.add('emb_w', w)
    pk.add('emb_b', bb)
    pk.add('pos', _sinusoidal_table(POS_PACKED, D_MODEL))

    for i in range(NUM_ENC_LAYERS):
        wq, bq = lin_t(D_MODEL, D_MODEL)
        wk, bk = lin_t(D_MODEL, D_MODEL)
        wv, bv = lin_t(D_MODEL, D_MODEL)
        pk.add(f'enc{i}_wqkv', np.concatenate([wq, wk, wv], axis=1))   # (D, 3D)
        pk.add(f'enc{i}_bqkv', np.concatenate([bq, bk, bv], axis=1))   # (1, 3D)
        wo, bo = lin_t(D_MODEL, D_MODEL)
        pk.add(f'enc{i}_wout', wo)
        pk.add(f'enc{i}_bout', bo)
        pk.add(f'enc{i}_g1', np.ones((1, D_MODEL), np.float32))
        pk.add(f'enc{i}_be1', np.zeros((1, D_MODEL), np.float32))
        w1, b1 = lin_t(D_MODEL, 4 * D_MODEL)
        pk.add(f'enc{i}_w1', w1)
        pk.add(f'enc{i}_b1', b1)
        w2, b2 = lin_t(4 * D_MODEL, D_MODEL)
        pk.add(f'enc{i}_w2', w2)
        pk.add(f'enc{i}_b2', b2)
        pk.add(f'enc{i}_g2', np.ones((1, D_MODEL), np.float32))
        pk.add(f'enc{i}_be2', np.zeros((1, D_MODEL), np.float32))

    w, bb = lin_t(D_MODEL, 2 * LATENT_DIM)
    pk.add('proj_w', w)
    pk.add('proj_b', bb)

    # LatentODEfunc: fc1 + 1 middle layer (ODE_LAYERS - 2) + fc_final
    w, bb = lin_t(LATENT_DIM, ODE_NHIDDEN)
    pk.add('ode_w1', w)
    pk.add('ode_b1', bb)
    w, bb = lin_t(ODE_NHIDDEN, ODE_NHIDDEN)
    pk.add('ode_wm', w)
    pk.add('ode_bm', bb)
    w, bb = lin_t(ODE_NHIDDEN, LATENT_DIM)
    pk.add('ode_wf', w)
    pk.add('ode_bf', bb)

    w, bb = lin_t(LATENT_DIM, DEC_NHIDDEN)
    pk.add('dec_w1', w)
    pk.add('dec_b1', bb)
    w, bb = lin_t(DEC_NHIDDEN, OBS_DIM)
    pk.add('dec_w2', w)
    pk.add('dec_b2', bb)

    slab, entries = pk.finish()
    return {'slab': slab, 'entries': entries}


# ------------------------------- fused kernel ---------------------------------
def make_fused_kernel(entries, b_sz, t_obs, t_tgt, n_unique):
    w_len = t_obs + t_tgt
    hd = D_MODEL // NHEAD
    scale = 1.0 / math.sqrt(hd)
    log2pi = float(np.log(2.0 * np.pi))
    noise_lv = 2.0 * math.log(NOISE_STD)
    inv_noise_var = math.exp(-noise_lv)
    f32 = jnp.float32

    def kernel(dts_ref, xwin_ref, eps_ref, sel_ref, slab_ref,
               predx_ref, loss_ref, zall_scr):

        def get(name, rows=None, full_lanes=False):
            off, r, c = entries[name]
            r = rows if rows is not None else r
            c = LANE if full_lanes else c
            return slab_ref[off:off + r, :c]

        # ------------- value embedding + sinusoidal positional embedding -------
        # xwin = [obs | target] along the window axis; obs is the first t_obs rows.
        obs_flat = xwin_ref[:, :t_obs, :].reshape(b_sz * t_obs, OBS_DIM)  # tile-aligned
        x = jnp.dot(obs_flat, get('emb_w'), preferred_element_type=f32) + get('emb_b')
        pos = get('pos', rows=t_obs)                                      # (T, D)
        x = (x.reshape(b_sz, t_obs, D_MODEL) + pos[None, :, :]            # broadcast add
             ).reshape(b_sz * t_obs, D_MODEL)

        # ------------- transformer encoder (post-norm, dropout = identity) -----
        def layer_norm(v, g, beta):
            mu = jnp.mean(v, axis=-1, keepdims=True)
            var = jnp.mean((v - mu) ** 2, axis=-1, keepdims=True)
            return (v - mu) * lax.rsqrt(var + 1e-5) * g + beta

        for li in range(NUM_ENC_LAYERS):
            qkv = (jnp.dot(x, get(f'enc{li}_wqkv'), preferred_element_type=f32)
                   + get(f'enc{li}_bqkv'))                                # (B*T, 3D)
            qkv3 = qkv.reshape(b_sz, t_obs, 3 * D_MODEL)                  # free reshape
            wout_off, _, _ = entries[f'enc{li}_wout']
            attn = None
            for h in range(NHEAD):                                        # static loop
                c0 = h * hd
                qh = qkv3[:, :, c0:c0 + hd] * scale                       # (B, T, hd)
                kh = qkv3[:, :, D_MODEL + c0:D_MODEL + c0 + hd]
                vh = qkv3[:, :, 2 * D_MODEL + c0:2 * D_MODEL + c0 + hd]
                s = jnp.einsum('btd,bsd->bts', qh, kh,
                               preferred_element_type=f32)                # (B, T, T)
                s = s - jnp.max(s, axis=-1, keepdims=True)
                p = jnp.exp(s)
                p = p * pl.reciprocal(jnp.sum(p, axis=-1, keepdims=True), approx=True)
                oh = jnp.einsum('bts,bsd->btd', p, vh,
                                preferred_element_type=f32)               # (B, T, hd)
                # concat_h(o_h) @ Wout == sum_h o_h @ Wout[h*hd:(h+1)*hd, :]
                wout_h = slab_ref[wout_off + c0:wout_off + c0 + hd, :D_MODEL]
                term = jnp.dot(oh.reshape(b_sz * t_obs, hd), wout_h,
                               preferred_element_type=f32)
                attn = term if attn is None else attn + term
            src = x + attn + get(f'enc{li}_bout')
            src = layer_norm(src, get(f'enc{li}_g1'), get(f'enc{li}_be1'))
            hmid = jnp.maximum(
                jnp.dot(src, get(f'enc{li}_w1'), preferred_element_type=f32)
                + get(f'enc{li}_b1'), 0.0)
            ff = (jnp.dot(hmid, get(f'enc{li}_w2'), preferred_element_type=f32)
                  + get(f'enc{li}_b2'))
            x = layer_norm(src + ff, get(f'enc{li}_g2'), get(f'enc{li}_be2'))

        # encoded[-1] in the PyTorch (T, B, E) layout == last token of each batch item
        h_last = jnp.concatenate(
            [x[b * t_obs + t_obs - 1: b * t_obs + t_obs, :] for b in range(b_sz)], axis=0)

        # ------------- initial latent state (reparameterization) ---------------
        zp = jnp.dot(h_last, get('proj_w'), preferred_element_type=f32) + get('proj_b')
        qz0_mean = zp[:, :LATENT_DIM]
        qz0_logvar = zp[:, LATENT_DIM:2 * LATENT_DIM]
        z0 = qz0_mean + eps_ref[...] * jnp.exp(0.5 * qz0_logvar)

        # ------------- latent ODE: fixed-step RK4, vreg-carried state ----------
        w1b = get('ode_w1').astype(ODE_MM_DTYPE)          # hoisted, resident in vregs
        wmb = get('ode_wm').astype(ODE_MM_DTYPE)
        wfb = get('ode_wf').astype(ODE_MM_DTYPE)
        b1f, bmf, bff = get('ode_b1'), get('ode_bm'), get('ode_bf')

        def elu(u):                       # ELU(alpha=1); element-wise math kept in f32
            return jnp.where(u > 0, u, jnp.exp(u) - 1.0)

        def ode_f(z):
            hh = elu(jnp.dot(z.astype(ODE_MM_DTYPE), w1b, preferred_element_type=f32) + b1f)
            hh = elu(jnp.dot(hh.astype(ODE_MM_DTYPE), wmb, preferred_element_type=f32) + bmf)
            return jnp.dot(hh.astype(ODE_MM_DTYPE), wfb, preferred_element_type=f32) + bff

        zall_scr[0] = z0

        def interval_body(i, z):
            dt = dts_ref[i] * (1.0 / N_SUB)
            for _sub in range(N_SUB):     # static -> fully unrolled RK4 substeps
                k1 = ode_f(z)
                k2 = ode_f(z + 0.5 * dt * k1)
                k3 = ode_f(z + 0.5 * dt * k2)
                k4 = ode_f(z + dt * k3)
                z = z + (dt / 6.0) * (k1 + 2.0 * k2 + 2.0 * k3 + k4)
            zall_scr[i + 1] = z           # only consumed by the decoder (off crit-path)
            return z                      # critical-path state stays in vregs

        lax.fori_loop(0, n_unique - 1, interval_body, z0)

        # -------- duplicate-time gather on latents + decoder MLP (once) --------
        # (concat of U tile-padded (B,L) slices; the alternative reshape is not
        #  tile-boundary aligned, so the proven concat is kept -- epilogue only)
        z_flat = jnp.concatenate([zall_scr[u] for u in range(n_unique)], axis=0)  # (U*B, L)
        z_gath = jnp.dot(sel_ref[...], z_flat, preferred_element_type=f32)        # (B*W, L)
        dh = jnp.maximum(
            jnp.dot(z_gath, get('dec_w1'), preferred_element_type=f32)
            + get('dec_b1'), 0.0)                                                 # (B*W, 32)
        # decoder output weight read with the full 128 zero-padded lanes so the result is
        # lane-dense (cols >= OBS_DIM are exactly zero) -> one unmasked lane-dense store.
        xp = (jnp.dot(dh, get('dec_w2', full_lanes=True), preferred_element_type=f32)
              + get('dec_b2', full_lanes=True))                                   # (B*W, 128)
        pred3 = xp.reshape(b_sz, w_len, LANE)                                     # tile-aligned
        predx_ref[...] = pred3

        # ------------- loss: one fused NLL reduction + KL epilogue -------------
        diff = xwin_ref[...] - pred3[:, :, :OBS_DIM]                              # (B, W, obs)
        n_elem = float(b_sz * w_len * OBS_DIM)
        nll = 0.5 * (n_elem * (log2pi + noise_lv) + inv_noise_var * jnp.sum(diff * diff))
        # normal_kl(mu, lv, 0, 0) = -lv + (exp(lv) + mu^2)/2 - 0.5   (matches the spec's
        # normal_kl with mu2 = lv2 = 0: kl = lv2 - lv1 + (v1 + (mu1-mu2)^2)/(2*v2) - 0.5)
        kl = jnp.sum(-qz0_logvar + (jnp.exp(qz0_logvar) + qz0_mean * qz0_mean) * 0.5 - 0.5)
        loss = (nll + kl) / float(b_sz)
        loss_ref[...] = loss * jnp.ones((1, LANE), f32)

    return kernel


# ------------------------------ forward wrapper --------------------------------
def filter_unique_times(times_1d):
    """Host-side replica of _filter_unique_times (runs on concrete values)."""
    unique_times = np.unique(times_1d)
    mapping = []
    j = 0
    for i in range(len(times_1d)):
        while j < len(unique_times) and times_1d[i] > unique_times[j]:
            j += 1
        mapping.append(j if j < len(unique_times) else j - 1)
    return unique_times, mapping


def forward(params, obs_traj, target_traj, full_time_np, eps):
    slab, entries = params['slab'], params['entries']
    b_sz, t_obs, _ = obs_traj.shape
    t_tgt = target_traj.shape[1]
    w_len = t_obs + t_tgt
    assert t_obs <= POS_PACKED

    # unique-time filtering on concrete host values (mirrors the eager torch loop)
    ft = np.asarray(full_time_np)[0]
    unique_times, mapping = filter_unique_times(ft)
    n_unique = int(len(unique_times))
    dts_np = np.diff(unique_times).astype(np.float32)
    if dts_np.size == 0:
        dts_np = np.zeros((1,), np.float32)   # dummy; the interval loop has 0 trips

    # static 0/1 selection matrix: row (b*W + w) picks unique-latent row (mapping[w]*B + b)
    sel_np = np.zeros((b_sz * w_len, n_unique * b_sz), np.float32)
    for b in range(b_sz):
        for w in range(w_len):
            sel_np[b * w_len + w, int(mapping[w]) * b_sz + b] = 1.0

    # obs/target concatenated once host-side -> single input, single fused NLL reduction
    xwin = jnp.concatenate([obs_traj, target_traj], axis=1)     # (B, W, obs_dim)

    kernel = make_fused_kernel(entries, b_sz, t_obs, t_tgt, n_unique)

    grid_spec = pltpu.PrefetchScalarGridSpec(
        num_scalar_prefetch=1,                 # dts -> SMEM
        grid=(1,),
        in_specs=[
            pl.BlockSpec((b_sz, w_len, OBS_DIM), lambda i, dts: (0, 0, 0)),       # xwin
            pl.BlockSpec((b_sz, LATENT_DIM), lambda i, dts: (0, 0)),              # eps
            pl.BlockSpec((b_sz * w_len, n_unique * b_sz), lambda i, dts: (0, 0)),  # sel
            pl.BlockSpec(slab.shape, lambda i, dts: (0, 0)),     # one packed weight slab
        ],
        out_specs=[
            pl.BlockSpec((b_sz, w_len, LANE), lambda i, dts: (0, 0, 0)),
            pl.BlockSpec((1, LANE), lambda i, dts: (0, 0)),
        ],
        scratch_shapes=[pltpu.VMEM((n_unique, b_sz, LATENT_DIM), jnp.float32)],
    )
    pred_pad, loss_pad = pl.pallas_call(
        kernel,
        grid_spec=grid_spec,
        out_shape=(jax.ShapeDtypeStruct((b_sz, w_len, LANE), jnp.float32),
                   jax.ShapeDtypeStruct((1, LANE), jnp.float32)),
        compiler_params=pltpu.CompilerParams(dimension_semantics=("arbitrary",)),
    )(jnp.asarray(dts_np), xwin, eps, jnp.asarray(sel_np), slab)

    loss = loss_pad[0, 0]
    pred_x = pred_pad[:, :, :OBS_DIM]          # drop the lane padding in the wrapper
    return loss, pred_x


# ---------------------------------- main ----------------------------------------
if __name__ == "__main__":
    key = jax.random.PRNGKey(0)
    k_params, k_obs, k_tgt, k_eps = jax.random.split(key, 4)

    params = init_params(k_params)

    obs_traj = jax.random.normal(k_obs, (B, T_OBS, OBS_DIM), jnp.float32)
    target_traj = jax.random.normal(k_tgt, (B, T_TARGET, OBS_DIM), jnp.float32)
    eps = jax.random.normal(k_eps, (B, LATENT_DIM), jnp.float32)

    # full_time: (B, window_length) with duplicated timestamps to exercise unique-filtering
    base = np.repeat(np.arange((T_OBS + T_TARGET) // 2, dtype=np.float32), 2) * 0.1
    full_time_np = np.tile(base[None, :], (B, 1))

    loss, pred_x = forward(params, obs_traj, target_traj, full_time_np, eps)
    loss, pred_x = jax.block_until_ready((loss, pred_x))

    assert pred_x.shape == (B, T_OBS + T_TARGET, OBS_DIM)
    assert np.isfinite(float(loss))
    print("KERNEL_OK")
</pallas_src>

<mosaic_0001>
module attributes {stable_mosaic.version = 11 : i64} {
  func.func @kernel(%arg0: i32, %arg1: memref<7xf32, #tpu.memory_space<smem>>, %arg2: memref<2x16x4xf32, #tpu.memory_space<vmem>>, %arg3: memref<2x8xf32, #tpu.memory_space<vmem>>, %arg4: memref<32x16xf32, #tpu.memory_space<vmem>>, %arg5: memref<848x128xf32, #tpu.memory_space<vmem>>, %arg6: memref<2x16x128xf32, #tpu.memory_space<vmem>>, %arg7: memref<1x128xf32, #tpu.memory_space<vmem>>, %arg8: memref<8x2x8xf32, #tpu.memory_space<vmem>>) attributes {dimension_semantics = [#tpu.dimension_semantics<arbitrary>], iteration_bounds = array<i64: 1>, scalar_prefetch = 1 : i64, scratch_operands = 1 : i64, tpu.core_type = #tpu.core_type<tc>, window_params = [{pipeline_mode = #tpu.pipeline_mode<synchronous>, transform_indices = @transform_0, window_bounds = array<i64: 2, 16, 4>}, {pipeline_mode = #tpu.pipeline_mode<synchronous>, transform_indices = @transform_1, window_bounds = array<i64: 2, 8>}, {pipeline_mode = #tpu.pipeline_mode<synchronous>, transform_indices = @transform_2, window_bounds = array<i64: 32, 16>}, {pipeline_mode = #tpu.pipeline_mode<synchronous>, transform_indices = @transform_3, window_bounds = array<i64: 848, 128>}, {pipeline_mode = #tpu.pipeline_mode<synchronous>, transform_indices = @transform_4, window_bounds = array<i64: 2, 16, 128>}, {pipeline_mode = #tpu.pipeline_mode<synchronous>, transform_indices = @transform_5, window_bounds = array<i64: 1, 128>}]} {
    %c0 = arith.constant 0 : index
    %c0_0 = arith.constant 0 : index
    %c0_1 = arith.constant 0 : index
    %0 = vector.load %arg2[%c0, %c0_0, %c0_1] : memref<2x16x4xf32, #tpu.memory_space<vmem>>, vector<2x8x4xf32>
    %1 = vector.shape_cast %0 : vector<2x8x4xf32> to vector<16x4xf32>
    %c0_2 = arith.constant 0 : index
    %c0_3 = arith.constant 0 : index
    %2 = vector.load %arg5[%c0_2, %c0_3] : memref<848x128xf32, #tpu.memory_space<vmem>>, vector<4x32xf32>
    %cst = arith.constant dense<0.000000e+00> : vector<16x32xf32>
    %3 = tpu.matmul %1, %2, %cst {dimension_numbers = #tpu.dot_dimension_numbers<[1], [0], [0], [1], [0, 0, 1, 1], [], []>} : vector<16x4xf32>, vector<4x32xf32>, vector<16x32xf32> -> vector<16x32xf32>
    %c8 = arith.constant 8 : index
    %c0_4 = arith.constant 0 : index
    %4 = vector.load %arg5[%c8, %c0_4] : memref<848x128xf32, #tpu.memory_space<vmem>>, vector<1x32xf32>
    %5 = vector.broadcast %4 : vector<1x32xf32> to vector<16x32xf32>
    %6 = arith.addf %3, %5 : vector<16x32xf32>
    %c16 = arith.constant 16 : index
    %c0_5 = arith.constant 0 : index
    %7 = vector.load %arg5[%c16, %c0_5] : memref<848x128xf32, #tpu.memory_space<vmem>>, vector<8x32xf32>
    %8 = vector.shape_cast %6 : vector<16x32xf32> to vector<2x8x32xf32>
    %9 = vector.shape_cast %7 : vector<8x32xf32> to vector<1x8x32xf32>
    %10 = vector.broadcast %9 : vector<1x8x32xf32> to vector<2x8x32xf32>
    %11 = arith.addf %8, %10 : vector<2x8x32xf32>
    %12 = vector.shape_cast %11 : vector<2x8x32xf32> to vector<16x32xf32>
    %c80 = arith.constant 80 : index
    %c0_6 = arith.constant 0 : index
    %13 = vector.load %arg5[%c80, %c0_6] : memref<848x128xf32, #tpu.memory_space<vmem>>, vector<32x96xf32>
    %cst_7 = arith.constant dense<0.000000e+00> : vector<16x96xf32>
    %14 = tpu.matmul %12, %13, %cst_7 {dimension_numbers = #tpu.dot_dimension_numbers<[1], [0], [0], [1], [0, 0, 1, 1], [], []>} : vector<16x32xf32>, vector<32x96xf32>, vector<16x96xf32> -> vector<16x96xf32>
    %c112 = arith.constant 112 : index
    %c0_8 = arith.constant 0 : index
    %15 = vector.load %arg5[%c112, %c0_8] : memref<848x128xf32, #tpu.memory_space<vmem>>, vector<1x96xf32>
    %16 = vector.broadcast %15 : vector<1x96xf32> to vector<16x96xf32>
    %17 = arith.addf %14, %16 : vector<16x96xf32>
    %18 = vector.shape_cast %17 : vector<16x96xf32> to vector<2x8x96xf32>
    %19 = vector.extract_strided_slice %18 {offsets = [0, 0, 0], sizes = [2, 8, 8], strides = [1, 1, 1]} : vector<2x8x96xf32> to vector<2x8x8xf32>
    %cst_9 = arith.constant 0.353553385 : f32
    %20 = vector.broadcast %cst_9 : f32 to vector<2x8x8xf32>
    %21 = arith.mulf %19, %20 : vector<2x8x8xf32>
    %22 = vector.extract_strided_slice %18 {offsets = [0, 0, 32], sizes = [2, 8, 8], strides = [1, 1, 1]} : vector<2x8x96xf32> to vector<2x8x8xf32>
    %23 = vector.extract_strided_slice %18 {offsets = [0, 0, 64], sizes = [2, 8, 8], strides = [1, 1, 1]} : vector<2x8x96xf32> to vector<2x8x8xf32>
    "tpu.trace_start"() <{level = 10 : i32, message = "btd,bsd->bts"}> : () -> ()
    %cst_10 = arith.constant dense<0.000000e+00> : vector<2x8x8xf32>
    %24 = tpu.matmul %21, %22, %cst_10 {dimension_numbers = #tpu.dot_dimension_numbers<[2], [2], [1], [1], [0, 0, 0, 1, 1, 1], [0], [0]>} : vector<2x8x8xf32>, vector<2x8x8xf32>, vector<2x8x8xf32> -> vector<2x8x8xf32>
    "tpu.trace_stop"() : () -> ()
    %cst_11 = arith.constant dense<0xFF800000> : vector<2x8xf32>
    %25 = vector.multi_reduction <maximumf>, %24, %cst_11 [2] : vector<2x8x8xf32> to vector<2x8xf32>
    %26 = vector.shape_cast %25 : vector<2x8xf32> to vector<2x8x1xf32>
    %27 = vector.broadcast %26 : vector<2x8x1xf32> to vector<2x8x8xf32>
    %28 = arith.subf %24, %27 : vector<2x8x8xf32>
    %29 = math.exp %28 : vector<2x8x8xf32>
    %cst_12 = arith.constant dense<0.000000e+00> : vector<2x8xf32>
    %30 = vector.multi_reduction <add>, %29, %cst_12 [2] : vector<2x8x8xf32> to vector<2x8xf32>
    %31 = vector.shape_cast %30 : vector<2x8xf32> to vector<2x8x1xf32>
    %32 = tpu.reciprocal %31 {approx = true} : vector<2x8x1xf32> -> vector<2x8x1xf32>
    %33 = vector.broadcast %32 : vector<2x8x1xf32> to vector<2x8x8xf32>
    %34 = arith.mulf %29, %33 : vector<2x8x8xf32>
    "tpu.trace_start"() <{level = 10 : i32, message = "bts,bsd->btd"}> : () -> ()
    %cst_13 = arith.constant dense<0.000000e+00> : vector<2x8x8xf32>
    %35 = tpu.matmul %34, %23, %cst_13 {dimension_numbers = #tpu.dot_dimension_numbers<[2], [1], [1], [2], [0, 0, 0, 1, 1, 2], [0], [0]>} : vector<2x8x8xf32>, vector<2x8x8xf32>, vector<2x8x8xf32> -> vector<2x8x8xf32>
    "tpu.trace_stop"() : () -> ()
    %c120 = arith.constant 120 : index
    %c0_14 = arith.constant 0 : index
    %36 = vector.load %arg5[%c120, %c0_14] : memref<848x128xf32, #tpu.memory_space<vmem>>, vector<8x32xf32>
    %37 = vector.shape_cast %35 : vector<2x8x8xf32> to vector<16x8xf32>
    %cst_15 = arith.constant dense<0.000000e+00> : vector<16x32xf32>
    %38 = tpu.matmul %37, %36, %cst_15 {dimension_numbers = #tpu.dot_dimension_numbers<[1], [0], [0], [1], [0, 0, 1, 1], [], []>} : vector<16x8xf32>, vector<8x32xf32>, vector<16x32xf32> -> vector<16x32xf32>
    %39 = vector.extract_strided_slice %18 {offsets = [0, 0, 8], sizes = [2, 8, 8], strides = [1, 1, 1]} : vector<2x8x96xf32> to vector<2x8x8xf32>
    %cst_16 = arith.constant 0.353553385 : f32
    %40 = vector.broadcast %cst_16 : f32 to vector<2x8x8xf32>
    %41 = arith.mulf %39, %40 : vector<2x8x8xf32>
    %42 = vector.extract_strided_slice %18 {offsets = [0, 0, 40], sizes = [2, 8, 8], strides = [1, 1, 1]} : vector<2x8x96xf32> to vector<2x8x8xf32>
    %43 = vector.extract_strided_slice %18 {offsets = [0, 0, 72], sizes = [2, 8, 8], strides = [1, 1, 1]} : vector<2x8x96xf32> to vector<2x8x8xf32>
    "tpu.trace_start"() <{level = 10 : i32, message = "btd,bsd->bts"}> : () -> ()
    %cst_17 = arith.constant dense<0.000000e+00> : vector<2x8x8xf32>
    %44 = tpu.matmul %41, %42, %cst_17 {dimension_numbers = #tpu.dot_dimension_numbers<[2], [2], [1], [1], [0, 0, 0, 1, 1, 1], [0], [0]>} : vector<2x8x8xf32>, vector<2x8x8xf32>, vector<2x8x8xf32> -> vector<2x8x8xf32>
    "tpu.trace_stop"() : () -> ()
    %cst_18 = arith.constant dense<0xFF800000> : vector<2x8xf32>
    %45 = vector.multi_reduction <maximumf>, %44, %cst_18 [2] : vector<2x8x8xf32> to vector<2x8xf32>
    %46 = vector.shape_cast %45 : vector<2x8xf32> to vector<2x8x1xf32>
    %47 = vector.broadcast %46 : vector<2x8x1xf32> to vector<2x8x8xf32>
    %48 = arith.subf %44, %47 : vector<2x8x8xf32>
    %49 = math.exp %48 : vector<2x8x8xf32>
    %cst_19 = arith.constant dense<0.000000e+00> : vector<2x8xf32>
    %50 = vector.multi_reduction <add>, %49, %cst_19 [2] : vector<2x8x8xf32> to vector<2x8xf32>
    %51 = vector.shape_cast %50 : vector<2x8xf32> to vector<2x8x1xf32>
    %52 = tpu.reciprocal %51 {approx = true} : vector<2x8x1xf32> -> vector<2x8x1xf32>
    %53 = vector.broadcast %52 : vector<2x8x1xf32> to vector<2x8x8xf32>
    %54 = arith.mulf %49, %53 : vector<2x8x8xf32>
    "tpu.trace_start"() <{level = 10 : i32, message = "bts,bsd->btd"}> : () -> ()
    %cst_20 = arith.constant dense<0.000000e+00> : vector<2x8x8xf32>
    %55 = tpu.matmul %54, %43, %cst_20 {dimension_numbers = #tpu.dot_dimension_numbers<[2], [1], [1], [2], [0, 0, 0, 1, 1, 2], [0], [0]>} : vector<2x8x8xf32>, vector<2x8x8xf32>, vector<2x8x8xf32> -> vector<2x8x8xf32>
    "tpu.trace_stop"() : () -> ()
    %c128 = arith.constant 128 : index
    %c0_21 = arith.constant 0 : index
    %56 = vector.load %arg5[%c128, %c0_21] : memref<848x128xf32, #tpu.memory_space<vmem>>, vector<8x32xf32>
    %57 = vector.shape_cast %55 : vector<2x8x8xf32> to vector<16x8xf32>
    %cst_22 = arith.constant dense<0.000000e+00> : vector<16x32xf32>
    %58 = tpu.matmul %57, %56, %cst_22 {dimension_numbers = #tpu.dot_dimension_numbers<[1], [0], [0], [1], [0, 0, 1, 1], [], []>} : vector<16x8xf32>, vector<8x32xf32>, vector<16x32xf32> -> vector<16x32xf32>
    %59 = arith.addf %38, %58 : vector<16x32xf32>
    %60 = vector.extract_strided_slice %18 {offsets = [0, 0, 16], sizes = [2, 8, 8], strides = [1, 1, 1]} : vector<2x8x96xf32> to vector<2x8x8xf32>
    %cst_23 = arith.constant 0.353553385 : f32
    %61 = vector.broadcast %cst_23 : f32 to vector<2x8x8xf32>
    %62 = arith.mulf %60, %61 : vector<2x8x8xf32>
    %63 = vector.extract_strided_slice %18 {offsets = [0, 0, 48], sizes = [2, 8, 8], strides = [1, 1, 1]} : vector<2x8x96xf32> to vector<2x8x8xf32>
    %64 = vector.extract_strided_slice %18 {offsets = [0, 0, 80], sizes = [2, 8, 8], strides = [1, 1, 1]} : vector<2x8x96xf32> to vector<2x8x8xf32>
    "tpu.trace_start"() <{level = 10 : i32, message = "btd,bsd->bts"}> : () -> ()
    %cst_24 = arith.constant dense<0.000000e+00> : vector<2x8x8xf32>
    %65 = tpu.matmul %62, %63, %cst_24 {dimension_numbers = #tpu.dot_dimension_numbers<[2], [2], [1], [1], [0, 0, 0, 1, 1, 1], [0], [0]>} : vector<2x8x8xf32>, vector<2x8x8xf32>, vector<2x8x8xf32> -> vector<2x8x8xf32>
    "tpu.trace_stop"() : () -> ()
    %cst_25 = arith.constant dense<0xFF800000> : vector<2x8xf32>
    %66 = vector.multi_reduction <maximumf>, %65, %cst_25 [2] : vector<2x8x8xf32> to vector<2x8xf32>
    %67 = vector.shape_cast %66 : vector<2x8xf32> to vector<2x8x1xf32>
    %68 = vector.broadcast %67 : vector<2x8x1xf32> to vector<2x8x8xf32>
    %69 = arith.subf %65, %68 : vector<2x8x8xf32>
    %70 = math.exp %69 : vector<2x8x8xf32>
    %cst_26 = arith.constant dense<0.000000e+00> : vector<2x8xf32>
    %71 = vector.multi_reduction <add>, %70, %cst_26 [2] : vector<2x8x8xf32> to vector<2x8xf32>
    %72 = vector.shape_cast %71 : vector<2x8xf32> to vector<2x8x1xf32>
    %73 = tpu.reciprocal %72 {approx = true} : vector<2x8x1xf32> -> vector<2x8x1xf32>
    %74 = vector.broadcast %73 : vector<2x8x1xf32> to vector<2x8x8xf32>
    %75 = arith.mulf %70, %74 : vector<2x8x8xf32>
    "tpu.trace_start"() <{level = 10 : i32, message = "bts,bsd->btd"}> : () -> ()
    %cst_27 = arith.constant dense<0.000000e+00> : vector<2x8x8xf32>
    %76 = tpu.matmul %75, %64, %cst_27 {dimension_numbers = #tpu.dot_dimension_numbers<[2], [1], [1], [2], [0, 0, 0, 1, 1, 2], [0], [0]>} : vector<2x8x8xf32>, vector<2x8x8xf32>, vector<2x8x8xf32> -> vector<2x8x8xf32>
    "tpu.trace_stop"() : () -> ()
    %c136 = arith.constant 136 : index
    %c0_28 = arith.constant 0 : index
    %77 = vector.load %arg5[%c136, %c0_28] : memref<848x128xf32, #tpu.memory_space<vmem>>, vector<8x32xf32>
    %78 = vector.shape_cast %76 : vector<2x8x8xf32> to vector<16x8xf32>
    %cst_29 = arith.constant dense<0.000000e+00> : vector<16x32xf32>
    %79 = tpu.matmul %78, %77, %cst_29 {dimension_numbers = #tpu.dot_dimension_numbers<[1], [0], [0], [1], [0, 0, 1, 1], [], []>} : vector<16x8xf32>, vector<8x32xf32>, vector<16x32xf32> -> vector<16x32xf32>
    %80 = arith.addf %59, %79 : vector<16x32xf32>
    %81 = vector.extract_strided_slice %18 {offsets = [0, 0, 24], sizes = [2, 8, 8], strides = [1, 1, 1]} : vector<2x8x96xf32> to vector<2x8x8xf32>
    %cst_30 = arith.constant 0.353553385 : f32
    %82 = vector.broadcast %cst_30 : f32 to vector<2x8x8xf32>
    %83 = arith.mulf %81, %82 : vector<2x8x8xf32>
    %84 = vector.extract_strided_slice %18 {offsets = [0, 0, 56], sizes = [2, 8, 8], strides = [1, 1, 1]} : vector<2x8x96xf32> to vector<2x8x8xf32>
    %85 = vector.extract_strided_slice %18 {offsets = [0, 0, 88], sizes = [2, 8, 8], strides = [1, 1, 1]} : vector<2x8x96xf32> to vector<2x8x8xf32>
    "tpu.trace_start"() <{level = 10 : i32, message = "btd,bsd->bts"}> : () -> ()
    %cst_31 = arith.constant dense<0.000000e+00> : vector<2x8x8xf32>
    %86 = tpu.matmul %83, %84, %cst_31 {dimension_numbers = #tpu.dot_dimension_numbers<[2], [2], [1], [1], [0, 0, 0, 1, 1, 1], [0], [0]>} : vector<2x8x8xf32>, vector<2x8x8xf32>, vector<2x8x8xf32> -> vector<2x8x8xf32>
    "tpu.trace_stop"() : () -> ()
    %cst_32 = arith.constant dense<0xFF800000> : vector<2x8xf32>
    %87 = vector.multi_reduction <maximumf>, %86, %cst_32 [2] : vector<2x8x8xf32> to vector<2x8xf32>
    %88 = vector.shape_cast %87 : vector<2x8xf32> to vector<2x8x1xf32>
    %89 = vector.broadcast %88 : vector<2x8x1xf32> to vector<2x8x8xf32>
    %90 = arith.subf %86, %89 : vector<2x8x8xf32>
    %91 = math.exp %90 : vector<2x8x8xf32>
    %cst_33 = arith.constant dense<0.000000e+00> : vector<2x8xf32>
    %92 = vector.multi_reduction <add>, %91, %cst_33 [2] : vector<2x8x8xf32> to vector<2x8xf32>
    %93 = vector.shape_cast %92 : vector<2x8xf32> to vector<2x8x1xf32>
    %94 = tpu.reciprocal %93 {approx = true} : vector<2x8x1xf32> -> vector<2x8x1xf32>
    %95 = vector.broadcast %94 : vector<2x8x1xf32> to vector<2x8x8xf32>
    %96 = arith.mulf %91, %95 : vector<2x8x8xf32>
    "tpu.trace_start"() <{level = 10 : i32, message = "bts,bsd->btd"}> : () -> ()
    %cst_34 = arith.constant dense<0.000000e+00> : vector<2x8x8xf32>
    %97 = tpu.matmul %96, %85, %cst_34 {dimension_numbers = #tpu.dot_dimension_numbers<[2], [1], [1], [2], [0, 0, 0, 1, 1, 2], [0], [0]>} : vector<2x8x8xf32>, vector<2x8x8xf32>, vector<2x8x8xf32> -> vector<2x8x8xf32>
    "tpu.trace_stop"() : () -> ()
    %c144 = arith.constant 144 : index
    %c0_35 = arith.constant 0 : index
    %98 = vector.load %arg5[%c144, %c0_35] : memref<848x128xf32, #tpu.memory_space<vmem>>, vector<8x32xf32>
    %99 = vector.shape_cast %97 : vector<2x8x8xf32> to vector<16x8xf32>
    %cst_36 = arith.constant dense<0.000000e+00> : vector<16x32xf32>
    %100 = tpu.matmul %99, %98, %cst_36 {dimension_numbers = #tpu.dot_dimension_numbers<[1], [0], [0], [1], [0, 0, 1, 1], [], []>} : vector<16x8xf32>, vector<8x32xf32>, vector<16x32xf32> -> vector<16x32xf32>
    %101 = arith.addf %80, %100 : vector<16x32xf32>
    %102 = arith.addf %12, %101 : vector<16x32xf32>
    %c152 = arith.constant 152 : index
    %c0_37 = arith.constant 0 : index
    %103 = vector.load %arg5[%c152, %c0_37] : memref<848x128xf32, #tpu.memory_space<vmem>>, vector<1x32xf32>
    %104 = vector.broadcast %103 : vector<1x32xf32> to vector<16x32xf32>
    %105 = arith.addf %102, %104 : vector<16x32xf32>
    %c160 = arith.constant 160 : index
    %c0_38 = arith.constant 0 : index
    %106 = vector.load %arg5[%c160, %c0_38] : memref<848x128xf32, #tpu.memory_space<vmem>>, vector<1x32xf32>
    %c168 = arith.constant 168 : index
    %c0_39 = arith.constant 0 : index
    %107 = vector.load %arg5[%c168, %c0_39] : memref<848x128xf32, #tpu.memory_space<vmem>>, vector<1x32xf32>
    %cst_40 = arith.constant dense<0.000000e+00> : vector<16xf32>
    %108 = vector.multi_reduction <add>, %105, %cst_40 [1] : vector<16x32xf32> to vector<16xf32>
    %109 = vector.shape_cast %108 : vector<16xf32> to vector<16x1xf32>
    %cst_41 = arith.constant 3.200000e+01 : f32
    %110 = vector.broadcast %cst_41 : f32 to vector<16x1xf32>
    %111 = arith.divf %109, %110 : vector<16x1xf32>
    %112 = vector.broadcast %111 : vector<16x1xf32> to vector<16x32xf32>
    %113 = arith.subf %105, %112 : vector<16x32xf32>
    %114 = arith.mulf %113, %113 : vector<16x32xf32>
    %cst_42 = arith.constant dense<0.000000e+00> : vector<16xf32>
    %115 = vector.multi_reduction <add>, %114, %cst_42 [1] : vector<16x32xf32> to vector<16xf32>
    %116 = vector.shape_cast %115 : vector<16xf32> to vector<16x1xf32>
    %cst_43 = arith.constant 3.200000e+01 : f32
    %117 = vector.broadcast %cst_43 : f32 to vector<16x1xf32>
    %118 = arith.divf %116, %117 : vector<16x1xf32>
    %119 = vector.broadcast %111 : vector<16x1xf32> to vector<16x32xf32>
    %120 = arith.subf %105, %119 : vector<16x32xf32>
    %cst_44 = arith.constant 9.99999974E-6 : f32
    %121 = vector.broadcast %cst_44 : f32 to vector<16x1xf32>
    %122 = arith.addf %118, %121 : vector<16x1xf32>
    %123 = math.rsqrt %122 : vector<16x1xf32>
    %124 = vector.broadcast %123 : vector<16x1xf32> to vector<16x32xf32>
    %125 = arith.mulf %120, %124 : vector<16x32xf32>
    %126 = vector.broadcast %106 : vector<1x32xf32> to vector<16x32xf32>
    %127 = arith.mulf %125, %126 : vector<16x32xf32>
    %128 = vector.broadcast %107 : vector<1x32xf32> to vector<16x32xf32>
    %129 = arith.addf %127, %128 : vector<16x32xf32>
    %c176 = arith.constant 176 : index
    %c0_45 = arith.constant 0 : index
    %130 = vector.load %arg5[%c176, %c0_45] : memref<848x128xf32, #tpu.memory_space<vmem>>, vector<32x128xf32>
    %cst_46 = arith.constant dense<0.000000e+00> : vector<16x128xf32>
    %131 = tpu.matmul %129, %130, %cst_46 {dimension_numbers = #tpu.dot_dimension_numbers<[1], [0], [0], [1], [0, 0, 1, 1], [], []>} : vector<16x32xf32>, vector<32x128xf32>, vector<16x128xf32> -> vector<16x128xf32>
    %c208 = arith.constant 208 : index
    %c0_47 = arith.constant 0 : index
    %132 = vector.load %arg5[%c208, %c0_47] : memref<848x128xf32, #tpu.memory_space<vmem>>, vector<1x128xf32>
    %133 = vector.broadcast %132 : vector<1x128xf32> to vector<16x128xf32>
    %134 = arith.addf %131, %133 : vector<16x128xf32>
    %cst_48 = arith.constant 0.000000e+00 : f32
    %135 = vector.broadcast %cst_48 : f32 to vector<16x128xf32>
    %136 = arith.maximumf %134, %135 : vector<16x128xf32>
    %c216 = arith.constant 216 : index
    %c0_49 = arith.constant 0 : index
    %137 = vector.load %arg5[%c216, %c0_49] : memref<848x128xf32, #tpu.memory_space<vmem>>, vector<128x32xf32>
    %cst_50 = arith.constant dense<0.000000e+00> : vector<16x32xf32>
    %138 = tpu.matmul %136, %137, %cst_50 {dimension_numbers = #tpu.dot_dimension_numbers<[1], [0], [0], [1], [0, 0, 1, 1], [], []>} : vector<16x128xf32>, vector<128x32xf32>, vector<16x32xf32> -> vector<16x32xf32>
    %c344 = arith.constant 344 : index
    %c0_51 = arith.constant 0 : index
    %139 = vector.load %arg5[%c344, %c0_51] : memref<848x128xf32, #tpu.memory_space<vmem>>, vector<1x32xf32>
    %140 = vector.broadcast %139 : vector<1x32xf32> to vector<16x32xf32>
    %141 = arith.addf %138, %140 : vector<16x32xf32>
    %142 = arith.addf %129, %141 : vector<16x32xf32>
    %c352 = arith.constant 352 : index
    %c0_52 = arith.constant 0 : index
    %143 = vector.load %arg5[%c352, %c0_52] : memref<848x128xf32, #tpu.memory_space<vmem>>, vector<1x32xf32>
    %c360 = arith.constant 360 : index
    %c0_53 = arith.constant 0 : index
    %144 = vector.load %arg5[%c360, %c0_53] : memref<848x128xf32, #tpu.memory_space<vmem>>, vector<1x32xf32>
    %cst_54 = arith.constant dense<0.000000e+00> : vector<16xf32>
    %145 = vector.multi_reduction <add>, %142, %cst_54 [1] : vector<16x32xf32> to vector<16xf32>
    %146 = vector.shape_cast %145 : vector<16xf32> to vector<16x1xf32>
    %cst_55 = arith.constant 3.200000e+01 : f32
    %147 = vector.broadcast %cst_55 : f32 to vector<16x1xf32>
    %148 = arith.divf %146, %147 : vector<16x1xf32>
    %149 = vector.broadcast %148 : vector<16x1xf32> to vector<16x32xf32>
    %150 = arith.subf %142, %149 : vector<16x32xf32>
    %151 = arith.mulf %150, %150 : vector<16x32xf32>
    %cst_56 = arith.constant dense<0.000000e+00> : vector<16xf32>
    %152 = vector.multi_reduction <add>, %151, %cst_56 [1] : vector<16x32xf32> to vector<16xf32>
    %153 = vector.shape_cast %152 : vector<16xf32> to vector<16x1xf32>
    %cst_57 = arith.constant 3.200000e+01 : f32
    %154 = vector.broadcast %cst_57 : f32 to vector<16x1xf32>
    %155 = arith.divf %153, %154 : vector<16x1xf32>
    %156 = vector.broadcast %148 : vector<16x1xf32> to vector<16x32xf32>
    %157 = arith.subf %142, %156 : vector<16x32xf32>
    %cst_58 = arith.constant 9.99999974E-6 : f32
    %158 = vector.broadcast %cst_58 : f32 to vector<16x1xf32>
    %159 = arith.addf %155, %158 : vector<16x1xf32>
    %160 = math.rsqrt %159 : vector<16x1xf32>
    %161 = vector.broadcast %160 : vector<16x1xf32> to vector<16x32xf32>
    %162 = arith.mulf %157, %161 : vector<16x32xf32>
    %163 = vector.broadcast %143 : vector<1x32xf32> to vector<16x32xf32>
    %164 = arith.mulf %162, %163 : vector<16x32xf32>
    %165 = vector.broadcast %144 : vector<1x32xf32> to vector<16x32xf32>
    %166 = arith.addf %164, %165 : vector<16x32xf32>
    %c368 = arith.constant 368 : index
    %c0_59 = arith.constant 0 : index
    %167 = vector.load %arg5[%c368, %c0_59] : memref<848x128xf32, #tpu.memory_space<vmem>>, vector<32x96xf32>
    %cst_60 = arith.constant dense<0.000000e+00> : vector<16x96xf32>
    %168 = tpu.matmul %166, %167, %cst_60 {dimension_numbers = #tpu.dot_dimension_numbers<[1], [0], [0], [1], [0, 0, 1, 1], [], []>} : vector<16x32xf32>, vector<32x96xf32>, vector<16x96xf32> -> vector<16x96xf32>
    %c400 = arith.constant 400 : index
    %c0_61 = arith.constant 0 : index
    %169 = vector.load %arg5[%c400, %c0_61] : memref<848x128xf32, #tpu.memory_space<vmem>>, vector<1x96xf32>
    %170 = vector.broadcast %169 : vector<1x96xf32> to vector<16x96xf32>
    %171 = arith.addf %168, %170 : vector<16x96xf32>
    %172 = vector.shape_cast %171 : vector<16x96xf32> to vector<2x8x96xf32>
    %173 = vector.extract_strided_slice %172 {offsets = [0, 0, 0], sizes = [2, 8, 8], strides = [1, 1, 1]} : vector<2x8x96xf32> to vector<2x8x8xf32>
    %cst_62 = arith.constant 0.353553385 : f32
    %174 = vector.broadcast %cst_62 : f32 to vector<2x8x8xf32>
    %175 = arith.mulf %173, %174 : vector<2x8x8xf32>
    %176 = vector.extract_strided_slice %172 {offsets = [0, 0, 32], sizes = [2, 8, 8], strides = [1, 1, 1]} : vector<2x8x96xf32> to vector<2x8x8xf32>
    %177 = vector.extract_strided_slice %172 {offsets = [0, 0, 64], sizes = [2, 8, 8], strides = [1, 1, 1]} : vector<2x8x96xf32> to vector<2x8x8xf32>
    "tpu.trace_start"() <{level = 10 : i32, message = "btd,bsd->bts"}> : () -> ()
    %cst_63 = arith.constant dense<0.000000e+00> : vector<2x8x8xf32>
    %178 = tpu.matmul %175, %176, %cst_63 {dimension_numbers = #tpu.dot_dimension_numbers<[2], [2], [1], [1], [0, 0, 0, 1, 1, 1], [0], [0]>} : vector<2x8x8xf32>, vector<2x8x8xf32>, vector<2x8x8xf32> -> vector<2x8x8xf32>
    "tpu.trace_stop"() : () -> ()
    %cst_64 = arith.constant dense<0xFF800000> : vector<2x8xf32>
    %179 = vector.multi_reduction <maximumf>, %178, %cst_64 [2] : vector<2x8x8xf32> to vector<2x8xf32>
    %180 = vector.shape_cast %179 : vector<2x8xf32> to vector<2x8x1xf32>
    %181 = vector.broadcast %180 : vector<2x8x1xf32> to vector<2x8x8xf32>
    %182 = arith.subf %178, %181 : vector<2x8x8xf32>
    %183 = math.exp %182 : vector<2x8x8xf32>
    %cst_65 = arith.constant dense<0.000000e+00> : vector<2x8xf32>
    %184 = vector.multi_reduction <add>, %183, %cst_65 [2] : vector<2x8x8xf32> to vector<2x8xf32>
    %185 = vector.shape_cast %184 : vector<2x8xf32> to vector<2x8x1xf32>
    %186 = tpu.reciprocal %185 {approx = true} : vector<2x8x1xf32> -> vector<2x8x1xf32>
    %187 = vector.broadcast %186 : vector<2x8x1xf32> to vector<2x8x8xf32>
    %188 = arith.mulf %183, %187 : vector<2x8x8xf32>
    "tpu.trace_start"() <{level = 10 : i32, message = "bts,bsd->btd"}> : () -> ()
    %cst_66 = arith.constant dense<0.000000e+00> : vector<2x8x8xf32>
    %189 = tpu.matmul %188, %177, %cst_66 {dimension_numbers = #tpu.dot_dimension_numbers<[2], [1], [1], [2], [0, 0, 0, 1, 1, 2], [0], [0]>} : vector<2x8x8xf32>, vector<2x8x8xf32>, vector<2x8x8xf32> -> vector<2x8x8xf32>
    "tpu.trace_stop"() : () -> ()
    %c408 = arith.constant 408 : index
    %c0_67 = arith.constant 0 : index
    %190 = vector.load %arg5[%c408, %c0_67] : memref<848x128xf32, #tpu.memory_space<vmem>>, vector<8x32xf32>
    %191 = vector.shape_cast %189 : vector<2x8x8xf32> to vector<16x8xf32>
    %cst_68 = arith.constant dense<0.000000e+00> : vector<16x32xf32>
    %192 = tpu.matmul %191, %190, %cst_68 {dimension_numbers = #tpu.dot_dimension_numbers<[1], [0], [0], [1], [0, 0, 1, 1], [], []>} : vector<16x8xf32>, vector<8x32xf32>, vector<16x32xf32> -> vector<16x32xf32>
    %193 = vector.extract_strided_slice %172 {offsets = [0, 0, 8], sizes = [2, 8, 8], strides = [1, 1, 1]} : vector<2x8x96xf32> to vector<2x8x8xf32>
    %cst_69 = arith.constant 0.353553385 : f32
    %194 = vector.broadcast %cst_69 : f32 to vector<2x8x8xf32>
    %195 = arith.mulf %193, %194 : vector<2x8x8xf32>
    %196 = vector.extract_strided_slice %172 {offsets = [0, 0, 40], sizes = [2, 8, 8], strides = [1, 1, 1]} : vector<2x8x96xf32> to vector<2x8x8xf32>
    %197 = vector.extract_strided_slice %172 {offsets = [0, 0, 72], sizes = [2, 8, 8], strides = [1, 1, 1]} : vector<2x8x96xf32> to vector<2x8x8xf32>
    "tpu.trace_start"() <{level = 10 : i32, message = "btd,bsd->bts"}> : () -> ()
    %cst_70 = arith.constant dense<0.000000e+00> : vector<2x8x8xf32>
    %198 = tpu.matmul %195, %196, %cst_70 {dimension_numbers = #tpu.dot_dimension_numbers<[2], [2], [1], [1], [0, 0, 0, 1, 1, 1], [0], [0]>} : vector<2x8x8xf32>, vector<2x8x8xf32>, vector<2x8x8xf32> -> vector<2x8x8xf32>
    "tpu.trace_stop"() : () -> ()
    %cst_71 = arith.constant dense<0xFF800000> : vector<2x8xf32>
    %199 = vector.multi_reduction <maximumf>, %198, %cst_71 [2] : vector<2x8x8xf32> to vector<2x8xf32>
    %200 = vector.shape_cast %199 : vector<2x8xf32> to vector<2x8x1xf32>
    %201 = vector.broadcast %200 : vector<2x8x1xf32> to vector<2x8x8xf32>
    %202 = arith.subf %198, %201 : vector<2x8x8xf32>
    %203 = math.exp %202 : vector<2x8x8xf32>
    %cst_72 = arith.constant dense<0.000000e+00> : vector<2x8xf32>
    %204 = vector.multi_reduction <add>, %203, %cst_72 [2] : vector<2x8x8xf32> to vector<2x8xf32>
    %205 = vector.shape_cast %204 : vector<2x8xf32> to vector<2x8x1xf32>
    %206 = tpu.reciprocal %205 {approx = true} : vector<2x8x1xf32> -> vector<2x8x1xf32>
    %207 = vector.broadcast %206 : vector<2x8x1xf32> to vector<2x8x8xf32>
    %208 = arith.mulf %203, %207 : vector<2x8x8xf32>
    "tpu.trace_start"() <{level = 10 : i32, message = "bts,bsd->btd"}> : () -> ()
    %cst_73 = arith.constant dense<0.000000e+00> : vector<2x8x8xf32>
    %209 = tpu.matmul %208, %197, %cst_73 {dimension_numbers = #tpu.dot_dimension_numbers<[2], [1], [1], [2], [0, 0, 0, 1, 1, 2], [0], [0]>} : vector<2x8x8xf32>, vector<2x8x8xf32>, vector<2x8x8xf32> -> vector<2x8x8xf32>
    "tpu.trace_stop"() : () -> ()
    %c416 = arith.constant 416 : index
    %c0_74 = arith.constant 0 : index
    %210 = vector.load %arg5[%c416, %c0_74] : memref<848x128xf32, #tpu.memory_space<vmem>>, vector<8x32xf32>
    %211 = vector.shape_cast %209 : vector<2x8x8xf32> to vector<16x8xf32>
    %cst_75 = arith.constant dense<0.000000e+00> : vector<16x32xf32>
    %212 = tpu.matmul %211, %210, %cst_75 {dimension_numbers = #tpu.dot_dimension_numbers<[1], [0], [0], [1], [0, 0, 1, 1], [], []>} : vector<16x8xf32>, vector<8x32xf32>, vector<16x32xf32> -> vector<16x32xf32>
    %213 = arith.addf %192, %212 : vector<16x32xf32>
    %214 = vector.extract_strided_slice %172 {offsets = [0, 0, 16], sizes = [2, 8, 8], strides = [1, 1, 1]} : vector<2x8x96xf32> to vector<2x8x8xf32>
    %cst_76 = arith.constant 0.353553385 : f32
    %215 = vector.broadcast %cst_76 : f32 to vector<2x8x8xf32>
    %216 = arith.mulf %214, %215 : vector<2x8x8xf32>
    %217 = vector.extract_strided_slice %172 {offsets = [0, 0, 48], sizes = [2, 8, 8], strides = [1, 1, 1]} : vector<2x8x96xf32> to vector<2x8x8xf32>
    %218 = vector.extract_strided_slice %172 {offsets = [0, 0, 80], sizes = [2, 8, 8], strides = [1, 1, 1]} : vector<2x8x96xf32> to vector<2x8x8xf32>
    "tpu.trace_start"() <{level = 10 : i32, message = "btd,bsd->bts"}> : () -> ()
    %cst_77 = arith.constant dense<0.000000e+00> : vector<2x8x8xf32>
    %219 = tpu.matmul %216, %217, %cst_77 {dimension_numbers = #tpu.dot_dimension_numbers<[2], [2], [1], [1], [0, 0, 0, 1, 1, 1], [0], [0]>} : vector<2x8x8xf32>, vector<2x8x8xf32>, vector<2x8x8xf32> -> vector<2x8x8xf32>
    "tpu.trace_stop"() : () -> ()
    %cst_78 = arith.constant dense<0xFF800000> : vector<2x8xf32>
    %220 = vector.multi_reduction <maximumf>, %219, %cst_78 [2] : vector<2x8x8xf32> to vector<2x8xf32>
    %221 = vector.shape_cast %220 : vector<2x8xf32> to vector<2x8x1xf32>
    %222 = vector.broadcast %221 : vector<2x8x1xf32> to vector<2x8x8xf32>
    %223 = arith.subf %219, %222 : vector<2x8x8xf32>
    %224 = math.exp %223 : vector<2x8x8xf32>
    %cst_79 = arith.constant dense<0.000000e+00> : vector<2x8xf32>
    %225 = vector.multi_reduction <add>, %224, %cst_79 [2] : vector<2x8x8xf32> to vector<2x8xf32>
    %226 = vector.shape_cast %225 : vector<2x8xf32> to vector<2x8x1xf32>
    %227 = tpu.reciprocal %226 {approx = true} : vector<2x8x1xf32> -> vector<2x8x1xf32>
    %228 = vector.broadcast %227 : vector<2x8x1xf32> to vector<2x8x8xf32>
    %229 = arith.mulf %224, %228 : vector<2x8x8xf32>
    "tpu.trace_start"() <{level = 10 : i32, message = "bts,bsd->btd"}> : () -> ()
    %cst_80 = arith.constant dense<0.000000e+00> : vector<2x8x8xf32>
    %230 = tpu.matmul %229, %218, %cst_80 {dimension_numbers = #tpu.dot_dimension_numbers<[2], [1], [1], [2], [0, 0, 0, 1, 1, 2], [0], [0]>} : vector<2x8x8xf32>, vector<2x8x8xf32>, vector<2x8x8xf32> -> vector<2x8x8xf32>
    "tpu.trace_stop"() : () -> ()
    %c424 = arith.constant 424 : index
    %c0_81 = arith.constant 0 : index
    %231 = vector.load %arg5[%c424, %c0_81] : memref<848x128xf32, #tpu.memory_space<vmem>>, vector<8x32xf32>
    %232 = vector.shape_cast %230 : vector<2x8x8xf32> to vector<16x8xf32>
    %cst_82 = arith.constant dense<0.000000e+00> : vector<16x32xf32>
    %233 = tpu.matmul %232, %231, %cst_82 {dimension_numbers = #tpu.dot_dimension_numbers<[1], [0], [0], [1], [0, 0, 1, 1], [], []>} : vector<16x8xf32>, vector<8x32xf32>, vector<16x32xf32> -> vector<16x32xf32>
    %234 = arith.addf %213, %233 : vector<16x32xf32>
    %235 = vector.extract_strided_slice %172 {offsets = [0, 0, 24], sizes = [2, 8, 8], strides = [1, 1, 1]} : vector<2x8x96xf32> to vector<2x8x8xf32>
    %cst_83 = arith.constant 0.353553385 : f32
    %236 = vector.broadcast %cst_83 : f32 to vector<2x8x8xf32>
    %237 = arith.mulf %235, %236 : vector<2x8x8xf32>
    %238 = vector.extract_strided_slice %172 {offsets = [0, 0, 56], sizes = [2, 8, 8], strides = [1, 1, 1]} : vector<2x8x96xf32> to vector<2x8x8xf32>
    %239 = vector.extract_strided_slice %172 {offsets = [0, 0, 88], sizes = [2, 8, 8], strides = [1, 1, 1]} : vector<2x8x96xf32> to vector<2x8x8xf32>
    "tpu.trace_start"() <{level = 10 : i32, message = "btd,bsd->bts"}> : () -> ()
    %cst_84 = arith.constant dense<0.000000e+00> : vector<2x8x8xf32>
    %240 = tpu.matmul %237, %238, %cst_84 {dimension_numbers = #tpu.dot_dimension_numbers<[2], [2], [1], [1], [0, 0, 0, 1, 1, 1], [0], [0]>} : vector<2x8x8xf32>, vector<2x8x8xf32>, vector<2x8x8xf32> -> vector<2x8x8xf32>
    "tpu.trace_stop"() : () -> ()
    %cst_85 = arith.constant dense<0xFF800000> : vector<2x8xf32>
    %241 = vector.multi_reduction <maximumf>, %240, %cst_85 [2] : vector<2x8x8xf32> to vector<2x8xf32>
    %242 = vector.shape_cast %241 : vector<2x8xf32> to vector<2x8x1xf32>
    %243 = vector.broadcast %242 : vector<2x8x1xf32> to vector<2x8x8xf32>
    %244 = arith.subf %240, %243 : vector<2x8x8xf32>
    %245 = math.exp %244 : vector<2x8x8xf32>
    %cst_86 = arith.constant dense<0.000000e+00> : vector<2x8xf32>
    %246 = vector.multi_reduction <add>, %245, %cst_86 [2] : vector<2x8x8xf32> to vector<2x8xf32>
    %247 = vector.shape_cast %246 : vector<2x8xf32> to vector<2x8x1xf32>
    %248 = tpu.reciprocal %247 {approx = true} : vector<2x8x1xf32> -> vector<2x8x1xf32>
    %249 = vector.broadcast %248 : vector<2x8x1xf32> to vector<2x8x8xf32>
    %250 = arith.mulf %245, %249 : vector<2x8x8xf32>
    "tpu.trace_start"() <{level = 10 : i32, message = "bts,bsd->btd"}> : () -> ()
    %cst_87 = arith.constant dense<0.000000e+00> : vector<2x8x8xf32>
    %251 = tpu.matmul %250, %239, %cst_87 {dimension_numbers = #tpu.dot_dimension_numbers<[2], [1], [1], [2], [0, 0, 0, 1, 1, 2], [0], [0]>} : vector<2x8x8xf32>, vector<2x8x8xf32>, vector<2x8x8xf32> -> vector<2x8x8xf32>
    "tpu.trace_stop"() : () -> ()
    %c432 = arith.constant 432 : index
    %c0_88 = arith.constant 0 : index
    %252 = vector.load %arg5[%c432, %c0_88] : memref<848x128xf32, #tpu.memory_space<vmem>>, vector<8x32xf32>
    %253 = vector.shape_cast %251 : vector<2x8x8xf32> to vector<16x8xf32>
    %cst_89 = arith.constant dense<0.000000e+00> : vector<16x32xf32>
    %254 = tpu.matmul %253, %252, %cst_89 {dimension_numbers = #tpu.dot_dimension_numbers<[1], [0], [0], [1], [0, 0, 1, 1], [], []>} : vector<16x8xf32>, vector<8x32xf32>, vector<16x32xf32> -> vector<16x32xf32>
    %255 = arith.addf %234, %254 : vector<16x32xf32>
    %256 = arith.addf %166, %255 : vector<16x32xf32>
    %c440 = arith.constant 440 : index
    %c0_90 = arith.constant 0 : index
    %257 = vector.load %arg5[%c440, %c0_90] : memref<848x128xf32, #tpu.memory_space<vmem>>, vector<1x32xf32>
    %258 = vector.broadcast %257 : vector<1x32xf32> to vector<16x32xf32>
    %259 = arith.addf %256, %258 : vector<16x32xf32>
    %c448 = arith.constant 448 : index
    %c0_91 = arith.constant 0 : index
    %260 = vector.load %arg5[%c448, %c0_91] : memref<848x128xf32, #tpu.memory_space<vmem>>, vector<1x32xf32>
    %c456 = arith.constant 456 : index
    %c0_92 = arith.constant 0 : index
    %261 = vector.load %arg5[%c456, %c0_92] : memref<848x128xf32, #tpu.memory_space<vmem>>, vector<1x32xf32>
    %cst_93 = arith.constant dense<0.000000e+00> : vector<16xf32>
    %262 = vector.multi_reduction <add>, %259, %cst_93 [1] : vector<16x32xf32> to vector<16xf32>
    %263 = vector.shape_cast %262 : vector<16xf32> to vector<16x1xf32>
    %cst_94 = arith.constant 3.200000e+01 : f32
    %264 = vector.broadcast %cst_94 : f32 to vector<16x1xf32>
    %265 = arith.divf %263, %264 : vector<16x1xf32>
    %266 = vector.broadcast %265 : vector<16x1xf32> to vector<16x32xf32>
    %267 = arith.subf %259, %266 : vector<16x32xf32>
    %268 = arith.mulf %267, %267 : vector<16x32xf32>
    %cst_95 = arith.constant dense<0.000000e+00> : vector<16xf32>
    %269 = vector.multi_reduction <add>, %268, %cst_95 [1] : vector<16x32xf32> to vector<16xf32>
    %270 = vector.shape_cast %269 : vector<16xf32> to vector<16x1xf32>
    %cst_96 = arith.constant 3.200000e+01 : f32
    %271 = vector.broadcast %cst_96 : f32 to vector<16x1xf32>
    %272 = arith.divf %270, %271 : vector<16x1xf32>
    %273 = vector.broadcast %265 : vector<16x1xf32> to vector<16x32xf32>
    %274 = arith.subf %259, %273 : vector<16x32xf32>
    %cst_97 = arith.constant 9.99999974E-6 : f32
    %275 = vector.broadcast %cst_97 : f32 to vector<16x1xf32>
    %276 = arith.addf %272, %275 : vector<16x1xf32>
    %277 = math.rsqrt %276 : vector<16x1xf32>
    %278 = vector.broadcast %277 : vector<16x1xf32> to vector<16x32xf32>
    %279 = arith.mulf %274, %278 : vector<16x32xf32>
    %280 = vector.broadcast %260 : vector<1x32xf32> to vector<16x32xf32>
    %281 = arith.mulf %279, %280 : vector<16x32xf32>
    %282 = vector.broadcast %261 : vector<1x32xf32> to vector<16x32xf32>
    %283 = arith.addf %281, %282 : vector<16x32xf32>
    %c464 = arith.constant 464 : index
    %c0_98 = arith.constant 0 : index
    %284 = vector.load %arg5[%c464, %c0_98] : memref<848x128xf32, #tpu.memory_space<vmem>>, vector<32x128xf32>
    %cst_99 = arith.constant dense<0.000000e+00> : vector<16x128xf32>
    %285 = tpu.matmul %283, %284, %cst_99 {dimension_numbers = #tpu.dot_dimension_numbers<[1], [0], [0], [1], [0, 0, 1, 1], [], []>} : vector<16x32xf32>, vector<32x128xf32>, vector<16x128xf32> -> vector<16x128xf32>
    %c496 = arith.constant 496 : index
    %c0_100 = arith.constant 0 : index
    %286 = vector.load %arg5[%c496, %c0_100] : memref<848x128xf32, #tpu.memory_space<vmem>>, vector<1x128xf32>
    %287 = vector.broadcast %286 : vector<1x128xf32> to vector<16x128xf32>
    %288 = arith.addf %285, %287 : vector<16x128xf32>
    %cst_101 = arith.constant 0.000000e+00 : f32
    %289 = vector.broadcast %cst_101 : f32 to vector<16x128xf32>
    %290 = arith.maximumf %288, %289 : vector<16x128xf32>
    %c504 = arith.constant 504 : index
    %c0_102 = arith.constant 0 : index
    %291 = vector.load %arg5[%c504, %c0_102] : memref<848x128xf32, #tpu.memory_space<vmem>>, vector<128x32xf32>
    %cst_103 = arith.constant dense<0.000000e+00> : vector<16x32xf32>
    %292 = tpu.matmul %290, %291, %cst_103 {dimension_numbers = #tpu.dot_dimension_numbers<[1], [0], [0], [1], [0, 0, 1, 1], [], []>} : vector<16x128xf32>, vector<128x32xf32>, vector<16x32xf32> -> vector<16x32xf32>
    %c632 = arith.constant 632 : index
    %c0_104 = arith.constant 0 : index
    %293 = vector.load %arg5[%c632, %c0_104] : memref<848x128xf32, #tpu.memory_space<vmem>>, vector<1x32xf32>
    %294 = vector.broadcast %293 : vector<1x32xf32> to vector<16x32xf32>
    %295 = arith.addf %292, %294 : vector<16x32xf32>
    %296 = arith.addf %283, %295 : vector<16x32xf32>
    %c640 = arith.constant 640 : index
    %c0_105 = arith.constant 0 : index
    %297 = vector.load %arg5[%c640, %c0_105] : memref<848x128xf32, #tpu.memory_space<vmem>>, vector<1x32xf32>
    %c648 = arith.constant 648 : index
    %c0_106 = arith.constant 0 : index
    %298 = vector.load %arg5[%c648, %c0_106] : memref<848x128xf32, #tpu.memory_space<vmem>>, vector<1x32xf32>
    %cst_107 = arith.constant dense<0.000000e+00> : vector<16xf32>
    %299 = vector.multi_reduction <add>, %296, %cst_107 [1] : vector<16x32xf32> to vector<16xf32>
    %300 = vector.shape_cast %299 : vector<16xf32> to vector<16x1xf32>
    %cst_108 = arith.constant 3.200000e+01 : f32
    %301 = vector.broadcast %cst_108 : f32 to vector<16x1xf32>
    %302 = arith.divf %300, %301 : vector<16x1xf32>
    %303 = vector.broadcast %302 : vector<16x1xf32> to vector<16x32xf32>
    %304 = arith.subf %296, %303 : vector<16x32xf32>
    %305 = arith.mulf %304, %304 : vector<16x32xf32>
    %cst_109 = arith.constant dense<0.000000e+00> : vector<16xf32>
    %306 = vector.multi_reduction <add>, %305, %cst_109 [1] : vector<16x32xf32> to vector<16xf32>
    %307 = vector.shape_cast %306 : vector<16xf32> to vector<16x1xf32>
    %cst_110 = arith.constant 3.200000e+01 : f32
    %308 = vector.broadcast %cst_110 : f32 to vector<16x1xf32>
    %309 = arith.divf %307, %308 : vector<16x1xf32>
    %310 = vector.broadcast %302 : vector<16x1xf32> to vector<16x32xf32>
    %311 = arith.subf %296, %310 : vector<16x32xf32>
    %cst_111 = arith.constant 9.99999974E-6 : f32
    %312 = vector.broadcast %cst_111 : f32 to vector<16x1xf32>
    %313 = arith.addf %309, %312 : vector<16x1xf32>
    %314 = math.rsqrt %313 : vector<16x1xf32>
    %315 = vector.broadcast %314 : vector<16x1xf32> to vector<16x32xf32>
    %316 = arith.mulf %311, %315 : vector<16x32xf32>
    %317 = vector.broadcast %297 : vector<1x32xf32> to vector<16x32xf32>
    %318 = arith.mulf %316, %317 : vector<16x32xf32>
    %319 = vector.broadcast %298 : vector<1x32xf32> to vector<16x32xf32>
    %320 = arith.addf %318, %319 : vector<16x32xf32>
    %321 = vector.extract_strided_slice %320 {offsets = [7, 0], sizes = [1, 32], strides = [1, 1]} : vector<16x32xf32> to vector<1x32xf32>
    %322 = vector.extract_strided_slice %320 {offsets = [15, 0], sizes = [1, 32], strides = [1, 1]} : vector<16x32xf32> to vector<1x32xf32>
    %323 = tpu.concatenate %321, %322 in 0 : vector<1x32xf32>, vector<1x32xf32> -> vector<2x32xf32>
    %c656 = arith.constant 656 : index
    %c0_112 = arith.constant 0 : index
    %324 = vector.load %arg5[%c656, %c0_112] : memref<848x128xf32, #tpu.memory_space<vmem>>, vector<32x16xf32>
    %cst_113 = arith.constant dense<0.000000e+00> : vector<2x16xf32>
    %325 = tpu.matmul %323, %324, %cst_113 {dimension_numbers = #tpu.dot_dimension_numbers<[1], [0], [0], [1], [0, 0, 1, 1], [], []>} : vector<2x32xf32>, vector<32x16xf32>, vector<2x16xf32> -> vector<2x16xf32>
    %c688 = arith.constant 688 : index
    %c0_114 = arith.constant 0 : index
    %326 = vector.load %arg5[%c688, %c0_114] : memref<848x128xf32, #tpu.memory_space<vmem>>, vector<1x16xf32>
    %327 = vector.broadcast %326 : vector<1x16xf32> to vector<2x16xf32>
    %328 = arith.addf %325, %327 : vector<2x16xf32>
    %329 = vector.extract_strided_slice %328 {offsets = [0, 0], sizes = [2, 8], strides = [1, 1]} : vector<2x16xf32> to vector<2x8xf32>
    %330 = vector.extract_strided_slice %328 {offsets = [0, 8], sizes = [2, 8], strides = [1, 1]} : vector<2x16xf32> to vector<2x8xf32>
    %c0_115 = arith.constant 0 : index
    %c0_116 = arith.constant 0 : index
    %331 = vector.load %arg3[%c0_115, %c0_116] : memref<2x8xf32, #tpu.memory_space<vmem>>, vector<2x8xf32>
    %cst_117 = arith.constant 5.000000e-01 : f32
    %332 = vector.broadcast %cst_117 : f32 to vector<2x8xf32>
    %333 = arith.mulf %332, %330 : vector<2x8xf32>
    %334 = math.exp %333 : vector<2x8xf32>
    %335 = arith.mulf %331, %334 : vector<2x8xf32>
    %336 = arith.addf %329, %335 : vector<2x8xf32>
    %c696 = arith.constant 696 : index
    %c0_118 = arith.constant 0 : index
    %337 = vector.load %arg5[%c696, %c0_118] : memref<848x128xf32, #tpu.memory_space<vmem>>, vector<8x32xf32>
    %338 = arith.truncf %337 : vector<8x32xf32> to vector<8x32xbf16>
    %c712 = arith.constant 712 : index
    %c0_119 = arith.constant 0 : index
    %339 = vector.load %arg5[%c712, %c0_119] : memref<848x128xf32, #tpu.memory_space<vmem>>, vector<32x32xf32>
    %340 = arith.truncf %339 : vector<32x32xf32> to vector<32x32xbf16>
    %c752 = arith.constant 752 : index
    %c0_120 = arith.constant 0 : index
    %341 = vector.load %arg5[%c752, %c0_120] : memref<848x128xf32, #tpu.memory_space<vmem>>, vector<32x8xf32>
    %342 = arith.truncf %341 : vector<32x8xf32> to vector<32x8xbf16>
    %c704 = arith.constant 704 : index
    %c0_121 = arith.constant 0 : index
    %343 = vector.load %arg5[%c704, %c0_121] : memref<848x128xf32, #tpu.memory_space<vmem>>, vector<1x32xf32>
    %c744 = arith.constant 744 : index
    %c0_122 = arith.constant 0 : index
    %344 = vector.load %arg5[%c744, %c0_122] : memref<848x128xf32, #tpu.memory_space<vmem>>, vector<1x32xf32>
    %c784 = arith.constant 784 : index
    %c0_123 = arith.constant 0 : index
    %345 = vector.load %arg5[%c784, %c0_123] : memref<848x128xf32, #tpu.memory_space<vmem>>, vector<1x8xf32>
    %c0_124 = arith.constant 0 : index
    %c0_125 = arith.constant 0 : index
    %c0_126 = arith.constant 0 : index
    %346 = vector.load %arg8[%c0_124, %c0_125, %c0_126] : memref<8x2x8xf32, #tpu.memory_space<vmem>>, vector<1x2x8xf32>
    %347 = vector.shape_cast %346 : vector<1x2x8xf32> to vector<2x8xf32>
    %348 = vector.shape_cast %336 : vector<2x8xf32> to vector<1x2x8xf32>
    tpu.vector_store %arg8[%c0_124, %c0_125, %c0_126], %348 {strides = array<i32>} : memref<8x2x8xf32, #tpu.memory_space<vmem>>, vector<1x2x8xf32>,
    %c0_i32 = arith.constant 0 : i32
    %c7_i32 = arith.constant 7 : i32
    %349 = arith.addi %c0_i32, %c7_i32 : i32
    %c1_i32 = arith.constant 1 : i32
    %350 = scf.for %arg9 = %c0_i32 to %349 step %c1_i32 iter_args(%arg10 = %336) -> (vector<2x8xf32>)  : i32 {
      %415 = arith.index_cast %arg9 : i32 to index
      %416 = memref.load %arg1[%415] : memref<7xf32, #tpu.memory_space<smem>>
      %cst_173 = arith.constant 1.250000e-01 : f32
      %417 = arith.mulf %416, %cst_173 : f32
      %418 = arith.truncf %arg10 : vector<2x8xf32> to vector<2x8xbf16>
      %cst_174 = arith.constant dense<0.000000e+00> : vector<2x32xf32>
      %419 = tpu.matmul %418, %338, %cst_174 {dimension_numbers = #tpu.dot_dimension_numbers<[1], [0], [0], [1], [0, 0, 1, 1], [], []>} : vector<2x8xbf16>, vector<8x32xbf16>, vector<2x32xf32> -> vector<2x32xf32>
      %420 = vector.broadcast %343 : vector<1x32xf32> to vector<2x32xf32>
      %421 = arith.addf %419, %420 : vector<2x32xf32>
      %cst_175 = arith.constant 0.000000e+00 : f32
      %422 = vector.broadcast %cst_175 : f32 to vector<2x32xf32>
      %423 = arith.cmpf ogt, %421, %422 : vector<2x32xf32>
      %424 = math.exp %421 : vector<2x32xf32>
      %cst_176 = arith.constant 1.000000e+00 : f32
      %425 = vector.broadcast %cst_176 : f32 to vector<2x32xf32>
      %426 = arith.subf %424, %425 : vector<2x32xf32>
      %427 = arith.select %423, %421, %426 : vector<2x32xi1>, vector<2x32xf32>
      %428 = arith.truncf %427 : vector<2x32xf32> to vector<2x32xbf16>
      %cst_177 = arith.constant dense<0.000000e+00> : vector<2x32xf32>
      %429 = tpu.matmul %428, %340, %cst_177 {dimension_numbers = #tpu.dot_dimension_numbers<[1], [0], [0], [1], [0, 0, 1, 1], [], []>} : vector<2x32xbf16>, vector<32x32xbf16>, vector<2x32xf32> -> vector<2x32xf32>
      %430 = vector.broadcast %344 : vector<1x32xf32> to vector<2x32xf32>
      %431 = arith.addf %429, %430 : vector<2x32xf32>
      %cst_178 = arith.constant 0.000000e+00 : f32
      %432 = vector.broadcast %cst_178 : f32 to vector<2x32xf32>
      %433 = arith.cmpf ogt, %431, %432 : vector<2x32xf32>
      %434 = math.exp %431 : vector<2x32xf32>
      %cst_179 = arith.constant 1.000000e+00 : f32
      %435 = vector.broadcast %cst_179 : f32 to vector<2x32xf32>
      %436 = arith.subf %434, %435 : vector<2x32xf32>
      %437 = arith.select %433, %431, %436 : vector<2x32xi1>, vector<2x32xf32>
      %438 = arith.truncf %437 : vector<2x32xf32> to vector<2x32xbf16>
      %cst_180 = arith.constant dense<0.000000e+00> : vector<2x8xf32>
      %439 = tpu.matmul %438, %342, %cst_180 {dimension_numbers = #tpu.dot_dimension_numbers<[1], [0], [0], [1], [0, 0, 1, 1], [], []>} : vector<2x32xbf16>, vector<32x8xbf16>, vector<2x8xf32> -> vector<2x8xf32>
      %440 = vector.broadcast %345 : vector<1x8xf32> to vector<2x8xf32>
      %441 = arith.addf %439, %440 : vector<2x8xf32>
      %cst_181 = arith.constant 5.000000e-01 : f32
      %442 = arith.mulf %cst_181, %417 : f32
      %443 = vector.broadcast %442 : f32 to vector<2x8xf32>
      %444 = arith.mulf %443, %441 : vector<2x8xf32>
      %445 = arith.addf %arg10, %444 : vector<2x8xf32>
      %446 = arith.truncf %445 : vector<2x8xf32> to vector<2x8xbf16>
      %cst_182 = arith.constant dense<0.000000e+00> : vector<2x32xf32>
      %447 = tpu.matmul %446, %338, %cst_182 {dimension_numbers = #tpu.dot_dimension_numbers<[1], [0], [0], [1], [0, 0, 1, 1], [], []>} : vector<2x8xbf16>, vector<8x32xbf16>, vector<2x32xf32> -> vector<2x32xf32>
      %448 = vector.broadcast %343 : vector<1x32xf32> to vector<2x32xf32>
      %449 = arith.addf %447, %448 : vector<2x32xf32>
      %cst_183 = arith.constant 0.000000e+00 : f32
      %450 = vector.broadcast %cst_183 : f32 to vector<2x32xf32>
      %451 = arith.cmpf ogt, %449, %450 : vector<2x32xf32>
      %452 = math.exp %449 : vector<2x32xf32>
      %cst_184 = arith.constant 1.000000e+00 : f32
      %453 = vector.broadcast %cst_184 : f32 to vector<2x32xf32>
      %454 = arith.subf %452, %453 : vector<2x32xf32>
      %455 = arith.select %451, %449, %454 : vector<2x32xi1>, vector<2x32xf32>
      %456 = arith.truncf %455 : vector<2x32xf32> to vector<2x32xbf16>
      %cst_185 = arith.constant dense<0.000000e+00> : vector<2x32xf32>
      %457 = tpu.matmul %456, %340, %cst_185 {dimension_numbers = #tpu.dot_dimension_numbers<[1], [0], [0], [1], [0, 0, 1, 1], [], []>} : vector<2x32xbf16>, vector<32x32xbf16>, vector<2x32xf32> -> vector<2x32xf32>
      %458 = vector.broadcast %344 : vector<1x32xf32> to vector<2x32xf32>
      %459 = arith.addf %457, %458 : vector<2x32xf32>
      %cst_186 = arith.constant 0.000000e+00 : f32
      %460 = vector.broadcast %cst_186 : f32 to vector<2x32xf32>
      %461 = arith.cmpf ogt, %459, %460 : vector<2x32xf32>
      %462 = math.exp %459 : vector<2x32xf32>
      %cst_187 = arith.constant 1.000000e+00 : f32
      %463 = vector.broadcast %cst_187 : f32 to vector<2x32xf32>
      %464 = arith.subf %462, %463 : vector<2x32xf32>
      %465 = arith.select %461, %459, %464 : vector<2x32xi1>, vector<2x32xf32>
      %466 = arith.truncf %465 : vector<2x32xf32> to vector<2x32xbf16>
      %cst_188 = arith.constant dense<0.000000e+00> : vector<2x8xf32>
      %467 = tpu.matmul %466, %342, %cst_188 {dimension_numbers = #tpu.dot_dimension_numbers<[1], [0], [0], [1], [0, 0, 1, 1], [], []>} : vector<2x32xbf16>, vector<32x8xbf16>, vector<2x8xf32> -> vector<2x8xf32>
      %468 = vector.broadcast %345 : vector<1x8xf32> to vector<2x8xf32>
      %469 = arith.addf %467, %468 : vector<2x8xf32>
      %cst_189 = arith.constant 5.000000e-01 : f32
      %470 = arith.mulf %cst_189, %417 : f32
      %471 = vector.broadcast %470 : f32 to vector<2x8xf32>
      %472 = arith.mulf %471, %469 : vector<2x8xf32>
      %473 = arith.addf %arg10, %472 : vector<2x8xf32>
      %474 = arith.truncf %473 : vector<2x8xf32> to vector<2x8xbf16>
      %cst_190 = arith.constant dense<0.000000e+00> : vector<2x32xf32>
      %475 = tpu.matmul %474, %338, %cst_190 {dimension_numbers = #tpu.dot_dimension_numbers<[1], [0], [0], [1], [0, 0, 1, 1], [], []>} : vector<2x8xbf16>, vector<8x32xbf16>, vector<2x32xf32> -> vector<2x32xf32>
      %476 = vector.broadcast %343 : vector<1x32xf32> to vector<2x32xf32>
      %477 = arith.addf %475, %476 : vector<2x32xf32>
      %cst_191 = arith.constant 0.000000e+00 : f32
      %478 = vector.broadcast %cst_191 : f32 to vector<2x32xf32>
      %479 = arith.cmpf ogt, %477, %478 : vector<2x32xf32>
      %480 = math.exp %477 : vector<2x32xf32>
      %cst_192 = arith.constant 1.000000e+00 : f32
      %481 = vector.broadcast %cst_192 : f32 to vector<2x32xf32>
      %482 = arith.subf %480, %481 : vector<2x32xf32>
      %483 = arith.select %479, %477, %482 : vector<2x32xi1>, vector<2x32xf32>
      %484 = arith.truncf %483 : vector<2x32xf32> to vector<2x32xbf16>
      %cst_193 = arith.constant dense<0.000000e+00> : vector<2x32xf32>
      %485 = tpu.matmul %484, %340, %cst_193 {dimension_numbers = #tpu.dot_dimension_numbers<[1], [0], [0], [1], [0, 0, 1, 1], [], []>} : vector<2x32xbf16>, vector<32x32xbf16>, vector<2x32xf32> -> vector<2x32xf32>
      %486 = vector.broadcast %344 : vector<1x32xf32> to vector<2x32xf32>
      %487 = arith.addf %485, %486 : vector<2x32xf32>
      %cst_194 = arith.constant 0.000000e+00 : f32
      %488 = vector.broadcast %cst_194 : f32 to vector<2x32xf32>
      %489 = arith.cmpf ogt, %487, %488 : vector<2x32xf32>
      %490 = math.exp %487 : vector<2x32xf32>
      %cst_195 = arith.constant 1.000000e+00 : f32
      %491 = vector.broadcast %cst_195 : f32 to vector<2x32xf32>
      %492 = arith.subf %490, %491 : vector<2x32xf32>
      %493 = arith.select %489, %487, %492 : vector<2x32xi1>, vector<2x32xf32>
      %494 = arith.truncf %493 : vector<2x32xf32> to vector<2x32xbf16>
      %cst_196 = arith.constant dense<0.000000e+00> : vector<2x8xf32>
      %495 = tpu.matmul %494, %342, %cst_196 {dimension_numbers = #tpu.dot_dimension_numbers<[1], [0], [0], [1], [0, 0, 1, 1], [], []>} : vector<2x32xbf16>, vector<32x8xbf16>, vector<2x8xf32> -> vector<2x8xf32>
      %496 = vector.broadcast %345 : vector<1x8xf32> to vector<2x8xf32>
      %497 = arith.addf %495, %496 : vector<2x8xf32>
      %498 = vector.broadcast %417 : f32 to vector<2x8xf32>
      %499 = arith.mulf %498, %497 : vector<2x8xf32>
      %500 = arith.addf %arg10, %499 : vector<2x8xf32>
      %501 = arith.truncf %500 : vector<2x8xf32> to vector<2x8xbf16>
      %cst_197 = arith.constant dense<0.000000e+00> : vector<2x32xf32>
      %502 = tpu.matmul %501, %338, %cst_197 {dimension_numbers = #tpu.dot_dimension_numbers<[1], [0], [0], [1], [0, 0, 1, 1], [], []>} : vector<2x8xbf16>, vector<8x32xbf16>, vector<2x32xf32> -> vector<2x32xf32>
      %503 = vector.broadcast %343 : vector<1x32xf32> to vector<2x32xf32>
      %504 = arith.addf %502, %503 : vector<2x32xf32>
      %cst_198 = arith.constant 0.000000e+00 : f32
      %505 = vector.broadcast %cst_198 : f32 to vector<2x32xf32>
      %506 = arith.cmpf ogt, %504, %505 : vector<2x32xf32>
      %507 = math.exp %504 : vector<2x32xf32>
      %cst_199 = arith.constant 1.000000e+00 : f32
      %508 = vector.broadcast %cst_199 : f32 to vector<2x32xf32>
      %509 = arith.subf %507, %508 : vector<2x32xf32>
      %510 = arith.select %506, %504, %509 : vector<2x32xi1>, vector<2x32xf32>
      %511 = arith.truncf %510 : vector<2x32xf32> to vector<2x32xbf16>
      %cst_200 = arith.constant dense<0.000000e+00> : vector<2x32xf32>
      %512 = tpu.matmul %511, %340, %cst_200 {dimension_numbers = #tpu.dot_dimension_numbers<[1], [0], [0], [1], [0, 0, 1, 1], [], []>} : vector<2x32xbf16>, vector<32x32xbf16>, vector<2x32xf32> -> vector<2x32xf32>
      %513 = vector.broadcast %344 : vector<1x32xf32> to vector<2x32xf32>
      %514 = arith.addf %512, %513 : vector<2x32xf32>
      %cst_201 = arith.constant 0.000000e+00 : f32
      %515 = vector.broadcast %cst_201 : f32 to vector<2x32xf32>
      %516 = arith.cmpf ogt, %514, %515 : vector<2x32xf32>
      %517 = math.exp %514 : vector<2x32xf32>
      %cst_202 = arith.constant 1.000000e+00 : f32
      %518 = vector.broadcast %cst_202 : f32 to vector<2x32xf32>
      %519 = arith.subf %517, %518 : vector<2x32xf32>
      %520 = arith.select %516, %514, %519 : vector<2x32xi1>, vector<2x32xf32>
      %521 = arith.truncf %520 : vector<2x32xf32> to vector<2x32xbf16>
      %cst_203 = arith.constant dense<0.000000e+00> : vector<2x8xf32>
      %522 = tpu.matmul %521, %342, %cst_203 {dimension_numbers = #tpu.dot_dimension_numbers<[1], [0], [0], [1], [0, 0, 1, 1], [], []>} : vector<2x32xbf16>, vector<32x8xbf16>, vector<2x8xf32> -> vector<2x8xf32>
      %523 = vector.broadcast %345 : vector<1x8xf32> to vector<2x8xf32>
      %524 = arith.addf %522, %523 : vector<2x8xf32>
      %cst_204 = arith.constant 6.000000e+00 : f32
      %525 = arith.divf %417, %cst_204 : f32
      %cst_205 = arith.constant 2.000000e+00 : f32
      %526 = vector.broadcast %cst_205 : f32 to vector<2x8xf32>
      %527 = arith.mulf %526, %469 : vector<2x8xf32>
      %528 = arith.addf %441, %527 : vector<2x8xf32>
      %cst_206 = arith.constant 2.000000e+00 : f32
      %529 = vector.broadcast %cst_206 : f32 to vector<2x8xf32>
      %530 = arith.mulf %529, %497 : vector<2x8xf32>
      %531 = arith.addf %528, %530 : vector<2x8xf32>
      %532 = arith.addf %531, %524 : vector<2x8xf32>
      %533 = vector.broadcast %525 : f32 to vector<2x8xf32>
      %534 = arith.mulf %533, %532 : vector<2x8xf32>
      %535 = arith.addf %arg10, %534 : vector<2x8xf32>
      %536 = arith.truncf %535 : vector<2x8xf32> to vector<2x8xbf16>
      %cst_207 = arith.constant dense<0.000000e+00> : vector<2x32xf32>
      %537 = tpu.matmul %536, %338, %cst_207 {dimension_numbers = #tpu.dot_dimension_numbers<[1], [0], [0], [1], [0, 0, 1, 1], [], []>} : vector<2x8xbf16>, vector<8x32xbf16>, vector<2x32xf32> -> vector<2x32xf32>
      %538 = vector.broadcast %343 : vector<1x32xf32> to vector<2x32xf32>
      %539 = arith.addf %537, %538 : vector<2x32xf32>
      %cst_208 = arith.constant 0.000000e+00 : f32
      %540 = vector.broadcast %cst_208 : f32 to vector<2x32xf32>
      %541 = arith.cmpf ogt, %539, %540 : vector<2x32xf32>
      %542 = math.exp %539 : vector<2x32xf32>
      %cst_209 = arith.constant 1.000000e+00 : f32
      %543 = vector.broadcast %cst_209 : f32 to vector<2x32xf32>
      %544 = arith.subf %542, %543 : vector<2x32xf32>
      %545 = arith.select %541, %539, %544 : vector<2x32xi1>, vector<2x32xf32>
      %546 = arith.truncf %545 : vector<2x32xf32> to vector<2x32xbf16>
      %cst_210 = arith.constant dense<0.000000e+00> : vector<2x32xf32>
      %547 = tpu.matmul %546, %340, %cst_210 {dimension_numbers = #tpu.dot_dimension_numbers<[1], [0], [0], [1], [0, 0, 1, 1], [], []>} : vector<2x32xbf16>, vector<32x32xbf16>, vector<2x32xf32> -> vector<2x32xf32>
      %548 = vector.broadcast %344 : vector<1x32xf32> to vector<2x32xf32>
      %549 = arith.addf %547, %548 : vector<2x32xf32>
      %cst_211 = arith.constant 0.000000e+00 : f32
      %550 = vector.broadcast %cst_211 : f32 to vector<2x32xf32>
      %551 = arith.cmpf ogt, %549, %550 : vector<2x32xf32>
      %552 = math.exp %549 : vector<2x32xf32>
      %cst_212 = arith.constant 1.000000e+00 : f32
      %553 = vector.broadcast %cst_212 : f32 to vector<2x32xf32>
      %554 = arith.subf %552, %553 : vector<2x32xf32>
      %555 = arith.select %551, %549, %554 : vector<2x32xi1>, vector<2x32xf32>
      %556 = arith.truncf %555 : vector<2x32xf32> to vector<2x32xbf16>
      %cst_213 = arith.constant dense<0.000000e+00> : vector<2x8xf32>
      %557 = tpu.matmul %556, %342, %cst_213 {dimension_numbers = #tpu.dot_dimension_numbers<[1], [0], [0], [1], [0, 0, 1, 1], [], []>} : vector<2x32xbf16>, vector<32x8xbf16>, vector<2x8xf32> -> vector<2x8xf32>
      %558 = vector.broadcast %345 : vector<1x8xf32> to vector<2x8xf32>
      %559 = arith.addf %557, %558 : vector<2x8xf32>
      %cst_214 = arith.constant 5.000000e-01 : f32
      %560 = arith.mulf %cst_214, %417 : f32
      %561 = vector.broadcast %560 : f32 to vector<2x8xf32>
      %562 = arith.mulf %561, %559 : vector<2x8xf32>
      %563 = arith.addf %535, %562 : vector<2x8xf32>
      %564 = arith.truncf %563 : vector<2x8xf32> to vector<2x8xbf16>
      %cst_215 = arith.constant dense<0.000000e+00> : vector<2x32xf32>
      %565 = tpu.matmul %564, %338, %cst_215 {dimension_numbers = #tpu.dot_dimension_numbers<[1], [0], [0], [1], [0, 0, 1, 1], [], []>} : vector<2x8xbf16>, vector<8x32xbf16>, vector<2x32xf32> -> vector<2x32xf32>
      %566 = vector.broadcast %343 : vector<1x32xf32> to vector<2x32xf32>
      %567 = arith.addf %565, %566 : vector<2x32xf32>
      %cst_216 = arith.constant 0.000000e+00 : f32
      %568 = vector.broadcast %cst_216 : f32 to vector<2x32xf32>
      %569 = arith.cmpf ogt, %567, %568 : vector<2x32xf32>
      %570 = math.exp %567 : vector<2x32xf32>
      %cst_217 = arith.constant 1.000000e+00 : f32
      %571 = vector.broadcast %cst_217 : f32 to vector<2x32xf32>
      %572 = arith.subf %570, %571 : vector<2x32xf32>
      %573 = arith.select %569, %567, %572 : vector<2x32xi1>, vector<2x32xf32>
      %574 = arith.truncf %573 : vector<2x32xf32> to vector<2x32xbf16>
      %cst_218 = arith.constant dense<0.000000e+00> : vector<2x32xf32>
      %575 = tpu.matmul %574, %340, %cst_218 {dimension_numbers = #tpu.dot_dimension_numbers<[1], [0], [0], [1], [0, 0, 1, 1], [], []>} : vector<2x32xbf16>, vector<32x32xbf16>, vector<2x32xf32> -> vector<2x32xf32>
      %576 = vector.broadcast %344 : vector<1x32xf32> to vector<2x32xf32>
      %577 = arith.addf %575, %576 : vector<2x32xf32>
      %cst_219 = arith.constant 0.000000e+00 : f32
      %578 = vector.broadcast %cst_219 : f32 to vector<2x32xf32>
      %579 = arith.cmpf ogt, %577, %578 : vector<2x32xf32>
      %580 = math.exp %577 : vector<2x32xf32>
      %cst_220 = arith.constant 1.000000e+00 : f32
      %581 = vector.broadcast %cst_220 : f32 to vector<2x32xf32>
      %582 = arith.subf %580, %581 : vector<2x32xf32>
      %583 = arith.select %579, %577, %582 : vector<2x32xi1>, vector<2x32xf32>
      %584 = arith.truncf %583 : vector<2x32xf32> to vector<2x32xbf16>
      %cst_221 = arith.constant dense<0.000000e+00> : vector<2x8xf32>
      %585 = tpu.matmul %584, %342, %cst_221 {dimension_numbers = #tpu.dot_dimension_numbers<[1], [0], [0], [1], [0, 0, 1, 1], [], []>} : vector<2x32xbf16>, vector<32x8xbf16>, vector<2x8xf32> -> vector<2x8xf32>
      %586 = vector.broadcast %345 : vector<1x8xf32> to vector<2x8xf32>
      %587 = arith.addf %585, %586 : vector<2x8xf32>
      %cst_222 = arith.constant 5.000000e-01 : f32
      %588 = arith.mulf %cst_222, %417 : f32
      %589 = vector.broadcast %588 : f32 to vector<2x8xf32>
      %590 = arith.mulf %589, %587 : vector<2x8xf32>
      %591 = arith.addf %535, %590 : vector<2x8xf32>
      %592 = arith.truncf %591 : vector<2x8xf32> to vector<2x8xbf16>
      %cst_223 = arith.constant dense<0.000000e+00> : vector<2x32xf32>
      %593 = tpu.matmul %592, %338, %cst_223 {dimension_numbers = #tpu.dot_dimension_numbers<[1], [0], [0], [1], [0, 0, 1, 1], [], []>} : vector<2x8xbf16>, vector<8x32xbf16>, vector<2x32xf32> -> vector<2x32xf32>
      %594 = vector.broadcast %343 : vector<1x32xf32> to vector<2x32xf32>
      %595 = arith.addf %593, %594 : vector<2x32xf32>
      %cst_224 = arith.constant 0.000000e+00 : f32
      %596 = vector.broadcast %cst_224 : f32 to vector<2x32xf32>
      %597 = arith.cmpf ogt, %595, %596 : vector<2x32xf32>
      %598 = math.exp %595 : vector<2x32xf32>
      %cst_225 = arith.constant 1.000000e+00 : f32
      %599 = vector.broadcast %cst_225 : f32 to vector<2x32xf32>
      %600 = arith.subf %598, %599 : vector<2x32xf32>
      %601 = arith.select %597, %595, %600 : vector<2x32xi1>, vector<2x32xf32>
      %602 = arith.truncf %601 : vector<2x32xf32> to vector<2x32xbf16>
      %cst_226 = arith.constant dense<0.000000e+00> : vector<2x32xf32>
      %603 = tpu.matmul %602, %340, %cst_226 {dimension_numbers = #tpu.dot_dimension_numbers<[1], [0], [0], [1], [0, 0, 1, 1], [], []>} : vector<2x32xbf16>, vector<32x32xbf16>, vector<2x32xf32> -> vector<2x32xf32>
      %604 = vector.broadcast %344 : vector<1x32xf32> to vector<2x32xf32>
      %605 = arith.addf %603, %604 : vector<2x32xf32>
      %cst_227 = arith.constant 0.000000e+00 : f32
      %606 = vector.broadcast %cst_227 : f32 to vector<2x32xf32>
      %607 = arith.cmpf ogt, %605, %606 : vector<2x32xf32>
      %608 = math.exp %605 : vector<2x32xf32>
      %cst_228 = arith.constant 1.000000e+00 : f32
      %609 = vector.broadcast %cst_228 : f32 to vector<2x32xf32>
      %610 = arith.subf %608, %609 : vector<2x32xf32>
      %611 = arith.select %607, %605, %610 : vector<2x32xi1>, vector<2x32xf32>
      %612 = arith.truncf %611 : vector<2x32xf32> to vector<2x32xbf16>
      %cst_229 = arith.constant dense<0.000000e+00> : vector<2x8xf32>
      %613 = tpu.matmul %612, %342, %cst_229 {dimension_numbers = #tpu.dot_dimension_numbers<[1], [0], [0], [1], [0, 0, 1, 1], [], []>} : vector<2x32xbf16>, vector<32x8xbf16>, vector<2x8xf32> -> vector<2x8xf32>
      %614 = vector.broadcast %345 : vector<1x8xf32> to vector<2x8xf32>
      %615 = arith.addf %613, %614 : vector<2x8xf32>
      %616 = vector.broadcast %417 : f32 to vector<2x8xf32>
      %617 = arith.mulf %616, %615 : vector<2x8xf32>
      %618 = arith.addf %535, %617 : vector<2x8xf32>
      %619 = arith.truncf %618 : vector<2x8xf32> to vector<2x8xbf16>
      %cst_230 = arith.constant dense<0.000000e+00> : vector<2x32xf32>
      %620 = tpu.matmul %619, %338, %cst_230 {dimension_numbers = #tpu.dot_dimension_numbers<[1], [0], [0], [1], [0, 0, 1, 1], [], []>} : vector<2x8xbf16>, vector<8x32xbf16>, vector<2x32xf32> -> vector<2x32xf32>
      %621 = vector.broadcast %343 : vector<1x32xf32> to vector<2x32xf32>
      %622 = arith.addf %620, %621 : vector<2x32xf32>
      %cst_231 = arith.constant 0.000000e+00 : f32
      %623 = vector.broadcast %cst_231 : f32 to vector<2x32xf32>
      %624 = arith.cmpf ogt, %622, %623 : vector<2x32xf32>
      %625 = math.exp %622 : vector<2x32xf32>
      %cst_232 = arith.constant 1.000000e+00 : f32
      %626 = vector.broadcast %cst_232 : f32 to vector<2x32xf32>
      %627 = arith.subf %625, %626 : vector<2x32xf32>
      %628 = arith.select %624, %622, %627 : vector<2x32xi1>, vector<2x32xf32>
      %629 = arith.truncf %628 : vector<2x32xf32> to vector<2x32xbf16>
      %cst_233 = arith.constant dense<0.000000e+00> : vector<2x32xf32>
      %630 = tpu.matmul %629, %340, %cst_233 {dimension_numbers = #tpu.dot_dimension_numbers<[1], [0], [0], [1], [0, 0, 1, 1], [], []>} : vector<2x32xbf16>, vector<32x32xbf16>, vector<2x32xf32> -> vector<2x32xf32>
      %631 = vector.broadcast %344 : vector<1x32xf32> to vector<2x32xf32>
      %632 = arith.addf %630, %631 : vector<2x32xf32>
      %cst_234 = arith.constant 0.000000e+00 : f32
      %633 = vector.broadcast %cst_234 : f32 to vector<2x32xf32>
      %634 = arith.cmpf ogt, %632, %633 : vector<2x32xf32>
      %635 = math.exp %632 : vector<2x32xf32>
      %cst_235 = arith.constant 1.000000e+00 : f32
      %636 = vector.broadcast %cst_235 : f32 to vector<2x32xf32>
      %637 = arith.subf %635, %636 : vector<2x32xf32>
      %638 = arith.select %634, %632, %637 : vector<2x32xi1>, vector<2x32xf32>
      %639 = arith.truncf %638 : vector<2x32xf32> to vector<2x32xbf16>
      %cst_236 = arith.constant dense<0.000000e+00> : vector<2x8xf32>
      %640 = tpu.matmul %639, %342, %cst_236 {dimension_numbers = #tpu.dot_dimension_numbers<[1], [0], [0], [1], [0, 0, 1, 1], [], []>} : vector<2x32xbf16>, vector<32x8xbf16>, vector<2x8xf32> -> vector<2x8xf32>
      %641 = vector.broadcast %345 : vector<1x8xf32> to vector<2x8xf32>
      %642 = arith.addf %640, %641 : vector<2x8xf32>
      %cst_237 = arith.constant 6.000000e+00 : f32
      %643 = arith.divf %417, %cst_237 : f32
      %cst_238 = arith.constant 2.000000e+00 : f32
      %644 = vector.broadcast %cst_238 : f32 to vector<2x8xf32>
      %645 = arith.mulf %644, %587 : vector<2x8xf32>
      %646 = arith.addf %559, %645 : vector<2x8xf32>
      %cst_239 = arith.constant 2.000000e+00 : f32
      %647 = vector.broadcast %cst_239 : f32 to vector<2x8xf32>
      %648 = arith.mulf %647, %615 : vector<2x8xf32>
      %649 = arith.addf %646, %648 : vector<2x8xf32>
      %650 = arith.addf %649, %642 : vector<2x8xf32>
      %651 = vector.broadcast %643 : f32 to vector<2x8xf32>
      %652 = arith.mulf %651, %650 : vector<2x8xf32>
      %653 = arith.addf %535, %652 : vector<2x8xf32>
      %654 = arith.truncf %653 : vector<2x8xf32> to vector<2x8xbf16>
      %cst_240 = arith.constant dense<0.000000e+00> : vector<2x32xf32>
      %655 = tpu.matmul %654, %338, %cst_240 {dimension_numbers = #tpu.dot_dimension_numbers<[1], [0], [0], [1], [0, 0, 1, 1], [], []>} : vector<2x8xbf16>, vector<8x32xbf16>, vector<2x32xf32> -> vector<2x32xf32>
      %656 = vector.broadcast %343 : vector<1x32xf32> to vector<2x32xf32>
      %657 = arith.addf %655, %656 : vector<2x32xf32>
      %cst_241 = arith.constant 0.000000e+00 : f32
      %658 = vector.broadcast %cst_241 : f32 to vector<2x32xf32>
      %659 = arith.cmpf ogt, %657, %658 : vector<2x32xf32>
      %660 = math.exp %657 : vector<2x32xf32>
      %cst_242 = arith.constant 1.000000e+00 : f32
      %661 = vector.broadcast %cst_242 : f32 to vector<2x32xf32>
      %662 = arith.subf %660, %661 : vector<2x32xf32>
      %663 = arith.select %659, %657, %662 : vector<2x32xi1>, vector<2x32xf32>
      %664 = arith.truncf %663 : vector<2x32xf32> to vector<2x32xbf16>
      %cst_243 = arith.constant dense<0.000000e+00> : vector<2x32xf32>
      %665 = tpu.matmul %664, %340, %cst_243 {dimension_numbers = #tpu.dot_dimension_numbers<[1], [0], [0], [1], [0, 0, 1, 1], [], []>} : vector<2x32xbf16>, vector<32x32xbf16>, vector<2x32xf32> -> vector<2x32xf32>
      %666 = vector.broadcast %344 : vector<1x32xf32> to vector<2x32xf32>
      %667 = arith.addf %665, %666 : vector<2x32xf32>
      %cst_244 = arith.constant 0.000000e+00 : f32
      %668 = vector.broadcast %cst_244 : f32 to vector<2x32xf32>
      %669 = arith.cmpf ogt, %667, %668 : vector<2x32xf32>
      %670 = math.exp %667 : vector<2x32xf32>
      %cst_245 = arith.constant 1.000000e+00 : f32
      %671 = vector.broadcast %cst_245 : f32 to vector<2x32xf32>
      %672 = arith.subf %670, %671 : vector<2x32xf32>
      %673 = arith.select %669, %667, %672 : vector<2x32xi1>, vector<2x32xf32>
      %674 = arith.truncf %673 : vector<2x32xf32> to vector<2x32xbf16>
      %cst_246 = arith.constant dense<0.000000e+00> : vector<2x8xf32>
      %675 = tpu.matmul %674, %342, %cst_246 {dimension_numbers = #tpu.dot_dimension_numbers<[1], [0], [0], [1], [0, 0, 1, 1], [], []>} : vector<2x32xbf16>, vector<32x8xbf16>, vector<2x8xf32> -> vector<2x8xf32>
      %676 = vector.broadcast %345 : vector<1x8xf32> to vector<2x8xf32>
      %677 = arith.addf %675, %676 : vector<2x8xf32>
      %cst_247 = arith.constant 5.000000e-01 : f32
      %678 = arith.mulf %cst_247, %417 : f32
      %679 = vector.broadcast %678 : f32 to vector<2x8xf32>
      %680 = arith.mulf %679, %677 : vector<2x8xf32>
      %681 = arith.addf %653, %680 : vector<2x8xf32>
      %682 = arith.truncf %681 : vector<2x8xf32> to vector<2x8xbf16>
      %cst_248 = arith.constant dense<0.000000e+00> : vector<2x32xf32>
      %683 = tpu.matmul %682, %338, %cst_248 {dimension_numbers = #tpu.dot_dimension_numbers<[1], [0], [0], [1], [0, 0, 1, 1], [], []>} : vector<2x8xbf16>, vector<8x32xbf16>, vector<2x32xf32> -> vector<2x32xf32>
      %684 = vector.broadcast %343 : vector<1x32xf32> to vector<2x32xf32>
      %685 = arith.addf %683, %684 : vector<2x32xf32>
      %cst_249 = arith.constant 0.000000e+00 : f32
      %686 = vector.broadcast %cst_249 : f32 to vector<2x32xf32>
      %687 = arith.cmpf ogt, %685, %686 : vector<2x32xf32>
      %688 = math.exp %685 : vector<2x32xf32>
      %cst_250 = arith.constant 1.000000e+00 : f32
      %689 = vector.broadcast %cst_250 : f32 to vector<2x32xf32>
      %690 = arith.subf %688, %689 : vector<2x32xf32>
      %691 = arith.select %687, %685, %690 : vector<2x32xi1>, vector<2x32xf32>
      %692 = arith.truncf %691 : vector<2x32xf32> to vector<2x32xbf16>
      %cst_251 = arith.constant dense<0.000000e+00> : vector<2x32xf32>
      %693 = tpu.matmul %692, %340, %cst_251 {dimension_numbers = #tpu.dot_dimension_numbers<[1], [0], [0], [1], [0, 0, 1, 1], [], []>} : vector<2x32xbf16>, vector<32x32xbf16>, vector<2x32xf32> -> vector<2x32xf32>
      %694 = vector.broadcast %344 : vector<1x32xf32> to vector<2x32xf32>
      %695 = arith.addf %693, %694 : vector<2x32xf32>
      %cst_252 = arith.constant 0.000000e+00 : f32
      %696 = vector.broadcast %cst_252 : f32 to vector<2x32xf32>
      %697 = arith.cmpf ogt, %695, %696 : vector<2x32xf32>
      %698 = math.exp %695 : vector<2x32xf32>
      %cst_253 = arith.constant 1.000000e+00 : f32
      %699 = vector.broadcast %cst_253 : f32 to vector<2x32xf32>
      %700 = arith.subf %698, %699 : vector<2x32xf32>
      %701 = arith.select %697, %695, %700 : vector<2x32xi1>, vector<2x32xf32>
      %702 = arith.truncf %701 : vector<2x32xf32> to vector<2x32xbf16>
      %cst_254 = arith.constant dense<0.000000e+00> : vector<2x8xf32>
      %703 = tpu.matmul %702, %342, %cst_254 {dimension_numbers = #tpu.dot_dimension_numbers<[1], [0], [0], [1], [0, 0, 1, 1], [], []>} : vector<2x32xbf16>, vector<32x8xbf16>, vector<2x8xf32> -> vector<2x8xf32>
      %704 = vector.broadcast %345 : vector<1x8xf32> to vector<2x8xf32>
      %705 = arith.addf %703, %704 : vector<2x8xf32>
      %cst_255 = arith.constant 5.000000e-01 : f32
      %706 = arith.mulf %cst_255, %417 : f32
      %707 = vector.broadcast %706 : f32 to vector<2x8xf32>
      %708 = arith.mulf %707, %705 : vector<2x8xf32>
      %709 = arith.addf %653, %708 : vector<2x8xf32>
      %710 = arith.truncf %709 : vector<2x8xf32> to vector<2x8xbf16>
      %cst_256 = arith.constant dense<0.000000e+00> : vector<2x32xf32>
      %711 = tpu.matmul %710, %338, %cst_256 {dimension_numbers = #tpu.dot_dimension_numbers<[1], [0], [0], [1], [0, 0, 1, 1], [], []>} : vector<2x8xbf16>, vector<8x32xbf16>, vector<2x32xf32> -> vector<2x32xf32>
      %712 = vector.broadcast %343 : vector<1x32xf32> to vector<2x32xf32>
      %713 = arith.addf %711, %712 : vector<2x32xf32>
      %cst_257 = arith.constant 0.000000e+00 : f32
      %714 = vector.broadcast %cst_257 : f32 to vector<2x32xf32>
      %715 = arith.cmpf ogt, %713, %714 : vector<2x32xf32>
      %716 = math.exp %713 : vector<2x32xf32>
      %cst_258 = arith.constant 1.000000e+00 : f32
      %717 = vector.broadcast %cst_258 : f32 to vector<2x32xf32>
      %718 = arith.subf %716, %717 : vector<2x32xf32>
      %719 = arith.select %715, %713, %718 : vector<2x32xi1>, vector<2x32xf32>
      %720 = arith.truncf %719 : vector<2x32xf32> to vector<2x32xbf16>
      %cst_259 = arith.constant dense<0.000000e+00> : vector<2x32xf32>
      %721 = tpu.matmul %720, %340, %cst_259 {dimension_numbers = #tpu.dot_dimension_numbers<[1], [0], [0], [1], [0, 0, 1, 1], [], []>} : vector<2x32xbf16>, vector<32x32xbf16>, vector<2x32xf32> -> vector<2x32xf32>
      %722 = vector.broadcast %344 : vector<1x32xf32> to vector<2x32xf32>
      %723 = arith.addf %721, %722 : vector<2x32xf32>
      %cst_260 = arith.constant 0.000000e+00 : f32
      %724 = vector.broadcast %cst_260 : f32 to vector<2x32xf32>
      %725 = arith.cmpf ogt, %723, %724 : vector<2x32xf32>
      %726 = math.exp %723 : vector<2x32xf32>
      %cst_261 = arith.constant 1.000000e+00 : f32
      %727 = vector.broadcast %cst_261 : f32 to vector<2x32xf32>
      %728 = arith.subf %726, %727 : vector<2x32xf32>
      %729 = arith.select %725, %723, %728 : vector<2x32xi1>, vector<2x32xf32>
      %730 = arith.truncf %729 : vector<2x32xf32> to vector<2x32xbf16>
      %cst_262 = arith.constant dense<0.000000e+00> : vector<2x8xf32>
      %731 = tpu.matmul %730, %342, %cst_262 {dimension_numbers = #tpu.dot_dimension_numbers<[1], [0], [0], [1], [0, 0, 1, 1], [], []>} : vector<2x32xbf16>, vector<32x8xbf16>, vector<2x8xf32> -> vector<2x8xf32>
      %732 = vector.broadcast %345 : vector<1x8xf32> to vector<2x8xf32>
      %733 = arith.addf %731, %732 : vector<2x8xf32>
      %734 = vector.broadcast %417 : f32 to vector<2x8xf32>
      %735 = arith.mulf %734, %733 : vector<2x8xf32>
      %736 = arith.addf %653, %735 : vector<2x8xf32>
      %737 = arith.truncf %736 : vector<2x8xf32> to vector<2x8xbf16>
      %cst_263 = arith.constant dense<0.000000e+00> : vector<2x32xf32>
      %738 = tpu.matmul %737, %338, %cst_263 {dimension_numbers = #tpu.dot_dimension_numbers<[1], [0], [0], [1], [0, 0, 1, 1], [], []>} : vector<2x8xbf16>, vector<8x32xbf16>, vector<2x32xf32> -> vector<2x32xf32>
      %739 = vector.broadcast %343 : vector<1x32xf32> to vector<2x32xf32>
      %740 = arith.addf %738, %739 : vector<2x32xf32>
      %cst_264 = arith.constant 0.000000e+00 : f32
      %741 = vector.broadcast %cst_264 : f32 to vector<2x32xf32>
      %742 = arith.cmpf ogt, %740, %741 : vector<2x32xf32>
      %743 = math.exp %740 : vector<2x32xf32>
      %cst_265 = arith.constant 1.000000e+00 : f32
      %744 = vector.broadcast %cst_265 : f32 to vector<2x32xf32>
      %745 = arith.subf %743, %744 : vector<2x32xf32>
      %746 = arith.select %742, %740, %745 : vector<2x32xi1>, vector<2x32xf32>
      %747 = arith.truncf %746 : vector<2x32xf32> to vector<2x32xbf16>
      %cst_266 = arith.constant dense<0.000000e+00> : vector<2x32xf32>
      %748 = tpu.matmul %747, %340, %cst_266 {dimension_numbers = #tpu.dot_dimension_numbers<[1], [0], [0], [1], [0, 0, 1, 1], [], []>} : vector<2x32xbf16>, vector<32x32xbf16>, vector<2x32xf32> -> vector<2x32xf32>
      %749 = vector.broadcast %344 : vector<1x32xf32> to vector<2x32xf32>
      %750 = arith.addf %748, %749 : vector<2x32xf32>
      %cst_267 = arith.constant 0.000000e+00 : f32
      %751 = vector.broadcast %cst_267 : f32 to vector<2x32xf32>
      %752 = arith.cmpf ogt, %750, %751 : vector<2x32xf32>
      %753 = math.exp %750 : vector<2x32xf32>
      %cst_268 = arith.constant 1.000000e+00 : f32
      %754 = vector.broadcast %cst_268 : f32 to vector<2x32xf32>
      %755 = arith.subf %753, %754 : vector<2x32xf32>
      %756 = arith.select %752, %750, %755 : vector<2x32xi1>, vector<2x32xf32>
      %757 = arith.truncf %756 : vector<2x32xf32> to vector<2x32xbf16>
      %cst_269 = arith.constant dense<0.000000e+00> : vector<2x8xf32>
      %758 = tpu.matmul %757, %342, %cst_269 {dimension_numbers = #tpu.dot_dimension_numbers<[1], [0], [0], [1], [0, 0, 1, 1], [], []>} : vector<2x32xbf16>, vector<32x8xbf16>, vector<2x8xf32> -> vector<2x8xf32>
      %759 = vector.broadcast %345 : vector<1x8xf32> to vector<2x8xf32>
      %760 = arith.addf %758, %759 : vector<2x8xf32>
      %cst_270 = arith.constant 6.000000e+00 : f32
      %761 = arith.divf %417, %cst_270 : f32
      %cst_271 = arith.constant 2.000000e+00 : f32
      %762 = vector.broadcast %cst_271 : f32 to vector<2x8xf32>
      %763 = arith.mulf %762, %705 : vector<2x8xf32>
      %764 = arith.addf %677, %763 : vector<2x8xf32>
      %cst_272 = arith.constant 2.000000e+00 : f32
      %765 = vector.broadcast %cst_272 : f32 to vector<2x8xf32>
      %766 = arith.mulf %765, %733 : vector<2x8xf32>
      %767 = arith.addf %764, %766 : vector<2x8xf32>
      %768 = arith.addf %767, %760 : vector<2x8xf32>
      %769 = vector.broadcast %761 : f32 to vector<2x8xf32>
      %770 = arith.mulf %769, %768 : vector<2x8xf32>
      %771 = arith.addf %653, %770 : vector<2x8xf32>
      %772 = arith.truncf %771 : vector<2x8xf32> to vector<2x8xbf16>
      %cst_273 = arith.constant dense<0.000000e+00> : vector<2x32xf32>
      %773 = tpu.matmul %772, %338, %cst_273 {dimension_numbers = #tpu.dot_dimension_numbers<[1], [0], [0], [1], [0, 0, 1, 1], [], []>} : vector<2x8xbf16>, vector<8x32xbf16>, vector<2x32xf32> -> vector<2x32xf32>
      %774 = vector.broadcast %343 : vector<1x32xf32> to vector<2x32xf32>
      %775 = arith.addf %773, %774 : vector<2x32xf32>
      %cst_274 = arith.constant 0.000000e+00 : f32
      %776 = vector.broadcast %cst_274 : f32 to vector<2x32xf32>
      %777 = arith.cmpf ogt, %775, %776 : vector<2x32xf32>
      %778 = math.exp %775 : vector<2x32xf32>
      %cst_275 = arith.constant 1.000000e+00 : f32
      %779 = vector.broadcast %cst_275 : f32 to vector<2x32xf32>
      %780 = arith.subf %778, %779 : vector<2x32xf32>
      %781 = arith.select %777, %775, %780 : vector<2x32xi1>, vector<2x32xf32>
      %782 = arith.truncf %781 : vector<2x32xf32> to vector<2x32xbf16>
      %cst_276 = arith.constant dense<0.000000e+00> : vector<2x32xf32>
      %783 = tpu.matmul %782, %340, %cst_276 {dimension_numbers = #tpu.dot_dimension_numbers<[1], [0], [0], [1], [0, 0, 1, 1], [], []>} : vector<2x32xbf16>, vector<32x32xbf16>, vector<2x32xf32> -> vector<2x32xf32>
      %784 = vector.broadcast %344 : vector<1x32xf32> to vector<2x32xf32>
      %785 = arith.addf %783, %784 : vector<2x32xf32>
      %cst_277 = arith.constant 0.000000e+00 : f32
      %786 = vector.broadcast %cst_277 : f32 to vector<2x32xf32>
      %787 = arith.cmpf ogt, %785, %786 : vector<2x32xf32>
      %788 = math.exp %785 : vector<2x32xf32>
      %cst_278 = arith.constant 1.000000e+00 : f32
      %789 = vector.broadcast %cst_278 : f32 to vector<2x32xf32>
      %790 = arith.subf %788, %789 : vector<2x32xf32>
      %791 = arith.select %787, %785, %790 : vector<2x32xi1>, vector<2x32xf32>
      %792 = arith.truncf %791 : vector<2x32xf32> to vector<2x32xbf16>
      %cst_279 = arith.constant dense<0.000000e+00> : vector<2x8xf32>
      %793 = tpu.matmul %792, %342, %cst_279 {dimension_numbers = #tpu.dot_dimension_numbers<[1], [0], [0], [1], [0, 0, 1, 1], [], []>} : vector<2x32xbf16>, vector<32x8xbf16>, vector<2x8xf32> -> vector<2x8xf32>
      %794 = vector.broadcast %345 : vector<1x8xf32> to vector<2x8xf32>
      %795 = arith.addf %793, %794 : vector<2x8xf32>
      %cst_280 = arith.constant 5.000000e-01 : f32
      %796 = arith.mulf %cst_280, %417 : f32
      %797 = vector.broadcast %796 : f32 to vector<2x8xf32>
      %798 = arith.mulf %797, %795 : vector<2x8xf32>
      %799 = arith.addf %771, %798 : vector<2x8xf32>
      %800 = arith.truncf %799 : vector<2x8xf32> to vector<2x8xbf16>
      %cst_281 = arith.constant dense<0.000000e+00> : vector<2x32xf32>
      %801 = tpu.matmul %800, %338, %cst_281 {dimension_numbers = #tpu.dot_dimension_numbers<[1], [0], [0], [1], [0, 0, 1, 1], [], []>} : vector<2x8xbf16>, vector<8x32xbf16>, vector<2x32xf32> -> vector<2x32xf32>
      %802 = vector.broadcast %343 : vector<1x32xf32> to vector<2x32xf32>
      %803 = arith.addf %801, %802 : vector<2x32xf32>
      %cst_282 = arith.constant 0.000000e+00 : f32
      %804 = vector.broadcast %cst_282 : f32 to vector<2x32xf32>
      %805 = arith.cmpf ogt, %803, %804 : vector<2x32xf32>
      %806 = math.exp %803 : vector<2x32xf32>
      %cst_283 = arith.constant 1.000000e+00 : f32
      %807 = vector.broadcast %cst_283 : f32 to vector<2x32xf32>
      %808 = arith.subf %806, %807 : vector<2x32xf32>
      %809 = arith.select %805, %803, %808 : vector<2x32xi1>, vector<2x32xf32>
      %810 = arith.truncf %809 : vector<2x32xf32> to vector<2x32xbf16>
      %cst_284 = arith.constant dense<0.000000e+00> : vector<2x32xf32>
      %811 = tpu.matmul %810, %340, %cst_284 {dimension_numbers = #tpu.dot_dimension_numbers<[1], [0], [0], [1], [0, 0, 1, 1], [], []>} : vector<2x32xbf16>, vector<32x32xbf16>, vector<2x32xf32> -> vector<2x32xf32>
      %812 = vector.broadcast %344 : vector<1x32xf32> to vector<2x32xf32>
      %813 = arith.addf %811, %812 : vector<2x32xf32>
      %cst_285 = arith.constant 0.000000e+00 : f32
      %814 = vector.broadcast %cst_285 : f32 to vector<2x32xf32>
      %815 = arith.cmpf ogt, %813, %814 : vector<2x32xf32>
      %816 = math.exp %813 : vector<2x32xf32>
      %cst_286 = arith.constant 1.000000e+00 : f32
      %817 = vector.broadcast %cst_286 : f32 to vector<2x32xf32>
      %818 = arith.subf %816, %817 : vector<2x32xf32>
      %819 = arith.select %815, %813, %818 : vector<2x32xi1>, vector<2x32xf32>
      %820 = arith.truncf %819 : vector<2x32xf32> to vector<2x32xbf16>
      %cst_287 = arith.constant dense<0.000000e+00> : vector<2x8xf32>
      %821 = tpu.matmul %820, %342, %cst_287 {dimension_numbers = #tpu.dot_dimension_numbers<[1], [0], [0], [1], [0, 0, 1, 1], [], []>} : vector<2x32xbf16>, vector<32x8xbf16>, vector<2x8xf32> -> vector<2x8xf32>
      %822 = vector.broadcast %345 : vector<1x8xf32> to vector<2x8xf32>
      %823 = arith.addf %821, %822 : vector<2x8xf32>
      %cst_288 = arith.constant 5.000000e-01 : f32
      %824 = arith.mulf %cst_288, %417 : f32
      %825 = vector.broadcast %824 : f32 to vector<2x8xf32>
      %826 = arith.mulf %825, %823 : vector<2x8xf32>
      %827 = arith.addf %771, %826 : vector<2x8xf32>
      %828 = arith.truncf %827 : vector<2x8xf32> to vector<2x8xbf16>
      %cst_289 = arith.constant dense<0.000000e+00> : vector<2x32xf32>
      %829 = tpu.matmul %828, %338, %cst_289 {dimension_numbers = #tpu.dot_dimension_numbers<[1], [0], [0], [1], [0, 0, 1, 1], [], []>} : vector<2x8xbf16>, vector<8x32xbf16>, vector<2x32xf32> -> vector<2x32xf32>
      %830 = vector.broadcast %343 : vector<1x32xf32> to vector<2x32xf32>
      %831 = arith.addf %829, %830 : vector<2x32xf32>
      %cst_290 = arith.constant 0.000000e+00 : f32
      %832 = vector.broadcast %cst_290 : f32 to vector<2x32xf32>
      %833 = arith.cmpf ogt, %831, %832 : vector<2x32xf32>
      %834 = math.exp %831 : vector<2x32xf32>
      %cst_291 = arith.constant 1.000000e+00 : f32
      %835 = vector.broadcast %cst_291 : f32 to vector<2x32xf32>
      %836 = arith.subf %834, %835 : vector<2x32xf32>
      %837 = arith.select %833, %831, %836 : vector<2x32xi1>, vector<2x32xf32>
      %838 = arith.truncf %837 : vector<2x32xf32> to vector<2x32xbf16>
      %cst_292 = arith.constant dense<0.000000e+00> : vector<2x32xf32>
      %839 = tpu.matmul %838, %340, %cst_292 {dimension_numbers = #tpu.dot_dimension_numbers<[1], [0], [0], [1], [0, 0, 1, 1], [], []>} : vector<2x32xbf16>, vector<32x32xbf16>, vector<2x32xf32> -> vector<2x32xf32>
      %840 = vector.broadcast %344 : vector<1x32xf32> to vector<2x32xf32>
      %841 = arith.addf %839, %840 : vector<2x32xf32>
      %cst_293 = arith.constant 0.000000e+00 : f32
      %842 = vector.broadcast %cst_293 : f32 to vector<2x32xf32>
      %843 = arith.cmpf ogt, %841, %842 : vector<2x32xf32>
      %844 = math.exp %841 : vector<2x32xf32>
      %cst_294 = arith.constant 1.000000e+00 : f32
      %845 = vector.broadcast %cst_294 : f32 to vector<2x32xf32>
      %846 = arith.subf %844, %845 : vector<2x32xf32>
      %847 = arith.select %843, %841, %846 : vector<2x32xi1>, vector<2x32xf32>
      %848 = arith.truncf %847 : vector<2x32xf32> to vector<2x32xbf16>
      %cst_295 = arith.constant dense<0.000000e+00> : vector<2x8xf32>
      %849 = tpu.matmul %848, %342, %cst_295 {dimension_numbers = #tpu.dot_dimension_numbers<[1], [0], [0], [1], [0, 0, 1, 1], [], []>} : vector<2x32xbf16>, vector<32x8xbf16>, vector<2x8xf32> -> vector<2x8xf32>
      %850 = vector.broadcast %345 : vector<1x8xf32> to vector<2x8xf32>
      %851 = arith.addf %849, %850 : vector<2x8xf32>
      %852 = vector.broadcast %417 : f32 to vector<2x8xf32>
      %853 = arith.mulf %852, %851 : vector<2x8xf32>
      %854 = arith.addf %771, %853 : vector<2x8xf32>
      %855 = arith.truncf %854 : vector<2x8xf32> to vector<2x8xbf16>
      %cst_296 = arith.constant dense<0.000000e+00> : vector<2x32xf32>
      %856 = tpu.matmul %855, %338, %cst_296 {dimension_numbers = #tpu.dot_dimension_numbers<[1], [0], [0], [1], [0, 0, 1, 1], [], []>} : vector<2x8xbf16>, vector<8x32xbf16>, vector<2x32xf32> -> vector<2x32xf32>
      %857 = vector.broadcast %343 : vector<1x32xf32> to vector<2x32xf32>
      %858 = arith.addf %856, %857 : vector<2x32xf32>
      %cst_297 = arith.constant 0.000000e+00 : f32
      %859 = vector.broadcast %cst_297 : f32 to vector<2x32xf32>
      %860 = arith.cmpf ogt, %858, %859 : vector<2x32xf32>
      %861 = math.exp %858 : vector<2x32xf32>
      %cst_298 = arith.constant 1.000000e+00 : f32
      %862 = vector.broadcast %cst_298 : f32 to vector<2x32xf32>
      %863 = arith.subf %861, %862 : vector<2x32xf32>
      %864 = arith.select %860, %858, %863 : vector<2x32xi1>, vector<2x32xf32>
      %865 = arith.truncf %864 : vector<2x32xf32> to vector<2x32xbf16>
      %cst_299 = arith.constant dense<0.000000e+00> : vector<2x32xf32>
      %866 = tpu.matmul %865, %340, %cst_299 {dimension_numbers = #tpu.dot_dimension_numbers<[1], [0], [0], [1], [0, 0, 1, 1], [], []>} : vector<2x32xbf16>, vector<32x32xbf16>, vector<2x32xf32> -> vector<2x32xf32>
      %867 = vector.broadcast %344 : vector<1x32xf32> to vector<2x32xf32>
      %868 = arith.addf %866, %867 : vector<2x32xf32>
      %cst_300 = arith.constant 0.000000e+00 : f32
      %869 = vector.broadcast %cst_300 : f32 to vector<2x32xf32>
      %870 = arith.cmpf ogt, %868, %869 : vector<2x32xf32>
      %871 = math.exp %868 : vector<2x32xf32>
      %cst_301 = arith.constant 1.000000e+00 : f32
      %872 = vector.broadcast %cst_301 : f32 to vector<2x32xf32>
      %873 = arith.subf %871, %872 : vector<2x32xf32>
      %874 = arith.select %870, %868, %873 : vector<2x32xi1>, vector<2x32xf32>
      %875 = arith.truncf %874 : vector<2x32xf32> to vector<2x32xbf16>
      %cst_302 = arith.constant dense<0.000000e+00> : vector<2x8xf32>
      %876 = tpu.matmul %875, %342, %cst_302 {dimension_numbers = #tpu.dot_dimension_numbers<[1], [0], [0], [1], [0, 0, 1, 1], [], []>} : vector<2x32xbf16>, vector<32x8xbf16>, vector<2x8xf32> -> vector<2x8xf32>
      %877 = vector.broadcast %345 : vector<1x8xf32> to vector<2x8xf32>
      %878 = arith.addf %876, %877 : vector<2x8xf32>
      %cst_303 = arith.constant 6.000000e+00 : f32
      %879 = arith.divf %417, %cst_303 : f32
      %cst_304 = arith.constant 2.000000e+00 : f32
      %880 = vector.broadcast %cst_304 : f32 to vector<2x8xf32>
      %881 = arith.mulf %880, %823 : vector<2x8xf32>
      %882 = arith.addf %795, %881 : vector<2x8xf32>
      %cst_305 = arith.constant 2.000000e+00 : f32
      %883 = vector.broadcast %cst_305 : f32 to vector<2x8xf32>
      %884 = arith.mulf %883, %851 : vector<2x8xf32>
      %885 = arith.addf %882, %884 : vector<2x8xf32>
      %886 = arith.addf %885, %878 : vector<2x8xf32>
      %887 = vector.broadcast %879 : f32 to vector<2x8xf32>
      %888 = arith.mulf %887, %886 : vector<2x8xf32>
      %889 = arith.addf %771, %888 : vector<2x8xf32>
      %890 = arith.truncf %889 : vector<2x8xf32> to vector<2x8xbf16>
      %cst_306 = arith.constant dense<0.000000e+00> : vector<2x32xf32>
      %891 = tpu.matmul %890, %338, %cst_306 {dimension_numbers = #tpu.dot_dimension_numbers<[1], [0], [0], [1], [0, 0, 1, 1], [], []>} : vector<2x8xbf16>, vector<8x32xbf16>, vector<2x32xf32> -> vector<2x32xf32>
      %892 = vector.broadcast %343 : vector<1x32xf32> to vector<2x32xf32>
      %893 = arith.addf %891, %892 : vector<2x32xf32>
      %cst_307 = arith.constant 0.000000e+00 : f32
      %894 = vector.broadcast %cst_307 : f32 to vector<2x32xf32>
      %895 = arith.cmpf ogt, %893, %894 : vector<2x32xf32>
      %896 = math.exp %893 : vector<2x32xf32>
      %cst_308 = arith.constant 1.000000e+00 : f32
      %897 = vector.broadcast %cst_308 : f32 to vector<2x32xf32>
      %898 = arith.subf %896, %897 : vector<2x32xf32>
      %899 = arith.select %895, %893, %898 : vector<2x32xi1>, vector<2x32xf32>
      %900 = arith.truncf %899 : vector<2x32xf32> to vector<2x32xbf16>
      %cst_309 = arith.constant dense<0.000000e+00> : vector<2x32xf32>
      %901 = tpu.matmul %900, %340, %cst_309 {dimension_numbers = #tpu.dot_dimension_numbers<[1], [0], [0], [1], [0, 0, 1, 1], [], []>} : vector<2x32xbf16>, vector<32x32xbf16>, vector<2x32xf32> -> vector<2x32xf32>
      %902 = vector.broadcast %344 : vector<1x32xf32> to vector<2x32xf32>
      %903 = arith.addf %901, %902 : vector<2x32xf32>
      %cst_310 = arith.constant 0.000000e+00 : f32
      %904 = vector.broadcast %cst_310 : f32 to vector<2x32xf32>
      %905 = arith.cmpf ogt, %903, %904 : vector<2x32xf32>
      %906 = math.exp %903 : vector<2x32xf32>
      %cst_311 = arith.constant 1.000000e+00 : f32
      %907 = vector.broadcast %cst_311 : f32 to vector<2x32xf32>
      %908 = arith.subf %906, %907 : vector<2x32xf32>
      %909 = arith.select %905, %903, %908 : vector<2x32xi1>, vector<2x32xf32>
      %910 = arith.truncf %909 : vector<2x32xf32> to vector<2x32xbf16>
      %cst_312 = arith.constant dense<0.000000e+00> : vector<2x8xf32>
      %911 = tpu.matmul %910, %342, %cst_312 {dimension_numbers = #tpu.dot_dimension_numbers<[1], [0], [0], [1], [0, 0, 1, 1], [], []>} : vector<2x32xbf16>, vector<32x8xbf16>, vector<2x8xf32> -> vector<2x8xf32>
      %912 = vector.broadcast %345 : vector<1x8xf32> to vector<2x8xf32>
      %913 = arith.addf %911, %912 : vector<2x8xf32>
      %cst_313 = arith.constant 5.000000e-01 : f32
      %914 = arith.mulf %cst_313, %417 : f32
      %915 = vector.broadcast %914 : f32 to vector<2x8xf32>
      %916 = arith.mulf %915, %913 : vector<2x8xf32>
      %917 = arith.addf %889, %916 : vector<2x8xf32>
      %918 = arith.truncf %917 : vector<2x8xf32> to vector<2x8xbf16>
      %cst_314 = arith.constant dense<0.000000e+00> : vector<2x32xf32>
      %919 = tpu.matmul %918, %338, %cst_314 {dimension_numbers = #tpu.dot_dimension_numbers<[1], [0], [0], [1], [0, 0, 1, 1], [], []>} : vector<2x8xbf16>, vector<8x32xbf16>, vector<2x32xf32> -> vector<2x32xf32>
      %920 = vector.broadcast %343 : vector<1x32xf32> to vector<2x32xf32>
      %921 = arith.addf %919, %920 : vector<2x32xf32>
      %cst_315 = arith.constant 0.000000e+00 : f32
      %922 = vector.broadcast %cst_315 : f32 to vector<2x32xf32>
      %923 = arith.cmpf ogt, %921, %922 : vector<2x32xf32>
      %924 = math.exp %921 : vector<2x32xf32>
      %cst_316 = arith.constant 1.000000e+00 : f32
      %925 = vector.broadcast %cst_316 : f32 to vector<2x32xf32>
      %926 = arith.subf %924, %925 : vector<2x32xf32>
      %927 = arith.select %923, %921, %926 : vector<2x32xi1>, vector<2x32xf32>
      %928 = arith.truncf %927 : vector<2x32xf32> to vector<2x32xbf16>
      %cst_317 = arith.constant dense<0.000000e+00> : vector<2x32xf32>
      %929 = tpu.matmul %928, %340, %cst_317 {dimension_numbers = #tpu.dot_dimension_numbers<[1], [0], [0], [1], [0, 0, 1, 1], [], []>} : vector<2x32xbf16>, vector<32x32xbf16>, vector<2x32xf32> -> vector<2x32xf32>
      %930 = vector.broadcast %344 : vector<1x32xf32> to vector<2x32xf32>
      %931 = arith.addf %929, %930 : vector<2x32xf32>
      %cst_318 = arith.constant 0.000000e+00 : f32
      %932 = vector.broadcast %cst_318 : f32 to vector<2x32xf32>
      %933 = arith.cmpf ogt, %931, %932 : vector<2x32xf32>
      %934 = math.exp %931 : vector<2x32xf32>
      %cst_319 = arith.constant 1.000000e+00 : f32
      %935 = vector.broadcast %cst_319 : f32 to vector<2x32xf32>
      %936 = arith.subf %934, %935 : vector<2x32xf32>
      %937 = arith.select %933, %931, %936 : vector<2x32xi1>, vector<2x32xf32>
      %938 = arith.truncf %937 : vector<2x32xf32> to vector<2x32xbf16>
      %cst_320 = arith.constant dense<0.000000e+00> : vector<2x8xf32>
      %939 = tpu.matmul %938, %342, %cst_320 {dimension_numbers = #tpu.dot_dimension_numbers<[1], [0], [0], [1], [0, 0, 1, 1], [], []>} : vector<2x32xbf16>, vector<32x8xbf16>, vector<2x8xf32> -> vector<2x8xf32>
      %940 = vector.broadcast %345 : vector<1x8xf32> to vector<2x8xf32>
      %941 = arith.addf %939, %940 : vector<2x8xf32>
      %cst_321 = arith.constant 5.000000e-01 : f32
      %942 = arith.mulf %cst_321, %417 : f32
      %943 = vector.broadcast %942 : f32 to vector<2x8xf32>
      %944 = arith.mulf %943, %941 : vector<2x8xf32>
      %945 = arith.addf %889, %944 : vector<2x8xf32>
      %946 = arith.truncf %945 : vector<2x8xf32> to vector<2x8xbf16>
      %cst_322 = arith.constant dense<0.000000e+00> : vector<2x32xf32>
      %947 = tpu.matmul %946, %338, %cst_322 {dimension_numbers = #tpu.dot_dimension_numbers<[1], [0], [0], [1], [0, 0, 1, 1], [], []>} : vector<2x8xbf16>, vector<8x32xbf16>, vector<2x32xf32> -> vector<2x32xf32>
      %948 = vector.broadcast %343 : vector<1x32xf32> to vector<2x32xf32>
      %949 = arith.addf %947, %948 : vector<2x32xf32>
      %cst_323 = arith.constant 0.000000e+00 : f32
      %950 = vector.broadcast %cst_323 : f32 to vector<2x32xf32>
      %951 = arith.cmpf ogt, %949, %950 : vector<2x32xf32>
      %952 = math.exp %949 : vector<2x32xf32>
      %cst_324 = arith.constant 1.000000e+00 : f32
      %953 = vector.broadcast %cst_324 : f32 to vector<2x32xf32>
      %954 = arith.subf %952, %953 : vector<2x32xf32>
      %955 = arith.select %951, %949, %954 : vector<2x32xi1>, vector<2x32xf32>
      %956 = arith.truncf %955 : vector<2x32xf32> to vector<2x32xbf16>
      %cst_325 = arith.constant dense<0.000000e+00> : vector<2x32xf32>
      %957 = tpu.matmul %956, %340, %cst_325 {dimension_numbers = #tpu.dot_dimension_numbers<[1], [0], [0], [1], [0, 0, 1, 1], [], []>} : vector<2x32xbf16>, vector<32x32xbf16>, vector<2x32xf32> -> vector<2x32xf32>
      %958 = vector.broadcast %344 : vector<1x32xf32> to vector<2x32xf32>
      %959 = arith.addf %957, %958 : vector<2x32xf32>
      %cst_326 = arith.constant 0.000000e+00 : f32
      %960 = vector.broadcast %cst_326 : f32 to vector<2x32xf32>
      %961 = arith.cmpf ogt, %959, %960 : vector<2x32xf32>
      %962 = math.exp %959 : vector<2x32xf32>
      %cst_327 = arith.constant 1.000000e+00 : f32
      %963 = vector.broadcast %cst_327 : f32 to vector<2x32xf32>
      %964 = arith.subf %962, %963 : vector<2x32xf32>
      %965 = arith.select %961, %959, %964 : vector<2x32xi1>, vector<2x32xf32>
      %966 = arith.truncf %965 : vector<2x32xf32> to vector<2x32xbf16>
      %cst_328 = arith.constant dense<0.000000e+00> : vector<2x8xf32>
      %967 = tpu.matmul %966, %342, %cst_328 {dimension_numbers = #tpu.dot_dimension_numbers<[1], [0], [0], [1], [0, 0, 1, 1], [], []>} : vector<2x32xbf16>, vector<32x8xbf16>, vector<2x8xf32> -> vector<2x8xf32>
      %968 = vector.broadcast %345 : vector<1x8xf32> to vector<2x8xf32>
      %969 = arith.addf %967, %968 : vector<2x8xf32>
      %970 = vector.broadcast %417 : f32 to vector<2x8xf32>
      %971 = arith.mulf %970, %969 : vector<2x8xf32>
      %972 = arith.addf %889, %971 : vector<2x8xf32>
      %973 = arith.truncf %972 : vector<2x8xf32> to vector<2x8xbf16>
      %cst_329 = arith.constant dense<0.000000e+00> : vector<2x32xf32>
      %974 = tpu.matmul %973, %338, %cst_329 {dimension_numbers = #tpu.dot_dimension_numbers<[1], [0], [0], [1], [0, 0, 1, 1], [], []>} : vector<2x8xbf16>, vector<8x32xbf16>, vector<2x32xf32> -> vector<2x32xf32>
      %975 = vector.broadcast %343 : vector<1x32xf32> to vector<2x32xf32>
      %976 = arith.addf %974, %975 : vector<2x32xf32>
      %cst_330 = arith.constant 0.000000e+00 : f32
      %977 = vector.broadcast %cst_330 : f32 to vector<2x32xf32>
      %978 = arith.cmpf ogt, %976, %977 : vector<2x32xf32>
      %979 = math.exp %976 : vector<2x32xf32>
      %cst_331 = arith.constant 1.000000e+00 : f32
      %980 = vector.broadcast %cst_331 : f32 to vector<2x32xf32>
      %981 = arith.subf %979, %980 : vector<2x32xf32>
      %982 = arith.select %978, %976, %981 : vector<2x32xi1>, vector<2x32xf32>
      %983 = arith.truncf %982 : vector<2x32xf32> to vector<2x32xbf16>
      %cst_332 = arith.constant dense<0.000000e+00> : vector<2x32xf32>
      %984 = tpu.matmul %983, %340, %cst_332 {dimension_numbers = #tpu.dot_dimension_numbers<[1], [0], [0], [1], [0, 0, 1, 1], [], []>} : vector<2x32xbf16>, vector<32x32xbf16>, vector<2x32xf32> -> vector<2x32xf32>
      %985 = vector.broadcast %344 : vector<1x32xf32> to vector<2x32xf32>
      %986 = arith.addf %984, %985 : vector<2x32xf32>
      %cst_333 = arith.constant 0.000000e+00 : f32
      %987 = vector.broadcast %cst_333 : f32 to vector<2x32xf32>
      %988 = arith.cmpf ogt, %986, %987 : vector<2x32xf32>
      %989 = math.exp %986 : vector<2x32xf32>
      %cst_334 = arith.constant 1.000000e+00 : f32
      %990 = vector.broadcast %cst_334 : f32 to vector<2x32xf32>
      %991 = arith.subf %989, %990 : vector<2x32xf32>
      %992 = arith.select %988, %986, %991 : vector<2x32xi1>, vector<2x32xf32>
      %993 = arith.truncf %992 : vector<2x32xf32> to vector<2x32xbf16>
      %cst_335 = arith.constant dense<0.000000e+00> : vector<2x8xf32>
      %994 = tpu.matmul %993, %342, %cst_335 {dimension_numbers = #tpu.dot_dimension_numbers<[1], [0], [0], [1], [0, 0, 1, 1], [], []>} : vector<2x32xbf16>, vector<32x8xbf16>, vector<2x8xf32> -> vector<2x8xf32>
      %995 = vector.broadcast %345 : vector<1x8xf32> to vector<2x8xf32>
      %996 = arith.addf %994, %995 : vector<2x8xf32>
      %cst_336 = arith.constant 6.000000e+00 : f32
      %997 = arith.divf %417, %cst_336 : f32
      %cst_337 = arith.constant 2.000000e+00 : f32
      %998 = vector.broadcast %cst_337 : f32 to vector<2x8xf32>
      %999 = arith.mulf %998, %941 : vector<2x8xf32>
      %1000 = arith.addf %913, %999 : vector<2x8xf32>
      %cst_338 = arith.constant 2.000000e+00 : f32
      %1001 = vector.broadcast %cst_338 : f32 to vector<2x8xf32>
      %1002 = arith.mulf %1001, %969 : vector<2x8xf32>
      %1003 = arith.addf %1000, %1002 : vector<2x8xf32>
      %1004 = arith.addf %1003, %996 : vector<2x8xf32>
      %1005 = vector.broadcast %997 : f32 to vector<2x8xf32>
      %1006 = arith.mulf %1005, %1004 : vector<2x8xf32>
      %1007 = arith.addf %889, %1006 : vector<2x8xf32>
      %1008 = arith.truncf %1007 : vector<2x8xf32> to vector<2x8xbf16>
      %cst_339 = arith.constant dense<0.000000e+00> : vector<2x32xf32>
      %1009 = tpu.matmul %1008, %338, %cst_339 {dimension_numbers = #tpu.dot_dimension_numbers<[1], [0], [0], [1], [0, 0, 1, 1], [], []>} : vector<2x8xbf16>, vector<8x32xbf16>, vector<2x32xf32> -> vector<2x32xf32>
      %1010 = vector.broadcast %343 : vector<1x32xf32> to vector<2x32xf32>
      %1011 = arith.addf %1009, %1010 : vector<2x32xf32>
      %cst_340 = arith.constant 0.000000e+00 : f32
      %1012 = vector.broadcast %cst_340 : f32 to vector<2x32xf32>
      %1013 = arith.cmpf ogt, %1011, %1012 : vector<2x32xf32>
      %1014 = math.exp %1011 : vector<2x32xf32>
      %cst_341 = arith.constant 1.000000e+00 : f32
      %1015 = vector.broadcast %cst_341 : f32 to vector<2x32xf32>
      %1016 = arith.subf %1014, %1015 : vector<2x32xf32>
      %1017 = arith.select %1013, %1011, %1016 : vector<2x32xi1>, vector<2x32xf32>
      %1018 = arith.truncf %1017 : vector<2x32xf32> to vector<2x32xbf16>
      %cst_342 = arith.constant dense<0.000000e+00> : vector<2x32xf32>
      %1019 = tpu.matmul %1018, %340, %cst_342 {dimension_numbers = #tpu.dot_dimension_numbers<[1], [0], [0], [1], [0, 0, 1, 1], [], []>} : vector<2x32xbf16>, vector<32x32xbf16>, vector<2x32xf32> -> vector<2x32xf32>
      %1020 = vector.broadcast %344 : vector<1x32xf32> to vector<2x32xf32>
      %1021 = arith.addf %1019, %1020 : vector<2x32xf32>
      %cst_343 = arith.constant 0.000000e+00 : f32
      %1022 = vector.broadcast %cst_343 : f32 to vector<2x32xf32>
      %1023 = arith.cmpf ogt, %1021, %1022 : vector<2x32xf32>
      %1024 = math.exp %1021 : vector<2x32xf32>
      %cst_344 = arith.constant 1.000000e+00 : f32
      %1025 = vector.broadcast %cst_344 : f32 to vector<2x32xf32>
      %1026 = arith.subf %1024, %1025 : vector<2x32xf32>
      %1027 = arith.select %1023, %1021, %1026 : vector<2x32xi1>, vector<2x32xf32>
      %1028 = arith.truncf %1027 : vector<2x32xf32> to vector<2x32xbf16>
      %cst_345 = arith.constant dense<0.000000e+00> : vector<2x8xf32>
      %1029 = tpu.matmul %1028, %342, %cst_345 {dimension_numbers = #tpu.dot_dimension_numbers<[1], [0], [0], [1], [0, 0, 1, 1], [], []>} : vector<2x32xbf16>, vector<32x8xbf16>, vector<2x8xf32> -> vector<2x8xf32>
      %1030 = vector.broadcast %345 : vector<1x8xf32> to vector<2x8xf32>
      %1031 = arith.addf %1029, %1030 : vector<2x8xf32>
      %cst_346 = arith.constant 5.000000e-01 : f32
      %1032 = arith.mulf %cst_346, %417 : f32
      %1033 = vector.broadcast %1032 : f32 to vector<2x8xf32>
      %1034 = arith.mulf %1033, %1031 : vector<2x8xf32>
      %1035 = arith.addf %1007, %1034 : vector<2x8xf32>
      %1036 = arith.truncf %1035 : vector<2x8xf32> to vector<2x8xbf16>
      %cst_347 = arith.constant dense<0.000000e+00> : vector<2x32xf32>
      %1037 = tpu.matmul %1036, %338, %cst_347 {dimension_numbers = #tpu.dot_dimension_numbers<[1], [0], [0], [1], [0, 0, 1, 1], [], []>} : vector<2x8xbf16>, vector<8x32xbf16>, vector<2x32xf32> -> vector<2x32xf32>
      %1038 = vector.broadcast %343 : vector<1x32xf32> to vector<2x32xf32>
      %1039 = arith.addf %1037, %1038 : vector<2x32xf32>
      %cst_348 = arith.constant 0.000000e+00 : f32
      %1040 = vector.broadcast %cst_348 : f32 to vector<2x32xf32>
      %1041 = arith.cmpf ogt, %1039, %1040 : vector<2x32xf32>
      %1042 = math.exp %1039 : vector<2x32xf32>
      %cst_349 = arith.constant 1.000000e+00 : f32
      %1043 = vector.broadcast %cst_349 : f32 to vector<2x32xf32>
      %1044 = arith.subf %1042, %1043 : vector<2x32xf32>
      %1045 = arith.select %1041, %1039, %1044 : vector<2x32xi1>, vector<2x32xf32>
      %1046 = arith.truncf %1045 : vector<2x32xf32> to vector<2x32xbf16>
      %cst_350 = arith.constant dense<0.000000e+00> : vector<2x32xf32>
      %1047 = tpu.matmul %1046, %340, %cst_350 {dimension_numbers = #tpu.dot_dimension_numbers<[1], [0], [0], [1], [0, 0, 1, 1], [], []>} : vector<2x32xbf16>, vector<32x32xbf16>, vector<2x32xf32> -> vector<2x32xf32>
      %1048 = vector.broadcast %344 : vector<1x32xf32> to vector<2x32xf32>
      %1049 = arith.addf %1047, %1048 : vector<2x32xf32>
      %cst_351 = arith.constant 0.000000e+00 : f32
      %1050 = vector.broadcast %cst_351 : f32 to vector<2x32xf32>
      %1051 = arith.cmpf ogt, %1049, %1050 : vector<2x32xf32>
      %1052 = math.exp %1049 : vector<2x32xf32>
      %cst_352 = arith.constant 1.000000e+00 : f32
      %1053 = vector.broadcast %cst_352 : f32 to vector<2x32xf32>
      %1054 = arith.subf %1052, %1053 : vector<2x32xf32>
      %1055 = arith.select %1051, %1049, %1054 : vector<2x32xi1>, vector<2x32xf32>
      %1056 = arith.truncf %1055 : vector<2x32xf32> to vector<2x32xbf16>
      %cst_353 = arith.constant dense<0.000000e+00> : vector<2x8xf32>
      %1057 = tpu.matmul %1056, %342, %cst_353 {dimension_numbers = #tpu.dot_dimension_numbers<[1], [0], [0], [1], [0, 0, 1, 1], [], []>} : vector<2x32xbf16>, vector<32x8xbf16>, vector<2x8xf32> -> vector<2x8xf32>
      %1058 = vector.broadcast %345 : vector<1x8xf32> to vector<2x8xf32>
      %1059 = arith.addf %1057, %1058 : vector<2x8xf32>
      %cst_354 = arith.constant 5.000000e-01 : f32
      %1060 = arith.mulf %cst_354, %417 : f32
      %1061 = vector.broadcast %1060 : f32 to vector<2x8xf32>
      %1062 = arith.mulf %1061, %1059 : vector<2x8xf32>
      %1063 = arith.addf %1007, %1062 : vector<2x8xf32>
      %1064 = arith.truncf %1063 : vector<2x8xf32> to vector<2x8xbf16>
      %cst_355 = arith.constant dense<0.000000e+00> : vector<2x32xf32>
      %1065 = tpu.matmul %1064, %338, %cst_355 {dimension_numbers = #tpu.dot_dimension_numbers<[1], [0], [0], [1], [0, 0, 1, 1], [], []>} : vector<2x8xbf16>, vector<8x32xbf16>, vector<2x32xf32> -> vector<2x32xf32>
      %1066 = vector.broadcast %343 : vector<1x32xf32> to vector<2x32xf32>
      %1067 = arith.addf %1065, %1066 : vector<2x32xf32>
      %cst_356 = arith.constant 0.000000e+00 : f32
      %1068 = vector.broadcast %cst_356 : f32 to vector<2x32xf32>
      %1069 = arith.cmpf ogt, %1067, %1068 : vector<2x32xf32>
      %1070 = math.exp %1067 : vector<2x32xf32>
      %cst_357 = arith.constant 1.000000e+00 : f32
      %1071 = vector.broadcast %cst_357 : f32 to vector<2x32xf32>
      %1072 = arith.subf %1070, %1071 : vector<2x32xf32>
      %1073 = arith.select %1069, %1067, %1072 : vector<2x32xi1>, vector<2x32xf32>
      %1074 = arith.truncf %1073 : vector<2x32xf32> to vector<2x32xbf16>
      %cst_358 = arith.constant dense<0.000000e+00> : vector<2x32xf32>
      %1075 = tpu.matmul %1074, %340, %cst_358 {dimension_numbers = #tpu.dot_dimension_numbers<[1], [0], [0], [1], [0, 0, 1, 1], [], []>} : vector<2x32xbf16>, vector<32x32xbf16>, vector<2x32xf32> -> vector<2x32xf32>
      %1076 = vector.broadcast %344 : vector<1x32xf32> to vector<2x32xf32>
      %1077 = arith.addf %1075, %1076 : vector<2x32xf32>
      %cst_359 = arith.constant 0.000000e+00 : f32
      %1078 = vector.broadcast %cst_359 : f32 to vector<2x32xf32>
      %1079 = arith.cmpf ogt, %1077, %1078 : vector<2x32xf32>
      %1080 = math.exp %1077 : vector<2x32xf32>
      %cst_360 = arith.constant 1.000000e+00 : f32
      %1081 = vector.broadcast %cst_360 : f32 to vector<2x32xf32>
      %1082 = arith.subf %1080, %1081 : vector<2x32xf32>
      %1083 = arith.select %1079, %1077, %1082 : vector<2x32xi1>, vector<2x32xf32>
      %1084 = arith.truncf %1083 : vector<2x32xf32> to vector<2x32xbf16>
      %cst_361 = arith.constant dense<0.000000e+00> : vector<2x8xf32>
      %1085 = tpu.matmul %1084, %342, %cst_361 {dimension_numbers = #tpu.dot_dimension_numbers<[1], [0], [0], [1], [0, 0, 1, 1], [], []>} : vector<2x32xbf16>, vector<32x8xbf16>, vector<2x8xf32> -> vector<2x8xf32>
      %1086 = vector.broadcast %345 : vector<1x8xf32> to vector<2x8xf32>
      %1087 = arith.addf %1085, %1086 : vector<2x8xf32>
      %1088 = vector.broadcast %417 : f32 to vector<2x8xf32>
      %1089 = arith.mulf %1088, %1087 : vector<2x8xf32>
      %1090 = arith.addf %1007, %1089 : vector<2x8xf32>
      %1091 = arith.truncf %1090 : vector<2x8xf32> to vector<2x8xbf16>
      %cst_362 = arith.constant dense<0.000000e+00> : vector<2x32xf32>
      %1092 = tpu.matmul %1091, %338, %cst_362 {dimension_numbers = #tpu.dot_dimension_numbers<[1], [0], [0], [1], [0, 0, 1, 1], [], []>} : vector<2x8xbf16>, vector<8x32xbf16>, vector<2x32xf32> -> vector<2x32xf32>
      %1093 = vector.broadcast %343 : vector<1x32xf32> to vector<2x32xf32>
      %1094 = arith.addf %1092, %1093 : vector<2x32xf32>
      %cst_363 = arith.constant 0.000000e+00 : f32
      %1095 = vector.broadcast %cst_363 : f32 to vector<2x32xf32>
      %1096 = arith.cmpf ogt, %1094, %1095 : vector<2x32xf32>
      %1097 = math.exp %1094 : vector<2x32xf32>
      %cst_364 = arith.constant 1.000000e+00 : f32
      %1098 = vector.broadcast %cst_364 : f32 to vector<2x32xf32>
      %1099 = arith.subf %1097, %1098 : vector<2x32xf32>
      %1100 = arith.select %1096, %1094, %1099 : vector<2x32xi1>, vector<2x32xf32>
      %1101 = arith.truncf %1100 : vector<2x32xf32> to vector<2x32xbf16>
      %cst_365 = arith.constant dense<0.000000e+00> : vector<2x32xf32>
      %1102 = tpu.matmul %1101, %340, %cst_365 {dimension_numbers = #tpu.dot_dimension_numbers<[1], [0], [0], [1], [0, 0, 1, 1], [], []>} : vector<2x32xbf16>, vector<32x32xbf16>, vector<2x32xf32> -> vector<2x32xf32>
      %1103 = vector.broadcast %344 : vector<1x32xf32> to vector<2x32xf32>
      %1104 = arith.addf %1102, %1103 : vector<2x32xf32>
      %cst_366 = arith.constant 0.000000e+00 : f32
      %1105 = vector.broadcast %cst_366 : f32 to vector<2x32xf32>
      %1106 = arith.cmpf ogt, %1104, %1105 : vector<2x32xf32>
      %1107 = math.exp %1104 : vector<2x32xf32>
      %cst_367 = arith.constant 1.000000e+00 : f32
      %1108 = vector.broadcast %cst_367 : f32 to vector<2x32xf32>
      %1109 = arith.subf %1107, %1108 : vector<2x32xf32>
      %1110 = arith.select %1106, %1104, %1109 : vector<2x32xi1>, vector<2x32xf32>
      %1111 = arith.truncf %1110 : vector<2x32xf32> to vector<2x32xbf16>
      %cst_368 = arith.constant dense<0.000000e+00> : vector<2x8xf32>
      %1112 = tpu.matmul %1111, %342, %cst_368 {dimension_numbers = #tpu.dot_dimension_numbers<[1], [0], [0], [1], [0, 0, 1, 1], [], []>} : vector<2x32xbf16>, vector<32x8xbf16>, vector<2x8xf32> -> vector<2x8xf32>
      %1113 = vector.broadcast %345 : vector<1x8xf32> to vector<2x8xf32>
      %1114 = arith.addf %1112, %1113 : vector<2x8xf32>
      %cst_369 = arith.constant 6.000000e+00 : f32
      %1115 = arith.divf %417, %cst_369 : f32
      %cst_370 = arith.constant 2.000000e+00 : f32
      %1116 = vector.broadcast %cst_370 : f32 to vector<2x8xf32>
      %1117 = arith.mulf %1116, %1059 : vector<2x8xf32>
      %1118 = arith.addf %1031, %1117 : vector<2x8xf32>
      %cst_371 = arith.constant 2.000000e+00 : f32
      %1119 = vector.broadcast %cst_371 : f32 to vector<2x8xf32>
      %1120 = arith.mulf %1119, %1087 : vector<2x8xf32>
      %1121 = arith.addf %1118, %1120 : vector<2x8xf32>
      %1122 = arith.addf %1121, %1114 : vector<2x8xf32>
      %1123 = vector.broadcast %1115 : f32 to vector<2x8xf32>
      %1124 = arith.mulf %1123, %1122 : vector<2x8xf32>
      %1125 = arith.addf %1007, %1124 : vector<2x8xf32>
      %1126 = arith.truncf %1125 : vector<2x8xf32> to vector<2x8xbf16>
      %cst_372 = arith.constant dense<0.000000e+00> : vector<2x32xf32>
      %1127 = tpu.matmul %1126, %338, %cst_372 {dimension_numbers = #tpu.dot_dimension_numbers<[1], [0], [0], [1], [0, 0, 1, 1], [], []>} : vector<2x8xbf16>, vector<8x32xbf16>, vector<2x32xf32> -> vector<2x32xf32>
      %1128 = vector.broadcast %343 : vector<1x32xf32> to vector<2x32xf32>
      %1129 = arith.addf %1127, %1128 : vector<2x32xf32>
      %cst_373 = arith.constant 0.000000e+00 : f32
      %1130 = vector.broadcast %cst_373 : f32 to vector<2x32xf32>
      %1131 = arith.cmpf ogt, %1129, %1130 : vector<2x32xf32>
      %1132 = math.exp %1129 : vector<2x32xf32>
      %cst_374 = arith.constant 1.000000e+00 : f32
      %1133 = vector.broadcast %cst_374 : f32 to vector<2x32xf32>
      %1134 = arith.subf %1132, %1133 : vector<2x32xf32>
      %1135 = arith.select %1131, %1129, %1134 : vector<2x32xi1>, vector<2x32xf32>
      %1136 = arith.truncf %1135 : vector<2x32xf32> to vector<2x32xbf16>
      %cst_375 = arith.constant dense<0.000000e+00> : vector<2x32xf32>
      %1137 = tpu.matmul %1136, %340, %cst_375 {dimension_numbers = #tpu.dot_dimension_numbers<[1], [0], [0], [1], [0, 0, 1, 1], [], []>} : vector<2x32xbf16>, vector<32x32xbf16>, vector<2x32xf32> -> vector<2x32xf32>
      %1138 = vector.broadcast %344 : vector<1x32xf32> to vector<2x32xf32>
      %1139 = arith.addf %1137, %1138 : vector<2x32xf32>
      %cst_376 = arith.constant 0.000000e+00 : f32
      %1140 = vector.broadcast %cst_376 : f32 to vector<2x32xf32>
      %1141 = arith.cmpf ogt, %1139, %1140 : vector<2x32xf32>
      %1142 = math.exp %1139 : vector<2x32xf32>
      %cst_377 = arith.constant 1.000000e+00 : f32
      %1143 = vector.broadcast %cst_377 : f32 to vector<2x32xf32>
      %1144 = arith.subf %1142, %1143 : vector<2x32xf32>
      %1145 = arith.select %1141, %1139, %1144 : vector<2x32xi1>, vector<2x32xf32>
      %1146 = arith.truncf %1145 : vector<2x32xf32> to vector<2x32xbf16>
      %cst_378 = arith.constant dense<0.000000e+00> : vector<2x8xf32>
      %1147 = tpu.matmul %1146, %342, %cst_378 {dimension_numbers = #tpu.dot_dimension_numbers<[1], [0], [0], [1], [0, 0, 1, 1], [], []>} : vector<2x32xbf16>, vector<32x8xbf16>, vector<2x8xf32> -> vector<2x8xf32>
      %1148 = vector.broadcast %345 : vector<1x8xf32> to vector<2x8xf32>
      %1149 = arith.addf %1147, %1148 : vector<2x8xf32>
      %cst_379 = arith.constant 5.000000e-01 : f32
      %1150 = arith.mulf %cst_379, %417 : f32
      %1151 = vector.broadcast %1150 : f32 to vector<2x8xf32>
      %1152 = arith.mulf %1151, %1149 : vector<2x8xf32>
      %1153 = arith.addf %1125, %1152 : vector<2x8xf32>
      %1154 = arith.truncf %1153 : vector<2x8xf32> to vector<2x8xbf16>
      %cst_380 = arith.constant dense<0.000000e+00> : vector<2x32xf32>
      %1155 = tpu.matmul %1154, %338, %cst_380 {dimension_numbers = #tpu.dot_dimension_numbers<[1], [0], [0], [1], [0, 0, 1, 1], [], []>} : vector<2x8xbf16>, vector<8x32xbf16>, vector<2x32xf32> -> vector<2x32xf32>
      %1156 = vector.broadcast %343 : vector<1x32xf32> to vector<2x32xf32>
      %1157 = arith.addf %1155, %1156 : vector<2x32xf32>
      %cst_381 = arith.constant 0.000000e+00 : f32
      %1158 = vector.broadcast %cst_381 : f32 to vector<2x32xf32>
      %1159 = arith.cmpf ogt, %1157, %1158 : vector<2x32xf32>
      %1160 = math.exp %1157 : vector<2x32xf32>
      %cst_382 = arith.constant 1.000000e+00 : f32
      %1161 = vector.broadcast %cst_382 : f32 to vector<2x32xf32>
      %1162 = arith.subf %1160, %1161 : vector<2x32xf32>
      %1163 = arith.select %1159, %1157, %1162 : vector<2x32xi1>, vector<2x32xf32>
      %1164 = arith.truncf %1163 : vector<2x32xf32> to vector<2x32xbf16>
      %cst_383 = arith.constant dense<0.000000e+00> : vector<2x32xf32>
      %1165 = tpu.matmul %1164, %340, %cst_383 {dimension_numbers = #tpu.dot_dimension_numbers<[1], [0], [0], [1], [0, 0, 1, 1], [], []>} : vector<2x32xbf16>, vector<32x32xbf16>, vector<2x32xf32> -> vector<2x32xf32>
      %1166 = vector.broadcast %344 : vector<1x32xf32> to vector<2x32xf32>
      %1167 = arith.addf %1165, %1166 : vector<2x32xf32>
      %cst_384 = arith.constant 0.000000e+00 : f32
      %1168 = vector.broadcast %cst_384 : f32 to vector<2x32xf32>
      %1169 = arith.cmpf ogt, %1167, %1168 : vector<2x32xf32>
      %1170 = math.exp %1167 : vector<2x32xf32>
      %cst_385 = arith.constant 1.000000e+00 : f32
      %1171 = vector.broadcast %cst_385 : f32 to vector<2x32xf32>
      %1172 = arith.subf %1170, %1171 : vector<2x32xf32>
      %1173 = arith.select %1169, %1167, %1172 : vector<2x32xi1>, vector<2x32xf32>
      %1174 = arith.truncf %1173 : vector<2x32xf32> to vector<2x32xbf16>
      %cst_386 = arith.constant dense<0.000000e+00> : vector<2x8xf32>
      %1175 = tpu.matmul %1174, %342, %cst_386 {dimension_numbers = #tpu.dot_dimension_numbers<[1], [0], [0], [1], [0, 0, 1, 1], [], []>} : vector<2x32xbf16>, vector<32x8xbf16>, vector<2x8xf32> -> vector<2x8xf32>
      %1176 = vector.broadcast %345 : vector<1x8xf32> to vector<2x8xf32>
      %1177 = arith.addf %1175, %1176 : vector<2x8xf32>
      %cst_387 = arith.constant 5.000000e-01 : f32
      %1178 = arith.mulf %cst_387, %417 : f32
      %1179 = vector.broadcast %1178 : f32 to vector<2x8xf32>
      %1180 = arith.mulf %1179, %1177 : vector<2x8xf32>
      %1181 = arith.addf %1125, %1180 : vector<2x8xf32>
      %1182 = arith.truncf %1181 : vector<2x8xf32> to vector<2x8xbf16>
      %cst_388 = arith.constant dense<0.000000e+00> : vector<2x32xf32>
      %1183 = tpu.matmul %1182, %338, %cst_388 {dimension_numbers = #tpu.dot_dimension_numbers<[1], [0], [0], [1], [0, 0, 1, 1], [], []>} : vector<2x8xbf16>, vector<8x32xbf16>, vector<2x32xf32> -> vector<2x32xf32>
      %1184 = vector.broadcast %343 : vector<1x32xf32> to vector<2x32xf32>
      %1185 = arith.addf %1183, %1184 : vector<2x32xf32>
      %cst_389 = arith.constant 0.000000e+00 : f32
      %1186 = vector.broadcast %cst_389 : f32 to vector<2x32xf32>
      %1187 = arith.cmpf ogt, %1185, %1186 : vector<2x32xf32>
      %1188 = math.exp %1185 : vector<2x32xf32>
      %cst_390 = arith.constant 1.000000e+00 : f32
      %1189 = vector.broadcast %cst_390 : f32 to vector<2x32xf32>
      %1190 = arith.subf %1188, %1189 : vector<2x32xf32>
      %1191 = arith.select %1187, %1185, %1190 : vector<2x32xi1>, vector<2x32xf32>
      %1192 = arith.truncf %1191 : vector<2x32xf32> to vector<2x32xbf16>
      %cst_391 = arith.constant dense<0.000000e+00> : vector<2x32xf32>
      %1193 = tpu.matmul %1192, %340, %cst_391 {dimension_numbers = #tpu.dot_dimension_numbers<[1], [0], [0], [1], [0, 0, 1, 1], [], []>} : vector<2x32xbf16>, vector<32x32xbf16>, vector<2x32xf32> -> vector<2x32xf32>
      %1194 = vector.broadcast %344 : vector<1x32xf32> to vector<2x32xf32>
      %1195 = arith.addf %1193, %1194 : vector<2x32xf32>
      %cst_392 = arith.constant 0.000000e+00 : f32
      %1196 = vector.broadcast %cst_392 : f32 to vector<2x32xf32>
      %1197 = arith.cmpf ogt, %1195, %1196 : vector<2x32xf32>
      %1198 = math.exp %1195 : vector<2x32xf32>
      %cst_393 = arith.constant 1.000000e+00 : f32
      %1199 = vector.broadcast %cst_393 : f32 to vector<2x32xf32>
      %1200 = arith.subf %1198, %1199 : vector<2x32xf32>
      %1201 = arith.select %1197, %1195, %1200 : vector<2x32xi1>, vector<2x32xf32>
      %1202 = arith.truncf %1201 : vector<2x32xf32> to vector<2x32xbf16>
      %cst_394 = arith.constant dense<0.000000e+00> : vector<2x8xf32>
      %1203 = tpu.matmul %1202, %342, %cst_394 {dimension_numbers = #tpu.dot_dimension_numbers<[1], [0], [0], [1], [0, 0, 1, 1], [], []>} : vector<2x32xbf16>, vector<32x8xbf16>, vector<2x8xf32> -> vector<2x8xf32>
      %1204 = vector.broadcast %345 : vector<1x8xf32> to vector<2x8xf32>
      %1205 = arith.addf %1203, %1204 : vector<2x8xf32>
      %1206 = vector.broadcast %417 : f32 to vector<2x8xf32>
      %1207 = arith.mulf %1206, %1205 : vector<2x8xf32>
      %1208 = arith.addf %1125, %1207 : vector<2x8xf32>
      %1209 = arith.truncf %1208 : vector<2x8xf32> to vector<2x8xbf16>
      %cst_395 = arith.constant dense<0.000000e+00> : vector<2x32xf32>
      %1210 = tpu.matmul %1209, %338, %cst_395 {dimension_numbers = #tpu.dot_dimension_numbers<[1], [0], [0], [1], [0, 0, 1, 1], [], []>} : vector<2x8xbf16>, vector<8x32xbf16>, vector<2x32xf32> -> vector<2x32xf32>
      %1211 = vector.broadcast %343 : vector<1x32xf32> to vector<2x32xf32>
      %1212 = arith.addf %1210, %1211 : vector<2x32xf32>
      %cst_396 = arith.constant 0.000000e+00 : f32
      %1213 = vector.broadcast %cst_396 : f32 to vector<2x32xf32>
      %1214 = arith.cmpf ogt, %1212, %1213 : vector<2x32xf32>
      %1215 = math.exp %1212 : vector<2x32xf32>
      %cst_397 = arith.constant 1.000000e+00 : f32
      %1216 = vector.broadcast %cst_397 : f32 to vector<2x32xf32>
      %1217 = arith.subf %1215, %1216 : vector<2x32xf32>
      %1218 = arith.select %1214, %1212, %1217 : vector<2x32xi1>, vector<2x32xf32>
      %1219 = arith.truncf %1218 : vector<2x32xf32> to vector<2x32xbf16>
      %cst_398 = arith.constant dense<0.000000e+00> : vector<2x32xf32>
      %1220 = tpu.matmul %1219, %340, %cst_398 {dimension_numbers = #tpu.dot_dimension_numbers<[1], [0], [0], [1], [0, 0, 1, 1], [], []>} : vector<2x32xbf16>, vector<32x32xbf16>, vector<2x32xf32> -> vector<2x32xf32>
      %1221 = vector.broadcast %344 : vector<1x32xf32> to vector<2x32xf32>
      %1222 = arith.addf %1220, %1221 : vector<2x32xf32>
      %cst_399 = arith.constant 0.000000e+00 : f32
      %1223 = vector.broadcast %cst_399 : f32 to vector<2x32xf32>
      %1224 = arith.cmpf ogt, %1222, %1223 : vector<2x32xf32>
      %1225 = math.exp %1222 : vector<2x32xf32>
      %cst_400 = arith.constant 1.000000e+00 : f32
      %1226 = vector.broadcast %cst_400 : f32 to vector<2x32xf32>
      %1227 = arith.subf %1225, %1226 : vector<2x32xf32>
      %1228 = arith.select %1224, %1222, %1227 : vector<2x32xi1>, vector<2x32xf32>
      %1229 = arith.truncf %1228 : vector<2x32xf32> to vector<2x32xbf16>
      %cst_401 = arith.constant dense<0.000000e+00> : vector<2x8xf32>
      %1230 = tpu.matmul %1229, %342, %cst_401 {dimension_numbers = #tpu.dot_dimension_numbers<[1], [0], [0], [1], [0, 0, 1, 1], [], []>} : vector<2x32xbf16>, vector<32x8xbf16>, vector<2x8xf32> -> vector<2x8xf32>
      %1231 = vector.broadcast %345 : vector<1x8xf32> to vector<2x8xf32>
      %1232 = arith.addf %1230, %1231 : vector<2x8xf32>
      %cst_402 = arith.constant 6.000000e+00 : f32
      %1233 = arith.divf %417, %cst_402 : f32
      %cst_403 = arith.constant 2.000000e+00 : f32
      %1234 = vector.broadcast %cst_403 : f32 to vector<2x8xf32>
      %1235 = arith.mulf %1234, %1177 : vector<2x8xf32>
      %1236 = arith.addf %1149, %1235 : vector<2x8xf32>
      %cst_404 = arith.constant 2.000000e+00 : f32
      %1237 = vector.broadcast %cst_404 : f32 to vector<2x8xf32>
      %1238 = arith.mulf %1237, %1205 : vector<2x8xf32>
      %1239 = arith.addf %1236, %1238 : vector<2x8xf32>
      %1240 = arith.addf %1239, %1232 : vector<2x8xf32>
      %1241 = vector.broadcast %1233 : f32 to vector<2x8xf32>
      %1242 = arith.mulf %1241, %1240 : vector<2x8xf32>
      %1243 = arith.addf %1125, %1242 : vector<2x8xf32>
      %1244 = arith.truncf %1243 : vector<2x8xf32> to vector<2x8xbf16>
      %cst_405 = arith.constant dense<0.000000e+00> : vector<2x32xf32>
      %1245 = tpu.matmul %1244, %338, %cst_405 {dimension_numbers = #tpu.dot_dimension_numbers<[1], [0], [0], [1], [0, 0, 1, 1], [], []>} : vector<2x8xbf16>, vector<8x32xbf16>, vector<2x32xf32> -> vector<2x32xf32>
      %1246 = vector.broadcast %343 : vector<1x32xf32> to vector<2x32xf32>
      %1247 = arith.addf %1245, %1246 : vector<2x32xf32>
      %cst_406 = arith.constant 0.000000e+00 : f32
      %1248 = vector.broadcast %cst_406 : f32 to vector<2x32xf32>
      %1249 = arith.cmpf ogt, %1247, %1248 : vector<2x32xf32>
      %1250 = math.exp %1247 : vector<2x32xf32>
      %cst_407 = arith.constant 1.000000e+00 : f32
      %1251 = vector.broadcast %cst_407 : f32 to vector<2x32xf32>
      %1252 = arith.subf %1250, %1251 : vector<2x32xf32>
      %1253 = arith.select %1249, %1247, %1252 : vector<2x32xi1>, vector<2x32xf32>
      %1254 = arith.truncf %1253 : vector<2x32xf32> to vector<2x32xbf16>
      %cst_408 = arith.constant dense<0.000000e+00> : vector<2x32xf32>
      %1255 = tpu.matmul %1254, %340, %cst_408 {dimension_numbers = #tpu.dot_dimension_numbers<[1], [0], [0], [1], [0, 0, 1, 1], [], []>} : vector<2x32xbf16>, vector<32x32xbf16>, vector<2x32xf32> -> vector<2x32xf32>
      %1256 = vector.broadcast %344 : vector<1x32xf32> to vector<2x32xf32>
      %1257 = arith.addf %1255, %1256 : vector<2x32xf32>
      %cst_409 = arith.constant 0.000000e+00 : f32
      %1258 = vector.broadcast %cst_409 : f32 to vector<2x32xf32>
      %1259 = arith.cmpf ogt, %1257, %1258 : vector<2x32xf32>
      %1260 = math.exp %1257 : vector<2x32xf32>
      %cst_410 = arith.constant 1.000000e+00 : f32
      %1261 = vector.broadcast %cst_410 : f32 to vector<2x32xf32>
      %1262 = arith.subf %1260, %1261 : vector<2x32xf32>
      %1263 = arith.select %1259, %1257, %1262 : vector<2x32xi1>, vector<2x32xf32>
      %1264 = arith.truncf %1263 : vector<2x32xf32> to vector<2x32xbf16>
      %cst_411 = arith.constant dense<0.000000e+00> : vector<2x8xf32>
      %1265 = tpu.matmul %1264, %342, %cst_411 {dimension_numbers = #tpu.dot_dimension_numbers<[1], [0], [0], [1], [0, 0, 1, 1], [], []>} : vector<2x32xbf16>, vector<32x8xbf16>, vector<2x8xf32> -> vector<2x8xf32>
      %1266 = vector.broadcast %345 : vector<1x8xf32> to vector<2x8xf32>
      %1267 = arith.addf %1265, %1266 : vector<2x8xf32>
      %cst_412 = arith.constant 5.000000e-01 : f32
      %1268 = arith.mulf %cst_412, %417 : f32
      %1269 = vector.broadcast %1268 : f32 to vector<2x8xf32>
      %1270 = arith.mulf %1269, %1267 : vector<2x8xf32>
      %1271 = arith.addf %1243, %1270 : vector<2x8xf32>
      %1272 = arith.truncf %1271 : vector<2x8xf32> to vector<2x8xbf16>
      %cst_413 = arith.constant dense<0.000000e+00> : vector<2x32xf32>
      %1273 = tpu.matmul %1272, %338, %cst_413 {dimension_numbers = #tpu.dot_dimension_numbers<[1], [0], [0], [1], [0, 0, 1, 1], [], []>} : vector<2x8xbf16>, vector<8x32xbf16>, vector<2x32xf32> -> vector<2x32xf32>
      %1274 = vector.broadcast %343 : vector<1x32xf32> to vector<2x32xf32>
      %1275 = arith.addf %1273, %1274 : vector<2x32xf32>
      %cst_414 = arith.constant 0.000000e+00 : f32
      %1276 = vector.broadcast %cst_414 : f32 to vector<2x32xf32>
      %1277 = arith.cmpf ogt, %1275, %1276 : vector<2x32xf32>
      %1278 = math.exp %1275 : vector<2x32xf32>
      %cst_415 = arith.constant 1.000000e+00 : f32
      %1279 = vector.broadcast %cst_415 : f32 to vector<2x32xf32>
      %1280 = arith.subf %1278, %1279 : vector<2x32xf32>
      %1281 = arith.select %1277, %1275, %1280 : vector<2x32xi1>, vector<2x32xf32>
      %1282 = arith.truncf %1281 : vector<2x32xf32> to vector<2x32xbf16>
      %cst_416 = arith.constant dense<0.000000e+00> : vector<2x32xf32>
      %1283 = tpu.matmul %1282, %340, %cst_416 {dimension_numbers = #tpu.dot_dimension_numbers<[1], [0], [0], [1], [0, 0, 1, 1], [], []>} : vector<2x32xbf16>, vector<32x32xbf16>, vector<2x32xf32> -> vector<2x32xf32>
      %1284 = vector.broadcast %344 : vector<1x32xf32> to vector<2x32xf32>
      %1285 = arith.addf %1283, %1284 : vector<2x32xf32>
      %cst_417 = arith.constant 0.000000e+00 : f32
      %1286 = vector.broadcast %cst_417 : f32 to vector<2x32xf32>
      %1287 = arith.cmpf ogt, %1285, %1286 : vector<2x32xf32>
      %1288 = math.exp %1285 : vector<2x32xf32>
      %cst_418 = arith.constant 1.000000e+00 : f32
      %1289 = vector.broadcast %cst_418 : f32 to vector<2x32xf32>
      %1290 = arith.subf %1288, %1289 : vector<2x32xf32>
      %1291 = arith.select %1287, %1285, %1290 : vector<2x32xi1>, vector<2x32xf32>
      %1292 = arith.truncf %1291 : vector<2x32xf32> to vector<2x32xbf16>
      %cst_419 = arith.constant dense<0.000000e+00> : vector<2x8xf32>
      %1293 = tpu.matmul %1292, %342, %cst_419 {dimension_numbers = #tpu.dot_dimension_numbers<[1], [0], [0], [1], [0, 0, 1, 1], [], []>} : vector<2x32xbf16>, vector<32x8xbf16>, vector<2x8xf32> -> vector<2x8xf32>
      %1294 = vector.broadcast %345 : vector<1x8xf32> to vector<2x8xf32>
      %1295 = arith.addf %1293, %1294 : vector<2x8xf32>
      %cst_420 = arith.constant 5.000000e-01 : f32
      %1296 = arith.mulf %cst_420, %417 : f32
      %1297 = vector.broadcast %1296 : f32 to vector<2x8xf32>
      %1298 = arith.mulf %1297, %1295 : vector<2x8xf32>
      %1299 = arith.addf %1243, %1298 : vector<2x8xf32>
      %1300 = arith.truncf %1299 : vector<2x8xf32> to vector<2x8xbf16>
      %cst_421 = arith.constant dense<0.000000e+00> : vector<2x32xf32>
      %1301 = tpu.matmul %1300, %338, %cst_421 {dimension_numbers = #tpu.dot_dimension_numbers<[1], [0], [0], [1], [0, 0, 1, 1], [], []>} : vector<2x8xbf16>, vector<8x32xbf16>, vector<2x32xf32> -> vector<2x32xf32>
      %1302 = vector.broadcast %343 : vector<1x32xf32> to vector<2x32xf32>
      %1303 = arith.addf %1301, %1302 : vector<2x32xf32>
      %cst_422 = arith.constant 0.000000e+00 : f32
      %1304 = vector.broadcast %cst_422 : f32 to vector<2x32xf32>
      %1305 = arith.cmpf ogt, %1303, %1304 : vector<2x32xf32>
      %1306 = math.exp %1303 : vector<2x32xf32>
      %cst_423 = arith.constant 1.000000e+00 : f32
      %1307 = vector.broadcast %cst_423 : f32 to vector<2x32xf32>
      %1308 = arith.subf %1306, %1307 : vector<2x32xf32>
      %1309 = arith.select %1305, %1303, %1308 : vector<2x32xi1>, vector<2x32xf32>
      %1310 = arith.truncf %1309 : vector<2x32xf32> to vector<2x32xbf16>
      %cst_424 = arith.constant dense<0.000000e+00> : vector<2x32xf32>
      %1311 = tpu.matmul %1310, %340, %cst_424 {dimension_numbers = #tpu.dot_dimension_numbers<[1], [0], [0], [1], [0, 0, 1, 1], [], []>} : vector<2x32xbf16>, vector<32x32xbf16>, vector<2x32xf32> -> vector<2x32xf32>
      %1312 = vector.broadcast %344 : vector<1x32xf32> to vector<2x32xf32>
      %1313 = arith.addf %1311, %1312 : vector<2x32xf32>
      %cst_425 = arith.constant 0.000000e+00 : f32
      %1314 = vector.broadcast %cst_425 : f32 to vector<2x32xf32>
      %1315 = arith.cmpf ogt, %1313, %1314 : vector<2x32xf32>
      %1316 = math.exp %1313 : vector<2x32xf32>
      %cst_426 = arith.constant 1.000000e+00 : f32
      %1317 = vector.broadcast %cst_426 : f32 to vector<2x32xf32>
      %1318 = arith.subf %1316, %1317 : vector<2x32xf32>
      %1319 = arith.select %1315, %1313, %1318 : vector<2x32xi1>, vector<2x32xf32>
      %1320 = arith.truncf %1319 : vector<2x32xf32> to vector<2x32xbf16>
      %cst_427 = arith.constant dense<0.000000e+00> : vector<2x8xf32>
      %1321 = tpu.matmul %1320, %342, %cst_427 {dimension_numbers = #tpu.dot_dimension_numbers<[1], [0], [0], [1], [0, 0, 1, 1], [], []>} : vector<2x32xbf16>, vector<32x8xbf16>, vector<2x8xf32> -> vector<2x8xf32>
      %1322 = vector.broadcast %345 : vector<1x8xf32> to vector<2x8xf32>
      %1323 = arith.addf %1321, %1322 : vector<2x8xf32>
      %1324 = vector.broadcast %417 : f32 to vector<2x8xf32>
      %1325 = arith.mulf %1324, %1323 : vector<2x8xf32>
      %1326 = arith.addf %1243, %1325 : vector<2x8xf32>
      %1327 = arith.truncf %1326 : vector<2x8xf32> to vector<2x8xbf16>
      %cst_428 = arith.constant dense<0.000000e+00> : vector<2x32xf32>
      %1328 = tpu.matmul %1327, %338, %cst_428 {dimension_numbers = #tpu.dot_dimension_numbers<[1], [0], [0], [1], [0, 0, 1, 1], [], []>} : vector<2x8xbf16>, vector<8x32xbf16>, vector<2x32xf32> -> vector<2x32xf32>
      %1329 = vector.broadcast %343 : vector<1x32xf32> to vector<2x32xf32>
      %1330 = arith.addf %1328, %1329 : vector<2x32xf32>
      %cst_429 = arith.constant 0.000000e+00 : f32
      %1331 = vector.broadcast %cst_429 : f32 to vector<2x32xf32>
      %1332 = arith.cmpf ogt, %1330, %1331 : vector<2x32xf32>
      %1333 = math.exp %1330 : vector<2x32xf32>
      %cst_430 = arith.constant 1.000000e+00 : f32
      %1334 = vector.broadcast %cst_430 : f32 to vector<2x32xf32>
      %1335 = arith.subf %1333, %1334 : vector<2x32xf32>
      %1336 = arith.select %1332, %1330, %1335 : vector<2x32xi1>, vector<2x32xf32>
      %1337 = arith.truncf %1336 : vector<2x32xf32> to vector<2x32xbf16>
      %cst_431 = arith.constant dense<0.000000e+00> : vector<2x32xf32>
      %1338 = tpu.matmul %1337, %340, %cst_431 {dimension_numbers = #tpu.dot_dimension_numbers<[1], [0], [0], [1], [0, 0, 1, 1], [], []>} : vector<2x32xbf16>, vector<32x32xbf16>, vector<2x32xf32> -> vector<2x32xf32>
      %1339 = vector.broadcast %344 : vector<1x32xf32> to vector<2x32xf32>
      %1340 = arith.addf %1338, %1339 : vector<2x32xf32>
      %cst_432 = arith.constant 0.000000e+00 : f32
      %1341 = vector.broadcast %cst_432 : f32 to vector<2x32xf32>
      %1342 = arith.cmpf ogt, %1340, %1341 : vector<2x32xf32>
      %1343 = math.exp %1340 : vector<2x32xf32>
      %cst_433 = arith.constant 1.000000e+00 : f32
      %1344 = vector.broadcast %cst_433 : f32 to vector<2x32xf32>
      %1345 = arith.subf %1343, %1344 : vector<2x32xf32>
      %1346 = arith.select %1342, %1340, %1345 : vector<2x32xi1>, vector<2x32xf32>
      %1347 = arith.truncf %1346 : vector<2x32xf32> to vector<2x32xbf16>
      %cst_434 = arith.constant dense<0.000000e+00> : vector<2x8xf32>
      %1348 = tpu.matmul %1347, %342, %cst_434 {dimension_numbers = #tpu.dot_dimension_numbers<[1], [0], [0], [1], [0, 0, 1, 1], [], []>} : vector<2x32xbf16>, vector<32x8xbf16>, vector<2x8xf32> -> vector<2x8xf32>
      %1349 = vector.broadcast %345 : vector<1x8xf32> to vector<2x8xf32>
      %1350 = arith.addf %1348, %1349 : vector<2x8xf32>
      %cst_435 = arith.constant 6.000000e+00 : f32
      %1351 = arith.divf %417, %cst_435 : f32
      %cst_436 = arith.constant 2.000000e+00 : f32
      %1352 = vector.broadcast %cst_436 : f32 to vector<2x8xf32>
      %1353 = arith.mulf %1352, %1295 : vector<2x8xf32>
      %1354 = arith.addf %1267, %1353 : vector<2x8xf32>
      %cst_437 = arith.constant 2.000000e+00 : f32
      %1355 = vector.broadcast %cst_437 : f32 to vector<2x8xf32>
      %1356 = arith.mulf %1355, %1323 : vector<2x8xf32>
      %1357 = arith.addf %1354, %1356 : vector<2x8xf32>
      %1358 = arith.addf %1357, %1350 : vector<2x8xf32>
      %1359 = vector.broadcast %1351 : f32 to vector<2x8xf32>
      %1360 = arith.mulf %1359, %1358 : vector<2x8xf32>
      %1361 = arith.addf %1243, %1360 : vector<2x8xf32>
      %c1_i32_438 = arith.constant 1 : i32
      %1362 = arith.addi %arg9, %c1_i32_438 : i32
      %1363 = arith.index_cast %1362 : i32 to index
      %c0_439 = arith.constant 0 : index
      %c0_440 = arith.constant 0 : index
      %1364 = vector.load %arg8[%1363, %c0_439, %c0_440] : memref<8x2x8xf32, #tpu.memory_space<vmem>>, vector<1x2x8xf32>
      %1365 = vector.shape_cast %1364 : vector<1x2x8xf32> to vector<2x8xf32>
      %1366 = vector.shape_cast %1361 : vector<2x8xf32> to vector<1x2x8xf32>
      tpu.vector_store %arg8[%1363, %c0_439, %c0_440], %1366 {strides = array<i32>} : memref<8x2x8xf32, #tpu.memory_space<vmem>>, vector<1x2x8xf32>,
      scf.yield %1361 : vector<2x8xf32>
    }
    %c7_i32_127 = arith.constant 7 : i32
    %c0_128 = arith.constant 0 : index
    %c0_129 = arith.constant 0 : index
    %c0_130 = arith.constant 0 : index
    %351 = vector.load %arg8[%c0_128, %c0_129, %c0_130] : memref<8x2x8xf32, #tpu.memory_space<vmem>>, vector<1x2x8xf32>
    %352 = vector.shape_cast %351 : vector<1x2x8xf32> to vector<2x8xf32>
    %c1 = arith.constant 1 : index
    %c0_131 = arith.constant 0 : index
    %c0_132 = arith.constant 0 : index
    %353 = vector.load %arg8[%c1, %c0_131, %c0_132] : memref<8x2x8xf32, #tpu.memory_space<vmem>>, vector<1x2x8xf32>
    %354 = vector.shape_cast %353 : vector<1x2x8xf32> to vector<2x8xf32>
    %c2 = arith.constant 2 : index
    %c0_133 = arith.constant 0 : index
    %c0_134 = arith.constant 0 : index
    %355 = vector.load %arg8[%c2, %c0_133, %c0_134] : memref<8x2x8xf32, #tpu.memory_space<vmem>>, vector<1x2x8xf32>
    %356 = vector.shape_cast %355 : vector<1x2x8xf32> to vector<2x8xf32>
    %c3 = arith.constant 3 : index
    %c0_135 = arith.constant 0 : index
    %c0_136 = arith.constant 0 : index
    %357 = vector.load %arg8[%c3, %c0_135, %c0_136] : memref<8x2x8xf32, #tpu.memory_space<vmem>>, vector<1x2x8xf32>
    %358 = vector.shape_cast %357 : vector<1x2x8xf32> to vector<2x8xf32>
    %c4 = arith.constant 4 : index
    %c0_137 = arith.constant 0 : index
    %c0_138 = arith.constant 0 : index
    %359 = vector.load %arg8[%c4, %c0_137, %c0_138] : memref<8x2x8xf32, #tpu.memory_space<vmem>>, vector<1x2x8xf32>
    %360 = vector.shape_cast %359 : vector<1x2x8xf32> to vector<2x8xf32>
    %c5 = arith.constant 5 : index
    %c0_139 = arith.constant 0 : index
    %c0_140 = arith.constant 0 : index
    %361 = vector.load %arg8[%c5, %c0_139, %c0_140] : memref<8x2x8xf32, #tpu.memory_space<vmem>>, vector<1x2x8xf32>
    %362 = vector.shape_cast %361 : vector<1x2x8xf32> to vector<2x8xf32>
    %c6 = arith.constant 6 : index
    %c0_141 = arith.constant 0 : index
    %c0_142 = arith.constant 0 : index
    %363 = vector.load %arg8[%c6, %c0_141, %c0_142] : memref<8x2x8xf32, #tpu.memory_space<vmem>>, vector<1x2x8xf32>
    %364 = vector.shape_cast %363 : vector<1x2x8xf32> to vector<2x8xf32>
    %c7 = arith.constant 7 : index
    %c0_143 = arith.constant 0 : index
    %c0_144 = arith.constant 0 : index
    %365 = vector.load %arg8[%c7, %c0_143, %c0_144] : memref<8x2x8xf32, #tpu.memory_space<vmem>>, vector<1x2x8xf32>
    %366 = vector.shape_cast %365 : vector<1x2x8xf32> to vector<2x8xf32>
    %367 = tpu.concatenate %352, %354, %356, %358, %360, %362, %364, %366 in 0 : vector<2x8xf32>, vector<2x8xf32>, vector<2x8xf32>, vector<2x8xf32>, vector<2x8xf32>, vector<2x8xf32>, vector<2x8xf32>, vector<2x8xf32> -> vector<16x8xf32>
    %c0_145 = arith.constant 0 : index
    %c0_146 = arith.constant 0 : index
    %368 = vector.load %arg4[%c0_145, %c0_146] : memref<32x16xf32, #tpu.memory_space<vmem>>, vector<32x16xf32>
    %cst_147 = arith.constant dense<0.000000e+00> : vector<32x8xf32>
    %369 = tpu.matmul %368, %367, %cst_147 {dimension_numbers = #tpu.dot_dimension_numbers<[1], [0], [0], [1], [0, 0, 1, 1], [], []>} : vector<32x16xf32>, vector<16x8xf32>, vector<32x8xf32> -> vector<32x8xf32>
    %c792 = arith.constant 792 : index
    %c0_148 = arith.constant 0 : index
    %370 = vector.load %arg5[%c792, %c0_148] : memref<848x128xf32, #tpu.memory_space<vmem>>, vector<8x32xf32>
    %cst_149 = arith.constant dense<0.000000e+00> : vector<32x32xf32>
    %371 = tpu.matmul %369, %370, %cst_149 {dimension_numbers = #tpu.dot_dimension_numbers<[1], [0], [0], [1], [0, 0, 1, 1], [], []>} : vector<32x8xf32>, vector<8x32xf32>, vector<32x32xf32> -> vector<32x32xf32>
    %c800 = arith.constant 800 : index
    %c0_150 = arith.constant 0 : index
    %372 = vector.load %arg5[%c800, %c0_150] : memref<848x128xf32, #tpu.memory_space<vmem>>, vector<1x32xf32>
    %373 = vector.broadcast %372 : vector<1x32xf32> to vector<32x32xf32>
    %374 = arith.addf %371, %373 : vector<32x32xf32>
    %cst_151 = arith.constant 0.000000e+00 : f32
    %375 = vector.broadcast %cst_151 : f32 to vector<32x32xf32>
    %376 = arith.maximumf %374, %375 : vector<32x32xf32>
    %c808 = arith.constant 808 : index
    %c0_152 = arith.constant 0 : index
    %377 = vector.load %arg5[%c808, %c0_152] : memref<848x128xf32, #tpu.memory_space<vmem>>, vector<32x128xf32>
    %cst_153 = arith.constant dense<0.000000e+00> : vector<32x128xf32>
    %378 = tpu.matmul %376, %377, %cst_153 {dimension_numbers = #tpu.dot_dimension_numbers<[1], [0], [0], [1], [0, 0, 1, 1], [], []>} : vector<32x32xf32>, vector<32x128xf32>, vector<32x128xf32> -> vector<32x128xf32>
    %c840 = arith.constant 840 : index
    %c0_154 = arith.constant 0 : index
    %379 = vector.load %arg5[%c840, %c0_154] : memref<848x128xf32, #tpu.memory_space<vmem>>, vector<1x128xf32>
    %380 = vector.broadcast %379 : vector<1x128xf32> to vector<32x128xf32>
    %381 = arith.addf %378, %380 : vector<32x128xf32>
    %382 = vector.shape_cast %381 : vector<32x128xf32> to vector<2x16x128xf32>
    %c0_155 = arith.constant 0 : index
    %c0_156 = arith.constant 0 : index
    %c0_157 = arith.constant 0 : index
    %383 = vector.load %arg6[%c0_155, %c0_156, %c0_157] : memref<2x16x128xf32, #tpu.memory_space<vmem>>, vector<2x16x128xf32>
    tpu.vector_store %arg6[%c0_155, %c0_156, %c0_157], %382 {strides = array<i32>} : memref<2x16x128xf32, #tpu.memory_space<vmem>>, vector<2x16x128xf32>,
    %c0_158 = arith.constant 0 : index
    %c0_159 = arith.constant 0 : index
    %c0_160 = arith.constant 0 : index
    %384 = vector.load %arg2[%c0_158, %c0_159, %c0_160] : memref<2x16x4xf32, #tpu.memory_space<vmem>>, vector<2x16x4xf32>
    %385 = vector.extract_strided_slice %382 {offsets = [0, 0, 0], sizes = [2, 16, 4], strides = [1, 1, 1]} : vector<2x16x128xf32> to vector<2x16x4xf32>
    %386 = arith.subf %384, %385 : vector<2x16x4xf32>
    %387 = arith.mulf %386, %386 : vector<2x16x4xf32>
    %388 = vector.shape_cast %387 : vector<2x16x4xf32> to vector<1x2x16x4xf32>
    %cst_161 = arith.constant dense<0.000000e+00> : vector<1xf32>
    %389 = vector.multi_reduction <add>, %388, %cst_161 [1, 2, 3] : vector<1x2x16x4xf32> to vector<1xf32>
    %390 = vector.shape_cast %389 : vector<1xf32> to vector<1x1x1x1xf32>
    %391 = vector.extract %390[0, 0, 0, 0] : f32 from vector<1x1x1x1xf32>
    %cst_162 = arith.constant 1.000000e+02 : f32
    %392 = arith.mulf %cst_162, %391 : f32
    %cst_163 = arith.constant -354.213531 : f32
    %393 = arith.addf %cst_163, %392 : f32
    %cst_164 = arith.constant 5.000000e-01 : f32
    %394 = arith.mulf %cst_164, %393 : f32
    %cst_165 = arith.constant 0.000000e+00 : f32
    %395 = vector.broadcast %cst_165 : f32 to vector<2x8xf32>
    %396 = arith.subf %395, %330 : vector<2x8xf32>
    %397 = math.exp %330 : vector<2x8xf32>
    %398 = arith.mulf %329, %329 : vector<2x8xf32>
    %399 = arith.addf %397, %398 : vector<2x8xf32>
    %cst_166 = arith.constant 5.000000e-01 : f32
    %400 = vector.broadcast %cst_166 : f32 to vector<2x8xf32>
    %401 = arith.mulf %399, %400 : vector<2x8xf32>
    %402 = arith.addf %396, %401 : vector<2x8xf32>
    %cst_167 = arith.constant 5.000000e-01 : f32
    %403 = vector.broadcast %cst_167 : f32 to vector<2x8xf32>
    %404 = arith.subf %402, %403 : vector<2x8xf32>
    %405 = vector.shape_cast %404 : vector<2x8xf32> to vector<1x2x8xf32>
    %cst_168 = arith.constant dense<0.000000e+00> : vector<1xf32>
    %406 = vector.multi_reduction <add>, %405, %cst_168 [1, 2] : vector<1x2x8xf32> to vector<1xf32>
    %407 = vector.shape_cast %406 : vector<1xf32> to vector<1x1x1xf32>
    %408 = vector.extract %407[0, 0, 0] : f32 from vector<1x1x1xf32>
    %409 = arith.addf %394, %408 : f32
    %cst_169 = arith.constant 2.000000e+00 : f32
    %410 = arith.divf %409, %cst_169 : f32
    %cst_170 = arith.constant 1.000000e+00 : f32
    %411 = vector.broadcast %cst_170 : f32 to vector<1x128xf32>
    %412 = vector.broadcast %410 : f32 to vector<1x128xf32>
    %413 = arith.mulf %412, %411 : vector<1x128xf32>
    %c0_171 = arith.constant 0 : index
    %c0_172 = arith.constant 0 : index
    %414 = vector.load %arg7[%c0_171, %c0_172] : memref<1x128xf32, #tpu.memory_space<vmem>>, vector<1x128xf32>
    tpu.vector_store %arg7[%c0_171, %c0_172], %413 {strides = array<i32>} : memref<1x128xf32, #tpu.memory_space<vmem>>, vector<1x128xf32>,
    return
  }
  func.func @transform_0(%arg0: i32, %arg1: memref<7xf32, #tpu.memory_space<smem>>) -> (i32, i32, i32) {
    %c0_i32 = arith.constant 0 : i32
    %c0_i32_0 = arith.constant 0 : i32
    %c0_i32_1 = arith.constant 0 : i32
    %c0_i32_2 = arith.constant 0 : i32
    return %c0_i32, %c0_i32_0, %c0_i32_1 : i32, i32, i32
  }
  func.func @transform_1(%arg0: i32, %arg1: memref<7xf32, #tpu.memory_space<smem>>) -> (i32, i32) {
    %c0_i32 = arith.constant 0 : i32
    %c0_i32_0 = arith.constant 0 : i32
    %c0_i32_1 = arith.constant 0 : i32
    return %c0_i32, %c0_i32_0 : i32, i32
  }
  func.func @transform_2(%arg0: i32, %arg1: memref<7xf32, #tpu.memory_space<smem>>) -> (i32, i32) {
    %c0_i32 = arith.constant 0 : i32
    %c0_i32_0 = arith.constant 0 : i32
    %c0_i32_1 = arith.constant 0 : i32
    return %c0_i32, %c0_i32_0 : i32, i32
  }
  func.func @transform_3(%arg0: i32, %arg1: memref<7xf32, #tpu.memory_space<smem>>) -> (i32, i32) {
    %c0_i32 = arith.constant 0 : i32
    %c0_i32_0 = arith.constant 0 : i32
    %c0_i32_1 = arith.constant 0 : i32
    return %c0_i32, %c0_i32_0 : i32, i32
  }
  func.func @transform_4(%arg0: i32, %arg1: memref<7xf32, #tpu.memory_space<smem>>) -> (i32, i32, i32) {
    %c0_i32 = arith.constant 0 : i32
    %c0_i32_0 = arith.constant 0 : i32
    %c0_i32_1 = arith.constant 0 : i32
    %c0_i32_2 = arith.constant 0 : i32
    return %c0_i32, %c0_i32_0, %c0_i32_1 : i32, i32, i32
  }
  func.func @transform_5(%arg0: i32, %arg1: memref<7xf32, #tpu.memory_space<smem>>) -> (i32, i32) {
    %c0_i32 = arith.constant 0 : i32
    %c0_i32_0 = arith.constant 0 : i32
    %c0_i32_1 = arith.constant 0 : i32
    return %c0_i32, %c0_i32_0 : i32, i32
  }
}

</mosaic_0001>

<bundles_post_ra>
// kernel: tpu_custom_call.1
= control target key start
LH: loop header
LB: loop body
LE: loop exit
PB: predicated region body
PF: predicated region fallthrough
CT: control target
= control target key end

     0   :  { %s4963_s24 = smov [#allocation4]   ;;  %s5923_s0 = inlined_call_operand.vmem [shape: f32[7], index: 0, kind: input, shape index: {}]   ;;  %s5924_s1 = inlined_call_operand.vmem [shape: f32[2,16,4], index: 1, kind: input, shape index: {}]   ;;  %s5925_s2 = inlined_call_operand.vmem [shape: f32[2,8], index: 2, kind: input, shape index: {}]   ;;  %s5926_s3 = inlined_call_operand.vmem [shape: f32[32,16], index: 3, kind: input, shape index: {}]   ;;  %s5927_s4 = inlined_call_operand.hbm [shape: f32[848,128], index: 4, kind: input, shape index: {}]   ;;  %s5928_s5 = inlined_call_operand.hbm [shape: f32[2,16,128], index: 5, kind: output, shape index: {0}]   ;;  %s5929_s6 = inlined_call_operand.hbm [shape: f32[1,128], index: 6, kind: output, shape index: {1}]  }
   0x1   :  { %s13_s23 = sshll.u32 %s5923_s0, 4  ;;  %s14_s23 = int_to_ptr.vmem [resolvable:$true] %s13_s23 }
   0x2   :  { %16 = dma.vmem_to_smem %s14_s23, 16, %s4963_s24, [#allocation3] }
   0x3   :  { %4947 = dma.done.wait [#allocation3], 16 }
   0x4   :  { %4948 = vsyncadd [#allocation3], 4294967280 }
   0x5   :  { %19 = sfence }
   0x6   :  { %20 = vsyncpa [#allocation6], 0 }
   0x7   :  { %21 = vsyncpa [#allocation7], 0 }
   0x8   :  { %22 = vsyncpa [#allocation10], 0  ;;  %s33_s27 = sshll.u32 %s5927_s4, 4  ;;  %s4964_s28 = smov [#allocation5]   ;;  %s34_s27 = int_to_ptr.hbm [resolvable:$true] %s33_s27 }
   0x9   :  { %s35_s29 = sshll.u32 %s4964_s28, 4  ;;  %s4965_s30 = smov 128   ;;  %s36_s29 = int_to_ptr.vmem [resolvable:$true] %s35_s29 }
   0xa   :  { %s4966_s7 = smov 8  }
   0xb   :  { %41 = dma.hbm_to_vmem [thread:$0]  %s34_s27, 13568, %s36_s29, [#allocation6], %s4965_s30, %s4965_s30, %s4966_s7  }
   0xc   :  { %4949 = dma.done.wait [#allocation6], 13568  }
   0xd   :  { %4950 = vsyncadd [#allocation6], 4294953728  ;;  %v5027_v0 = vld [vmem:[#allocation5 + $0x2b8] sm:$0xff]  ;;  %v1889_v1 = vld [vmem:[#allocation5 + $0x2c8] sm:$0xff]  ;;  %vm59_vm0 = vcmask 1043456   ;;  %vm52_vm1 = vcmask 31744  }
   0xe   :  { %v1890_v2 = vld [vmem:[#allocation5 + $0x2d0] sm:$0xff]  ;;  %v1888_v3 = vpack.c.bf16 %v5027_v0, %v5027_v0  ;;  %v1891_v4 = vld [vmem:[#allocation5 + $0x2d8] sm:$0xff]  ;;  %v1892_v5 = vld [vmem:[#allocation5 + $0x2e0] sm:$0xff]  ;;  %vm95_vm2 = vcmask 261120   ;;  %s4967_s10 = smov 88   ;;  %s4968_s11 = smov 96  }
   0xf   :  { %v5031_v6 = vpack.c.bf16 %v1890_v2, %v1889_v1  ;;  %v1895_v7 = vld [vmem:[#allocation5 + $0x2f0] sm:$0xff]  ;;  %v5033_v8 = vpack.c.bf16 %v1892_v5, %v1891_v4  ;;  %v1896_v9 = vld [vmem:[#allocation5 + $0x2f8] sm:$0xff]  ;;  %v1897_v10 = vld [vmem:[#allocation5 + $0x300] sm:$0xff]  ;;  %s4969_s12 = smov 120   ;;  %s4970_s13 = smov 64   ;;  %vm130_vm3 = vcmask 64512  }
  0x10   :  { %v1898_v11 = vld [vmem:[#allocation5 + $0x308] sm:$0xff]  ;;  %v5035_v12 = vpack.c.bf16 %v1896_v9, %v1895_v7  ;;  %v5039_v14 = vld [vmem:[#allocation5 + $0x2c0] sm:$0x1]  ;;  %v5043_v16 = vld [vmem:[#allocation5 + $0x310] sm:$0x1]  ;;  %s4971_s14 = smov 56  }
  0x11   :  { %v5037_v13 = vpack.c.bf16 %v1898_v11, %v1897_v10  ;;  %v5041_v15 = vld [vmem:[#allocation5 + $0x2e8] sm:$0x1]  ;;  %v49_v17 = vld [vmem:[#allocation5] sm:$0xf]  ;;  %v47_v18 = vld [vmem:[%s5924_s1] sm:$0xff]  ;;  %s4972_s15 = smov 80  }
  0x12   :  { %v48_v19 = vld [vmem:[%s5924_s1 + $0x10] sm:$0xff]  ;;  %4295 = vmatpush.msk.msra.mxu2 %vm59_vm0, %v49_v17  ;;  %4546 = vmatpush.msk.msra.mxu3 %vm59_vm0, %v49_v17  ;;  %v92_v20 = vld [vmem:[#allocation5 + $0x68] sm:$0xff]  ;;  %v90_v22 = vld [vmem:[#allocation5 + $0x58] sm:$0xff]  ;;  %s4973_s16 = smov 112   ;;  %s4974_s17 = smov 48  }
  0x13   :  { %4296 = vmatmul.msk.f32.vlgmr.msra.gmra.mxu2 %vm52_vm1, %v47_v18  ;;  %4297 = vmatmul.msk.f32.vlgmr.msra.gmra.mxu3 %vm52_vm1, %v48_v19  ;;  %v91_v21 = vld [vmem:[#allocation5 + $0x60] sm:$0xff]  ;;  %v89_v23 = vld [vmem:[#allocation5 + $0x50] sm:$0xff]  ;;  %v4617_v24 = vld [vmem:[#allocation5 + $0x8] ss:$0 sm:$0xff]  ;;  %s4975_s18 = smov 72   ;;  %s4976_s19 = smov 104  }
  0x14   :  { %114 = vmatpush.msra.mxu1 %v92_v20  ;;  %v86_v26 = vld [vmem:[#allocation5 + $0x10] sm:$0xff]  ;;  %s4977_s20 = smov 40   ;;  %s5351_s23 = smov 0  }
  0x15   :  { %v4618_v32 = vld [vmem:[#allocation5 + $0x70] ss:$0 sm:$0xff] }
  0x16   :  { %115 = vmatpush.msra.mxu1 %v91_v21 }
  0x18   :  { %116 = vmatpush.msra.mxu1 %v90_v22 }
  0x1a   :  { %117 = vmatpush.msra.mxu1 %v89_v23 }
  0x96   :  { %v80_v25 = vpop.f32.mrf.mxu2  ;;  %v83_v28 = vpop.f32.mrf.mxu3 }
  0x97   :  { %v81_v27 = vadd.f32 %v4617_v24, %v80_v25  ;;  %v84_v30 = vadd.f32 %v4617_v24, %v83_v28  ;;  %v258_v28 = vld [vmem:[#allocation5 + $0x78] sm:$0xff] }
  0x99   :  { %v5055_v29 = vadd.f32 %v86_v26, %v81_v27  ;;  %v5059_v31 = vadd.f32 %v86_v26, %v84_v30  ;;  %v389_v30 = vld [vmem:[#allocation5 + $0x80] sm:$0xff] }
  0x9b   :  { %4298 = vmatmul.msk.f32.vlgmr.msra.gmra.mxu1 %vm95_vm2, %v5055_v29 }
  0xa3   :  { %4299 = vmatmul.msk.f32.gmra.mxu1 %vm95_vm2, %v5059_v31 }
 0x118   :  { %v119_v33 = vpop.f32.mrf.mxu1 }
 0x119   :  { %v5063_v34 = vadd.f32 %v4618_v32, %v119_v33 }
 0x11b   :  { %261 = vrot.lane.b32.xlu1 %v5063_v34, %s4967_s10  ;;  %v5070_v37 = vmul.f32 0.35355338, %v5063_v34 }
 0x120   :  { %v122_v35 = vpop.f32.mrf.mxu1 }
 0x121   :  { %v5067_v36 = vadd.f32 %v4618_v32, %v122_v35 }
 0x123   :  { %157 = vrot.lane.b32.xlu0 %v5067_v36, %s4968_s11  ;;  %259 = vrot.lane.b32.xlu1 %v5070_v37, %s4969_s12  ;;  %v4597_v38 = vpack.i.bf16 %v5063_v34, %v5067_v36  ;;  %v5085_v44 = vmul.f32 0.35355338, %v5067_v36 }
 0x125   :  { %4598 = vrot.lane.b32.xlu2 %v4597_v38, %s4970_s13 }
 0x12b   :  { %128 = vrot.lane.b32.xlu0 %v5063_v34, %s4968_s11 }
 0x17f   :  { %v4599_v40 = vpop.permute.xlu2 %4598 }
 0x180   :  { %v4600_v41 = vunpack.i.l.bf16 %v4599_v40  ;;  %v4601_v45 = vunpack.i.h.bf16 %v4599_v40 }
 0x18d   :  { %v262_v39 = vpop.permute.xlu1 %261 }
 0x18e   :  { %4306 = vmatpush.xpose.msk.msra.mxu0 %vm130_vm3, %v262_v39 }
 0x192   :  { %411 = vmatpush.msrb.mxu0 %v389_v30 }
 0x195   :  { %v158_v42 = vpop.permute.xlu0 %157  ;;  %v260_v43 = vpop.permute.xlu1 %259 }
 0x196   :  { %4302 = vmatpush.xpose.msk.msrb.mxu3 %vm130_vm3, %v158_v42  ;;  %4307 = vmatmul.msk.f32.vlgmr.msra.gmra.mxu0 %vm130_vm3, %v260_v43 }
 0x199   :  { %4303 = vmatmul.msk.f32.vlgmr.msrb.gmra.mxu3 %vm130_vm3, %v5085_v44 }
 0x19a   :  { %253 = vmatpush.msra.mxu3 %v4600_v41 }
 0x19d   :  { %v129_v46 = vpop.permute.xlu0 %128 }
 0x19e   :  { %4300 = vmatpush.xpose.msk.msrb.mxu2 %vm130_vm3, %v129_v46 }
 0x1a1   :  { %4301 = vmatmul.msk.f32.vlgmr.msrb.gmra.mxu2 %vm130_vm3, %v5070_v37 }
 0x1a2   :  { %227 = vmatpush.msra.mxu2 %v4601_v45 }
 0x213   :  { %v284_v47 = vpop.f32.mrf.mxu0 }
 0x214   :  { %v315_v48 = vsel %vm130_vm3, %v284_v47, -inf }
 0x215   :  { %316 = vmax.xlane.f32.xlu0 %v315_v48 }
 0x21c   :  { %v181_v51 = vpop.f32.mrf.mxu3 }
 0x21d   :  { %v187_v52 = vsel %vm130_vm3, %v181_v51, -inf }
 0x224   :  { %v153_v49 = vpop.f32.mrf.mxu2 }
 0x225   :  { %v184_v50 = vsel %vm130_vm3, %v153_v49, -inf }
 0x226   :  { %185 = vmax.xlane.f32.xlu2 %v184_v50 }
 0x229   :  { %289 = vrot.lane.b32.xlu0 %v5067_v36, %s4967_s10 }
 0x22e   :  { %188 = vmax.xlane.f32.xlu2 %v187_v52 }
 0x246   :  { %337 = vrot.lane.b32.xlu2 %v5063_v34, %s4971_s14 }
 0x288   :  { %v317_v53 = vpop.xlane.xlu0 %316 }
 0x289   :  { %v321_v54 = vsub.f32 %v284_v47, %v317_v53 }
 0x28b   :  { %v323_v55 = vmul.f32 1.442695, %v321_v54 }
 0x28d   :  { %4635 = vpow2.f32 %v323_v55 }
 0x293   :  { %v4636_v56 = vpop.eup %4635 }
 0x294   :  { %v327_v57 = vsel %vm130_vm3, %v4636_v56, 0.0 }
 0x295   :  { %328 = vadd.xlane.f32.xlu2 %v327_v57 }
 0x299   :  { %v186_v58 = vpop.xlane.xlu2 %185 }
 0x29a   :  { %v190_v59 = vsub.f32 %v153_v49, %v186_v58 }
 0x29b   :  { %v290_v60 = vpop.permute.xlu0 %289 }
 0x29c   :  { %v192_v61 = vmul.f32 1.442695, %v190_v59  ;;  %4308 = vmatpush.xpose.msk.msrb.mxu2 %vm130_vm3, %v290_v60 }
 0x29e   :  { %4637 = vpow2.f32 %v192_v61 }
 0x2a1   :  { %v189_v62 = vpop.xlane.xlu2 %188 }
 0x2a2   :  { %v191_v63 = vsub.f32 %v181_v51, %v189_v62 }
 0x2a4   :  { %v4638_v1 = vpop.eup %4637  ;;  %v194_v2 = vmul.f32 1.442695, %v191_v63 }
 0x2a5   :  { %v196_v4 = vsel %vm130_vm3, %v4638_v1, 0.0 }
 0x2a6   :  { %4639 = vpow2.f32 %v194_v2  ;;  %197 = vadd.xlane.f32.xlu2 %v196_v4 }
 0x2a9   :  { %v338_v5 = vpop.permute.xlu2 %337 }
 0x2aa   :  { %358 = vmatpush.msrb.mxu3 %v338_v5 }
 0x2ac   :  { %v4640_v7 = vpop.eup %4639 }
 0x2ad   :  { %v199_v9 = vsel %vm130_vm3, %v4640_v7, 0.0 }
 0x2ae   :  { %200 = vadd.xlane.f32.xlu1 %v199_v9 }
 0x2be   :  { %450 = vrot.lane.b32.xlu2 %v5063_v34, %s4972_s15 }
 0x2c6   :  { %448 = vrot.lane.b32.xlu2 %v5070_v37, %s4973_s16 }
 0x2c7   :  { %287 = vrot.lane.b32.xlu1 %v5085_v44, %s4969_s12 }
 0x2cf   :  { %526 = vrot.lane.b32.xlu1 %v5063_v34, %s4974_s17 }
 0x308   :  { %v329_v10 = vpop.xlane.xlu2 %328 }
 0x319   :  { %v198_v11 = vpop.xlane.xlu2 %197 }
 0x31a   :  { %4641 = vrcp.f32 %v198_v11 }
 0x320   :  { %v4642_v17 = vpop.eup %4641 }
 0x321   :  { %v204_v18 = vmul.f32 %v4642_v17, %v4638_v1  ;;  %v201_v19 = vpop.xlane.xlu1 %200  ;;  %v451_v22 = vpop.permute.xlu2 %450 }
 0x322   :  { %4643 = vrcp.f32 %v201_v19 }
 0x323   :  { %4304 = vmatmul.msk.f32.vlgmr.msra.gmra.mxu2 %vm130_vm3, %v204_v18  ;;  %4645 = vrcp.f32 %v329_v10 }
 0x324   :  { %440 = vmatpush.msra.mxu2 %v258_v28 }
 0x328   :  { %v4644_v20 = vpop.eup %4643 }
 0x329   :  { %v205_v21 = vmul.f32 %v4644_v20, %v4640_v7  ;;  %v4646_v23 = vpop.eup %4645  ;;  %v449_v26 = vpop.permute.xlu2 %448  ;;  %v578_v7 = vld [vmem:[#allocation5 + $0x88] sm:$0xff] }
 0x32a   :  { %v335_v24 = vmul.f32 %v4646_v23, %v4636_v56  ;;  %600 = vmatpush.msra.mxu0 %v578_v7 }
 0x32b   :  { %4305 = vmatmul.msk.f32.vlgmr.msra.gmra.mxu3 %vm130_vm3, %v205_v21 }
 0x32c   :  { %4316 = vmatpush.xpose.msk.msra.mxu3 %vm130_vm3, %v451_v22 }
 0x333   :  { %4310 = vmatmul.msk.f32.vlgmr.msrb.gmra.mxu3 %vm130_vm3, %v335_v24 }
 0x339   :  { %v288_v25 = vpop.permute.xlu1 %287 }
 0x33a   :  { %4309 = vmatmul.msk.f32.vlgmr.msrb.gmra.mxu2 %vm130_vm3, %v288_v25  ;;  %v4602_v25 = vpack.i.bf16 %v5067_v36, %v5063_v34 }
 0x33b   :  { %4317 = vmatmul.msk.f32.vlgmr.msra.gmra.mxu3 %vm130_vm3, %v449_v26 }
 0x341   :  { %v527_v27 = vpop.permute.xlu1 %526 }
 0x342   :  { %547 = vmatpush.msrb.mxu3 %v527_v27 }
 0x3a6   :  { %v229_v32 = vpop.f32.mrf.mxu2 }
 0x3a7   :  { %4314 = vmatmul.msk.f32.vlgmr.msra.gmra.mxu2 %vm130_vm3, %v229_v32 }
 0x3ae   :  { %v255_v33 = vpop.f32.mrf.mxu3 }
 0x3af   :  { %4315 = vmatmul.msk.f32.gmra.mxu2 %vm130_vm3, %v255_v33 }
 0x3b6   :  { %v360_v35 = vpop.f32.mrf.mxu3 }
 0x3b7   :  { %4312 = vmatmul.msk.f32.vlgmr.msrb.gmra.mxu0 %vm130_vm3, %v360_v35 }
 0x3bd   :  { %v312_v38 = vpop.f32.mrf.mxu2 }
 0x3be   :  { %v473_v39 = vpop.f32.mrf.mxu3  ;;  %v318_v40 = vsel %vm130_vm3, %v312_v38, -inf }
 0x3bf   :  { %319 = vmax.xlane.f32.xlu0 %v318_v40  ;;  %v504_v41 = vsel %vm130_vm3, %v473_v39, -inf }
 0x3c0   :  { %505 = vmax.xlane.f32.xlu2 %v504_v41 }
 0x3d3   :  { %478 = vrot.lane.b32.xlu0 %v5067_v36, %s4972_s15 }
 0x3d8   :  { %363 = vrot.lane.b32.xlu2 %v5067_v36, %s4971_s14 }
 0x3db   :  { %476 = vrot.lane.b32.xlu0 %v5085_v44, %s4973_s16 }
 0x3e0   :  { %612 = vrot.lane.b32.xlu2 %v5063_v34, %s4975_s18 }
 0x3e8   :  { %610 = vrot.lane.b32.xlu2 %v5070_v37, %s4976_s19 }
 0x42a   :  { %v5142_v63 = vpop.f32.mrf.mxu2 }
 0x432   :  { %v320_v42 = vpop.xlane.xlu0 %319 }
 0x433   :  { %v322_v43 = vsub.f32 %v312_v38, %v320_v42  ;;  %v506_v45 = vpop.xlane.xlu2 %505 }
 0x434   :  { %v510_v46 = vsub.f32 %v473_v39, %v506_v45 }
 0x435   :  { %v325_v47 = vmul.f32 1.442695, %v322_v43 }
 0x436   :  { %v512_v48 = vmul.f32 1.442695, %v510_v46 }
 0x437   :  { %4647 = vpow2.f32 %v325_v47 }
 0x438   :  { %4649 = vpow2.f32 %v512_v48 }
 0x43b   :  { %v364_v49 = vpop.permute.xlu2 %363 }
 0x43c   :  { %384 = vmatpush.msrb.mxu1 %v364_v49 }
 0x43d   :  { %v4648_v50 = vpop.eup %4647 }
 0x43e   :  { %v4650_v51 = vpop.eup %4649  ;;  %v330_v52 = vsel %vm130_vm3, %v4648_v50, 0.0 }
 0x43f   :  { %331 = vadd.xlane.f32.xlu1 %v330_v52  ;;  %v516_v53 = vsel %vm130_vm3, %v4650_v51, 0.0 }
 0x440   :  { %517 = vadd.xlane.f32.xlu0 %v516_v53  ;;  %v740_v53 = vld [vmem:[#allocation5 + $0x90] sm:$0xff] }
 0x443   :  { %v613_v54 = vpop.permute.xlu2 %612 }
 0x444   :  { %4324 = vmatpush.xpose.msk.msrb.mxu2 %vm130_vm3, %v613_v54 }
 0x445   :  { %v479_v37 = vpop.permute.xlu0 %478 }
 0x446   :  { %4318 = vmatpush.xpose.msk.msra.mxu1 %vm130_vm3, %v479_v37 }
 0x44b   :  { %v611_v55 = vpop.permute.xlu2 %610 }
 0x44c   :  { %4325 = vmatmul.msk.f32.vlgmr.msrb.gmra.mxu2 %vm130_vm3, %v611_v55 }
 0x44d   :  { %v477_v56 = vpop.permute.xlu0 %476 }
 0x454   :  { %638 = vrot.lane.b32.xlu0 %v5085_v44, %s4976_s19  ;;  %v5146_v44 = vpop.f32.mrf.mxu2 }
 0x458   :  { %640 = vrot.lane.b32.xlu1 %v5067_v36, %s4975_s18 }
 0x4b2   :  { %v332_v57 = vpop.xlane.xlu1 %331 }
 0x4b3   :  { %4651 = vrcp.f32 %v332_v57  ;;  %v518_v58 = vpop.xlane.xlu0 %517 }
 0x4b4   :  { %4653 = vrcp.f32 %v518_v58 }
 0x4b9   :  { %v4652_v59 = vpop.eup %4651 }
 0x4ba   :  { %v4654_v60 = vpop.eup %4653  ;;  %v336_v61 = vmul.f32 %v4652_v59, %v4648_v50 }
 0x4bb   :  { %v524_v62 = vmul.f32 %v4654_v60, %v4650_v51 }
 0x4bc   :  { %4311 = vmatmul.msk.f32.vlgmr.msrb.gmra.mxu1 %vm130_vm3, %v336_v61 }
 0x4bd   :  { %4320 = vmatmul.msk.f32.vlgmr.msrb.gmra.mxu3 %vm130_vm3, %v524_v62 }
 0x4c4   :  { %4319 = vmatmul.msk.f32.vlgmr.msra.gmra.mxu1 %vm130_vm3, %v477_v56  ;;  %v413_v56 = vpop.f32.mrf.mxu0 }
 0x4c5   :  { %v443_v59 = vadd.f32 %v5142_v63, %v413_v56 }
 0x4c6   :  { %v639_v2 = vpop.permute.xlu0 %638 }
 0x4ca   :  { %v641_v1 = vpop.permute.xlu1 %640 }
 0x4cb   :  { %4326 = vmatpush.xpose.msk.msra.mxu3 %vm130_vm3, %v641_v1  ;;  %v4619_v1 = vld [vmem:[#allocation5 + $0x98] ss:$0 sm:$0xff] }
 0x4ce   :  { %4327 = vmatmul.msk.f32.vlgmr.msra.gmra.mxu3 %vm130_vm3, %v639_v2 }
 0x4cf   :  { %v635_v4 = vpop.f32.mrf.mxu2  ;;  %762 = vmatpush.msrb.mxu3 %v740_v53  ;;  %v886_v53 = vld [vmem:[#allocation5 + $0x138] sm:$0xff] }
 0x4d0   :  { %v666_v5 = vsel %vm130_vm3, %v635_v4, -inf }
 0x4d1   :  { %667 = vmax.xlane.f32.xlu2 %v666_v5 }
 0x539   :  { %v386_v9 = vpop.f32.mrf.mxu1 }
 0x53a   :  { %4313 = vmatmul.msk.f32.gmra.mxu0 %vm130_vm3, %v386_v9 }
 0x540   :  { %v549_v10 = vpop.f32.mrf.mxu3 }
 0x541   :  { %v501_v11 = vpop.f32.mrf.mxu1 }
 0x542   :  { %4322 = vmatmul.msk.f32.vlgmr.msra.gmra.mxu0 %vm130_vm3, %v549_v10  ;;  %v507_v17 = vsel %vm130_vm3, %v501_v11, -inf }
 0x543   :  { %508 = vmax.xlane.f32.xlu1 %v507_v17 }
 0x544   :  { %v668_v18 = vpop.xlane.xlu2 %667 }
 0x545   :  { %v672_v19 = vsub.f32 %v635_v4, %v668_v18 }
 0x547   :  { %v674_v20 = vmul.f32 1.442695, %v672_v19 }
 0x549   :  { %4655 = vpow2.f32 %v674_v20  ;;  %v4978_v20 = vmov 32.0  }
 0x54f   :  { %v4656_v21 = vpop.eup %4655 }
 0x550   :  { %v678_v22 = vsel %vm130_vm3, %v4656_v21, 0.0 }
 0x551   :  { %v663_v23 = vpop.f32.mrf.mxu3  ;;  %679 = vadd.xlane.f32.xlu2 %v678_v22 }
 0x552   :  { %v669_v24 = vsel %vm130_vm3, %v663_v23, -inf }
 0x553   :  { %670 = vmax.xlane.f32.xlu0 %v669_v24 }
 0x567   :  { %552 = vrot.lane.b32.xlu0 %v5067_v36, %s4974_s17 }
 0x569   :  { %4603 = vrot.lane.b32.xlu2 %v4602_v25, %s4977_s20 }
 0x5b6   :  { %v509_v26 = vpop.xlane.xlu1 %508 }
 0x5b7   :  { %v511_v27 = vsub.f32 %v501_v11, %v509_v26  ;;  %v416_v57 = vpop.f32.mrf.mxu0 }
 0x5b8   :  { %v446_v9 = vadd.f32 %v5146_v44, %v416_v57  ;;  %v884_v57 = vld [vmem:[#allocation5 + $0x128] sm:$0xff] }
 0x5b9   :  { %v514_v28 = vmul.f32 1.442695, %v511_v27 }
 0x5bb   :  { %4657 = vpow2.f32 %v514_v28 }
 0x5bf   :  { %v602_v58 = vpop.f32.mrf.mxu0 }
 0x5c0   :  { %v608_v60 = vadd.f32 %v602_v58, %v443_v59  ;;  %v4620_v59 = vld [vmem:[#allocation5 + $0xa0] ss:$0 sm:$0xff] }
 0x5c1   :  { %v4658_v30 = vpop.eup %4657 }
 0x5c2   :  { %v519_v32 = vsel %vm130_vm3, %v4658_v30, 0.0 }
 0x5c3   :  { %520 = vadd.xlane.f32.xlu1 %v519_v32 }
 0x5c4   :  { %v680_v33 = vpop.xlane.xlu2 %679 }
 0x5c6   :  { %v671_v35 = vpop.xlane.xlu0 %670 }
 0x5c7   :  { %v673_v38 = vsub.f32 %v663_v23, %v671_v35 }
 0x5c9   :  { %v676_v39 = vmul.f32 1.442695, %v673_v38 }
 0x5cb   :  { %4659 = vpow2.f32 %v676_v39  ;;  %v840_v39 = vld [vmem:[#allocation5 + $0xc8] sm:$0xff] }
 0x5cc   :  { %v4604_v40 = vpop.permute.xlu2 %4603 }
 0x5cd   :  { %v4606_v41 = vunpack.i.h.bf16 %v4604_v40  ;;  %v4605_v42 = vunpack.i.l.bf16 %v4604_v40  ;;  %v839_v40 = vld [vmem:[#allocation5 + $0xc0] sm:$0xff] }
 0x5cf   :  { %735 = vmatpush.msra.mxu2 %v4606_v41  ;;  %v838_v41 = vld [vmem:[#allocation5 + $0xb8] sm:$0xff] }
 0x5d1   :  { %v4660_v34 = vpop.eup %4659 }
 0x5d2   :  { %v681_v36 = vsel %vm130_vm3, %v4660_v34, 0.0 }
 0x5d3   :  { %682 = vadd.xlane.f32.xlu1 %v681_v36 }
 0x5d9   :  { %v553_v43 = vpop.permute.xlu0 %552 }
 0x5da   :  { %573 = vmatpush.msrb.mxu1 %v553_v43 }
 0x5dc   :  { %709 = vmatpush.msra.mxu1 %v4605_v42 }
 0x636   :  { %v521_v45 = vpop.xlane.xlu1 %520 }
 0x637   :  { %4661 = vrcp.f32 %v521_v45 }
 0x638   :  { %4663 = vrcp.f32 %v680_v33 }
 0x63d   :  { %v4662_v46 = vpop.eup %4661 }
 0x63e   :  { %v525_v47 = vmul.f32 %v4662_v46, %v4658_v30  ;;  %v4664_v48 = vpop.eup %4663  ;;  %v889_v46 = vld [vmem:[#allocation5 + $0x150] sm:$0xff] }
 0x63f   :  { %v686_v49 = vmul.f32 %v4664_v48, %v4656_v21  ;;  %892 = vmatpush.msrb.mxu0 %v889_v46 }
 0x640   :  { %4321 = vmatmul.msk.f32.vlgmr.msrb.gmra.mxu1 %vm130_vm3, %v525_v47  ;;  %v888_v47 = vld [vmem:[#allocation5 + $0x148] sm:$0xff] }
 0x641   :  { %861 = vmatpush.msrb.mxu1 %v840_v39  ;;  %893 = vmatpush.msrb.mxu0 %v888_v47 }
 0x643   :  { %862 = vmatpush.msrb.mxu1 %v839_v40 }
 0x645   :  { %863 = vmatpush.msrb.mxu1 %v838_v41 }
 0x646   :  { %v683_v50 = vpop.xlane.xlu1 %682 }
 0x647   :  { %4665 = vrcp.f32 %v683_v50 }
 0x648   :  { %4328 = vmatmul.msk.f32.vlgmr.msra.gmra.mxu1 %vm130_vm3, %v686_v49  ;;  %4667 = vrcp.f32 %v4978_v20  ;;  %v887_v49 = vld [vmem:[#allocation5 + $0x140] sm:$0xff] }
 0x649   :  { %894 = vmatpush.msrb.mxu0 %v887_v49 }
 0x64b   :  { %895 = vmatpush.msrb.mxu0 %v886_v53 }
 0x64d   :  { %v4666_v51 = vpop.eup %4665 }
 0x64e   :  { %v687_v52 = vmul.f32 %v4666_v51, %v4660_v34  ;;  %v4668_v21 = vpop.eup %4667  ;;  %v837_v34 = vld [vmem:[#allocation5 + $0xb0] sm:$0xff] }
 0x64f   :  { %vm791_vm4 = vweird.f32 %v4668_v21  ;;  %864 = vmatpush.msrb.mxu1 %v837_v34 }
 0x650   :  { %4329 = vmatmul.msk.f32.vlgmr.msra.gmra.mxu2 %vm130_vm3, %v687_v52 }
 0x6bd   :  { %v575_v54 = vpop.f32.mrf.mxu1 }
 0x6be   :  { %4323 = vmatmul.msk.f32.gmra.mxu0 %vm130_vm3, %v575_v54 }
 0x6c5   :  { %v711_v37 = vpop.f32.mrf.mxu1 }
 0x6c6   :  { %4330 = vmatmul.msk.f32.vlgmr.msrb.gmra.mxu3 %vm130_vm3, %v711_v37 }
 0x6d3   :  { %v737_v55 = vpop.f32.mrf.mxu2 }
 0x6d4   :  { %4331 = vmatmul.msk.f32.gmra.mxu3 %vm130_vm3, %v737_v55  ;;  %v885_v55 = vld [vmem:[#allocation5 + $0x130] sm:$0xff] }
 0x6d5   :  { %896 = vmatpush.msrb.mxu0 %v885_v55 }
 0x6d7   :  { %897 = vmatpush.msrb.mxu0 %v884_v57  ;;  %v972_v57 = vld [vmem:[#allocation5 + $0x188] sm:$0xff] }
 0x6d8   :  { %993 = vmatpush.msrb.mxu2 %v972_v57 }
 0x73b   :  { %v605_v7 = vpop.f32.mrf.mxu0 }
 0x73c   :  { %v609_v10 = vadd.f32 %v605_v7, %v446_v9  ;;  %v881_v7 = vld [vmem:[#allocation5 + $0x110] sm:$0xff] }
 0x749   :  { %v764_v61 = vpop.f32.mrf.mxu3 }
 0x74a   :  { %v770_v62 = vadd.f32 %v764_v61, %v608_v60  ;;  %v883_v60 = vld [vmem:[#allocation5 + $0x120] sm:$0xff] }
 0x74b   :  { %898 = vmatpush.msrb.mxu0 %v883_v60  ;;  %v969_v60 = vld [vmem:[#allocation5 + $0x170] sm:$0xff] }
 0x74c   :  { %v772_v2 = vadd.f32 %v770_v62, %v5055_v29  ;;  %v787_v29 = vmul.f32 32.0, %v4668_v21 }
 0x74e   :  { %v776_v4 = vadd.f32 %v4619_v1, %v772_v2  ;;  %v788_v22 = vsub.f32 1.0, %v787_v29  ;;  %v882_v2 = vld [vmem:[#allocation5 + $0x118] sm:$0xff] }
 0x74f   :  { %899 = vmatpush.msrb.mxu0 %v882_v2 }
 0x750   :  { %v780_v5 = vsel %vm95_vm2, %v776_v4, 0.0  ;;  %v789_v23 = vmul.f32 %v4668_v21, %v788_v22 }
 0x751   :  { %781 = vadd.xlane.f32.xlu1 %v780_v5  ;;  %900 = vmatpush.msrb.mxu0 %v881_v7 }
 0x752   :  { %v790_v24 = vadd.f32 %v4668_v21, %v789_v23 }
 0x754   :  { %v5175_v25 = vsel %vm791_vm4, %v4668_v21, %v790_v24  ;;  %v877_v21 = vld [vmem:[#allocation5 + $0xf0] sm:$0xff] }
 0x757   :  { %v767_v11 = vpop.f32.mrf.mxu3 }
 0x758   :  { %v771_v17 = vadd.f32 %v767_v11, %v609_v10  ;;  %v880_v11 = vld [vmem:[#allocation5 + $0x108] sm:$0xff] }
 0x759   :  { %901 = vmatpush.msrb.mxu0 %v880_v11 }
 0x75a   :  { %v773_v18 = vadd.f32 %v771_v17, %v5059_v31 }
 0x75c   :  { %v777_v19 = vadd.f32 %v4619_v1, %v773_v18  ;;  %v4621_v1 = vld [vmem:[#allocation5 + $0xa8] ss:$0 sm:$0xff]  ;;  %v879_v18 = vld [vmem:[#allocation5 + $0x100] sm:$0xff] }
 0x75d   :  { %902 = vmatpush.msrb.mxu0 %v879_v18 }
 0x75e   :  { %v783_v63 = vsel %vm95_vm2, %v777_v19, 0.0 }
 0x75f   :  { %784 = vadd.xlane.f32.xlu1 %v783_v63  ;;  %v878_v63 = vld [vmem:[#allocation5 + $0xf8] sm:$0xff] }
 0x760   :  { %903 = vmatpush.msrb.mxu0 %v878_v63 }
 0x762   :  { %904 = vmatpush.msrb.mxu0 %v877_v21  ;;  %v4625_v21 = vld [vmem:[#allocation5 + $0x168] ss:$0 sm:$0xff] }
 0x7c4   :  { %v782_v44 = vpop.xlane.xlu1 %781 }
 0x7c5   :  { %v793_v26 = vmul.f32 %v5175_v25, %v782_v44 }
 0x7c7   :  { %v795_v27 = vsub.f32 %v776_v4, %v793_v26  ;;  %v876_v26 = vld [vmem:[#allocation5 + $0xe8] sm:$0xff] }
 0x7c8   :  { %905 = vmatpush.msrb.mxu0 %v876_v26 }
 0x7c9   :  { %v797_v28 = vmul.f32 %v795_v27, %v795_v27 }
 0x7cb   :  { %v799_v31 = vsel %vm95_vm2, %v797_v28, 0.0  ;;  %v874_v28 = vld [vmem:[#allocation5 + $0xd8] sm:$0xff] }
 0x7cc   :  { %800 = vadd.xlane.f32.xlu0 %v799_v31  ;;  %v4622_v31 = vld [vmem:[#allocation5 + $0xd0] ss:$0 sm:$0xff] }
 0x7d2   :  { %v785_v30 = vpop.xlane.xlu1 %784 }
 0x7d3   :  { %v794_v32 = vmul.f32 %v5175_v25, %v785_v30 }
 0x7d5   :  { %v5180_v33 = vsub.f32 %v777_v19, %v794_v32 }
 0x7d7   :  { %v798_v35 = vmul.f32 %v5180_v33, %v5180_v33 }
 0x7d9   :  { %v802_v38 = vsel %vm95_vm2, %v798_v35, 0.0 }
 0x7da   :  { %803 = vadd.xlane.f32.xlu1 %v802_v38 }
 0x83f   :  { %v801_v36 = vpop.xlane.xlu0 %800 }
 0x840   :  { %v805_v42 = vmul.f32 %v801_v36, %v5175_v25 }
 0x842   :  { %v807_v43 = vadd.f32 1e-05, %v805_v42 }
 0x844   :  { %4669 = vrsqrt.f32 %v807_v43  ;;  %vm815_vm6 = vweird.f32 %v807_v43 }
 0x84a   :  { %v4670_v45 = vpop.eup %4669 }
 0x84b   :  { %v810_v48 = vmul.f32 %v4670_v45, %v807_v43  ;;  %vm816_vm5 = vweird.f32 %v4670_v45 }
 0x84c   :  { %vm817_vm7 = vmor %vm815_vm6, %vm816_vm5 }
 0x84d   :  { %v811_v50 = vmul.f32 %v4670_v45, %v810_v48  ;;  %v804_v51 = vpop.xlane.xlu1 %803 }
 0x84e   :  { %v806_v52 = vmul.f32 %v804_v51, %v5175_v25 }
 0x84f   :  { %v812_v54 = vmul.f32 0.5, %v811_v50 }
 0x850   :  { %v808_v37 = vadd.f32 1e-05, %v806_v52 }
 0x851   :  { %v813_v56 = vsub.f32 1.5, %v812_v54 }
 0x852   :  { %4671 = vrsqrt.f32 %v808_v37  ;;  %vm825_vm9 = vweird.f32 %v808_v37 }
 0x853   :  { %v814_v58 = vmul.f32 %v4670_v45, %v813_v56 }
 0x855   :  { %v818_v61 = vsel %vm817_vm7, %v4670_v45, %v814_v58  ;;  %v971_v58 = vld [vmem:[#allocation5 + $0x180] sm:$0xff] }
 0x856   :  { %v829_v62 = vmul.f32 %v818_v61, %v795_v27  ;;  %v875_v27 = vld [vmem:[#allocation5 + $0xe0] sm:$0xff]  ;;  %994 = vmatpush.msrb.mxu2 %v971_v58 }
 0x857   :  { %906 = vmatpush.msrb.mxu0 %v875_v27 }
 0x858   :  { %v4672_v4 = vpop.eup %4671  ;;  %v832_v5 = vmul.f32 %v4620_v59, %v829_v62 }
 0x859   :  { %v820_v9 = vmul.f32 %v4672_v4, %v808_v37  ;;  %vm826_vm8 = vweird.f32 %v4672_v4  ;;  %907 = vmatpush.msrb.mxu0 %v874_v28 }
 0x85a   :  { %v835_v10 = vadd.f32 %v4621_v1, %v832_v5  ;;  %vm827_vm10 = vmor %vm825_vm9, %vm826_vm8 }
 0x85b   :  { %v821_v17 = vmul.f32 %v4672_v4, %v820_v9 }
 0x85c   :  { %4332 = vmatmul.msk.f32.vlgmr.msrb.gmra.mxu1 %vm95_vm2, %v835_v10 }
 0x85d   :  { %v822_v19 = vmul.f32 0.5, %v821_v17 }
 0x85f   :  { %v823_v20 = vsub.f32 1.5, %v822_v19  ;;  %v4624_v19 = vld [vmem:[#allocation5 + $0x160] ss:$0 sm:$0xff] }
 0x861   :  { %v824_v29 = vmul.f32 %v4672_v4, %v823_v20 }
 0x863   :  { %v828_v22 = vsel %vm827_vm10, %v4672_v4, %v824_v29 }
 0x864   :  { %v830_v23 = vmul.f32 %v828_v22, %v5180_v33  ;;  %v4623_v33 = vld [vmem:[#allocation5 + $0x158] ss:$0 sm:$0xff] }
 0x866   :  { %v833_v24 = vmul.f32 %v4620_v59, %v830_v23  ;;  %v970_v59 = vld [vmem:[#allocation5 + $0x178] sm:$0xff] }
 0x867   :  { %995 = vmatpush.msrb.mxu2 %v970_v59 }
 0x868   :  { %v836_v44 = vadd.f32 %v4621_v1, %v833_v24 }
 0x869   :  { %996 = vmatpush.msrb.mxu2 %v969_v60 }
 0x86a   :  { %4333 = vmatmul.msk.f32.gmra.mxu1 %vm95_vm2, %v836_v44 }
 0x8d9   :  { %v866_v30 = vpop.f32.mrf.mxu1 }
 0x8da   :  { %v867_v32 = vadd.f32 %v4622_v31, %v866_v30 }
 0x8dc   :  { %v872_v35 = vmax.f32 %v867_v32, 0.0 }
 0x8de   :  { %908 = vmatmul.f32.vlgmr.msrb.gmra.mxu0 %v872_v35 }
 0x8e7   :  { %v869_v38 = vpop.f32.mrf.mxu1 }
 0x8e8   :  { %v870_v39 = vadd.f32 %v4622_v31, %v869_v38  ;;  %v4626_v38 = vld [vmem:[#allocation5 + $0x190] ss:$0 sm:$0xff] }
 0x8ea   :  { %v873_v40 = vmax.f32 %v870_v39, 0.0 }
 0x8ec   :  { %911 = vmatmul.f32.gmra.mxu0 %v873_v40 }
 0x95b   :  { %v909_v41 = vpop.f32.mrf.mxu0 }
 0x95c   :  { %v910_v34 = vadd.f32 %v4623_v33, %v909_v41 }
 0x95e   :  { %v915_v36 = vadd.f32 %v910_v34, %v835_v10 }
 0x960   :  { %v919_v42 = vsel %vm95_vm2, %v915_v36, 0.0 }
 0x961   :  { %920 = vadd.xlane.f32.xlu2 %v919_v42 }
 0x969   :  { %v912_v43 = vpop.f32.mrf.mxu0 }
 0x96a   :  { %v913_v45 = vadd.f32 %v4623_v33, %v912_v43 }
 0x96c   :  { %v916_v46 = vadd.f32 %v913_v45, %v836_v44 }
 0x96e   :  { %v922_v47 = vsel %vm95_vm2, %v916_v46, 0.0 }
 0x96f   :  { %923 = vadd.xlane.f32.xlu1 %v922_v47 }
 0x9d4   :  { %v921_v48 = vpop.xlane.xlu2 %920 }
 0x9d5   :  { %v925_v49 = vmul.f32 %v921_v48, %v5175_v25 }
 0x9d7   :  { %v927_v50 = vsub.f32 %v915_v36, %v925_v49 }
 0x9d9   :  { %v929_v51 = vmul.f32 %v927_v50, %v927_v50 }
 0x9db   :  { %v931_v52 = vsel %vm95_vm2, %v929_v51, 0.0 }
 0x9dc   :  { %932 = vadd.xlane.f32.xlu1 %v931_v52 }
 0x9e2   :  { %v924_v53 = vpop.xlane.xlu1 %923 }
 0x9e3   :  { %v926_v54 = vmul.f32 %v924_v53, %v5175_v25 }
 0x9e5   :  { %v928_v37 = vsub.f32 %v916_v46, %v926_v54 }
 0x9e7   :  { %v930_v55 = vmul.f32 %v928_v37, %v928_v37 }
 0x9e9   :  { %v934_v56 = vsel %vm95_vm2, %v930_v55, 0.0 }
 0x9ea   :  { %935 = vadd.xlane.f32.xlu1 %v934_v56 }
 0xa4f   :  { %v933_v61 = vpop.xlane.xlu1 %932 }
 0xa50   :  { %v937_v62 = vmul.f32 %v933_v61, %v5175_v25 }
 0xa52   :  { %v939_v1 = vadd.f32 1e-05, %v937_v62 }
 0xa54   :  { %4673 = vrsqrt.f32 %v939_v1  ;;  %vm947_vm12 = vweird.f32 %v939_v1 }
 0xa5a   :  { %v4674_v2 = vpop.eup %4673 }
 0xa5b   :  { %v942_v4 = vmul.f32 %v4674_v2, %v939_v1  ;;  %vm948_vm11 = vweird.f32 %v4674_v2 }
 0xa5c   :  { %vm949_vm13 = vmor %vm947_vm12, %vm948_vm11 }
 0xa5d   :  { %v943_v5 = vmul.f32 %v4674_v2, %v942_v4  ;;  %v936_v7 = vpop.xlane.xlu1 %935 }
 0xa5e   :  { %v938_v9 = vmul.f32 %v936_v7, %v5175_v25 }
 0xa5f   :  { %v944_v10 = vmul.f32 0.5, %v943_v5 }
 0xa60   :  { %v940_v11 = vadd.f32 1e-05, %v938_v9 }
 0xa61   :  { %v945_v17 = vsub.f32 1.5, %v944_v10 }
 0xa62   :  { %4675 = vrsqrt.f32 %v940_v11  ;;  %vm957_vm15 = vweird.f32 %v940_v11 }
 0xa63   :  { %v946_v18 = vmul.f32 %v4674_v2, %v945_v17 }
 0xa65   :  { %v950_v63 = vsel %vm949_vm13, %v4674_v2, %v946_v18 }
 0xa66   :  { %v961_v20 = vmul.f32 %v950_v63, %v927_v50 }
 0xa68   :  { %v4676_v29 = vpop.eup %4675  ;;  %v964_v22 = vmul.f32 %v4624_v19, %v961_v20 }
 0xa69   :  { %v952_v23 = vmul.f32 %v4676_v29, %v940_v11  ;;  %vm958_vm14 = vweird.f32 %v4676_v29 }
 0xa6a   :  { %v5198_v24 = vadd.f32 %v4625_v21, %v964_v22  ;;  %vm959_vm4 = vmor %vm957_vm15, %vm958_vm14 }
 0xa6b   :  { %v953_v44 = vmul.f32 %v4676_v29, %v952_v23 }
 0xa6c   :  { %4334 = vmatmul.msk.f32.vlgmr.msrb.gmra.mxu2 %vm95_vm2, %v5198_v24 }
 0xa6d   :  { %v954_v26 = vmul.f32 0.5, %v953_v44 }
 0xa6f   :  { %v955_v27 = vsub.f32 1.5, %v954_v26 }
 0xa71   :  { %v956_v28 = vmul.f32 %v4676_v29, %v955_v27 }
 0xa73   :  { %v960_v31 = vsel %vm959_vm4, %v4676_v29, %v956_v28 }
 0xa74   :  { %v962_v30 = vmul.f32 %v960_v31, %v928_v37 }
 0xa76   :  { %v965_v32 = vmul.f32 %v4624_v19, %v962_v30  ;;  %v1136_v30 = vld [vmem:[#allocation5 + $0x198] sm:$0xff] }
 0xa78   :  { %v5202_v35 = vadd.f32 %v4625_v21, %v965_v32  ;;  %v1267_v32 = vld [vmem:[#allocation5 + $0x1a0] sm:$0xff] }
 0xa79   :  { %1289 = vmatpush.msra.mxu0 %v1267_v32 }
 0xa7a   :  { %4335 = vmatmul.msk.f32.gmra.mxu2 %vm95_vm2, %v5202_v35 }
 0xaef   :  { %v998_v39 = vpop.f32.mrf.mxu2 }
 0xaf0   :  { %v5206_v40 = vadd.f32 %v4626_v38, %v998_v39 }
 0xaf2   :  { %1139 = vrot.lane.b32.xlu2 %v5206_v40, %s4967_s10  ;;  %1007 = vrot.lane.b32.xlu1 %v5206_v40, %s4968_s11  ;;  %v5217_v34 = vmul.f32 0.35355338, %v5206_v40 }
 0xafd   :  { %v1001_v33 = vpop.f32.mrf.mxu2 }
 0xafe   :  { %v5212_v41 = vadd.f32 %v4626_v38, %v1001_v33 }
 0xb00   :  { %1035 = vrot.lane.b32.xlu0 %v5212_v41, %s4968_s11  ;;  %v5227_v45 = vmul.f32 0.35355338, %v5212_v41  ;;  %v4607_v53 = vpack.i.bf16 %v5206_v40, %v5212_v41 }
 0xb08   :  { %1137 = vrot.lane.b32.xlu0 %v5217_v34, %s4969_s12 }
 0xb4c   :  { %v1140_v43 = vpop.permute.xlu2 %1139 }
 0xb64   :  { %v1008_v36 = vpop.permute.xlu1 %1007 }
 0xb65   :  { %4336 = vmatpush.xpose.msk.msra.mxu3 %vm130_vm3, %v1008_v36 }
 0xb68   :  { %4337 = vmatmul.msk.f32.vlgmr.msra.gmra.mxu3 %vm130_vm3, %v5217_v34 }
 0xb72   :  { %v1036_v42 = vpop.permute.xlu0 %1035 }
 0xb73   :  { %4338 = vmatpush.xpose.msk.msra.mxu1 %vm130_vm3, %v1036_v42 }
 0xb76   :  { %4339 = vmatmul.msk.f32.vlgmr.msra.gmra.mxu1 %vm130_vm3, %v5227_v45 }
 0xb77   :  { %4342 = vmatpush.xpose.msk.msrb.mxu1 %vm130_vm3, %v1140_v43 }
 0xb7a   :  { %v1138_v46 = vpop.permute.xlu0 %1137 }
 0xb7e   :  { %4343 = vmatmul.msk.f32.vlgmr.msrb.gmra.mxu1 %vm130_vm3, %v1138_v46 }
 0xbeb   :  { %v1031_v47 = vpop.f32.mrf.mxu3 }
 0xbec   :  { %v1062_v48 = vsel %vm130_vm3, %v1031_v47, -inf }
 0xbed   :  { %1063 = vmax.xlane.f32.xlu0 %v1062_v48 }
 0xbf3   :  { %v1059_v49 = vpop.f32.mrf.mxu1 }
 0xbf4   :  { %v1065_v50 = vsel %vm130_vm3, %v1059_v49, -inf }
 0xbf5   :  { %1066 = vmax.xlane.f32.xlu1 %v1065_v50 }
 0xbfb   :  { %v1162_v51 = vpop.f32.mrf.mxu1 }
 0xbfc   :  { %v1193_v52 = vsel %vm130_vm3, %v1162_v51, -inf }
 0xbfd   :  { %1194 = vmax.xlane.f32.xlu2 %v1193_v52 }
 0xc01   :  { %1215 = vrot.lane.b32.xlu0 %v5206_v40, %s4971_s14 }
 0xc0e   :  { %1167 = vrot.lane.b32.xlu1 %v5212_v41, %s4967_s10 }
 0xc15   :  { %4608 = vrot.lane.b32.xlu2 %v4607_v53, %s4970_s13 }
 0xc1d   :  { %1165 = vrot.lane.b32.xlu2 %v5227_v45, %s4969_s12 }
 0xc60   :  { %v1064_v54 = vpop.xlane.xlu0 %1063 }
 0xc61   :  { %v1068_v37 = vsub.f32 %v1031_v47, %v1064_v54 }
 0xc63   :  { %v1070_v55 = vmul.f32 1.442695, %v1068_v37 }
 0xc65   :  { %4677 = vpow2.f32 %v1070_v55 }
 0xc68   :  { %v1067_v56 = vpop.xlane.xlu1 %1066 }
 0xc69   :  { %v1069_v57 = vsub.f32 %v1059_v49, %v1067_v56 }
 0xc6b   :  { %v4678_v58 = vpop.eup %4677  ;;  %v1072_v59 = vmul.f32 1.442695, %v1069_v57 }
 0xc6c   :  { %v1074_v60 = vsel %vm130_vm3, %v4678_v58, 0.0 }
 0xc6d   :  { %4679 = vpow2.f32 %v1072_v59  ;;  %1075 = vadd.xlane.f32.xlu0 %v1074_v60 }
 0xc70   :  { %v1195_v61 = vpop.xlane.xlu2 %1194 }
 0xc71   :  { %v1199_v62 = vsub.f32 %v1162_v51, %v1195_v61 }
 0xc73   :  { %v4680_v1 = vpop.eup %4679  ;;  %v1201_v2 = vmul.f32 1.442695, %v1199_v62  ;;  %v1216_v11 = vpop.permute.xlu0 %1215 }
 0xc74   :  { %v1077_v4 = vsel %vm130_vm3, %v4680_v1, 0.0 }
 0xc75   :  { %4681 = vpow2.f32 %v1201_v2  ;;  %1078 = vadd.xlane.f32.xlu1 %v1077_v4 }
 0xc78   :  { %v4609_v5 = vpop.permute.xlu2 %4608 }
 0xc79   :  { %v4611_v7 = vunpack.i.h.bf16 %v4609_v5  ;;  %v4610_v9 = vunpack.i.l.bf16 %v4609_v5 }
 0xc7b   :  { %v4682_v10 = vpop.eup %4681  ;;  %1105 = vmatpush.msra.mxu2 %v4611_v7  ;;  %1131 = vmatpush.msrb.mxu3 %v4610_v9  ;;  %v1456_v9 = vld [vmem:[#allocation5 + $0x1a8] sm:$0xff] }
 0xc7c   :  { %v1205_v17 = vsel %vm130_vm3, %v4682_v10, 0.0  ;;  %1478 = vmatpush.msrb.mxu0 %v1456_v9 }
 0xc7d   :  { %1236 = vmatpush.msra.mxu3 %v1216_v11  ;;  %1206 = vadd.xlane.f32.xlu1 %v1205_v17 }
 0xc80   :  { %v1168_v18 = vpop.permute.xlu1 %1167  ;;  %v1166_v44 = vpop.permute.xlu2 %1165 }
 0xc81   :  { %1328 = vrot.lane.b32.xlu0 %v5206_v40, %s4972_s15  ;;  %4344 = vmatpush.xpose.msk.msrb.mxu2 %vm130_vm3, %v1168_v18 }
 0xc96   :  { %1326 = vrot.lane.b32.xlu1 %v5217_v34, %s4973_s16 }
 0xc9e   :  { %1356 = vrot.lane.b32.xlu1 %v5212_v41, %s4972_s15 }
 0xce0   :  { %v1076_v19 = vpop.xlane.xlu0 %1075 }
 0xce1   :  { %4683 = vrcp.f32 %v1076_v19 }
 0xce7   :  { %v4684_v63 = vpop.eup %4683 }
 0xce8   :  { %v1082_v20 = vmul.f32 %v4684_v63, %v4678_v58  ;;  %v1079_v21 = vpop.xlane.xlu1 %1078 }
 0xce9   :  { %4685 = vrcp.f32 %v1079_v21 }
 0xcea   :  { %4340 = vmatmul.msk.f32.vlgmr.msra.gmra.mxu2 %vm130_vm3, %v1082_v20 }
 0xceb   :  { %1318 = vmatpush.msra.mxu2 %v1136_v30 }
 0xcef   :  { %v4686_v29 = vpop.eup %4685 }
 0xcf0   :  { %v1083_v22 = vmul.f32 %v4686_v29, %v4680_v1  ;;  %v1207_v23 = vpop.xlane.xlu1 %1206 }
 0xcf1   :  { %4687 = vrcp.f32 %v1207_v23 }
 0xcf2   :  { %4341 = vmatmul.msk.f32.vlgmr.msrb.gmra.mxu3 %vm130_vm3, %v1083_v22  ;;  %4345 = vmatmul.msk.f32.vlgmr.msrb.gmra.mxu2 %vm130_vm3, %v1166_v44 }
 0xcf3   :  { %v1329_v26 = vpop.permute.xlu0 %1328 }
 0xcf4   :  { %4352 = vmatpush.xpose.msk.msrb.mxu3 %vm130_vm3, %v1329_v26 }
 0xcf7   :  { %v4688_v27 = vpop.eup %4687 }
 0xcf8   :  { %v1213_v28 = vmul.f32 %v4688_v27, %v4682_v10 }
 0xcfa   :  { %4346 = vmatmul.msk.f32.vlgmr.msra.gmra.mxu3 %vm130_vm3, %v1213_v28 }
 0xd08   :  { %v1327_v31 = vpop.permute.xlu1 %1326 }
 0xd09   :  { %4353 = vmatmul.msk.f32.vlgmr.msrb.gmra.mxu3 %vm130_vm3, %v1327_v31 }
 0xd10   :  { %v1357_v57 = vpop.permute.xlu1 %1356 }
 0xd6d   :  { %v1107_v38 = vpop.f32.mrf.mxu2 }
 0xd6e   :  { %4350 = vmatmul.msk.f32.vlgmr.msra.gmra.mxu2 %vm130_vm3, %v1107_v38 }
 0xd75   :  { %v1133_v39 = vpop.f32.mrf.mxu3  ;;  %v1190_v33 = vpop.f32.mrf.mxu2 }
 0xd76   :  { %4351 = vmatmul.msk.f32.gmra.mxu2 %vm130_vm3, %v1133_v39  ;;  %v1196_v36 = vsel %vm130_vm3, %v1190_v33, -inf }
 0xd77   :  { %1197 = vmax.xlane.f32.xlu2 %v1196_v36 }
 0xd7d   :  { %v1238_v42 = vpop.f32.mrf.mxu3 }
 0xd7e   :  { %4348 = vmatmul.msk.f32.vlgmr.msra.gmra.mxu0 %vm130_vm3, %v1238_v42 }
 0xd8c   :  { %v1351_v43 = vpop.f32.mrf.mxu3 }
 0xd8d   :  { %v1382_v46 = vsel %vm130_vm3, %v1351_v43, -inf }
 0xd8e   :  { %1383 = vmax.xlane.f32.xlu0 %v1382_v46 }
 0xd8f   :  { %1404 = vrot.lane.b32.xlu2 %v5206_v40, %s4974_s17 }
 0xda2   :  { %1241 = vrot.lane.b32.xlu0 %v5212_v41, %s4971_s14 }
 0xdaa   :  { %1490 = vrot.lane.b32.xlu0 %v5206_v40, %s4975_s18 }
 0xdb2   :  { %1354 = vrot.lane.b32.xlu0 %v5227_v45, %s4973_s16 }
 0xdba   :  { %1516 = vrot.lane.b32.xlu0 %v5227_v45, %s4976_s19 }
 0xdea   :  { %v1198_v47 = vpop.xlane.xlu2 %1197 }
 0xdeb   :  { %v1200_v48 = vsub.f32 %v1190_v33, %v1198_v47 }
 0xded   :  { %v1203_v49 = vmul.f32 1.442695, %v1200_v48  ;;  %v4612_v48 = vpack.i.bf16 %v5212_v41, %v5206_v40  ;;  %v1618_v40 = vld [vmem:[#allocation5 + $0x1b0] sm:$0xff] }
 0xdef   :  { %4689 = vpow2.f32 %v1203_v49 }
 0xdf1   :  { %v5290_v11 = vpop.f32.mrf.mxu2 }
 0xdf2   :  { %v1405_v50 = vpop.permute.xlu2 %1404 }
 0xdf3   :  { %1425 = vmatpush.msra.mxu3 %v1405_v50 }
 0xdf5   :  { %v4690_v51 = vpop.eup %4689 }
 0xdf6   :  { %v1208_v52 = vsel %vm130_vm3, %v4690_v51, 0.0 }
 0xdf7   :  { %1209 = vadd.xlane.f32.xlu1 %v1208_v52 }
 0xdf9   :  { %v5293_v19 = vpop.f32.mrf.mxu2 }
 0xe01   :  { %v1384_v53 = vpop.xlane.xlu0 %1383 }
 0xe02   :  { %v1388_v54 = vsub.f32 %v1351_v43, %v1384_v53 }
 0xe04   :  { %v1390_v37 = vmul.f32 1.442695, %v1388_v54 }
 0xe06   :  { %4691 = vpow2.f32 %v1390_v37 }
 0xe0c   :  { %v4692_v55 = vpop.eup %4691 }
 0xe0d   :  { %v1394_v56 = vsel %vm130_vm3, %v4692_v55, 0.0 }
 0xe0e   :  { %1395 = vadd.xlane.f32.xlu2 %v1394_v56 }
 0xe10   :  { %1488 = vrot.lane.b32.xlu1 %v5217_v34, %s4976_s19 }
 0xe14   :  { %v1242_v45 = vpop.permute.xlu0 %1241 }
 0xe15   :  { %1262 = vmatpush.msra.mxu1 %v1242_v45 }
 0xe17   :  { %4354 = vmatpush.xpose.msk.msrb.mxu1 %vm130_vm3, %v1357_v57 }
 0xe1c   :  { %v1491_v58 = vpop.permute.xlu0 %1490 }
 0xe1d   :  { %4360 = vmatpush.xpose.msk.msrb.mxu2 %vm130_vm3, %v1491_v58 }
 0xe24   :  { %v1355_v62 = vpop.permute.xlu0 %1354 }
 0xe26   :  { %1518 = vrot.lane.b32.xlu2 %v5212_v41, %s4975_s18 }
 0xe2c   :  { %v1517_v7 = vpop.permute.xlu0 %1516 }
 0xe6a   :  { %v1210_v59 = vpop.xlane.xlu1 %1209 }
 0xe6b   :  { %4693 = vrcp.f32 %v1210_v59 }
 0xe71   :  { %v4694_v60 = vpop.eup %4693 }
 0xe72   :  { %v1214_v61 = vmul.f32 %v4694_v60, %v4690_v51 }
 0xe74   :  { %4347 = vmatmul.msk.f32.vlgmr.msra.gmra.mxu1 %vm130_vm3, %v1214_v61  ;;  %v1291_v61 = vpop.f32.mrf.mxu0 }
 0xe7c   :  { %4355 = vmatmul.msk.f32.vlgmr.msrb.gmra.mxu1 %vm130_vm3, %v1355_v62 }
 0xe81   :  { %v1396_v34 = vpop.xlane.xlu2 %1395 }
 0xe82   :  { %4695 = vrcp.f32 %v1396_v34  ;;  %v1489_v1 = vpop.permute.xlu1 %1488 }
 0xe83   :  { %4361 = vmatmul.msk.f32.vlgmr.msrb.gmra.mxu2 %vm130_vm3, %v1489_v1  ;;  %v1321_v1 = vadd.f32 %v5290_v11, %v1291_v61 }
 0xe88   :  { %v4696_v2 = vpop.eup %4695 }
 0xe89   :  { %v1402_v4 = vmul.f32 %v4696_v2, %v4692_v55  ;;  %v1519_v5 = vpop.permute.xlu2 %1518 }
 0xe8a   :  { %4362 = vmatpush.xpose.msk.msrb.mxu3 %vm130_vm3, %v1519_v5 }
 0xe8b   :  { %4356 = vmatmul.msk.f32.vlgmr.msra.gmra.mxu3 %vm130_vm3, %v1402_v4 }
 0xe8e   :  { %1640 = vmatpush.msra.mxu3 %v1618_v40  ;;  %v1753_v40 = vld [vmem:[#allocation5 + $0x238] sm:$0xff] }
 0xe93   :  { %4363 = vmatmul.msk.f32.vlgmr.msrb.gmra.mxu3 %vm130_vm3, %v1517_v7  ;;  %v4627_v7 = vld [vmem:[#allocation5 + $0x1b8] ss:$0 sm:$0xff] }
 0xef1   :  { %v1264_v10 = vpop.f32.mrf.mxu1 }
 0xef2   :  { %4349 = vmatmul.msk.f32.gmra.mxu0 %vm130_vm3, %v1264_v10 }
 0xef9   :  { %v1379_v17 = vpop.f32.mrf.mxu1 }
 0xefa   :  { %v1385_v18 = vsel %vm130_vm3, %v1379_v17, -inf }
 0xefb   :  { %1386 = vmax.xlane.f32.xlu2 %v1385_v18 }
 0xf06   :  { %v1513_v63 = vpop.f32.mrf.mxu2 }
 0xf07   :  { %v1544_v20 = vsel %vm130_vm3, %v1513_v63, -inf }
 0xf08   :  { %1545 = vmax.xlane.f32.xlu1 %v1544_v20 }
 0xf0e   :  { %v1427_v21 = vpop.f32.mrf.mxu3 }
 0xf0f   :  { %4358 = vmatmul.msk.f32.vlgmr.msrb.gmra.mxu0 %vm130_vm3, %v1427_v21 }
 0xf16   :  { %v1541_v29 = vpop.f32.mrf.mxu3 }
 0xf17   :  { %v1547_v22 = vsel %vm130_vm3, %v1541_v29, -inf }
 0xf18   :  { %1548 = vmax.xlane.f32.xlu0 %v1547_v22 }
 0xf2c   :  { %1430 = vrot.lane.b32.xlu0 %v5212_v41, %s4974_s17 }
 0xf6e   :  { %v1387_v23 = vpop.xlane.xlu2 %1386 }
 0xf6f   :  { %v1389_v44 = vsub.f32 %v1379_v17, %v1387_v23  ;;  %v1294_v62 = vpop.f32.mrf.mxu0 }
 0xf70   :  { %v1324_v17 = vadd.f32 %v5293_v19, %v1294_v62 }
 0xf71   :  { %v1392_v26 = vmul.f32 1.442695, %v1389_v44 }
 0xf73   :  { %4697 = vpow2.f32 %v1392_v26 }
 0xf79   :  { %v4698_v27 = vpop.eup %4697 }
 0xf7a   :  { %v1397_v28 = vsel %vm130_vm3, %v4698_v27, 0.0 }
 0xf7b   :  { %1398 = vadd.xlane.f32.xlu2 %v1397_v28  ;;  %v1546_v31 = vpop.xlane.xlu1 %1545 }
 0xf7c   :  { %v1550_v30 = vsub.f32 %v1513_v63, %v1546_v31 }
 0xf7e   :  { %v1552_v32 = vmul.f32 1.442695, %v1550_v30 }
 0xf80   :  { %4699 = vpow2.f32 %v1552_v32 }
 0xf86   :  { %v4700_v38 = vpop.eup %4699 }
 0xf87   :  { %v1556_v39 = vsel %vm130_vm3, %v4700_v38, 0.0 }
 0xf88   :  { %1557 = vadd.xlane.f32.xlu1 %v1556_v39  ;;  %v1710_v39 = vld [vmem:[#allocation5 + $0x1e0] sm:$0xff] }
 0xf8b   :  { %v1549_v33 = vpop.xlane.xlu0 %1548 }
 0xf8c   :  { %v1551_v36 = vsub.f32 %v1541_v29, %v1549_v33  ;;  %v1480_v34 = vpop.f32.mrf.mxu0  ;;  %v1709_v33 = vld [vmem:[#allocation5 + $0x1d8] sm:$0xff] }
 0xf8d   :  { %v1486_v2 = vadd.f32 %v1480_v34, %v1321_v1  ;;  %v4628_v34 = vld [vmem:[#allocation5 + $0x1c0] ss:$0 sm:$0xff]  ;;  %v1751_v1 = vld [vmem:[#allocation5 + $0x228] sm:$0xff] }
 0xf8e   :  { %v1554_v42 = vmul.f32 1.442695, %v1551_v36  ;;  %v1708_v36 = vld [vmem:[#allocation5 + $0x1d0] sm:$0xff] }
 0xf90   :  { %4701 = vpow2.f32 %v1554_v42 }
 0xf96   :  { %v4702_v43 = vpop.eup %4701 }
 0xf97   :  { %v1559_v46 = vsel %vm130_vm3, %v4702_v43, 0.0 }
 0xf98   :  { %1560 = vadd.xlane.f32.xlu2 %v1559_v46 }
 0xf9e   :  { %v1431_v47 = vpop.permute.xlu0 %1430 }
 0xf9f   :  { %1451 = vmatpush.msra.mxu1 %v1431_v47  ;;  %v1760_v47 = vld [vmem:[#allocation5 + $0x270] sm:$0xff] }
 0xfa0   :  { %1763 = vmatpush.msra.mxu0 %v1760_v47 }
 0xfa1   :  { %4613 = vrot.lane.b32.xlu1 %v4612_v48, %s4977_s20  ;;  %v1759_v48 = vld [vmem:[#allocation5 + $0x268] sm:$0xff] }
 0xfa2   :  { %1764 = vmatpush.msra.mxu0 %v1759_v48 }
 0xfee   :  { %v1399_v49 = vpop.xlane.xlu2 %1398 }
 0xfef   :  { %4703 = vrcp.f32 %v1399_v49  ;;  %v1758_v49 = vld [vmem:[#allocation5 + $0x260] sm:$0xff] }
 0xff0   :  { %1765 = vmatpush.msra.mxu0 %v1758_v49 }
 0xff5   :  { %v4704_v50 = vpop.eup %4703 }
 0xff6   :  { %v1403_v51 = vmul.f32 %v4704_v50, %v4698_v27 }
 0xff8   :  { %4357 = vmatmul.msk.f32.vlgmr.msra.gmra.mxu1 %vm130_vm3, %v1403_v51 }
 0xffb   :  { %v1558_v52 = vpop.xlane.xlu1 %1557 }
 0xffc   :  { %4705 = vrcp.f32 %v1558_v52  ;;  %v1757_v52 = vld [vmem:[#allocation5 + $0x258] sm:$0xff] }
 0xffd   :  { %1766 = vmatpush.msra.mxu0 %v1757_v52 }
0x1002   :  { %v4706_v54 = vpop.eup %4705 }
0x1003   :  { %v1564_v57 = vmul.f32 %v4706_v54, %v4700_v38  ;;  %v1711_v38 = vld [vmem:[#allocation5 + $0x1e8] sm:$0xff] }
0x100b   :  { %v1561_v53 = vpop.xlane.xlu2 %1560 }
0x100c   :  { %4707 = vrcp.f32 %v1561_v53 }
0x1012   :  { %v4708_v37 = vpop.eup %4707 }
0x1013   :  { %v4614_v55 = vpop.permute.xlu1 %4613  ;;  %v1565_v58 = vmul.f32 %v4708_v37, %v4702_v43  ;;  %v1756_v37 = vld [vmem:[#allocation5 + $0x250] sm:$0xff] }
0x1014   :  { %v4616_v56 = vunpack.i.h.bf16 %v4614_v55  ;;  %v4615_v45 = vunpack.i.l.bf16 %v4614_v55  ;;  %1767 = vmatpush.msra.mxu0 %v1756_v37 }
0x1016   :  { %1587 = vmatpush.msrb.mxu1 %v4615_v45  ;;  %1613 = vmatpush.msra.mxu2 %v4616_v56  ;;  %v1755_v56 = vld [vmem:[#allocation5 + $0x248] sm:$0xff] }
0x1017   :  { %4364 = vmatmul.msk.f32.vlgmr.msrb.gmra.mxu1 %vm130_vm3, %v1564_v57  ;;  %4365 = vmatmul.msk.f32.vlgmr.msra.gmra.mxu2 %vm130_vm3, %v1565_v58  ;;  %v1754_v57 = vld [vmem:[#allocation5 + $0x240] sm:$0xff] }
0x1018   :  { %1732 = vmatpush.msra.mxu1 %v1711_v38  ;;  %1768 = vmatpush.msra.mxu0 %v1755_v56 }
0x101a   :  { %1733 = vmatpush.msra.mxu1 %v1710_v39  ;;  %1769 = vmatpush.msra.mxu0 %v1754_v57 }
0x101c   :  { %1734 = vmatpush.msra.mxu1 %v1709_v33  ;;  %1770 = vmatpush.msra.mxu0 %v1753_v40 }
0x101e   :  { %1735 = vmatpush.msra.mxu1 %v1708_v36 }
0x1075   :  { %v1453_v41 = vpop.f32.mrf.mxu1 }
0x1076   :  { %4359 = vmatmul.msk.f32.gmra.mxu0 %vm130_vm3, %v1453_v41 }
0x1094   :  { %v1589_v59 = vpop.f32.mrf.mxu1 }
0x1095   :  { %4366 = vmatmul.msk.f32.vlgmr.msra.gmra.mxu3 %vm130_vm3, %v1589_v59 }
0x109a   :  { %v1615_v60 = vpop.f32.mrf.mxu2 }
0x109d   :  { %4367 = vmatmul.msk.f32.gmra.mxu3 %vm130_vm3, %v1615_v60  ;;  %v1752_v60 = vld [vmem:[#allocation5 + $0x230] sm:$0xff] }
0x109e   :  { %1771 = vmatpush.msra.mxu0 %v1752_v60 }
0x10a0   :  { %1772 = vmatpush.msra.mxu0 %v1751_v1 }
0x10f3   :  { %v1483_v10 = vpop.f32.mrf.mxu0 }
0x10f4   :  { %v1487_v63 = vadd.f32 %v1483_v10, %v1324_v17 }
0x1118   :  { %v1642_v4 = vpop.f32.mrf.mxu3 }
0x1119   :  { %v1648_v5 = vadd.f32 %v1642_v4, %v1486_v2 }
0x111b   :  { %v1650_v9 = vadd.f32 %v1648_v5, %v5198_v24 }
0x111d   :  { %v1654_v18 = vadd.f32 %v4627_v7, %v1650_v9  ;;  %v1750_v9 = vld [vmem:[#allocation5 + $0x220] sm:$0xff] }
0x111e   :  { %1773 = vmatpush.msra.mxu0 %v1750_v9 }
0x111f   :  { %v1658_v20 = vsel %vm95_vm2, %v1654_v18, 0.0 }
0x1120   :  { %1659 = vadd.xlane.f32.xlu2 %v1658_v20  ;;  %v1645_v21 = vpop.f32.mrf.mxu3 }
0x1121   :  { %v1649_v29 = vadd.f32 %v1645_v21, %v1487_v63  ;;  %v1748_v21 = vld [vmem:[#allocation5 + $0x210] sm:$0xff] }
0x1123   :  { %v1651_v22 = vadd.f32 %v1649_v29, %v5202_v35 }
0x1125   :  { %v1655_v23 = vadd.f32 %v4627_v7, %v1651_v22  ;;  %v4629_v7 = vld [vmem:[#allocation5 + $0x1c8] ss:$0 sm:$0xff] }
0x1127   :  { %v1661_v11 = vsel %vm95_vm2, %v1655_v23, 0.0 }
0x1128   :  { %1662 = vadd.xlane.f32.xlu2 %v1661_v11 }
0x1193   :  { %v1660_v44 = vpop.xlane.xlu2 %1659 }
0x1194   :  { %v1664_v26 = vmul.f32 %v1660_v44, %v5175_v25 }
0x1196   :  { %v1666_v24 = vsub.f32 %v1654_v18, %v1664_v26  ;;  %v1749_v18 = vld [vmem:[#allocation5 + $0x218] sm:$0xff]  ;;  %v1747_v26 = vld [vmem:[#allocation5 + $0x208] sm:$0xff] }
0x1197   :  { %1774 = vmatpush.msra.mxu0 %v1749_v18 }
0x1198   :  { %v1668_v27 = vmul.f32 %v1666_v24, %v1666_v24 }
0x1199   :  { %1775 = vmatpush.msra.mxu0 %v1748_v21 }
0x119a   :  { %v1670_v19 = vsel %vm95_vm2, %v1668_v27, 0.0  ;;  %v1745_v27 = vld [vmem:[#allocation5 + $0x1f8] sm:$0xff] }
0x119b   :  { %1671 = vadd.xlane.f32.xlu0 %v1670_v19  ;;  %v1663_v28 = vpop.xlane.xlu2 %1662  ;;  %1776 = vmatpush.msra.mxu0 %v1747_v26  ;;  %v4630_v19 = vld [vmem:[#allocation5 + $0x1f0] ss:$0 sm:$0xff]  ;;  %v4633_v26 = vld [vmem:[#allocation5 + $0x288] ss:$0 sm:$0xff] }
0x119c   :  { %v1665_v31 = vmul.f32 %v1663_v28, %v5175_v25 }
0x119e   :  { %v5321_v30 = vsub.f32 %v1655_v23, %v1665_v31 }
0x11a0   :  { %v1669_v35 = vmul.f32 %v5321_v30, %v5321_v30 }
0x11a2   :  { %v1673_v32 = vsel %vm95_vm2, %v1669_v35, 0.0 }
0x11a3   :  { %1674 = vadd.xlane.f32.xlu2 %v1673_v32 }
0x120e   :  { %v1672_v42 = vpop.xlane.xlu0 %1671 }
0x120f   :  { %v1676_v43 = vmul.f32 %v1672_v42, %v5175_v25 }
0x1211   :  { %v1678_v46 = vadd.f32 1e-05, %v1676_v43 }
0x1213   :  { %4709 = vrsqrt.f32 %v1678_v46  ;;  %vm1686_vm6 = vweird.f32 %v1678_v46 }
0x1216   :  { %v1675_v50 = vpop.xlane.xlu2 %1674 }
0x1217   :  { %v1677_v51 = vmul.f32 %v1675_v50, %v5175_v25 }
0x1219   :  { %v4710_v53 = vpop.eup %4709  ;;  %v1679_v54 = vadd.f32 1e-05, %v1677_v51 }
0x121a   :  { %v1681_v55 = vmul.f32 %v4710_v53, %v1678_v46  ;;  %vm1687_vm5 = vweird.f32 %v4710_v53 }
0x121b   :  { %4711 = vrsqrt.f32 %v1679_v54  ;;  %vm1688_vm7 = vmor %vm1686_vm6, %vm1687_vm5  ;;  %vm1696_vm9 = vweird.f32 %v1679_v54  ;;  %vm1846_vm5 = vcmask 1040384   ;;  %vm1904_vm6 = vcmask 58368  }
0x121c   :  { %v1682_v45 = vmul.f32 %v4710_v53, %v1681_v55 }
0x121e   :  { %v1683_v58 = vmul.f32 0.5, %v1682_v45 }
0x1220   :  { %v1684_v41 = vsub.f32 1.5, %v1683_v58 }
0x1221   :  { %v4712_v59 = vpop.eup %4711 }
0x1222   :  { %v1685_v61 = vmul.f32 %v4710_v53, %v1684_v41  ;;  %v1691_v62 = vmul.f32 %v4712_v59, %v1679_v54  ;;  %vm1697_vm8 = vweird.f32 %v4712_v59  ;;  %v1851_v41 = vld [vmem:[#allocation5 + $0x2a8] sm:$0xff] }
0x1223   :  { %vm1698_vm10 = vmor %vm1696_vm9, %vm1697_vm8  ;;  %1869 = vmatpush.msrb.mxu2 %v1851_v41 }
0x1224   :  { %v1689_v2 = vsel %vm1688_vm7, %v4710_v53, %v1685_v61  ;;  %v1692_v4 = vmul.f32 %v4712_v59, %v1691_v62  ;;  %v1849_v61 = vld [vmem:[#allocation5 + $0x298] sm:$0xff]  ;;  %v1848_v62 = vld [vmem:[#allocation5 + $0x290] sm:$0xff] }
0x1225   :  { %v1700_v5 = vmul.f32 %v1689_v2, %v1666_v24  ;;  %v1746_v24 = vld [vmem:[#allocation5 + $0x200] sm:$0xff] }
0x1226   :  { %v1693_v10 = vmul.f32 0.5, %v1692_v4  ;;  %1777 = vmatpush.msra.mxu0 %v1746_v24 }
0x1227   :  { %v1703_v17 = vmul.f32 %v4628_v34, %v1700_v5 }
0x1228   :  { %v1694_v63 = vsub.f32 1.5, %v1693_v10  ;;  %1778 = vmatpush.msra.mxu0 %v1745_v27 }
0x1229   :  { %v1706_v20 = vadd.f32 %v4629_v7, %v1703_v17 }
0x122a   :  { %v1695_v29 = vmul.f32 %v4712_v59, %v1694_v63 }
0x122b   :  { %4368 = vmatmul.msk.f32.vlgmr.msra.gmra.mxu1 %vm95_vm2, %v1706_v20 }
0x122c   :  { %v1699_v22 = vsel %vm1698_vm10, %v4712_v59, %v1695_v29  ;;  %v1850_v59 = vld [vmem:[#allocation5 + $0x2a0] sm:$0xff] }
0x122d   :  { %v1701_v23 = vmul.f32 %v1699_v22, %v5321_v30  ;;  %v4631_v30 = vld [vmem:[#allocation5 + $0x278] ss:$0 sm:$0xff]  ;;  %1870 = vmatpush.msrb.mxu2 %v1850_v59  ;;  %v4632_v22 = vld [vmem:[#allocation5 + $0x280] ss:$0 sm:$0xff] }
0x122f   :  { %v1704_v11 = vmul.f32 %v4628_v34, %v1701_v23  ;;  %1871 = vmatpush.msrb.mxu2 %v1849_v61 }
0x1231   :  { %v1707_v44 = vadd.f32 %v4629_v7, %v1704_v11  ;;  %1872 = vmatpush.msrb.mxu2 %v1848_v62 }
0x1233   :  { %4369 = vmatmul.msk.f32.gmra.mxu1 %vm95_vm2, %v1707_v44 }
0x12a8   :  { %v1737_v28 = vpop.f32.mrf.mxu1 }
0x12a9   :  { %v1738_v31 = vadd.f32 %v4630_v19, %v1737_v28 }
0x12ab   :  { %v1743_v35 = vmax.f32 %v1738_v31, 0.0 }
0x12ad   :  { %1779 = vmatmul.f32.vlgmr.msra.gmra.mxu0 %v1743_v35 }
0x12b0   :  { %v1740_v32 = vpop.f32.mrf.mxu1 }
0x12b1   :  { %v1741_v38 = vadd.f32 %v4630_v19, %v1740_v32 }
0x12b3   :  { %v1744_v39 = vmax.f32 %v1741_v38, 0.0 }
0x12b5   :  { %1782 = vmatmul.f32.gmra.mxu0 %v1744_v39  ;;  %v4634_v39 = vld [vmem:[#allocation5 + $0x2b0] ss:$0 sm:$0xff] }
0x132a   :  { %v1780_v33 = vpop.f32.mrf.mxu0 }
0x132b   :  { %v1781_v36 = vadd.f32 %v4631_v30, %v1780_v33 }
0x132d   :  { %v1786_v42 = vadd.f32 %v1781_v36, %v1706_v20 }
0x132f   :  { %v1790_v43 = vsel %vm95_vm2, %v1786_v42, 0.0 }
0x1330   :  { %1791 = vadd.xlane.f32.xlu1 %v1790_v43 }
0x1332   :  { %v1783_v46 = vpop.f32.mrf.mxu0 }
0x1333   :  { %v1784_v47 = vadd.f32 %v4631_v30, %v1783_v46  ;;  %v1877_v46 = vld [vmem:[%s5925_s2] sm:$0x3] }
0x1335   :  { %v1787_v48 = vadd.f32 %v1784_v47, %v1707_v44 }
0x1337   :  { %v1793_v49 = vsel %vm95_vm2, %v1787_v48, 0.0 }
0x1338   :  { %1794 = vadd.xlane.f32.xlu2 %v1793_v49 }
0x13a3   :  { %v1792_v50 = vpop.xlane.xlu1 %1791 }
0x13a4   :  { %v1796_v51 = vmul.f32 %v1792_v50, %v5175_v25 }
0x13a6   :  { %v1798_v52 = vsub.f32 %v1786_v42, %v1796_v51 }
0x13a8   :  { %v1800_v53 = vmul.f32 %v1798_v52, %v1798_v52 }
0x13aa   :  { %v1802_v54 = vsel %vm95_vm2, %v1800_v53, 0.0 }
0x13ab   :  { %1803 = vadd.xlane.f32.xlu2 %v1802_v54  ;;  %v1795_v37 = vpop.xlane.xlu2 %1794 }
0x13ac   :  { %v1797_v55 = vmul.f32 %v1795_v37, %v5175_v25 }
0x13ae   :  { %v1799_v56 = vsub.f32 %v1787_v48, %v1797_v55 }
0x13b0   :  { %v1801_v45 = vmul.f32 %v1799_v56, %v1799_v56 }
0x13b2   :  { %v1805_v57 = vsel %vm95_vm2, %v1801_v45, 0.0 }
0x13b3   :  { %1806 = vadd.xlane.f32.xlu2 %v1805_v57 }
0x141e   :  { %v1804_v58 = vpop.xlane.xlu2 %1803 }
0x141f   :  { %v1808_v40 = vmul.f32 %v1804_v58, %v5175_v25 }
0x1421   :  { %v1810_v60 = vadd.f32 1e-05, %v1808_v40 }
0x1423   :  { %4713 = vrsqrt.f32 %v1810_v60  ;;  %vm1818_vm12 = vweird.f32 %v1810_v60 }
0x1426   :  { %v1807_v34 = vpop.xlane.xlu2 %1806 }
0x1427   :  { %v1809_v1 = vmul.f32 %v1807_v34, %v5175_v25 }
0x1429   :  { %v4714_v2 = vpop.eup %4713  ;;  %v1811_v4 = vadd.f32 1e-05, %v1809_v1 }
0x142a   :  { %v1813_v5 = vmul.f32 %v4714_v2, %v1810_v60  ;;  %vm1819_vm11 = vweird.f32 %v4714_v2 }
0x142b   :  { %4715 = vrsqrt.f32 %v1811_v4  ;;  %vm1820_vm13 = vmor %vm1818_vm12, %vm1819_vm11  ;;  %vm1828_vm15 = vweird.f32 %v1811_v4 }
0x142c   :  { %v1814_v7 = vmul.f32 %v4714_v2, %v1813_v5 }
0x142e   :  { %v1815_v9 = vmul.f32 0.5, %v1814_v7 }
0x1430   :  { %v1816_v10 = vsub.f32 1.5, %v1815_v9 }
0x1431   :  { %v4716_v17 = vpop.eup %4715 }
0x1432   :  { %v1817_v18 = vmul.f32 %v4714_v2, %v1816_v10  ;;  %v1823_v63 = vmul.f32 %v4716_v17, %v1811_v4  ;;  %vm1829_vm14 = vweird.f32 %v4716_v17 }
0x1433   :  { %vm1830_vm4 = vmor %vm1828_vm15, %vm1829_vm14 }
0x1434   :  { %v1821_v20 = vsel %vm1820_vm13, %v4714_v2, %v1817_v18  ;;  %v1824_v21 = vmul.f32 %v4716_v17, %v1823_v63 }
0x1435   :  { %v1832_v23 = vmul.f32 %v1821_v20, %v1798_v52 }
0x1436   :  { %v1825_v29 = vmul.f32 0.5, %v1824_v21 }
0x1437   :  { %v1835_v44 = vmul.f32 %v4632_v22, %v1832_v23 }
0x1438   :  { %v1826_v11 = vsub.f32 1.5, %v1825_v29 }
0x1439   :  { %v1838_v28 = vadd.f32 %v4633_v26, %v1835_v44 }
0x143a   :  { %v1827_v25 = vmul.f32 %v4716_v17, %v1826_v11 }
0x143b   :  { %v1841_v35 = vrot.slane %v1838_v28, 7 }
0x143c   :  { %v1831_v24 = vsel %vm1830_vm4, %v4716_v17, %v1827_v25 }
0x143d   :  { %v1833_v27 = vmul.f32 %v1831_v24, %v1799_v56 }
0x143f   :  { %v1836_v19 = vmul.f32 %v4632_v22, %v1833_v27 }
0x1441   :  { %v1839_v31 = vadd.f32 %v4633_v26, %v1836_v19 }
0x1443   :  { %v1844_v32 = vrot.slane %v1839_v31, 6 }
0x1445   :  { %v1847_v38 = vsel %vm1846_vm5, %v1841_v35, %v1844_v32 }
0x1446   :  { %4370 = vmatmul.msk.f32.vlgmr.msrb.gmra.mxu2 %vm95_vm2, %v1847_v38 }
0x14c9   :  { %v1874_v30 = vpop.f32.mrf.mxu2 }
0x14ca   :  { %v5340_v33 = vadd.f32 %v4634_v39, %v1874_v30 }
0x14cc   :  { %v1878_v36 = vmul.f32 0.5, %v5340_v33 }
0x14ce   :  { %v1879_v42 = vmul.f32 1.442695, %v1878_v36 }
0x14d0   :  { %4717 = vpow2.f32 %v1879_v42 }
0x14d6   :  { %v4718_v43 = vpop.eup %4717 }
0x14d7   :  { %1882 = vrot.lane.b32.xlu2 %v4718_v43, %s4969_s12 }
0x1531   :  { %v1883_v47 = vpop.permute.xlu2 %1882 }
0x1532   :  { %v1885_v48 = vmul.f32 %v1883_v47, %v1877_v46 }
0x1534   :  { %v1886_v49 = vadd.f32 %v1885_v48, %v5340_v33  }
0x1536   :  { %1905 = vst.msk [vmem:[#allocation2] sm:$0x3] %vm1904_vm6, %v1886_v49 }
0x1537 LB: > { %v5363_v50 = vsel %vm59_vm0, %v1888_v3, 0  ;;  %1952 = vmatpush.bf16.msra.mxu1 %v5033_v8  ;;  %1975 = vmatpush.bf16.msra.mxu2 %v5037_v13  ;;  %v1915_v51 = vpack.c.bf16 %v4957_v49, %v4957_v49  ;;  %v5384_v52 = vperm.slane %v5039_v14, 0  ;;  %v5391_v40 = vperm.slane %v5041_v15, 0  ;;  %s1913_s2 = sld [smem:[#allocation4 + %s4961_s23]]  ;;  %s4531_s28 = sshll.u32 %s4961_s23, 1  ;;  %s4961_s23 = sphi %s5351_s23, %s1911_s23   ;;  %v4957_v49 = vphi %v1886_v49, %v3989_v49  }
0x1538   : > { %1930 = vmatpush.bf16.msra.mxu0 %v5363_v50  ;;  %1997 = vmatpush.bf16.msra.mxu3 %v5363_v50  ;;  %v5402_v4 = vperm.slane %v5043_v16, 0  ;;  %s4285_s29 = scalar_lea.vmem [#allocation2], %s4531_s28  ;;  %s1911_s23 = sadd.s32 1, %s4961_s23  }
0x1539   : > { %p1908_p0 = scmp.ge.s32.totalorder %s1911_s23, 7  }
0x153a   :  { %v4036_v14 = vld [vmem:[%s5926_s3 + $0x8] sm:$0xff] (%p1908_p0)  ;;  %v4037_v15 = vld [vmem:[%s5926_s3 + $0x10] sm:$0xff] (%p1908_p0)  ;;  %s4269_s0 = sshll.u32 (%p1908_p0), %s5929_s6, 4  ;;  %s4270_s0 = int_to_ptr.hbm [resolvable:$true] %s4269_s0 }
0x153b   : > { %4371 = vmatmul.msk.bf16.vlgmr.msra.gmra.mxu0 %vm130_vm3, %v1915_v51  ;;  %1953 = vmatpush.bf16.msra.mxu1 %v5031_v6  ;;  %v4081_v16 = vld [vmem:[#allocation5 + $0x318] sm:$0xff] (%p1908_p0) }
0x153c   : > { %2018 = vmatpush.bf16.msrb.mxu0 %v5033_v8  ;;  %2040 = vmatpush.bf16.msrb.mxu3 %v5037_v13 }
0x153d   : > { %1976 = vmatpush.bf16.msra.mxu2 %v5035_v12  ;;  %s5398_s24 = smul.f32 0.125, %s1913_s2  ;;  %s4255_s2 = sshll.u32 (%p1908_p0), %s5928_s5, 4  ;;  %s4256_s2 = int_to_ptr.hbm [resolvable:$true] %s4255_s2 }
0x153f   : > { %2060 = vmatpush.bf16.msrb.mxu1 %v5363_v50  ;;  %s1982_s25 = smul.f32 0.5, %s5398_s24 }
0x1540   : > { %2019 = vmatpush.bf16.msrb.mxu0 %v5031_v6  ;;  %2041 = vmatpush.bf16.msrb.mxu3 %v5035_v12 }
0x1541   : > { %2081 = vmatpush.bf16.msrb.mxu2 %v5033_v8  ;;  %v5404_v7 = vstv %s1982_s25  ;;  %s4982_s25 = smov (%p1908_p0), [#allocation9]  }
0x1544   : > { %2103 = vmatpush.bf16.msra.mxu0 %v5037_v13 }
0x1545   : > { %2082 = vmatpush.bf16.msrb.mxu2 %v5031_v6 }
0x1548   : > { %2104 = vmatpush.bf16.msra.mxu0 %v5035_v12 }
0x15b8   : > { %v1932_v53 = vpop.f32.mrf.mxu0 }
0x15b9   : > { %v1933_v54 = vadd.f32 %v1932_v53, %v5384_v52 }
0x15bb   : > { %v1937_v37 = vmul.f32 1.442695, %v1933_v54  ;;  %vm1936_vm7 = vcmp.gt.f32.partialorder %v1933_v54, 0.0 }
0x15bd   : > { %4719 = vpow2.f32 %v1937_v37 }
0x15c0   : > { %v1934_v55 = vpop.f32.mrf.mxu0 }
0x15c3   : > { %v4720_v56 = vpop.eup %4719 }
0x15c4   : > { %v4372_v45 = vadd.f32 -1.0, %v4720_v56 }
0x15c6   : > { %v1940_v57 = vsel %vm1936_vm7, %v1933_v54, %v4372_v45 }
0x15c7   : > { %v1941_v58 = vpack.c.bf16 %v1940_v57, %v1940_v57 }
0x15c9   : > { %4373 = vmatmul.msk.bf16.vlgmr.msra.gmra.mxu1 %vm95_vm2, %v1941_v58 }
0x15ca   : > { %2145 = vmatpush.bf16.msra.mxu1 %v5033_v8 }
0x15ce   : > { %2146 = vmatpush.bf16.msra.mxu1 %v5031_v6 }
0x1646   : > { %v1955_v41 = vpop.f32.mrf.mxu1 }
0x1647   : > { %v1956_v59 = vadd.f32 %v1955_v41, %v5391_v40 }
0x1649   : > { %v1960_v60 = vmul.f32 1.442695, %v1956_v59  ;;  %vm1959_vm8 = vcmp.gt.f32.partialorder %v1956_v59, 0.0 }
0x164b   : > { %4721 = vpow2.f32 %v1960_v60 }
0x164e   : > { %v1957_v61 = vpop.f32.mrf.mxu1 }
0x1651   : > { %v4722_v62 = vpop.eup %4721 }
0x1652   : > { %v4374_v34 = vadd.f32 -1.0, %v4722_v62 }
0x1654   : > { %v1963_v1 = vsel %vm1959_vm8, %v1956_v59, %v4374_v34 }
0x1655   : > { %v1964_v2 = vpack.c.bf16 %v1963_v1, %v1963_v1  ;;  %v5435_v1 = vstv %s5398_s24 }
0x1657   : > { %4375 = vmatmul.msk.bf16.vlgmr.msra.gmra.mxu2 %vm95_vm2, %v1964_v2 }
0x1658   : > { %2167 = vmatpush.bf16.msra.mxu2 %v5037_v13 }
0x165c   : > { %2168 = vmatpush.bf16.msra.mxu2 %v5035_v12 }
0x16da   : > { %v1978_v5 = vpop.f32.mrf.mxu2 }
0x16db   : > { %v5407_v9 = vadd.f32 %v1978_v5, %v5402_v4 }
0x16dd   : > { %v1984_v10 = vmul.f32 %v5404_v7, %v5407_v9 }
0x16df   : > { %v1985_v17 = vadd.f32 %v4957_v49, %v1984_v10 }
0x16e1   : > { %v1986_v18 = vpack.c.bf16 %v1985_v17, %v1985_v17 }
0x16e2   : > { %v1980_v63 = vpop.f32.mrf.mxu2 }
0x16e3   : > { %4376 = vmatmul.msk.bf16.vlgmr.msra.gmra.mxu3 %vm130_vm3, %v1986_v18 }
0x16e4   : > { %2124 = vmatpush.bf16.msra.mxu3 %v5363_v50 }
0x1766   : > { %v1999_v20 = vpop.f32.mrf.mxu3 }
0x1767   : > { %v2000_v21 = vadd.f32 %v1999_v20, %v5384_v52 }
0x1769   : > { %v2004_v29 = vmul.f32 1.442695, %v2000_v21  ;;  %vm2003_vm9 = vcmp.gt.f32.partialorder %v2000_v21, 0.0 }
0x176b   : > { %4723 = vpow2.f32 %v2004_v29 }
0x176e   : > { %v2001_v22 = vpop.f32.mrf.mxu3 }
0x1771   : > { %v4724_v23 = vpop.eup %4723 }
0x1772   : > { %v4377_v11 = vadd.f32 -1.0, %v4724_v23 }
0x1774   : > { %v2007_v25 = vsel %vm2003_vm9, %v2000_v21, %v4377_v11 }
0x1775   : > { %v2008_v44 = vpack.c.bf16 %v2007_v25, %v2007_v25 }
0x1777   : > { %4378 = vmatmul.msk.bf16.vlgmr.msrb.gmra.mxu0 %vm95_vm2, %v2008_v44 }
0x1778   : > { %2202 = vmatpush.bf16.msrb.mxu0 %v5363_v50 }
0x17f4   : > { %v2021_v26 = vpop.f32.mrf.mxu0 }
0x17f5   : > { %v2022_v24 = vadd.f32 %v2021_v26, %v5391_v40 }
0x17f7   : > { %v2026_v27 = vmul.f32 1.442695, %v2022_v24  ;;  %vm2025_vm10 = vcmp.gt.f32.partialorder %v2022_v24, 0.0 }
0x17f9   : > { %4725 = vpow2.f32 %v2026_v27 }
0x17fc   : > { %v2023_v19 = vpop.f32.mrf.mxu0 }
0x17ff   : > { %v4726_v28 = vpop.eup %4725 }
0x1800   : > { %v4379_v31 = vadd.f32 -1.0, %v4726_v28 }
0x1802   : > { %v2029_v35 = vsel %vm2025_vm10, %v2022_v24, %v4379_v31  ;;  %v4979_v24 = vmov 6.0  }
0x1803   : > { %v2030_v32 = vpack.c.bf16 %v2029_v35, %v2029_v35 }
0x1805   : > { %4380 = vmatmul.msk.bf16.vlgmr.msrb.gmra.mxu3 %vm95_vm2, %v2030_v32 }
0x1806   : > { %2223 = vmatpush.bf16.msrb.mxu3 %v5033_v8 }
0x180a   : > { %2224 = vmatpush.bf16.msrb.mxu3 %v5031_v6 }
0x1888   : > { %v2043_v38 = vpop.f32.mrf.mxu3 }
0x1889   : > { %v2044_v39 = vadd.f32 %v2043_v38, %v5402_v4 }
0x188b   : > { %v2047_v30 = vmul.f32 %v2044_v39, %v5404_v7  ;;  %v2183_v62 = vmul.f32 2.0, %v2044_v39 }
0x188d   : > { %v2048_v36 = vadd.f32 %v4957_v49, %v2047_v30  ;;  %v2184_v5 = vadd.f32 %v2183_v62, %v5407_v9 }
0x188f   : > { %v2049_v42 = vpack.c.bf16 %v2048_v36, %v2048_v36 }
0x1890   : > { %v2045_v43 = vpop.f32.mrf.mxu3 }
0x1891   : > { %4381 = vmatmul.msk.bf16.vlgmr.msrb.gmra.mxu1 %vm130_vm3, %v2049_v42 }
0x1892   : > { %2245 = vmatpush.bf16.msrb.mxu1 %v5037_v13 }
0x1896   : > { %2246 = vmatpush.bf16.msrb.mxu1 %v5035_v12 }
0x190e   : > { %v2062_v46 = vpop.f32.mrf.mxu1 }
0x190f   : > { %v2063_v47 = vadd.f32 %v2062_v46, %v5384_v52 }
0x1911   : > { %v2067_v48 = vmul.f32 1.442695, %v2063_v47  ;;  %vm2066_vm11 = vcmp.gt.f32.partialorder %v2063_v47, 0.0 }
0x1913   : > { %4727 = vpow2.f32 %v2067_v48 }
0x1916   : > { %v2064_v51 = vpop.f32.mrf.mxu1 }
0x1919   : > { %v4728_v53 = vpop.eup %4727 }
0x191a   : > { %v4382_v54 = vadd.f32 -1.0, %v4728_v53 }
0x191c   : > { %v2070_v37 = vsel %vm2066_vm11, %v2063_v47, %v4382_v54 }
0x191d   : > { %v2071_v55 = vpack.c.bf16 %v2070_v37, %v2070_v37 }
0x191f   : > { %4383 = vmatmul.msk.bf16.vlgmr.msrb.gmra.mxu2 %vm95_vm2, %v2071_v55 }
0x1920   : > { %2265 = vmatpush.bf16.msrb.mxu2 %v5363_v50 }
0x19a2   : > { %v2084_v56 = vpop.f32.mrf.mxu2 }
0x19a3   : > { %v2085_v45 = vadd.f32 %v2084_v56, %v5391_v40 }
0x19a5   : > { %v2089_v57 = vmul.f32 1.442695, %v2085_v45  ;;  %vm2088_vm12 = vcmp.gt.f32.partialorder %v2085_v45, 0.0 }
0x19a7   : > { %4729 = vpow2.f32 %v2089_v57 }
0x19aa   : > { %v2086_v58 = vpop.f32.mrf.mxu2 }
0x19ad   : > { %v4730_v41 = vpop.eup %4729 }
0x19ae   : > { %v4384_v59 = vadd.f32 -1.0, %v4730_v41 }
0x19b0   : > { %v2092_v60 = vsel %vm2088_vm12, %v2085_v45, %v4384_v59 }
0x19b1   : > { %v2093_v61 = vpack.c.bf16 %v2092_v60, %v2092_v60 }
0x19b3   : > { %4385 = vmatmul.msk.bf16.vlgmr.msra.gmra.mxu0 %vm95_vm2, %v2093_v61 }
0x19b4   : > { %2286 = vmatpush.bf16.msra.mxu0 %v5033_v8 }
0x19b8   : > { %2287 = vmatpush.bf16.msra.mxu0 %v5031_v6 }
0x1a30   : > { %v2106_v34 = vpop.f32.mrf.mxu0 }
0x1a31   : > { %v2107_v2 = vadd.f32 %v2106_v34, %v5402_v4 }
0x1a33   : > { %v2111_v10 = vmul.f32 %v5435_v1, %v2107_v2  ;;  %v2185_v17 = vmul.f32 2.0, %v2107_v2 }
0x1a35   : > { %v2112_v18 = vadd.f32 %v4957_v49, %v2111_v10  ;;  %v2186_v63 = vadd.f32 %v2185_v17, %v2184_v5 }
0x1a37   : > { %v2113_v20 = vpack.c.bf16 %v2112_v18, %v2112_v18 }
0x1a38   : > { %v2108_v21 = vpop.f32.mrf.mxu0 }
0x1a39   : > { %4386 = vmatmul.msk.bf16.vlgmr.msra.gmra.mxu3 %vm130_vm3, %v2113_v20 }
0x1a3a   : > { %2308 = vmatpush.bf16.msra.mxu3 %v5037_v13 }
0x1a3e   : > { %2309 = vmatpush.bf16.msra.mxu3 %v5035_v12 }
0x1abc   : > { %v2126_v29 = vpop.f32.mrf.mxu3 }
0x1abd   : > { %v2127_v22 = vadd.f32 %v2126_v29, %v5384_v52 }
0x1abf   : > { %v2131_v23 = vmul.f32 1.442695, %v2127_v22  ;;  %vm2130_vm13 = vcmp.gt.f32.partialorder %v2127_v22, 0.0 }
0x1ac1   : > { %4731 = vpow2.f32 %v2131_v23 }
0x1ac2   : > { %4733 = vrcp.f32 %v4979_v24 }
0x1ac4   : > { %v2128_v9 = vpop.f32.mrf.mxu3 }
0x1ac7   : > { %v4732_v11 = vpop.eup %4731 }
0x1ac8   : > { %v4387_v25 = vadd.f32 -1.0, %v4732_v11  ;;  %v4734_v27 = vpop.eup %4733 }
0x1ac9   : > { %v2175_v19 = vmul.f32 6.0, %v4734_v27  ;;  %vm2179_vm14 = vweird.f32 %v4734_v27 }
0x1aca   : > { %v2134_v44 = vsel %vm2130_vm13, %v2127_v22, %v4387_v25 }
0x1acb   : > { %v2135_v26 = vpack.c.bf16 %v2134_v44, %v2134_v44  ;;  %v2176_v28 = vsub.f32 1.0, %v2175_v19 }
0x1acd   : > { %4388 = vmatmul.msk.bf16.vlgmr.msra.gmra.mxu1 %vm95_vm2, %v2135_v26  ;;  %v2177_v31 = vmul.f32 %v4734_v27, %v2176_v28 }
0x1ace   : > { %2328 = vmatpush.bf16.msra.mxu1 %v5363_v50 }
0x1acf   : > { %v2178_v35 = vadd.f32 %v4734_v27, %v2177_v31 }
0x1ad1   : > { %v2180_v39 = vsel %vm2179_vm14, %v4734_v27, %v2178_v35 }
0x1ad2   : > { %4553 = vpush %v2180_v39 }
0x1b03   : > { %s4554_s26 = spop %4553 }
0x1b04   : > { %s2182_s27 = smul.f32 %s4554_s26, %s5398_s24  ;;  %s4267_s26 = sshll.u32 (%p1908_p0), %s4982_s25, 4  ;;  %s4268_s26 = int_to_ptr.vmem [resolvable:$true] %s4267_s26 }
0x1b06   : > { %v5453_v53 = vstv %s2182_s27 }
0x1b4a   : > { %v2148_v32 = vpop.f32.mrf.mxu1 }
0x1b4b   : > { %v2149_v38 = vadd.f32 %v2148_v32, %v5391_v40 }
0x1b4d   : > { %v2153_v30 = vmul.f32 1.442695, %v2149_v38  ;;  %vm2152_vm15 = vcmp.gt.f32.partialorder %v2149_v38, 0.0 }
0x1b4f   : > { %4735 = vpow2.f32 %v2153_v30 }
0x1b52   : > { %v2150_v36 = vpop.f32.mrf.mxu1 }
0x1b55   : > { %v4736_v42 = vpop.eup %4735 }
0x1b56   : > { %v4389_v43 = vadd.f32 -1.0, %v4736_v42 }
0x1b58   : > { %v2156_v46 = vsel %vm2152_vm15, %v2149_v38, %v4389_v43 }
0x1b59   : > { %v2157_v47 = vpack.c.bf16 %v2156_v46, %v2156_v46 }
0x1b5b   : > { %4390 = vmatmul.msk.bf16.vlgmr.msra.gmra.mxu2 %vm95_vm2, %v2157_v47 }
0x1b5c   : > { %2349 = vmatpush.bf16.msra.mxu2 %v5033_v8 }
0x1b60   : > { %2350 = vmatpush.bf16.msra.mxu2 %v5031_v6 }
0x1bde   : > { %v2170_v48 = vpop.f32.mrf.mxu2 }
0x1bdf   : > { %v2171_v51 = vadd.f32 %v2170_v48, %v5402_v4 }
0x1be1   : > { %v2187_v54 = vadd.f32 %v2186_v63, %v2171_v51 }
0x1be3   : > { %v2189_v37 = vmul.f32 %v5453_v53, %v2187_v54 }
0x1be5   : > { %v5457_v55 = vadd.f32 %v4957_v49, %v2189_v37 }
0x1be6   : > { %v2172_v56 = vpop.f32.mrf.mxu2 }
0x1be7   : > { %v2191_v45 = vpack.c.bf16 %v5457_v55, %v5457_v55 }
0x1be9   : > { %4391 = vmatmul.msk.bf16.vlgmr.msrb.gmra.mxu0 %vm130_vm3, %v2191_v45 }
0x1bea   : > { %2371 = vmatpush.bf16.msrb.mxu0 %v5037_v13 }
0x1bee   : > { %2372 = vmatpush.bf16.msrb.mxu0 %v5035_v12 }
0x1c66   : > { %v2204_v57 = vpop.f32.mrf.mxu0 }
0x1c67   : > { %v2205_v58 = vadd.f32 %v2204_v57, %v5384_v52 }
0x1c69   : > { %v2209_v41 = vmul.f32 1.442695, %v2205_v58  ;;  %vm2208_vm4 = vcmp.gt.f32.partialorder %v2205_v58, 0.0 }
0x1c6b   : > { %4737 = vpow2.f32 %v2209_v41 }
0x1c6e   : > { %v2206_v59 = vpop.f32.mrf.mxu0 }
0x1c71   : > { %v4738_v60 = vpop.eup %4737 }
0x1c72   : > { %v4392_v61 = vadd.f32 -1.0, %v4738_v60 }
0x1c74   : > { %v2212_v49 = vsel %vm2208_vm4, %v2205_v58, %v4392_v61 }
0x1c75   : > { %v2213_v62 = vpack.c.bf16 %v2212_v49, %v2212_v49 }
0x1c77   : > { %4393 = vmatmul.msk.bf16.vlgmr.msrb.gmra.mxu3 %vm95_vm2, %v2213_v62 }
0x1c78   : > { %2391 = vmatpush.bf16.msrb.mxu3 %v5363_v50 }
0x1cfa   : > { %v2226_v34 = vpop.f32.mrf.mxu3 }
0x1cfb   : > { %v2227_v2 = vadd.f32 %v2226_v34, %v5391_v40 }
0x1cfd   : > { %v2231_v5 = vmul.f32 1.442695, %v2227_v2  ;;  %vm2230_vm5 = vcmp.gt.f32.partialorder %v2227_v2, 0.0 }
0x1cff   : > { %4739 = vpow2.f32 %v2231_v5 }
0x1d02   : > { %v2228_v10 = vpop.f32.mrf.mxu3 }
0x1d05   : > { %v4740_v17 = vpop.eup %4739 }
0x1d06   : > { %v4394_v18 = vadd.f32 -1.0, %v4740_v17 }
0x1d08   : > { %v2234_v63 = vsel %vm2230_vm5, %v2227_v2, %v4394_v18 }
0x1d09   : > { %v2235_v20 = vpack.c.bf16 %v2234_v63, %v2234_v63 }
0x1d0b   : > { %4395 = vmatmul.msk.bf16.vlgmr.msrb.gmra.mxu1 %vm95_vm2, %v2235_v20 }
0x1d0c   : > { %2412 = vmatpush.bf16.msrb.mxu1 %v5033_v8 }
0x1d10   : > { %2413 = vmatpush.bf16.msrb.mxu1 %v5031_v6 }
0x1d88   : > { %v2248_v21 = vpop.f32.mrf.mxu1 }
0x1d89   : > { %v5472_v29 = vadd.f32 %v2248_v21, %v5402_v4 }
0x1d8b   : > { %v2252_v22 = vmul.f32 %v5472_v29, %v5404_v7 }
0x1d8d   : > { %v2253_v23 = vadd.f32 %v2252_v22, %v5457_v55 }
0x1d8f   : > { %v2254_v9 = vpack.c.bf16 %v2253_v23, %v2253_v23 }
0x1d90   : > { %v2250_v11 = vpop.f32.mrf.mxu1 }
0x1d91   : > { %4396 = vmatmul.msk.bf16.vlgmr.msrb.gmra.mxu2 %vm130_vm3, %v2254_v9 }
0x1d92   : > { %2434 = vmatpush.bf16.msrb.mxu2 %v5037_v13 }
0x1d96   : > { %2435 = vmatpush.bf16.msrb.mxu2 %v5035_v12 }
0x1e14   : > { %v2267_v25 = vpop.f32.mrf.mxu2 }
0x1e15   : > { %v2268_v44 = vadd.f32 %v2267_v25, %v5384_v52 }
0x1e17   : > { %v2272_v26 = vmul.f32 1.442695, %v2268_v44  ;;  %vm2271_vm7 = vcmp.gt.f32.partialorder %v2268_v44, 0.0 }
0x1e19   : > { %4741 = vpow2.f32 %v2272_v26 }
0x1e1c   : > { %v2269_v24 = vpop.f32.mrf.mxu2 }
0x1e1f   : > { %v4742_v27 = vpop.eup %4741 }
0x1e20   : > { %v4397_v19 = vadd.f32 -1.0, %v4742_v27 }
0x1e22   : > { %v2275_v28 = vsel %vm2271_vm7, %v2268_v44, %v4397_v19 }
0x1e23   : > { %v2276_v31 = vpack.c.bf16 %v2275_v28, %v2275_v28 }
0x1e25   : > { %4398 = vmatmul.msk.bf16.vlgmr.msra.gmra.mxu0 %vm95_vm2, %v2276_v31 }
0x1e26   : > { %2459 = vmatpush.bf16.msra.mxu0 %v5363_v50 }
0x1ea2   : > { %v2289_v35 = vpop.f32.mrf.mxu0 }
0x1ea3   : > { %v2290_v32 = vadd.f32 %v2289_v35, %v5391_v40 }
0x1ea5   : > { %v2294_v38 = vmul.f32 1.442695, %v2290_v32  ;;  %vm2293_vm8 = vcmp.gt.f32.partialorder %v2290_v32, 0.0 }
0x1ea7   : > { %4743 = vpow2.f32 %v2294_v38 }
0x1eaa   : > { %v2291_v39 = vpop.f32.mrf.mxu0 }
0x1ead   : > { %v4744_v30 = vpop.eup %4743 }
0x1eae   : > { %v4399_v36 = vadd.f32 -1.0, %v4744_v30 }
0x1eb0   : > { %v2297_v42 = vsel %vm2293_vm8, %v2290_v32, %v4399_v36 }
0x1eb1   : > { %v2298_v43 = vpack.c.bf16 %v2297_v42, %v2297_v42 }
0x1eb3   : > { %4400 = vmatmul.msk.bf16.vlgmr.msra.gmra.mxu3 %vm95_vm2, %v2298_v43 }
0x1eb4   : > { %2480 = vmatpush.bf16.msra.mxu3 %v5033_v8 }
0x1eb8   : > { %2481 = vmatpush.bf16.msra.mxu3 %v5031_v6 }
0x1f36   : > { %v2311_v46 = vpop.f32.mrf.mxu3 }
0x1f37   : > { %v2312_v47 = vadd.f32 %v2311_v46, %v5402_v4 }
0x1f39   : > { %v2315_v48 = vmul.f32 %v2312_v47, %v5404_v7  ;;  %v2441_v63 = vmul.f32 2.0, %v2312_v47 }
0x1f3b   : > { %v2316_v51 = vadd.f32 %v2315_v48, %v5457_v55  ;;  %v2442_v22 = vadd.f32 %v2441_v63, %v5472_v29 }
0x1f3d   : > { %v2317_v54 = vpack.c.bf16 %v2316_v51, %v2316_v51 }
0x1f3e   : > { %v2313_v37 = vpop.f32.mrf.mxu3 }
0x1f3f   : > { %4401 = vmatmul.msk.bf16.vlgmr.msra.gmra.mxu1 %vm130_vm3, %v2317_v54 }
0x1f40   : > { %2502 = vmatpush.bf16.msra.mxu1 %v5037_v13 }
0x1f44   : > { %2503 = vmatpush.bf16.msra.mxu1 %v5035_v12 }
0x1fbc   : > { %v2330_v56 = vpop.f32.mrf.mxu1 }
0x1fbd   : > { %v2331_v45 = vadd.f32 %v2330_v56, %v5384_v52 }
0x1fbf   : > { %v2335_v57 = vmul.f32 1.442695, %v2331_v45  ;;  %vm2334_vm9 = vcmp.gt.f32.partialorder %v2331_v45, 0.0 }
0x1fc1   : > { %4745 = vpow2.f32 %v2335_v57 }
0x1fc4   : > { %v2332_v58 = vpop.f32.mrf.mxu1 }
0x1fc7   : > { %v4746_v41 = vpop.eup %4745 }
0x1fc8   : > { %v4402_v59 = vadd.f32 -1.0, %v4746_v41 }
0x1fca   : > { %v2338_v60 = vsel %vm2334_vm9, %v2331_v45, %v4402_v59 }
0x1fcb   : > { %v2339_v61 = vpack.c.bf16 %v2338_v60, %v2338_v60 }
0x1fcd   : > { %4403 = vmatmul.msk.bf16.vlgmr.msra.gmra.mxu2 %vm95_vm2, %v2339_v61 }
0x1fce   : > { %2522 = vmatpush.bf16.msra.mxu2 %v5363_v50 }
0x2050   : > { %v2352_v49 = vpop.f32.mrf.mxu2 }
0x2051   : > { %v2353_v62 = vadd.f32 %v2352_v49, %v5391_v40 }
0x2053   : > { %v2357_v34 = vmul.f32 1.442695, %v2353_v62  ;;  %vm2356_vm10 = vcmp.gt.f32.partialorder %v2353_v62, 0.0 }
0x2055   : > { %4747 = vpow2.f32 %v2357_v34 }
0x2058   : > { %v2354_v2 = vpop.f32.mrf.mxu2 }
0x205b   : > { %v4748_v5 = vpop.eup %4747 }
0x205c   : > { %v4404_v10 = vadd.f32 -1.0, %v4748_v5 }
0x205e   : > { %v2360_v17 = vsel %vm2356_vm10, %v2353_v62, %v4404_v10 }
0x205f   : > { %v2361_v18 = vpack.c.bf16 %v2360_v17, %v2360_v17 }
0x2061   : > { %4405 = vmatmul.msk.bf16.vlgmr.msrb.gmra.mxu0 %vm95_vm2, %v2361_v18 }
0x2062   : > { %2543 = vmatpush.bf16.msrb.mxu0 %v5033_v8 }
0x2066   : > { %2544 = vmatpush.bf16.msrb.mxu0 %v5031_v6 }
0x20de   : > { %v2374_v20 = vpop.f32.mrf.mxu0 }
0x20df   : > { %v2375_v21 = vadd.f32 %v2374_v20, %v5402_v4 }
0x20e1   : > { %v2378_v23 = vmul.f32 %v2375_v21, %v5435_v1  ;;  %v2443_v9 = vmul.f32 2.0, %v2375_v21 }
0x20e3   : > { %v2379_v11 = vadd.f32 %v2378_v23, %v5457_v55  ;;  %v2444_v25 = vadd.f32 %v2443_v9, %v2442_v22 }
0x20e5   : > { %v2380_v44 = vpack.c.bf16 %v2379_v11, %v2379_v11 }
0x20e6   : > { %v2376_v26 = vpop.f32.mrf.mxu0 }
0x20e7   : > { %4406 = vmatmul.msk.bf16.vlgmr.msrb.gmra.mxu3 %vm130_vm3, %v2380_v44 }
0x20e8   : > { %2565 = vmatpush.bf16.msrb.mxu3 %v5037_v13 }
0x20ec   : > { %2566 = vmatpush.bf16.msrb.mxu3 %v5035_v12 }
0x216a   : > { %v2393_v24 = vpop.f32.mrf.mxu3 }
0x216b   : > { %v2394_v27 = vadd.f32 %v2393_v24, %v5384_v52 }
0x216d   : > { %v2398_v19 = vmul.f32 1.442695, %v2394_v27  ;;  %vm2397_vm11 = vcmp.gt.f32.partialorder %v2394_v27, 0.0 }
0x216f   : > { %4749 = vpow2.f32 %v2398_v19 }
0x2172   : > { %v2395_v29 = vpop.f32.mrf.mxu3 }
0x2175   : > { %v4750_v28 = vpop.eup %4749 }
0x2176   : > { %v4407_v31 = vadd.f32 -1.0, %v4750_v28 }
0x2178   : > { %v2401_v35 = vsel %vm2397_vm11, %v2394_v27, %v4407_v31 }
0x2179   : > { %v2402_v32 = vpack.c.bf16 %v2401_v35, %v2401_v35 }
0x217b   : > { %4408 = vmatmul.msk.bf16.vlgmr.msrb.gmra.mxu1 %vm95_vm2, %v2402_v32 }
0x217c   : > { %2585 = vmatpush.bf16.msrb.mxu1 %v5363_v50 }
0x21f8   : > { %v2415_v38 = vpop.f32.mrf.mxu1 }
0x21f9   : > { %v2416_v39 = vadd.f32 %v2415_v38, %v5391_v40 }
0x21fb   : > { %v2420_v30 = vmul.f32 1.442695, %v2416_v39  ;;  %vm2419_vm12 = vcmp.gt.f32.partialorder %v2416_v39, 0.0 }
0x21fd   : > { %4751 = vpow2.f32 %v2420_v30 }
0x2200   : > { %v2417_v36 = vpop.f32.mrf.mxu1 }
0x2203   : > { %v4752_v42 = vpop.eup %4751 }
0x2204   : > { %v4409_v43 = vadd.f32 -1.0, %v4752_v42 }
0x2206   : > { %v2423_v46 = vsel %vm2419_vm12, %v2416_v39, %v4409_v43 }
0x2207   : > { %v2424_v47 = vpack.c.bf16 %v2423_v46, %v2423_v46 }
0x2209   : > { %4410 = vmatmul.msk.bf16.vlgmr.msrb.gmra.mxu2 %vm95_vm2, %v2424_v47 }
0x220a   : > { %2606 = vmatpush.bf16.msrb.mxu2 %v5033_v8 }
0x220e   : > { %2607 = vmatpush.bf16.msrb.mxu2 %v5031_v6 }
0x228c   : > { %v2437_v48 = vpop.f32.mrf.mxu2 }
0x228d   : > { %v2438_v51 = vadd.f32 %v2437_v48, %v5402_v4 }
0x228f   : > { %v2445_v54 = vadd.f32 %v2444_v25, %v2438_v51 }
0x2291   : > { %v2446_v37 = vmul.f32 %v2445_v54, %v5453_v53 }
0x2293   : > { %v5517_v56 = vadd.f32 %v2446_v37, %v5457_v55 }
0x2294   : > { %v2439_v45 = vpop.f32.mrf.mxu2 }
0x2295   : > { %v2448_v57 = vpack.c.bf16 %v5517_v56, %v5517_v56 }
0x2297   : > { %4411 = vmatmul.msk.bf16.vlgmr.msra.gmra.mxu0 %vm130_vm3, %v2448_v57 }
0x2298   : > { %2628 = vmatpush.bf16.msra.mxu0 %v5037_v13 }
0x229c   : > { %2629 = vmatpush.bf16.msra.mxu0 %v5035_v12 }
0x2314   : > { %v2461_v58 = vpop.f32.mrf.mxu0 }
0x2315   : > { %v2462_v41 = vadd.f32 %v2461_v58, %v5384_v52 }
0x2317   : > { %v2466_v59 = vmul.f32 1.442695, %v2462_v41  ;;  %vm2465_vm13 = vcmp.gt.f32.partialorder %v2462_v41, 0.0 }
0x2319   : > { %4753 = vpow2.f32 %v2466_v59 }
0x231c   : > { %v2463_v60 = vpop.f32.mrf.mxu0 }
0x231f   : > { %v4754_v61 = vpop.eup %4753 }
0x2320   : > { %v4412_v49 = vadd.f32 -1.0, %v4754_v61 }
0x2322   : > { %v2469_v55 = vsel %vm2465_vm13, %v2462_v41, %v4412_v49 }
0x2323   : > { %v2470_v62 = vpack.c.bf16 %v2469_v55, %v2469_v55 }
0x2325   : > { %4413 = vmatmul.msk.bf16.vlgmr.msra.gmra.mxu3 %vm95_vm2, %v2470_v62 }
0x2326   : > { %2648 = vmatpush.bf16.msra.mxu3 %v5363_v50 }
0x23a8   : > { %v2483_v34 = vpop.f32.mrf.mxu3 }
0x23a9   : > { %v2484_v2 = vadd.f32 %v2483_v34, %v5391_v40 }
0x23ab   : > { %v2488_v5 = vmul.f32 1.442695, %v2484_v2  ;;  %vm2487_vm14 = vcmp.gt.f32.partialorder %v2484_v2, 0.0 }
0x23ad   : > { %4755 = vpow2.f32 %v2488_v5 }
0x23b0   : > { %v2485_v10 = vpop.f32.mrf.mxu3 }
0x23b3   : > { %v4756_v17 = vpop.eup %4755 }
0x23b4   : > { %v4414_v18 = vadd.f32 -1.0, %v4756_v17 }
0x23b6   : > { %v2491_v63 = vsel %vm2487_vm14, %v2484_v2, %v4414_v18 }
0x23b7   : > { %v2492_v20 = vpack.c.bf16 %v2491_v63, %v2491_v63 }
0x23b9   : > { %4415 = vmatmul.msk.bf16.vlgmr.msra.gmra.mxu1 %vm95_vm2, %v2492_v20 }
0x23ba   : > { %2669 = vmatpush.bf16.msra.mxu1 %v5033_v8 }
0x23be   : > { %2670 = vmatpush.bf16.msra.mxu1 %v5031_v6 }
0x2436   : > { %v2505_v21 = vpop.f32.mrf.mxu1 }
0x2437   : > { %v5532_v22 = vadd.f32 %v2505_v21, %v5402_v4 }
0x2439   : > { %v2509_v23 = vmul.f32 %v5532_v22, %v5404_v7 }
0x243b   : > { %v2510_v9 = vadd.f32 %v2509_v23, %v5517_v56 }
0x243d   : > { %v2511_v11 = vpack.c.bf16 %v2510_v9, %v2510_v9 }
0x243e   : > { %v2507_v25 = vpop.f32.mrf.mxu1 }
0x243f   : > { %4416 = vmatmul.msk.bf16.vlgmr.msra.gmra.mxu2 %vm130_vm3, %v2511_v11 }
0x2440   : > { %2691 = vmatpush.bf16.msra.mxu2 %v5037_v13 }
0x2444   : > { %2692 = vmatpush.bf16.msra.mxu2 %v5035_v12 }
0x24c2   : > { %v2524_v44 = vpop.f32.mrf.mxu2 }
0x24c3   : > { %v2525_v26 = vadd.f32 %v2524_v44, %v5384_v52 }
0x24c5   : > { %v2529_v24 = vmul.f32 1.442695, %v2525_v26  ;;  %vm2528_vm15 = vcmp.gt.f32.partialorder %v2525_v26, 0.0 }
0x24c7   : > { %4757 = vpow2.f32 %v2529_v24 }
0x24ca   : > { %v2526_v27 = vpop.f32.mrf.mxu2 }
0x24cd   : > { %v4758_v19 = vpop.eup %4757 }
0x24ce   : > { %v4417_v29 = vadd.f32 -1.0, %v4758_v19 }
0x24d0   : > { %v2532_v28 = vsel %vm2528_vm15, %v2525_v26, %v4417_v29 }
0x24d1   : > { %v2533_v31 = vpack.c.bf16 %v2532_v28, %v2532_v28 }
0x24d3   : > { %4418 = vmatmul.msk.bf16.vlgmr.msrb.gmra.mxu0 %vm95_vm2, %v2533_v31 }
0x24d4   : > { %2716 = vmatpush.bf16.msrb.mxu0 %v5363_v50 }
0x2550   : > { %v2546_v35 = vpop.f32.mrf.mxu0 }
0x2551   : > { %v2547_v32 = vadd.f32 %v2546_v35, %v5391_v40 }
0x2553   : > { %v2551_v38 = vmul.f32 1.442695, %v2547_v32  ;;  %vm2550_vm4 = vcmp.gt.f32.partialorder %v2547_v32, 0.0 }
0x2555   : > { %4759 = vpow2.f32 %v2551_v38 }
0x2558   : > { %v2548_v39 = vpop.f32.mrf.mxu0 }
0x255b   : > { %v4760_v30 = vpop.eup %4759 }
0x255c   : > { %v4419_v36 = vadd.f32 -1.0, %v4760_v30 }
0x255e   : > { %v2554_v42 = vsel %vm2550_vm4, %v2547_v32, %v4419_v36 }
0x255f   : > { %v2555_v43 = vpack.c.bf16 %v2554_v42, %v2554_v42 }
0x2561   : > { %4420 = vmatmul.msk.bf16.vlgmr.msrb.gmra.mxu3 %vm95_vm2, %v2555_v43 }
0x2562   : > { %2737 = vmatpush.bf16.msrb.mxu3 %v5033_v8 }
0x2566   : > { %2738 = vmatpush.bf16.msrb.mxu3 %v5031_v6 }
0x25e4   : > { %v2568_v46 = vpop.f32.mrf.mxu3 }
0x25e5   : > { %v2569_v47 = vadd.f32 %v2568_v46, %v5402_v4 }
0x25e7   : > { %v2572_v48 = vmul.f32 %v2569_v47, %v5404_v7  ;;  %v2698_v63 = vmul.f32 2.0, %v2569_v47 }
0x25e9   : > { %v2573_v51 = vadd.f32 %v2572_v48, %v5517_v56  ;;  %v2699_v23 = vadd.f32 %v2698_v63, %v5532_v22 }
0x25eb   : > { %v2574_v54 = vpack.c.bf16 %v2573_v51, %v2573_v51 }
0x25ec   : > { %v2570_v37 = vpop.f32.mrf.mxu3 }
0x25ed   : > { %4421 = vmatmul.msk.bf16.vlgmr.msrb.gmra.mxu1 %vm130_vm3, %v2574_v54 }
0x25ee   : > { %2759 = vmatpush.bf16.msrb.mxu1 %v5037_v13 }
0x25f2   : > { %2760 = vmatpush.bf16.msrb.mxu1 %v5035_v12 }
0x266a   : > { %v2587_v45 = vpop.f32.mrf.mxu1 }
0x266b   : > { %v2588_v57 = vadd.f32 %v2587_v45, %v5384_v52 }
0x266d   : > { %v2592_v58 = vmul.f32 1.442695, %v2588_v57  ;;  %vm2591_vm5 = vcmp.gt.f32.partialorder %v2588_v57, 0.0 }
0x266f   : > { %4761 = vpow2.f32 %v2592_v58 }
0x2672   : > { %v2589_v41 = vpop.f32.mrf.mxu1 }
0x2675   : > { %v4762_v59 = vpop.eup %4761 }
0x2676   : > { %v4422_v60 = vadd.f32 -1.0, %v4762_v59 }
0x2678   : > { %v2595_v61 = vsel %vm2591_vm5, %v2588_v57, %v4422_v60 }
0x2679   : > { %v2596_v49 = vpack.c.bf16 %v2595_v61, %v2595_v61 }
0x267b   : > { %4423 = vmatmul.msk.bf16.vlgmr.msrb.gmra.mxu2 %vm95_vm2, %v2596_v49 }
0x267c   : > { %2779 = vmatpush.bf16.msrb.mxu2 %v5363_v50 }
0x26fe   : > { %v2609_v55 = vpop.f32.mrf.mxu2 }
0x26ff   : > { %v2610_v62 = vadd.f32 %v2609_v55, %v5391_v40 }
0x2701   : > { %v2614_v34 = vmul.f32 1.442695, %v2610_v62  ;;  %vm2613_vm7 = vcmp.gt.f32.partialorder %v2610_v62, 0.0 }
0x2703   : > { %4763 = vpow2.f32 %v2614_v34 }
0x2706   : > { %v2611_v2 = vpop.f32.mrf.mxu2 }
0x2709   : > { %v4764_v5 = vpop.eup %4763 }
0x270a   : > { %v4424_v10 = vadd.f32 -1.0, %v4764_v5 }
0x270c   : > { %v2617_v17 = vsel %vm2613_vm7, %v2610_v62, %v4424_v10 }
0x270d   : > { %v2618_v18 = vpack.c.bf16 %v2617_v17, %v2617_v17 }
0x270f   : > { %4425 = vmatmul.msk.bf16.vlgmr.msra.gmra.mxu0 %vm95_vm2, %v2618_v18 }
0x2710   : > { %2800 = vmatpush.bf16.msra.mxu0 %v5033_v8 }
0x2714   : > { %2801 = vmatpush.bf16.msra.mxu0 %v5031_v6 }
0x278c   : > { %v2631_v20 = vpop.f32.mrf.mxu0 }
0x278d   : > { %v2632_v21 = vadd.f32 %v2631_v20, %v5402_v4 }
0x278f   : > { %v2635_v9 = vmul.f32 %v2632_v21, %v5435_v1  ;;  %v2700_v11 = vmul.f32 2.0, %v2632_v21 }
0x2791   : > { %v2636_v25 = vadd.f32 %v2635_v9, %v5517_v56  ;;  %v2701_v44 = vadd.f32 %v2700_v11, %v2699_v23 }
0x2793   : > { %v2637_v26 = vpack.c.bf16 %v2636_v25, %v2636_v25 }
0x2794   : > { %v2633_v24 = vpop.f32.mrf.mxu0 }
0x2795   : > { %4426 = vmatmul.msk.bf16.vlgmr.msra.gmra.mxu3 %vm130_vm3, %v2637_v26 }
0x2796   : > { %2822 = vmatpush.bf16.msra.mxu3 %v5037_v13 }
0x279a   : > { %2823 = vmatpush.bf16.msra.mxu3 %v5035_v12 }
0x2818   : > { %v2650_v27 = vpop.f32.mrf.mxu3 }
0x2819   : > { %v2651_v19 = vadd.f32 %v2650_v27, %v5384_v52 }
0x281b   : > { %v2655_v29 = vmul.f32 1.442695, %v2651_v19  ;;  %vm2654_vm8 = vcmp.gt.f32.partialorder %v2651_v19, 0.0 }
0x281d   : > { %4765 = vpow2.f32 %v2655_v29 }
0x2820   : > { %v2652_v22 = vpop.f32.mrf.mxu3 }
0x2823   : > { %v4766_v28 = vpop.eup %4765 }
0x2824   : > { %v4427_v31 = vadd.f32 -1.0, %v4766_v28 }
0x2826   : > { %v2658_v35 = vsel %vm2654_vm8, %v2651_v19, %v4427_v31 }
0x2827   : > { %v2659_v32 = vpack.c.bf16 %v2658_v35, %v2658_v35 }
0x2829   : > { %4428 = vmatmul.msk.bf16.vlgmr.msra.gmra.mxu1 %vm95_vm2, %v2659_v32 }
0x282a   : > { %2842 = vmatpush.bf16.msra.mxu1 %v5363_v50 }
0x28a6   : > { %v2672_v38 = vpop.f32.mrf.mxu1 }
0x28a7   : > { %v2673_v39 = vadd.f32 %v2672_v38, %v5391_v40 }
0x28a9   : > { %v2677_v30 = vmul.f32 1.442695, %v2673_v39  ;;  %vm2676_vm9 = vcmp.gt.f32.partialorder %v2673_v39, 0.0 }
0x28ab   : > { %4767 = vpow2.f32 %v2677_v30 }
0x28ae   : > { %v2674_v36 = vpop.f32.mrf.mxu1 }
0x28b1   : > { %v4768_v42 = vpop.eup %4767 }
0x28b2   : > { %v4429_v43 = vadd.f32 -1.0, %v4768_v42 }
0x28b4   : > { %v2680_v46 = vsel %vm2676_vm9, %v2673_v39, %v4429_v43 }
0x28b5   : > { %v2681_v47 = vpack.c.bf16 %v2680_v46, %v2680_v46 }
0x28b7   : > { %4430 = vmatmul.msk.bf16.vlgmr.msra.gmra.mxu2 %vm95_vm2, %v2681_v47 }
0x28b8   : > { %2863 = vmatpush.bf16.msra.mxu2 %v5033_v8 }
0x28bc   : > { %2864 = vmatpush.bf16.msra.mxu2 %v5031_v6 }
0x293a   : > { %v2694_v48 = vpop.f32.mrf.mxu2 }
0x293b   : > { %v2695_v51 = vadd.f32 %v2694_v48, %v5402_v4 }
0x293d   : > { %v2702_v54 = vadd.f32 %v2701_v44, %v2695_v51 }
0x293f   : > { %v2703_v37 = vmul.f32 %v2702_v54, %v5453_v53 }
0x2941   : > { %v5577_v45 = vadd.f32 %v2703_v37, %v5517_v56 }
0x2942   : > { %v2696_v57 = vpop.f32.mrf.mxu2 }
0x2943   : > { %v2705_v58 = vpack.c.bf16 %v5577_v45, %v5577_v45 }
0x2945   : > { %4431 = vmatmul.msk.bf16.vlgmr.msrb.gmra.mxu0 %vm130_vm3, %v2705_v58 }
0x2946   : > { %2885 = vmatpush.bf16.msrb.mxu0 %v5037_v13 }
0x294a   : > { %2886 = vmatpush.bf16.msrb.mxu0 %v5035_v12 }
0x29c2   : > { %v2718_v41 = vpop.f32.mrf.mxu0 }
0x29c3   : > { %v2719_v59 = vadd.f32 %v2718_v41, %v5384_v52 }
0x29c5   : > { %v2723_v60 = vmul.f32 1.442695, %v2719_v59  ;;  %vm2722_vm10 = vcmp.gt.f32.partialorder %v2719_v59, 0.0 }
0x29c7   : > { %4769 = vpow2.f32 %v2723_v60 }
0x29ca   : > { %v2720_v61 = vpop.f32.mrf.mxu0 }
0x29cd   : > { %v4770_v49 = vpop.eup %4769 }
0x29ce   : > { %v4432_v55 = vadd.f32 -1.0, %v4770_v49 }
0x29d0   : > { %v2726_v56 = vsel %vm2722_vm10, %v2719_v59, %v4432_v55 }
0x29d1   : > { %v2727_v62 = vpack.c.bf16 %v2726_v56, %v2726_v56 }
0x29d3   : > { %4433 = vmatmul.msk.bf16.vlgmr.msrb.gmra.mxu3 %vm95_vm2, %v2727_v62 }
0x29d4   : > { %2905 = vmatpush.bf16.msrb.mxu3 %v5363_v50 }
0x2a56   : > { %v2740_v34 = vpop.f32.mrf.mxu3 }
0x2a57   : > { %v2741_v2 = vadd.f32 %v2740_v34, %v5391_v40 }
0x2a59   : > { %v2745_v5 = vmul.f32 1.442695, %v2741_v2  ;;  %vm2744_vm11 = vcmp.gt.f32.partialorder %v2741_v2, 0.0 }
0x2a5b   : > { %4771 = vpow2.f32 %v2745_v5 }
0x2a5e   : > { %v2742_v10 = vpop.f32.mrf.mxu3 }
0x2a61   : > { %v4772_v17 = vpop.eup %4771 }
0x2a62   : > { %v4434_v18 = vadd.f32 -1.0, %v4772_v17 }
0x2a64   : > { %v2748_v63 = vsel %vm2744_vm11, %v2741_v2, %v4434_v18 }
0x2a65   : > { %v2749_v20 = vpack.c.bf16 %v2748_v63, %v2748_v63 }
0x2a67   : > { %4435 = vmatmul.msk.bf16.vlgmr.msrb.gmra.mxu1 %vm95_vm2, %v2749_v20 }
0x2a68   : > { %2926 = vmatpush.bf16.msrb.mxu1 %v5033_v8 }
0x2a6c   : > { %2927 = vmatpush.bf16.msrb.mxu1 %v5031_v6 }
0x2ae4   : > { %v2762_v21 = vpop.f32.mrf.mxu1 }
0x2ae5   : > { %v5592_v23 = vadd.f32 %v2762_v21, %v5402_v4 }
0x2ae7   : > { %v2766_v9 = vmul.f32 %v5592_v23, %v5404_v7 }
0x2ae9   : > { %v2767_v11 = vadd.f32 %v2766_v9, %v5577_v45 }
0x2aeb   : > { %v2768_v25 = vpack.c.bf16 %v2767_v11, %v2767_v11 }
0x2aec   : > { %v2764_v44 = vpop.f32.mrf.mxu1 }
0x2aed   : > { %4436 = vmatmul.msk.bf16.vlgmr.msrb.gmra.mxu2 %vm130_vm3, %v2768_v25 }
0x2aee   : > { %2948 = vmatpush.bf16.msrb.mxu2 %v5037_v13 }
0x2af2   : > { %2949 = vmatpush.bf16.msrb.mxu2 %v5035_v12 }
0x2b70   : > { %v2781_v26 = vpop.f32.mrf.mxu2 }
0x2b71   : > { %v2782_v24 = vadd.f32 %v2781_v26, %v5384_v52 }
0x2b73   : > { %v2786_v27 = vmul.f32 1.442695, %v2782_v24  ;;  %vm2785_vm12 = vcmp.gt.f32.partialorder %v2782_v24, 0.0 }
0x2b75   : > { %4773 = vpow2.f32 %v2786_v27 }
0x2b78   : > { %v2783_v19 = vpop.f32.mrf.mxu2 }
0x2b7b   : > { %v4774_v29 = vpop.eup %4773 }
0x2b7c   : > { %v4437_v22 = vadd.f32 -1.0, %v4774_v29 }
0x2b7e   : > { %v2789_v28 = vsel %vm2785_vm12, %v2782_v24, %v4437_v22 }
0x2b7f   : > { %v2790_v31 = vpack.c.bf16 %v2789_v28, %v2789_v28 }
0x2b81   : > { %4438 = vmatmul.msk.bf16.vlgmr.msra.gmra.mxu0 %vm95_vm2, %v2790_v31 }
0x2b82   : > { %2973 = vmatpush.bf16.msra.mxu0 %v5363_v50 }
0x2bfe   : > { %v2803_v35 = vpop.f32.mrf.mxu0 }
0x2bff   : > { %v2804_v32 = vadd.f32 %v2803_v35, %v5391_v40 }
0x2c01   : > { %v2808_v38 = vmul.f32 1.442695, %v2804_v32  ;;  %vm2807_vm13 = vcmp.gt.f32.partialorder %v2804_v32, 0.0 }
0x2c03   : > { %4775 = vpow2.f32 %v2808_v38 }
0x2c06   : > { %v2805_v39 = vpop.f32.mrf.mxu0 }
0x2c09   : > { %v4776_v30 = vpop.eup %4775 }
0x2c0a   : > { %v4439_v36 = vadd.f32 -1.0, %v4776_v30 }
0x2c0c   : > { %v2811_v42 = vsel %vm2807_vm13, %v2804_v32, %v4439_v36 }
0x2c0d   : > { %v2812_v43 = vpack.c.bf16 %v2811_v42, %v2811_v42 }
0x2c0f   : > { %4440 = vmatmul.msk.bf16.vlgmr.msra.gmra.mxu3 %vm95_vm2, %v2812_v43 }
0x2c10   : > { %2994 = vmatpush.bf16.msra.mxu3 %v5033_v8 }
0x2c14   : > { %2995 = vmatpush.bf16.msra.mxu3 %v5031_v6 }
0x2c92   : > { %v2825_v46 = vpop.f32.mrf.mxu3 }
0x2c93   : > { %v2826_v47 = vadd.f32 %v2825_v46, %v5402_v4 }
0x2c95   : > { %v2829_v48 = vmul.f32 %v2826_v47, %v5404_v7  ;;  %v2955_v63 = vmul.f32 2.0, %v2826_v47 }
0x2c97   : > { %v2830_v51 = vadd.f32 %v2829_v48, %v5577_v45  ;;  %v2956_v9 = vadd.f32 %v2955_v63, %v5592_v23 }
0x2c99   : > { %v2831_v54 = vpack.c.bf16 %v2830_v51, %v2830_v51 }
0x2c9a   : > { %v2827_v37 = vpop.f32.mrf.mxu3 }
0x2c9b   : > { %4441 = vmatmul.msk.bf16.vlgmr.msra.gmra.mxu1 %vm130_vm3, %v2831_v54 }
0x2c9c   : > { %3016 = vmatpush.bf16.msra.mxu1 %v5037_v13 }
0x2ca0   : > { %3017 = vmatpush.bf16.msra.mxu1 %v5035_v12 }
0x2d18   : > { %v2844_v57 = vpop.f32.mrf.mxu1 }
0x2d19   : > { %v2845_v58 = vadd.f32 %v2844_v57, %v5384_v52 }
0x2d1b   : > { %v2849_v41 = vmul.f32 1.442695, %v2845_v58  ;;  %vm2848_vm14 = vcmp.gt.f32.partialorder %v2845_v58, 0.0 }
0x2d1d   : > { %4777 = vpow2.f32 %v2849_v41 }
0x2d20   : > { %v2846_v59 = vpop.f32.mrf.mxu1 }
0x2d23   : > { %v4778_v60 = vpop.eup %4777 }
0x2d24   : > { %v4442_v61 = vadd.f32 -1.0, %v4778_v60 }
0x2d26   : > { %v2852_v49 = vsel %vm2848_vm14, %v2845_v58, %v4442_v61 }
0x2d27   : > { %v2853_v55 = vpack.c.bf16 %v2852_v49, %v2852_v49 }
0x2d29   : > { %4443 = vmatmul.msk.bf16.vlgmr.msra.gmra.mxu2 %vm95_vm2, %v2853_v55 }
0x2d2a   : > { %3036 = vmatpush.bf16.msra.mxu2 %v5363_v50 }
0x2dac   : > { %v2866_v56 = vpop.f32.mrf.mxu2 }
0x2dad   : > { %v2867_v62 = vadd.f32 %v2866_v56, %v5391_v40 }
0x2daf   : > { %v2871_v34 = vmul.f32 1.442695, %v2867_v62  ;;  %vm2870_vm15 = vcmp.gt.f32.partialorder %v2867_v62, 0.0 }
0x2db1   : > { %4779 = vpow2.f32 %v2871_v34 }
0x2db4   : > { %v2868_v2 = vpop.f32.mrf.mxu2 }
0x2db7   : > { %v4780_v5 = vpop.eup %4779 }
0x2db8   : > { %v4444_v10 = vadd.f32 -1.0, %v4780_v5 }
0x2dba   : > { %v2874_v17 = vsel %vm2870_vm15, %v2867_v62, %v4444_v10 }
0x2dbb   : > { %v2875_v18 = vpack.c.bf16 %v2874_v17, %v2874_v17 }
0x2dbd   : > { %4445 = vmatmul.msk.bf16.vlgmr.msrb.gmra.mxu0 %vm95_vm2, %v2875_v18 }
0x2dbe   : > { %3057 = vmatpush.bf16.msrb.mxu0 %v5033_v8 }
0x2dc2   : > { %3058 = vmatpush.bf16.msrb.mxu0 %v5031_v6 }
0x2e3a   : > { %v2888_v20 = vpop.f32.mrf.mxu0 }
0x2e3b   : > { %v2889_v21 = vadd.f32 %v2888_v20, %v5402_v4 }
0x2e3d   : > { %v2892_v11 = vmul.f32 %v2889_v21, %v5435_v1  ;;  %v2957_v25 = vmul.f32 2.0, %v2889_v21 }
0x2e3f   : > { %v2893_v44 = vadd.f32 %v2892_v11, %v5577_v45  ;;  %v2958_v26 = vadd.f32 %v2957_v25, %v2956_v9 }
0x2e41   : > { %v2894_v24 = vpack.c.bf16 %v2893_v44, %v2893_v44 }
0x2e42   : > { %v2890_v27 = vpop.f32.mrf.mxu0 }
0x2e43   : > { %4446 = vmatmul.msk.bf16.vlgmr.msrb.gmra.mxu3 %vm130_vm3, %v2894_v24 }
0x2e44   : > { %3079 = vmatpush.bf16.msrb.mxu3 %v5037_v13 }
0x2e48   : > { %3080 = vmatpush.bf16.msrb.mxu3 %v5035_v12 }
0x2ec6   : > { %v2907_v19 = vpop.f32.mrf.mxu3 }
0x2ec7   : > { %v2908_v29 = vadd.f32 %v2907_v19, %v5384_v52 }
0x2ec9   : > { %v2912_v22 = vmul.f32 1.442695, %v2908_v29  ;;  %vm2911_vm4 = vcmp.gt.f32.partialorder %v2908_v29, 0.0 }
0x2ecb   : > { %4781 = vpow2.f32 %v2912_v22 }
0x2ece   : > { %v2909_v23 = vpop.f32.mrf.mxu3 }
0x2ed1   : > { %v4782_v28 = vpop.eup %4781 }
0x2ed2   : > { %v4447_v31 = vadd.f32 -1.0, %v4782_v28 }
0x2ed4   : > { %v2915_v35 = vsel %vm2911_vm4, %v2908_v29, %v4447_v31 }
0x2ed5   : > { %v2916_v32 = vpack.c.bf16 %v2915_v35, %v2915_v35 }
0x2ed7   : > { %4448 = vmatmul.msk.bf16.vlgmr.msrb.gmra.mxu1 %vm95_vm2, %v2916_v32 }
0x2ed8   : > { %3099 = vmatpush.bf16.msrb.mxu1 %v5363_v50 }
0x2f54   : > { %v2929_v38 = vpop.f32.mrf.mxu1 }
0x2f55   : > { %v2930_v39 = vadd.f32 %v2929_v38, %v5391_v40 }
0x2f57   : > { %v2934_v30 = vmul.f32 1.442695, %v2930_v39  ;;  %vm2933_vm5 = vcmp.gt.f32.partialorder %v2930_v39, 0.0 }
0x2f59   : > { %4783 = vpow2.f32 %v2934_v30 }
0x2f5c   : > { %v2931_v36 = vpop.f32.mrf.mxu1 }
0x2f5f   : > { %v4784_v42 = vpop.eup %4783 }
0x2f60   : > { %v4449_v43 = vadd.f32 -1.0, %v4784_v42 }
0x2f62   : > { %v2937_v46 = vsel %vm2933_vm5, %v2930_v39, %v4449_v43 }
0x2f63   : > { %v2938_v47 = vpack.c.bf16 %v2937_v46, %v2937_v46 }
0x2f65   : > { %4450 = vmatmul.msk.bf16.vlgmr.msrb.gmra.mxu2 %vm95_vm2, %v2938_v47 }
0x2f66   : > { %3120 = vmatpush.bf16.msrb.mxu2 %v5033_v8 }
0x2f6a   : > { %3121 = vmatpush.bf16.msrb.mxu2 %v5031_v6 }
0x2fe8   : > { %v2951_v48 = vpop.f32.mrf.mxu2 }
0x2fe9   : > { %v2952_v51 = vadd.f32 %v2951_v48, %v5402_v4 }
0x2feb   : > { %v2959_v54 = vadd.f32 %v2958_v26, %v2952_v51 }
0x2fed   : > { %v2960_v37 = vmul.f32 %v2959_v54, %v5453_v53 }
0x2fef   : > { %v5637_v57 = vadd.f32 %v2960_v37, %v5577_v45 }
0x2ff0   : > { %v2953_v58 = vpop.f32.mrf.mxu2 }
0x2ff1   : > { %v2962_v41 = vpack.c.bf16 %v5637_v57, %v5637_v57 }
0x2ff3   : > { %4451 = vmatmul.msk.bf16.vlgmr.msra.gmra.mxu0 %vm130_vm3, %v2962_v41 }
0x2ff4   : > { %3142 = vmatpush.bf16.msra.mxu0 %v5037_v13 }
0x2ff8   : > { %3143 = vmatpush.bf16.msra.mxu0 %v5035_v12 }
0x3070   : > { %v2975_v59 = vpop.f32.mrf.mxu0 }
0x3071   : > { %v2976_v60 = vadd.f32 %v2975_v59, %v5384_v52 }
0x3073   : > { %v2980_v61 = vmul.f32 1.442695, %v2976_v60  ;;  %vm2979_vm7 = vcmp.gt.f32.partialorder %v2976_v60, 0.0 }
0x3075   : > { %4785 = vpow2.f32 %v2980_v61 }
0x3078   : > { %v2977_v49 = vpop.f32.mrf.mxu0 }
0x307b   : > { %v4786_v55 = vpop.eup %4785 }
0x307c   : > { %v4452_v56 = vadd.f32 -1.0, %v4786_v55 }
0x307e   : > { %v2983_v45 = vsel %vm2979_vm7, %v2976_v60, %v4452_v56 }
0x307f   : > { %v2984_v62 = vpack.c.bf16 %v2983_v45, %v2983_v45 }
0x3081   : > { %4453 = vmatmul.msk.bf16.vlgmr.msra.gmra.mxu3 %vm95_vm2, %v2984_v62 }
0x3082   : > { %3162 = vmatpush.bf16.msra.mxu3 %v5363_v50 }
0x3104   : > { %v2997_v34 = vpop.f32.mrf.mxu3 }
0x3105   : > { %v2998_v2 = vadd.f32 %v2997_v34, %v5391_v40 }
0x3107   : > { %v3002_v5 = vmul.f32 1.442695, %v2998_v2  ;;  %vm3001_vm8 = vcmp.gt.f32.partialorder %v2998_v2, 0.0 }
0x3109   : > { %4787 = vpow2.f32 %v3002_v5 }
0x310c   : > { %v2999_v10 = vpop.f32.mrf.mxu3 }
0x310f   : > { %v4788_v17 = vpop.eup %4787 }
0x3110   : > { %v4454_v18 = vadd.f32 -1.0, %v4788_v17 }
0x3112   : > { %v3005_v63 = vsel %vm3001_vm8, %v2998_v2, %v4454_v18 }
0x3113   : > { %v3006_v20 = vpack.c.bf16 %v3005_v63, %v3005_v63 }
0x3115   : > { %4455 = vmatmul.msk.bf16.vlgmr.msra.gmra.mxu1 %vm95_vm2, %v3006_v20 }
0x3116   : > { %3183 = vmatpush.bf16.msra.mxu1 %v5033_v8 }
0x311a   : > { %3184 = vmatpush.bf16.msra.mxu1 %v5031_v6 }
0x3192   : > { %v3019_v21 = vpop.f32.mrf.mxu1 }
0x3193   : > { %v5652_v9 = vadd.f32 %v3019_v21, %v5402_v4 }
0x3195   : > { %v3023_v11 = vmul.f32 %v5652_v9, %v5404_v7 }
0x3197   : > { %v3024_v25 = vadd.f32 %v3023_v11, %v5637_v57 }
0x3199   : > { %v3025_v44 = vpack.c.bf16 %v3024_v25, %v3024_v25 }
0x319a   : > { %v3021_v26 = vpop.f32.mrf.mxu1 }
0x319b   : > { %4456 = vmatmul.msk.bf16.vlgmr.msra.gmra.mxu2 %vm130_vm3, %v3025_v44 }
0x319c   : > { %3205 = vmatpush.bf16.msra.mxu2 %v5037_v13 }
0x31a0   : > { %3206 = vmatpush.bf16.msra.mxu2 %v5035_v12 }
0x321e   : > { %v3038_v24 = vpop.f32.mrf.mxu2 }
0x321f   : > { %v3039_v27 = vadd.f32 %v3038_v24, %v5384_v52 }
0x3221   : > { %v3043_v19 = vmul.f32 1.442695, %v3039_v27  ;;  %vm3042_vm9 = vcmp.gt.f32.partialorder %v3039_v27, 0.0 }
0x3223   : > { %4789 = vpow2.f32 %v3043_v19 }
0x3226   : > { %v3040_v29 = vpop.f32.mrf.mxu2 }
0x3229   : > { %v4790_v22 = vpop.eup %4789 }
0x322a   : > { %v4457_v23 = vadd.f32 -1.0, %v4790_v22 }
0x322c   : > { %v3046_v28 = vsel %vm3042_vm9, %v3039_v27, %v4457_v23 }
0x322d   : > { %v3047_v31 = vpack.c.bf16 %v3046_v28, %v3046_v28 }
0x322f   : > { %4458 = vmatmul.msk.bf16.vlgmr.msrb.gmra.mxu0 %vm95_vm2, %v3047_v31 }
0x3230   : > { %3230 = vmatpush.bf16.msrb.mxu0 %v5363_v50 }
0x32ac   : > { %v3060_v35 = vpop.f32.mrf.mxu0 }
0x32ad   : > { %v3061_v32 = vadd.f32 %v3060_v35, %v5391_v40 }
0x32af   : > { %v3065_v38 = vmul.f32 1.442695, %v3061_v32  ;;  %vm3064_vm10 = vcmp.gt.f32.partialorder %v3061_v32, 0.0 }
0x32b1   : > { %4791 = vpow2.f32 %v3065_v38 }
0x32b4   : > { %v3062_v39 = vpop.f32.mrf.mxu0 }
0x32b7   : > { %v4792_v30 = vpop.eup %4791 }
0x32b8   : > { %v4459_v36 = vadd.f32 -1.0, %v4792_v30 }
0x32ba   : > { %v3068_v42 = vsel %vm3064_vm10, %v3061_v32, %v4459_v36 }
0x32bb   : > { %v3069_v43 = vpack.c.bf16 %v3068_v42, %v3068_v42 }
0x32bd   : > { %4460 = vmatmul.msk.bf16.vlgmr.msrb.gmra.mxu3 %vm95_vm2, %v3069_v43 }
0x32be   : > { %3251 = vmatpush.bf16.msrb.mxu3 %v5033_v8 }
0x32c2   : > { %3252 = vmatpush.bf16.msrb.mxu3 %v5031_v6 }
0x3340   : > { %v3082_v46 = vpop.f32.mrf.mxu3 }
0x3341   : > { %v3083_v47 = vadd.f32 %v3082_v46, %v5402_v4 }
0x3343   : > { %v3086_v48 = vmul.f32 %v3083_v47, %v5404_v7  ;;  %v3212_v63 = vmul.f32 2.0, %v3083_v47 }
0x3345   : > { %v3087_v51 = vadd.f32 %v3086_v48, %v5637_v57  ;;  %v3213_v11 = vadd.f32 %v3212_v63, %v5652_v9 }
0x3347   : > { %v3088_v54 = vpack.c.bf16 %v3087_v51, %v3087_v51 }
0x3348   : > { %v3084_v37 = vpop.f32.mrf.mxu3 }
0x3349   : > { %4461 = vmatmul.msk.bf16.vlgmr.msrb.gmra.mxu1 %vm130_vm3, %v3088_v54 }
0x334a   : > { %3273 = vmatpush.bf16.msrb.mxu1 %v5037_v13 }
0x334e   : > { %3274 = vmatpush.bf16.msrb.mxu1 %v5035_v12 }
0x33c6   : > { %v3101_v58 = vpop.f32.mrf.mxu1 }
0x33c7   : > { %v3102_v41 = vadd.f32 %v3101_v58, %v5384_v52 }
0x33c9   : > { %v3106_v59 = vmul.f32 1.442695, %v3102_v41  ;;  %vm3105_vm11 = vcmp.gt.f32.partialorder %v3102_v41, 0.0 }
0x33cb   : > { %4793 = vpow2.f32 %v3106_v59 }
0x33ce   : > { %v3103_v60 = vpop.f32.mrf.mxu1 }
0x33d1   : > { %v4794_v61 = vpop.eup %4793 }
0x33d2   : > { %v4462_v49 = vadd.f32 -1.0, %v4794_v61 }
0x33d4   : > { %v3109_v55 = vsel %vm3105_vm11, %v3102_v41, %v4462_v49 }
0x33d5   : > { %v3110_v56 = vpack.c.bf16 %v3109_v55, %v3109_v55 }
0x33d7   : > { %4463 = vmatmul.msk.bf16.vlgmr.msrb.gmra.mxu2 %vm95_vm2, %v3110_v56 }
0x33d8   : > { %3293 = vmatpush.bf16.msrb.mxu2 %v5363_v50 }
0x345a   : > { %v3123_v45 = vpop.f32.mrf.mxu2 }
0x345b   : > { %v3124_v62 = vadd.f32 %v3123_v45, %v5391_v40 }
0x345d   : > { %v3128_v34 = vmul.f32 1.442695, %v3124_v62  ;;  %vm3127_vm12 = vcmp.gt.f32.partialorder %v3124_v62, 0.0 }
0x345f   : > { %4795 = vpow2.f32 %v3128_v34 }
0x3462   : > { %v3125_v2 = vpop.f32.mrf.mxu2 }
0x3465   : > { %v4796_v5 = vpop.eup %4795 }
0x3466   : > { %v4464_v10 = vadd.f32 -1.0, %v4796_v5 }
0x3468   : > { %v3131_v17 = vsel %vm3127_vm12, %v3124_v62, %v4464_v10 }
0x3469   : > { %v3132_v18 = vpack.c.bf16 %v3131_v17, %v3131_v17 }
0x346b   : > { %4465 = vmatmul.msk.bf16.vlgmr.msra.gmra.mxu0 %vm95_vm2, %v3132_v18 }
0x346c   : > { %3314 = vmatpush.bf16.msra.mxu0 %v5033_v8 }
0x3470   : > { %3315 = vmatpush.bf16.msra.mxu0 %v5031_v6 }
0x34e8   : > { %v3145_v20 = vpop.f32.mrf.mxu0 }
0x34e9   : > { %v3146_v21 = vadd.f32 %v3145_v20, %v5402_v4 }
0x34eb   : > { %v3149_v25 = vmul.f32 %v3146_v21, %v5435_v1  ;;  %v3214_v44 = vmul.f32 2.0, %v3146_v21 }
0x34ed   : > { %v3150_v26 = vadd.f32 %v3149_v25, %v5637_v57  ;;  %v3215_v24 = vadd.f32 %v3214_v44, %v3213_v11 }
0x34ef   : > { %v3151_v27 = vpack.c.bf16 %v3150_v26, %v3150_v26 }
0x34f0   : > { %v3147_v19 = vpop.f32.mrf.mxu0 }
0x34f1   : > { %4466 = vmatmul.msk.bf16.vlgmr.msra.gmra.mxu3 %vm130_vm3, %v3151_v27 }
0x34f2   : > { %3336 = vmatpush.bf16.msra.mxu3 %v5037_v13 }
0x34f6   : > { %3337 = vmatpush.bf16.msra.mxu3 %v5035_v12 }
0x3574   : > { %v3164_v29 = vpop.f32.mrf.mxu3 }
0x3575   : > { %v3165_v22 = vadd.f32 %v3164_v29, %v5384_v52 }
0x3577   : > { %v3169_v23 = vmul.f32 1.442695, %v3165_v22  ;;  %vm3168_vm13 = vcmp.gt.f32.partialorder %v3165_v22, 0.0 }
0x3579   : > { %4797 = vpow2.f32 %v3169_v23 }
0x357c   : > { %v3166_v9 = vpop.f32.mrf.mxu3 }
0x357f   : > { %v4798_v28 = vpop.eup %4797 }
0x3580   : > { %v4467_v31 = vadd.f32 -1.0, %v4798_v28 }
0x3582   : > { %v3172_v35 = vsel %vm3168_vm13, %v3165_v22, %v4467_v31 }
0x3583   : > { %v3173_v32 = vpack.c.bf16 %v3172_v35, %v3172_v35 }
0x3585   : > { %4468 = vmatmul.msk.bf16.vlgmr.msra.gmra.mxu1 %vm95_vm2, %v3173_v32 }
0x3586   : > { %3356 = vmatpush.bf16.msra.mxu1 %v5363_v50 }
0x3602   : > { %v3186_v38 = vpop.f32.mrf.mxu1 }
0x3603   : > { %v3187_v39 = vadd.f32 %v3186_v38, %v5391_v40 }
0x3605   : > { %v3191_v30 = vmul.f32 1.442695, %v3187_v39  ;;  %vm3190_vm14 = vcmp.gt.f32.partialorder %v3187_v39, 0.0 }
0x3607   : > { %4799 = vpow2.f32 %v3191_v30 }
0x360a   : > { %v3188_v36 = vpop.f32.mrf.mxu1 }
0x360d   : > { %v4800_v42 = vpop.eup %4799 }
0x360e   : > { %v4469_v43 = vadd.f32 -1.0, %v4800_v42 }
0x3610   : > { %v3194_v46 = vsel %vm3190_vm14, %v3187_v39, %v4469_v43 }
0x3611   : > { %v3195_v47 = vpack.c.bf16 %v3194_v46, %v3194_v46 }
0x3613   : > { %4470 = vmatmul.msk.bf16.vlgmr.msra.gmra.mxu2 %vm95_vm2, %v3195_v47 }
0x3614   : > { %3377 = vmatpush.bf16.msra.mxu2 %v5033_v8 }
0x3618   : > { %3378 = vmatpush.bf16.msra.mxu2 %v5031_v6 }
0x3696   : > { %v3208_v48 = vpop.f32.mrf.mxu2 }
0x3697   : > { %v3209_v51 = vadd.f32 %v3208_v48, %v5402_v4 }
0x3699   : > { %v3216_v54 = vadd.f32 %v3215_v24, %v3209_v51 }
0x369b   : > { %v3217_v37 = vmul.f32 %v3216_v54, %v5453_v53 }
0x369d   : > { %v5697_v58 = vadd.f32 %v3217_v37, %v5637_v57 }
0x369e   : > { %v3210_v41 = vpop.f32.mrf.mxu2 }
0x369f   : > { %v3219_v59 = vpack.c.bf16 %v5697_v58, %v5697_v58 }
0x36a1   : > { %4471 = vmatmul.msk.bf16.vlgmr.msrb.gmra.mxu0 %vm130_vm3, %v3219_v59 }
0x36a2   : > { %3399 = vmatpush.bf16.msrb.mxu0 %v5037_v13 }
0x36a6   : > { %3400 = vmatpush.bf16.msrb.mxu0 %v5035_v12 }
0x371e   : > { %v3232_v60 = vpop.f32.mrf.mxu0 }
0x371f   : > { %v3233_v61 = vadd.f32 %v3232_v60, %v5384_v52 }
0x3721   : > { %v3237_v49 = vmul.f32 1.442695, %v3233_v61  ;;  %vm3236_vm15 = vcmp.gt.f32.partialorder %v3233_v61, 0.0 }
0x3723   : > { %4801 = vpow2.f32 %v3237_v49 }
0x3726   : > { %v3234_v55 = vpop.f32.mrf.mxu0 }
0x3729   : > { %v4802_v56 = vpop.eup %4801 }
0x372a   : > { %v4472_v45 = vadd.f32 -1.0, %v4802_v56 }
0x372c   : > { %v3240_v57 = vsel %vm3236_vm15, %v3233_v61, %v4472_v45 }
0x372d   : > { %v3241_v62 = vpack.c.bf16 %v3240_v57, %v3240_v57 }
0x372f   : > { %4473 = vmatmul.msk.bf16.vlgmr.msrb.gmra.mxu3 %vm95_vm2, %v3241_v62 }
0x3730   : > { %3419 = vmatpush.bf16.msrb.mxu3 %v5363_v50 }
0x37b2   : > { %v3254_v34 = vpop.f32.mrf.mxu3 }
0x37b3   : > { %v3255_v2 = vadd.f32 %v3254_v34, %v5391_v40 }
0x37b5   : > { %v3259_v5 = vmul.f32 1.442695, %v3255_v2  ;;  %vm3258_vm4 = vcmp.gt.f32.partialorder %v3255_v2, 0.0 }
0x37b7   : > { %4803 = vpow2.f32 %v3259_v5 }
0x37ba   : > { %v3256_v10 = vpop.f32.mrf.mxu3 }
0x37bd   : > { %v4804_v17 = vpop.eup %4803 }
0x37be   : > { %v4474_v18 = vadd.f32 -1.0, %v4804_v17 }
0x37c0   : > { %v3262_v63 = vsel %vm3258_vm4, %v3255_v2, %v4474_v18 }
0x37c1   : > { %v3263_v20 = vpack.c.bf16 %v3262_v63, %v3262_v63 }
0x37c3   : > { %4475 = vmatmul.msk.bf16.vlgmr.msrb.gmra.mxu1 %vm95_vm2, %v3263_v20 }
0x37c4   : > { %3440 = vmatpush.bf16.msrb.mxu1 %v5033_v8 }
0x37c8   : > { %3441 = vmatpush.bf16.msrb.mxu1 %v5031_v6 }
0x3840   : > { %v3276_v21 = vpop.f32.mrf.mxu1 }
0x3841   : > { %v5712_v11 = vadd.f32 %v3276_v21, %v5402_v4 }
0x3843   : > { %v3280_v25 = vmul.f32 %v5712_v11, %v5404_v7 }
0x3845   : > { %v3281_v44 = vadd.f32 %v3280_v25, %v5697_v58 }
0x3847   : > { %v3282_v26 = vpack.c.bf16 %v3281_v44, %v3281_v44 }
0x3848   : > { %v3278_v24 = vpop.f32.mrf.mxu1 }
0x3849   : > { %4476 = vmatmul.msk.bf16.vlgmr.msrb.gmra.mxu2 %vm130_vm3, %v3282_v26 }
0x384a   : > { %3462 = vmatpush.bf16.msrb.mxu2 %v5037_v13 }
0x384e   : > { %3463 = vmatpush.bf16.msrb.mxu2 %v5035_v12 }
0x38cc   : > { %v3295_v27 = vpop.f32.mrf.mxu2 }
0x38cd   : > { %v3296_v19 = vadd.f32 %v3295_v27, %v5384_v52 }
0x38cf   : > { %v3300_v29 = vmul.f32 1.442695, %v3296_v19  ;;  %vm3299_vm5 = vcmp.gt.f32.partialorder %v3296_v19, 0.0 }
0x38d1   : > { %4805 = vpow2.f32 %v3300_v29 }
0x38d4   : > { %v3297_v22 = vpop.f32.mrf.mxu2 }
0x38d7   : > { %v4806_v23 = vpop.eup %4805 }
0x38d8   : > { %v4477_v9 = vadd.f32 -1.0, %v4806_v23 }
0x38da   : > { %v3303_v28 = vsel %vm3299_vm5, %v3296_v19, %v4477_v9 }
0x38db   : > { %v3304_v31 = vpack.c.bf16 %v3303_v28, %v3303_v28 }
0x38dd   : > { %4478 = vmatmul.msk.bf16.vlgmr.msra.gmra.mxu0 %vm95_vm2, %v3304_v31 }
0x38de   : > { %3487 = vmatpush.bf16.msra.mxu0 %v5363_v50 }
0x395a   : > { %v3317_v35 = vpop.f32.mrf.mxu0 }
0x395b   : > { %v3318_v32 = vadd.f32 %v3317_v35, %v5391_v40 }
0x395d   : > { %v3322_v38 = vmul.f32 1.442695, %v3318_v32  ;;  %vm3321_vm7 = vcmp.gt.f32.partialorder %v3318_v32, 0.0 }
0x395f   : > { %4807 = vpow2.f32 %v3322_v38 }
0x3962   : > { %v3319_v39 = vpop.f32.mrf.mxu0 }
0x3965   : > { %v4808_v30 = vpop.eup %4807 }
0x3966   : > { %v4479_v36 = vadd.f32 -1.0, %v4808_v30 }
0x3968   : > { %v3325_v42 = vsel %vm3321_vm7, %v3318_v32, %v4479_v36 }
0x3969   : > { %v3326_v43 = vpack.c.bf16 %v3325_v42, %v3325_v42 }
0x396b   : > { %4480 = vmatmul.msk.bf16.vlgmr.msra.gmra.mxu3 %vm95_vm2, %v3326_v43 }
0x396c   : > { %3508 = vmatpush.bf16.msra.mxu3 %v5033_v8 }
0x3970   : > { %3509 = vmatpush.bf16.msra.mxu3 %v5031_v6 }
0x39ee   : > { %v3339_v46 = vpop.f32.mrf.mxu3 }
0x39ef   : > { %v3340_v47 = vadd.f32 %v3339_v46, %v5402_v4 }
0x39f1   : > { %v3343_v48 = vmul.f32 %v3340_v47, %v5404_v7  ;;  %v3469_v63 = vmul.f32 2.0, %v3340_v47 }
0x39f3   : > { %v3344_v51 = vadd.f32 %v3343_v48, %v5697_v58  ;;  %v3470_v25 = vadd.f32 %v3469_v63, %v5712_v11 }
0x39f5   : > { %v3345_v54 = vpack.c.bf16 %v3344_v51, %v3344_v51 }
0x39f6   : > { %v3341_v37 = vpop.f32.mrf.mxu3 }
0x39f7   : > { %4481 = vmatmul.msk.bf16.vlgmr.msra.gmra.mxu1 %vm130_vm3, %v3345_v54 }
0x39f8   : > { %3530 = vmatpush.bf16.msra.mxu1 %v5037_v13 }
0x39fc   : > { %3531 = vmatpush.bf16.msra.mxu1 %v5035_v12 }
0x3a74   : > { %v3358_v41 = vpop.f32.mrf.mxu1 }
0x3a75   : > { %v3359_v59 = vadd.f32 %v3358_v41, %v5384_v52 }
0x3a77   : > { %v3363_v60 = vmul.f32 1.442695, %v3359_v59  ;;  %vm3362_vm8 = vcmp.gt.f32.partialorder %v3359_v59, 0.0 }
0x3a79   : > { %4809 = vpow2.f32 %v3363_v60 }
0x3a7c   : > { %v3360_v61 = vpop.f32.mrf.mxu1 }
0x3a7f   : > { %v4810_v49 = vpop.eup %4809 }
0x3a80   : > { %v4482_v55 = vadd.f32 -1.0, %v4810_v49 }
0x3a82   : > { %v3366_v56 = vsel %vm3362_vm8, %v3359_v59, %v4482_v55 }
0x3a83   : > { %v3367_v45 = vpack.c.bf16 %v3366_v56, %v3366_v56 }
0x3a85   : > { %4483 = vmatmul.msk.bf16.vlgmr.msra.gmra.mxu2 %vm95_vm2, %v3367_v45 }
0x3a86   : > { %3550 = vmatpush.bf16.msra.mxu2 %v5363_v50 }
0x3b08   : > { %v3380_v57 = vpop.f32.mrf.mxu2 }
0x3b09   : > { %v3381_v62 = vadd.f32 %v3380_v57, %v5391_v40 }
0x3b0b   : > { %v3385_v34 = vmul.f32 1.442695, %v3381_v62  ;;  %vm3384_vm9 = vcmp.gt.f32.partialorder %v3381_v62, 0.0 }
0x3b0d   : > { %4811 = vpow2.f32 %v3385_v34 }
0x3b10   : > { %v3382_v2 = vpop.f32.mrf.mxu2 }
0x3b13   : > { %v4812_v5 = vpop.eup %4811 }
0x3b14   : > { %v4484_v10 = vadd.f32 -1.0, %v4812_v5 }
0x3b16   : > { %v3388_v17 = vsel %vm3384_vm9, %v3381_v62, %v4484_v10 }
0x3b17   : > { %v3389_v18 = vpack.c.bf16 %v3388_v17, %v3388_v17 }
0x3b19   : > { %4485 = vmatmul.msk.bf16.vlgmr.msrb.gmra.mxu0 %vm95_vm2, %v3389_v18 }
0x3b1a   : > { %3571 = vmatpush.bf16.msrb.mxu0 %v5033_v8 }
0x3b1e   : > { %3572 = vmatpush.bf16.msrb.mxu0 %v5031_v6 }
0x3b96   : > { %v3402_v20 = vpop.f32.mrf.mxu0 }
0x3b97   : > { %v3403_v21 = vadd.f32 %v3402_v20, %v5402_v4 }
0x3b99   : > { %v3406_v44 = vmul.f32 %v3403_v21, %v5435_v1  ;;  %v3471_v26 = vmul.f32 2.0, %v3403_v21 }
0x3b9b   : > { %v3407_v24 = vadd.f32 %v3406_v44, %v5697_v58  ;;  %v3472_v27 = vadd.f32 %v3471_v26, %v3470_v25 }
0x3b9d   : > { %v3408_v19 = vpack.c.bf16 %v3407_v24, %v3407_v24 }
0x3b9e   : > { %v3404_v29 = vpop.f32.mrf.mxu0 }
0x3b9f   : > { %4486 = vmatmul.msk.bf16.vlgmr.msrb.gmra.mxu3 %vm130_vm3, %v3408_v19 }
0x3ba0   : > { %3593 = vmatpush.bf16.msrb.mxu3 %v5037_v13 }
0x3ba4   : > { %3594 = vmatpush.bf16.msrb.mxu3 %v5035_v12 }
0x3c22   : > { %v3421_v22 = vpop.f32.mrf.mxu3 }
0x3c23   : > { %v3422_v23 = vadd.f32 %v3421_v22, %v5384_v52 }
0x3c25   : > { %v3426_v9 = vmul.f32 1.442695, %v3422_v23  ;;  %vm3425_vm10 = vcmp.gt.f32.partialorder %v3422_v23, 0.0 }
0x3c27   : > { %4813 = vpow2.f32 %v3426_v9 }
0x3c2a   : > { %v3423_v11 = vpop.f32.mrf.mxu3 }
0x3c2d   : > { %v4814_v28 = vpop.eup %4813 }
0x3c2e   : > { %v4487_v31 = vadd.f32 -1.0, %v4814_v28 }
0x3c30   : > { %v3429_v35 = vsel %vm3425_vm10, %v3422_v23, %v4487_v31 }
0x3c31   : > { %v3430_v32 = vpack.c.bf16 %v3429_v35, %v3429_v35 }
0x3c33   : > { %4488 = vmatmul.msk.bf16.vlgmr.msrb.gmra.mxu1 %vm95_vm2, %v3430_v32 }
0x3c34   : > { %3613 = vmatpush.bf16.msrb.mxu1 %v5363_v50 }
0x3cb0   : > { %v3443_v38 = vpop.f32.mrf.mxu1 }
0x3cb1   : > { %v3444_v39 = vadd.f32 %v3443_v38, %v5391_v40 }
0x3cb3   : > { %v3448_v30 = vmul.f32 1.442695, %v3444_v39  ;;  %vm3447_vm11 = vcmp.gt.f32.partialorder %v3444_v39, 0.0 }
0x3cb5   : > { %4815 = vpow2.f32 %v3448_v30 }
0x3cb8   : > { %v3445_v36 = vpop.f32.mrf.mxu1 }
0x3cbb   : > { %v4816_v42 = vpop.eup %4815 }
0x3cbc   : > { %v4489_v43 = vadd.f32 -1.0, %v4816_v42 }
0x3cbe   : > { %v3451_v46 = vsel %vm3447_vm11, %v3444_v39, %v4489_v43 }
0x3cbf   : > { %v3452_v47 = vpack.c.bf16 %v3451_v46, %v3451_v46 }
0x3cc1   : > { %4490 = vmatmul.msk.bf16.vlgmr.msrb.gmra.mxu2 %vm95_vm2, %v3452_v47 }
0x3cc2   : > { %3634 = vmatpush.bf16.msrb.mxu2 %v5033_v8 }
0x3cc6   : > { %3635 = vmatpush.bf16.msrb.mxu2 %v5031_v6 }
0x3d44   : > { %v3465_v48 = vpop.f32.mrf.mxu2 }
0x3d45   : > { %v3466_v51 = vadd.f32 %v3465_v48, %v5402_v4 }
0x3d47   : > { %v3473_v54 = vadd.f32 %v3472_v27, %v3466_v51 }
0x3d49   : > { %v3474_v37 = vmul.f32 %v3473_v54, %v5453_v53 }
0x3d4b   : > { %v5757_v41 = vadd.f32 %v3474_v37, %v5697_v58 }
0x3d4c   : > { %v3467_v59 = vpop.f32.mrf.mxu2 }
0x3d4d   : > { %v3476_v60 = vpack.c.bf16 %v5757_v41, %v5757_v41 }
0x3d4f   : > { %4491 = vmatmul.msk.bf16.vlgmr.msra.gmra.mxu0 %vm130_vm3, %v3476_v60 }
0x3d50   : > { %3656 = vmatpush.bf16.msra.mxu0 %v5037_v13 }
0x3d54   : > { %3657 = vmatpush.bf16.msra.mxu0 %v5035_v12 }
0x3dcc   : > { %v3489_v61 = vpop.f32.mrf.mxu0 }
0x3dcd   : > { %v3490_v49 = vadd.f32 %v3489_v61, %v5384_v52 }
0x3dcf   : > { %v3494_v55 = vmul.f32 1.442695, %v3490_v49  ;;  %vm3493_vm12 = vcmp.gt.f32.partialorder %v3490_v49, 0.0 }
0x3dd1   : > { %4817 = vpow2.f32 %v3494_v55 }
0x3dd4   : > { %v3491_v56 = vpop.f32.mrf.mxu0 }
0x3dd7   : > { %v4818_v45 = vpop.eup %4817 }
0x3dd8   : > { %v4492_v57 = vadd.f32 -1.0, %v4818_v45 }
0x3dda   : > { %v3497_v58 = vsel %vm3493_vm12, %v3490_v49, %v4492_v57 }
0x3ddb   : > { %v3498_v62 = vpack.c.bf16 %v3497_v58, %v3497_v58 }
0x3ddd   : > { %4493 = vmatmul.msk.bf16.vlgmr.msra.gmra.mxu3 %vm95_vm2, %v3498_v62 }
0x3dde   : > { %3676 = vmatpush.bf16.msra.mxu3 %v5363_v50 }
0x3e60   : > { %v3511_v34 = vpop.f32.mrf.mxu3 }
0x3e61   : > { %v3512_v2 = vadd.f32 %v3511_v34, %v5391_v40 }
0x3e63   : > { %v3516_v5 = vmul.f32 1.442695, %v3512_v2  ;;  %vm3515_vm13 = vcmp.gt.f32.partialorder %v3512_v2, 0.0 }
0x3e65   : > { %4819 = vpow2.f32 %v3516_v5 }
0x3e68   : > { %v3513_v10 = vpop.f32.mrf.mxu3 }
0x3e6b   : > { %v4820_v17 = vpop.eup %4819 }
0x3e6c   : > { %v4494_v18 = vadd.f32 -1.0, %v4820_v17 }
0x3e6e   : > { %v3519_v63 = vsel %vm3515_vm13, %v3512_v2, %v4494_v18 }
0x3e6f   : > { %v3520_v20 = vpack.c.bf16 %v3519_v63, %v3519_v63 }
0x3e71   : > { %4495 = vmatmul.msk.bf16.vlgmr.msra.gmra.mxu1 %vm95_vm2, %v3520_v20 }
0x3e72   : > { %3697 = vmatpush.bf16.msra.mxu1 %v5033_v8 }
0x3e76   : > { %3698 = vmatpush.bf16.msra.mxu1 %v5031_v6 }
0x3eee   : > { %v3533_v21 = vpop.f32.mrf.mxu1 }
0x3eef   : > { %v5772_v25 = vadd.f32 %v3533_v21, %v5402_v4 }
0x3ef1   : > { %v3537_v44 = vmul.f32 %v5772_v25, %v5404_v7 }
0x3ef3   : > { %v3538_v26 = vadd.f32 %v3537_v44, %v5757_v41 }
0x3ef5   : > { %v3539_v24 = vpack.c.bf16 %v3538_v26, %v3538_v26 }
0x3ef6   : > { %v3535_v27 = vpop.f32.mrf.mxu1 }
0x3ef7   : > { %4496 = vmatmul.msk.bf16.vlgmr.msra.gmra.mxu2 %vm130_vm3, %v3539_v24 }
0x3ef8   : > { %3719 = vmatpush.bf16.msra.mxu2 %v5037_v13 }
0x3efc   : > { %3720 = vmatpush.bf16.msra.mxu2 %v5035_v12 }
0x3f7a   : > { %v3552_v19 = vpop.f32.mrf.mxu2 }
0x3f7b   : > { %v3553_v29 = vadd.f32 %v3552_v19, %v5384_v52 }
0x3f7d   : > { %v3557_v22 = vmul.f32 1.442695, %v3553_v29  ;;  %vm3556_vm14 = vcmp.gt.f32.partialorder %v3553_v29, 0.0 }
0x3f7f   : > { %4821 = vpow2.f32 %v3557_v22 }
0x3f82   : > { %v3554_v23 = vpop.f32.mrf.mxu2 }
0x3f85   : > { %v4822_v9 = vpop.eup %4821 }
0x3f86   : > { %v4497_v11 = vadd.f32 -1.0, %v4822_v9 }
0x3f88   : > { %v3560_v28 = vsel %vm3556_vm14, %v3553_v29, %v4497_v11 }
0x3f89   : > { %v3561_v31 = vpack.c.bf16 %v3560_v28, %v3560_v28 }
0x3f8b   : > { %4498 = vmatmul.msk.bf16.vlgmr.msrb.gmra.mxu0 %vm95_vm2, %v3561_v31 }
0x3f8c   : > { %3744 = vmatpush.bf16.msrb.mxu0 %v5363_v50 }
0x4008   : > { %v3574_v35 = vpop.f32.mrf.mxu0 }
0x4009   : > { %v3575_v32 = vadd.f32 %v3574_v35, %v5391_v40 }
0x400b   : > { %v3579_v38 = vmul.f32 1.442695, %v3575_v32  ;;  %vm3578_vm15 = vcmp.gt.f32.partialorder %v3575_v32, 0.0 }
0x400d   : > { %4823 = vpow2.f32 %v3579_v38 }
0x4010   : > { %v3576_v39 = vpop.f32.mrf.mxu0 }
0x4013   : > { %v4824_v30 = vpop.eup %4823 }
0x4014   : > { %v4499_v36 = vadd.f32 -1.0, %v4824_v30 }
0x4016   : > { %v3582_v42 = vsel %vm3578_vm15, %v3575_v32, %v4499_v36 }
0x4017   : > { %v3583_v43 = vpack.c.bf16 %v3582_v42, %v3582_v42 }
0x4019   : > { %4500 = vmatmul.msk.bf16.vlgmr.msrb.gmra.mxu3 %vm95_vm2, %v3583_v43 }
0x401a   : > { %3765 = vmatpush.bf16.msrb.mxu3 %v5033_v8 }
0x401e   : > { %3766 = vmatpush.bf16.msrb.mxu3 %v5031_v6 }
0x409c   : > { %v3596_v46 = vpop.f32.mrf.mxu3 }
0x409d   : > { %v3597_v47 = vadd.f32 %v3596_v46, %v5402_v4 }
0x409f   : > { %v3600_v48 = vmul.f32 %v3597_v47, %v5404_v7  ;;  %v3726_v63 = vmul.f32 2.0, %v3597_v47 }
0x40a1   : > { %v3601_v51 = vadd.f32 %v3600_v48, %v5757_v41  ;;  %v3727_v44 = vadd.f32 %v3726_v63, %v5772_v25 }
0x40a3   : > { %v3602_v54 = vpack.c.bf16 %v3601_v51, %v3601_v51 }
0x40a4   : > { %v3598_v37 = vpop.f32.mrf.mxu3 }
0x40a5   : > { %4501 = vmatmul.msk.bf16.vlgmr.msrb.gmra.mxu1 %vm130_vm3, %v3602_v54 }
0x40a6   : > { %3787 = vmatpush.bf16.msrb.mxu1 %v5037_v13 }
0x40aa   : > { %3788 = vmatpush.bf16.msrb.mxu1 %v5035_v12 }
0x4122   : > { %v3615_v59 = vpop.f32.mrf.mxu1 }
0x4123   : > { %v3616_v60 = vadd.f32 %v3615_v59, %v5384_v52 }
0x4125   : > { %v3620_v61 = vmul.f32 1.442695, %v3616_v60  ;;  %vm3619_vm4 = vcmp.gt.f32.partialorder %v3616_v60, 0.0 }
0x4127   : > { %4825 = vpow2.f32 %v3620_v61 }
0x412a   : > { %v3617_v49 = vpop.f32.mrf.mxu1 }
0x412d   : > { %v4826_v55 = vpop.eup %4825 }
0x412e   : > { %v4502_v56 = vadd.f32 -1.0, %v4826_v55 }
0x4130   : > { %v3623_v45 = vsel %vm3619_vm4, %v3616_v60, %v4502_v56 }
0x4131   : > { %v3624_v57 = vpack.c.bf16 %v3623_v45, %v3623_v45 }
0x4133   : > { %4503 = vmatmul.msk.bf16.vlgmr.msrb.gmra.mxu2 %vm95_vm2, %v3624_v57 }
0x4134   : > { %3807 = vmatpush.bf16.msrb.mxu2 %v5363_v50 }
0x41b6   : > { %v3637_v58 = vpop.f32.mrf.mxu2 }
0x41b7   : > { %v3638_v62 = vadd.f32 %v3637_v58, %v5391_v40 }
0x41b9   : > { %v3642_v34 = vmul.f32 1.442695, %v3638_v62  ;;  %vm3641_vm5 = vcmp.gt.f32.partialorder %v3638_v62, 0.0 }
0x41bb   : > { %4827 = vpow2.f32 %v3642_v34 }
0x41be   : > { %v3639_v2 = vpop.f32.mrf.mxu2 }
0x41c1   : > { %v4828_v5 = vpop.eup %4827 }
0x41c2   : > { %v4504_v10 = vadd.f32 -1.0, %v4828_v5 }
0x41c4   : > { %v3645_v17 = vsel %vm3641_vm5, %v3638_v62, %v4504_v10  ;;  %vm4027_vm5 = vcmask (%p1908_p0), 1041408  }
0x41c5   : > { %v3646_v18 = vpack.c.bf16 %v3645_v17, %v3645_v17 }
0x41c7   : > { %4505 = vmatmul.msk.bf16.vlgmr.msra.gmra.mxu0 %vm95_vm2, %v3646_v18 }
0x41c8   : > { %3828 = vmatpush.bf16.msra.mxu0 %v5033_v8 }
0x41cc   : > { %3829 = vmatpush.bf16.msra.mxu0 %v5031_v6 }
0x4244   : > { %v3659_v20 = vpop.f32.mrf.mxu0 }
0x4245   : > { %v3660_v21 = vadd.f32 %v3659_v20, %v5402_v4 }
0x4247   : > { %v3663_v26 = vmul.f32 %v3660_v21, %v5435_v1  ;;  %v3728_v24 = vmul.f32 2.0, %v3660_v21 }
0x4249   : > { %v3664_v27 = vadd.f32 %v3663_v26, %v5757_v41  ;;  %v3729_v19 = vadd.f32 %v3728_v24, %v3727_v44 }
0x424b   : > { %v3665_v29 = vpack.c.bf16 %v3664_v27, %v3664_v27 }
0x424c   : > { %v3661_v22 = vpop.f32.mrf.mxu0 }
0x424d   : > { %4506 = vmatmul.msk.bf16.vlgmr.msra.gmra.mxu3 %vm130_vm3, %v3665_v29 }
0x424e   : > { %3850 = vmatpush.bf16.msra.mxu3 %v5037_v13 }
0x4252   : > { %3851 = vmatpush.bf16.msra.mxu3 %v5035_v12 }
0x42d0   : > { %v3678_v23 = vpop.f32.mrf.mxu3 }
0x42d1   : > { %v3679_v9 = vadd.f32 %v3678_v23, %v5384_v52 }
0x42d3   : > { %v3683_v11 = vmul.f32 1.442695, %v3679_v9  ;;  %vm3682_vm7 = vcmp.gt.f32.partialorder %v3679_v9, 0.0 }
0x42d5   : > { %4829 = vpow2.f32 %v3683_v11 }
0x42d8   : > { %v3680_v25 = vpop.f32.mrf.mxu3 }
0x42db   : > { %v4830_v28 = vpop.eup %4829 }
0x42dc   : > { %v4507_v31 = vadd.f32 -1.0, %v4830_v28 }
0x42de   : > { %v3686_v35 = vsel %vm3682_vm7, %v3679_v9, %v4507_v31  ;;  %vm4030_vm7 = vcmask (%p1908_p0), 1045504  }
0x42df   : > { %v3687_v32 = vpack.c.bf16 %v3686_v35, %v3686_v35 }
0x42e1   : > { %4508 = vmatmul.msk.bf16.vlgmr.msra.gmra.mxu1 %vm95_vm2, %v3687_v32 }
0x42e2   : > { %3870 = vmatpush.bf16.msra.mxu1 %v5363_v50 }
0x435e   : > { %v3700_v38 = vpop.f32.mrf.mxu1 }
0x435f   : > { %v3701_v39 = vadd.f32 %v3700_v38, %v5391_v40 }
0x4361   : > { %v3705_v30 = vmul.f32 1.442695, %v3701_v39  ;;  %vm3704_vm8 = vcmp.gt.f32.partialorder %v3701_v39, 0.0 }
0x4363   : > { %4831 = vpow2.f32 %v3705_v30 }
0x4366   : > { %v3702_v36 = vpop.f32.mrf.mxu1 }
0x4369   : > { %v4832_v42 = vpop.eup %4831 }
0x436a   : > { %v4509_v43 = vadd.f32 -1.0, %v4832_v42 }
0x436c   : > { %v3708_v46 = vsel %vm3704_vm8, %v3701_v39, %v4509_v43  ;;  %vm4039_vm8 = vcmask (%p1908_p0), 130048  }
0x436d   : > { %v3709_v47 = vpack.c.bf16 %v3708_v46, %v3708_v46 }
0x436f   : > { %4510 = vmatmul.msk.bf16.vlgmr.msra.gmra.mxu2 %vm95_vm2, %v3709_v47 }
0x4370   : > { %3891 = vmatpush.bf16.msra.mxu2 %v5033_v8 }
0x4374   : > { %3892 = vmatpush.bf16.msra.mxu2 %v5031_v6 }
0x43f2   : > { %v3722_v48 = vpop.f32.mrf.mxu2 }
0x43f3   : > { %v3723_v51 = vadd.f32 %v3722_v48, %v5402_v4 }
0x43f5   : > { %v3730_v54 = vadd.f32 %v3729_v19, %v3723_v51 }
0x43f7   : > { %v3731_v37 = vmul.f32 %v3730_v54, %v5453_v53 }
0x43f9   : > { %v5817_v59 = vadd.f32 %v3731_v37, %v5757_v41 }
0x43fa   : > { %v3724_v60 = vpop.f32.mrf.mxu2 }
0x43fb   : > { %v3733_v61 = vpack.c.bf16 %v5817_v59, %v5817_v59 }
0x43fd   : > { %4511 = vmatmul.msk.bf16.vlgmr.msrb.gmra.mxu0 %vm130_vm3, %v3733_v61 }
0x43fe   : > { %3913 = vmatpush.bf16.msrb.mxu0 %v5037_v13 }
0x4402   : > { %3914 = vmatpush.bf16.msrb.mxu0 %v5035_v12 }
0x447a   : > { %v3746_v49 = vpop.f32.mrf.mxu0 }
0x447b   : > { %v3747_v55 = vadd.f32 %v3746_v49, %v5384_v52 }
0x447d   : > { %v3751_v56 = vmul.f32 1.442695, %v3747_v55  ;;  %vm3750_vm9 = vcmp.gt.f32.partialorder %v3747_v55, 0.0 }
0x447f   : > { %4833 = vpow2.f32 %v3751_v56 }
0x4482   : > { %v3748_v45 = vpop.f32.mrf.mxu0 }
0x4485   : > { %v4834_v57 = vpop.eup %4833 }
0x4486   : > { %v4512_v58 = vadd.f32 -1.0, %v4834_v57 }
0x4488   : > { %v3754_v41 = vsel %vm3750_vm9, %v3747_v55, %v4512_v58 }
0x4489   : > { %v3755_v62 = vpack.c.bf16 %v3754_v41, %v3754_v41 }
0x448b   : > { %4513 = vmatmul.msk.bf16.vlgmr.msrb.gmra.mxu3 %vm95_vm2, %v3755_v62 }
0x448c   : > { %3933 = vmatpush.bf16.msrb.mxu3 %v5363_v50 }
0x450e   : > { %v3768_v34 = vpop.f32.mrf.mxu3 }
0x450f   : > { %v3769_v2 = vadd.f32 %v3768_v34, %v5391_v40 }
0x4511   : > { %v3773_v5 = vmul.f32 1.442695, %v3769_v2  ;;  %vm3772_vm10 = vcmp.gt.f32.partialorder %v3769_v2, 0.0 }
0x4513   : > { %4835 = vpow2.f32 %v3773_v5 }
0x4516   : > { %v3770_v10 = vpop.f32.mrf.mxu3 }
0x4519   : > { %v4836_v17 = vpop.eup %4835 }
0x451a   : > { %v4514_v18 = vadd.f32 -1.0, %v4836_v17 }
0x451c   : > { %v3776_v63 = vsel %vm3772_vm10, %v3769_v2, %v4514_v18 }
0x451d   : > { %v3777_v20 = vpack.c.bf16 %v3776_v63, %v3776_v63 }
0x451f   : > { %4515 = vmatmul.msk.bf16.vlgmr.msrb.gmra.mxu1 %vm95_vm2, %v3777_v20 }
0x4520   : > { %3954 = vmatpush.bf16.msrb.mxu1 %v5033_v8  ;;  %v4035_v8 = vld [vmem:[%s5926_s3] sm:$0xff] (%p1908_p0) }
0x4524   : > { %3955 = vmatpush.bf16.msrb.mxu1 %v5031_v6 }
0x459c   : > { %v3790_v21 = vpop.f32.mrf.mxu1 }
0x459d   : > { %v3791_v50 = vadd.f32 %v3790_v21, %v5402_v4 }
0x459f   : > { %v3794_v44 = vmul.f32 %v3791_v50, %v5404_v7 }
0x45a1   : > { %v3795_v26 = vadd.f32 %v3794_v44, %v5817_v59 }
0x45a3   : > { %v3796_v24 = vpack.c.bf16 %v3795_v26, %v3795_v26 }
0x45a4   : > { %v3792_v27 = vpop.f32.mrf.mxu1 }
0x45a5   : > { %4516 = vmatmul.msk.bf16.vlgmr.msrb.gmra.mxu2 %vm130_vm3, %v3796_v24 }
0x45a6   : > { %3976 = vmatpush.bf16.msrb.mxu2 %v5037_v13 }
0x45aa   : > { %3977 = vmatpush.bf16.msrb.mxu2 %v5035_v12  ;;  %v4038_v12 = vld [vmem:[%s5926_s3 + $0x18] sm:$0xff] (%p1908_p0) }
0x4628   : > { %v3809_v19 = vpop.f32.mrf.mxu2 }
0x4629   : > { %v3810_v29 = vadd.f32 %v3809_v19, %v5384_v52 }
0x462b   : > { %v3814_v22 = vmul.f32 1.442695, %v3810_v29  ;;  %vm3813_vm11 = vcmp.gt.f32.partialorder %v3810_v29, 0.0 }
0x462d   : > { %4837 = vpow2.f32 %v3814_v22 }
0x4630   : > { %v3811_v23 = vpop.f32.mrf.mxu2 }
0x4633   : > { %v4838_v9 = vpop.eup %4837 }
0x4634   : > { %v4517_v11 = vadd.f32 -1.0, %v4838_v9 }
0x4636   : > { %v3817_v25 = vsel %vm3813_vm11, %v3810_v29, %v4517_v11 }
0x4637   : > { %v3818_v28 = vpack.c.bf16 %v3817_v25, %v3817_v25 }
0x4639   : > { %4518 = vmatmul.msk.bf16.vlgmr.msra.gmra.mxu0 %vm95_vm2, %v3818_v28 }
0x46b6   : > { %v3831_v31 = vpop.f32.mrf.mxu0 }
0x46b7   : > { %v3832_v35 = vadd.f32 %v3831_v31, %v5391_v40 }
0x46b9   : > { %v3836_v32 = vmul.f32 1.442695, %v3832_v35  ;;  %vm3835_vm12 = vcmp.gt.f32.partialorder %v3832_v35, 0.0 }
0x46bb   : > { %4839 = vpow2.f32 %v3836_v32 }
0x46be   : > { %v3833_v38 = vpop.f32.mrf.mxu0 }
0x46c1   : > { %v4840_v39 = vpop.eup %4839 }
0x46c2   : > { %v4519_v30 = vadd.f32 -1.0, %v4840_v39 }
0x46c4   : > { %v3839_v36 = vsel %vm3835_vm12, %v3832_v35, %v4519_v30 }
0x46c5   : > { %v3840_v42 = vpack.c.bf16 %v3839_v36, %v3839_v36 }
0x46c7   : > { %4520 = vmatmul.msk.bf16.vlgmr.msra.gmra.mxu3 %vm95_vm2, %v3840_v42 }
0x474a   : > { %v3853_v43 = vpop.f32.mrf.mxu3 }
0x474b   : > { %v3854_v46 = vadd.f32 %v3853_v43, %v5402_v4 }
0x474d   : > { %v3857_v47 = vmul.f32 %v3854_v46, %v5404_v7  ;;  %v3983_v17 = vmul.f32 2.0, %v3854_v46 }
0x474f   : > { %v3858_v48 = vadd.f32 %v3857_v47, %v5817_v59  ;;  %v3984_v20 = vadd.f32 %v3983_v17, %v3791_v50  ;;  %v4130_v17 = vld [vmem:[#allocation5 + $0x330] sm:$0xff] (%p1908_p0) }
0x4751   : > { %v3859_v51 = vpack.c.bf16 %v3858_v48, %v3858_v48 }
0x4752   : > { %v3855_v54 = vpop.f32.mrf.mxu3 }
0x4753   : > { %4521 = vmatmul.msk.bf16.vlgmr.msra.gmra.mxu1 %vm130_vm3, %v3859_v51 }
0x4754   :  { %4111 = vmatpush.msra.mxu1 (%p1908_p0), %v4081_v16 }
0x47d0   : > { %v3872_v37 = vpop.f32.mrf.mxu1 }
0x47d1   : > { %v3873_v60 = vadd.f32 %v3872_v37, %v5384_v52 }
0x47d3   : > { %v3877_v61 = vmul.f32 1.442695, %v3873_v60  ;;  %vm3876_vm13 = vcmp.gt.f32.partialorder %v3873_v60, 0.0 }
0x47d5   : > { %4841 = vpow2.f32 %v3877_v61 }
0x47d8   : > { %v3874_v49 = vpop.f32.mrf.mxu1 }
0x47db   : > { %v4842_v55 = vpop.eup %4841 }
0x47dc   : > { %v4522_v56 = vadd.f32 -1.0, %v4842_v55 }
0x47de   : > { %v3880_v45 = vsel %vm3876_vm13, %v3873_v60, %v4522_v56 }
0x47df   : > { %v3881_v57 = vpack.c.bf16 %v3880_v45, %v3880_v45 }
0x47e1   : > { %4523 = vmatmul.msk.bf16.vlgmr.msra.gmra.mxu2 %vm95_vm2, %v3881_v57 }
0x4864   : > { %v3894_v7 = vpop.f32.mrf.mxu2 }
0x4865   : > { %v3895_v58 = vadd.f32 %v3894_v7, %v5391_v40 }
0x4867   : > { %v3899_v41 = vmul.f32 1.442695, %v3895_v58  ;;  %vm3898_vm14 = vcmp.gt.f32.partialorder %v3895_v58, 0.0 }
0x4869   : > { %4843 = vpow2.f32 %v3899_v41  ;;  %v4132_v41 = vld [vmem:[#allocation5 + $0x340] sm:$0xff] (%p1908_p0) }
0x486a   :  { %4549 = vmatpush.msra.mxu3 (%p1908_p0), %v4132_v41 }
0x486c   : > { %v3896_v62 = vpop.f32.mrf.mxu2 }
0x486f   : > { %v4844_v34 = vpop.eup %4843 }
0x4870   : > { %v4524_v2 = vadd.f32 -1.0, %v4844_v34 }
0x4872   : > { %v3902_v5 = vsel %vm3898_vm14, %v3895_v58, %v4524_v2  ;;  %v4214_v58 = vmul.f32 (%p1908_p0), %v5340_v33, %v5340_v33 }
0x4873   : > { %v3903_v10 = vpack.c.bf16 %v3902_v5, %v3902_v5 }
0x4874   :  { %4216 = vrot.lane.b32.xlu0 (%p1908_p0), %v4214_v58, %s4966_s7 }
0x4875   : > { %4525 = vmatmul.msk.bf16.vlgmr.msrb.gmra.mxu0 %vm95_vm2, %v3903_v10  ;;  %v4131_v10 = vld [vmem:[#allocation5 + $0x338] sm:$0xff] (%p1908_p0) }
0x4876   :  { %4550 = vmatpush.msra.mxu3 (%p1908_p0), %v4131_v10 }
0x4878   :  { %4551 = vmatpush.msra.mxu3 (%p1908_p0), %v4130_v17 }
0x48f2   : > { %v3916_v18 = vpop.f32.mrf.mxu0 }
0x48f3   : > { %v3917_v63 = vadd.f32 %v3916_v18, %v5402_v4  ;;  %v4129_v18 = vld [vmem:[#allocation5 + $0x328] sm:$0xff] (%p1908_p0) }
0x48f4   :  { %4552 = vmatpush.msra.mxu3 (%p1908_p0), %v4129_v18 }
0x48f5   : > { %v3920_v21 = vmul.f32 %v3917_v63, %v5435_v1  ;;  %v3985_v44 = vmul.f32 2.0, %v3917_v63  ;;  %v4849_v63 = vld [vmem:[#allocation5 + $0x320] ss:$0 sm:$0xff] (%p1908_p0) }
0x48f7   : > { %v3921_v26 = vadd.f32 %v3920_v21, %v5817_v59  ;;  %v3986_v24 = vadd.f32 %v3985_v44, %v3984_v20  ;;  %v4212_v20 = vmul.f32 (%p1908_p0), 1.442695, %v5340_v33 }
0x48f9   : > { %v3922_v27 = vpack.c.bf16 %v3921_v26, %v3921_v26 }
0x48fa   : > { %v3918_v19 = vpop.f32.mrf.mxu0 }
0x48fb   : > { %4526 = vmatmul.msk.bf16.vlgmr.msrb.gmra.mxu3 %vm130_vm3, %v3922_v27 }
0x497e   : > { %v3935_v29 = vpop.f32.mrf.mxu3 }
0x497f   : > { %v3936_v22 = vadd.f32 %v3935_v29, %v5384_v52  ;;  %v4211_v29 = vsub.f32 (%p1908_p0), 0.0, %v5340_v33  ;;  %v4850_v33 = vld [vmem:[#allocation5 + $0x348] ss:$0 sm:$0xff] (%p1908_p0) }
0x4981   : > { %v3940_v23 = vmul.f32 1.442695, %v3936_v22  ;;  %vm3939_vm15 = vcmp.gt.f32.partialorder %v3936_v22, 0.0 }
0x4983   : > { %4845 = vpow2.f32 %v3940_v23 }
0x4986   : > { %v3937_v9 = vpop.f32.mrf.mxu3 }
0x4989   : > { %v4846_v11 = vpop.eup %4845 }
0x498a   : > { %v4527_v25 = vadd.f32 -1.0, %v4846_v11 }
0x498c   : > { %v3943_v50 = vsel %vm3939_vm15, %v3936_v22, %v4527_v25 }
0x498d   : > { %v3944_v28 = vpack.c.bf16 %v3943_v50, %v3943_v50 }
0x498f   : > { %4528 = vmatmul.msk.bf16.vlgmr.msrb.gmra.mxu1 %vm95_vm2, %v3944_v28 }
0x4a0c   : > { %v3957_v1 = vpop.f32.mrf.mxu1 }
0x4a0d   : > { %v3958_v31 = vadd.f32 %v3957_v1, %v5391_v40 }
0x4a0f   : > { %v3962_v35 = vmul.f32 1.442695, %v3958_v31  ;;  %vm3961_vm4 = vcmp.gt.f32.partialorder %v3958_v31, 0.0 }
0x4a11   : > { %4847 = vpow2.f32 %v3962_v35 }
0x4a12   :  { %4851 = vpow2.f32 (%p1908_p0), %v4212_v20 }
0x4a14   : > { %v3959_v32 = vpop.f32.mrf.mxu1 }
0x4a17   : > { %v4848_v38 = vpop.eup %4847 }
0x4a18   : > { %v4529_v39 = vadd.f32 -1.0, %v4848_v38  ;;  %v4852_v27 = vpop.eup (%p1908_p0), %4851 }
0x4a1a   : > { %v3965_v52 = vsel %vm3961_vm4, %v3958_v31, %v4529_v39 }
0x4a1b   : > { %v3966_v30 = vpack.c.bf16 %v3965_v52, %v3965_v52 }
0x4a1d   : > { %4530 = vmatmul.msk.bf16.vlgmr.msrb.gmra.mxu2 %vm95_vm2, %v3966_v30 }
0x4aa0   : > { %v3979_v36 = vpop.f32.mrf.mxu2 }
0x4aa1   : > { %v3980_v42 = vadd.f32 %v3979_v36, %v5402_v4 }
0x4aa3   : > { %v3987_v43 = vadd.f32 %v3986_v24, %v3980_v42  ;;  %v4217_v24 = vpop.permute.xlu0 (%p1908_p0), %4216  ;;  %v4181_v42 = vld [vmem:[%s5924_s1 + $0x8] sm:$0xff] (%p1908_p0) }
0x4aa4   :  { %v4219_v19 = vadd.f32 (%p1908_p0), %v4852_v27, %v4217_v24 }
0x4aa5   : > { %v3988_v46 = vmul.f32 %v3987_v43, %v5453_v53  ;;  %1910 = sbr.rel (!%p1908_p0) target bundleno = 5431 (0x1537), region = 63  ;;  %v4180_v43 = vld [vmem:[%s5924_s1] sm:$0xff] (%p1908_p0) }
0x4aa6   :  { %v4220_v23 = vmul.f32 (%p1908_p0), 0.5, %v4219_v19 }
0x4aa7   : > { %v3989_v49 = vadd.f32 %v3988_v46, %v5817_v59  }
0x4aa8   : > { %v3981_v40 = vpop.f32.mrf.mxu2  ;;  %v4221_v11 = vadd.f32 (%p1908_p0), %v4220_v23, %v4211_v29 }
0x4aa9   : > { %4532 = vst.msk [vmem:[%s4285_s29 + $0x2] sm:$0x3] %vm1904_vm6, %v3989_v49  ;;  %v4182_v40 = vld [vmem:[%s5924_s1 + $0x10] sm:$0xff] (%p1908_p0) }
0x4aaa   :  { %v4545_v50 = vadd.f32 -0.5, %v4221_v11 }
0x4aac   :  { %4224 = vrot.lane.b32.xlu0 %v4545_v50, %s4969_s12 }
0x4ab0   :  { %v4002_v47 = vld [vmem:[#allocation2 + $0x8] sm:$0x3]  ;;  %v4004_v4 = vld [vmem:[#allocation2 + $0xa] sm:$0x3]  ;;  %v4006_v48 = vld [vmem:[#allocation2 + $0xc] sm:$0x3] }
0x4ab1   :  { %v4008_v51 = vld [vmem:[#allocation2 + $0xe] sm:$0x3]  ;;  %v4019_v54 = vrot.slane %v4004_v4, 6  ;;  %v4022_v53 = vrot.slane %v4006_v48, 4  ;;  %v3994_v37 = vld [vmem:[#allocation2] sm:$0x3] }
0x4ab2   :  { %v4025_v59 = vrot.slane %v4008_v51, 2  ;;  %v3996_v60 = vld [vmem:[#allocation2 + $0x2] sm:$0x3]  ;;  %v3998_v55 = vld [vmem:[#allocation2 + $0x4] sm:$0x3] }
0x4ab3   :  { %v4032_v61 = vsel %vm4027_vm5, %v4002_v47, %v4019_v54  ;;  %v4000_v56 = vld [vmem:[#allocation2 + $0x6] sm:$0x3]  ;;  %v4010_v45 = vrot.slane %v3996_v60, 6  ;;  %v4013_v57 = vrot.slane %v3998_v55, 4  ;;  %v4183_v60 = vld [vmem:[%s5924_s1 + $0x18] sm:$0xff]  ;;  %s4980_s1 = smov [#allocation8]  }
0x4ab4   :  { %v4033_v49 = vsel %vm59_vm0, %v4032_v61, %v4022_v53  ;;  %v4016_v7 = vrot.slane %v4000_v56, 2  ;;  %s4253_s21 = sshll.u32 %s4980_s1, 4  ;;  %s4254_s21 = int_to_ptr.vmem [resolvable:$true] %s4253_s21 }
0x4ab5   :  { %v4034_v0 = vsel %vm4030_vm7, %v4033_v49, %v4025_v59  ;;  %v4028_v3 = vsel %vm4027_vm5, %v3994_v37, %v4010_v45 }
0x4ab6   :  { %4066 = vmatpush.msra.mxu0 %v4034_v0  ;;  %v4029_v6 = vsel %vm59_vm0, %v4028_v3, %v4013_v57  ;;  %4547 = vmatpush.msra.mxu2 %v4034_v0 }
0x4ab7   :  { %v4031_v13 = vsel %vm4030_vm7, %v4029_v6, %v4016_v7 }
0x4ab8   :  { %4067 = vmatpush.msra.mxu0 %v4031_v13  ;;  %4548 = vmatpush.msra.mxu2 %v4031_v13  ;;  %v4981_v13 = vmov 2.0  }
0x4ab9   :  { %4533 = vmatmul.msk.f32.vlgmr.msra.gmra.mxu0 %vm4039_vm8, %v4035_v8  ;;  %4536 = vmatmul.msk.f32.vlgmr.msra.gmra.mxu2 %vm4039_vm8, %v4038_v12  ;;  %4853 = vrcp.f32 %v4981_v13 }
0x4aba   :  { %4159 = vmatpush.msrb.mxu2 %v4132_v41 }
0x4abc   :  { %4160 = vmatpush.msrb.mxu2 %v4131_v10 }
0x4abe   :  { %4161 = vmatpush.msrb.mxu2 %v4130_v17 }
0x4ac0   :  { %4162 = vmatpush.msrb.mxu2 %v4129_v18 }
0x4ac1   :  { %4534 = vmatmul.msk.f32.gmra.mxu0 %vm4039_vm8, %v4036_v14  ;;  %v4854_v14 = vpop.eup %4853 }
0x4ac2   :  { %v4239_v41 = vmul.f32 2.0, %v4854_v14  ;;  %vm4243_vm0 = vweird.f32 %v4854_v14 }
0x4ac9   :  { %4535 = vmatmul.msk.f32.gmra.mxu0 %vm4039_vm8, %v4037_v15 }
0x4b1e   :  { %v4225_v8 = vpop.permute.xlu0 %4224 }
0x4b1f   :  { %v4227_v12 = vsel %vm1904_vm6, %v4225_v8, 0.0 }
0x4b36   :  { %v4069_v62 = vpop.f32.mrf.mxu0 }
0x4b37   :  { %4537 = vmatmul.msk.f32.vlgmr.msra.gmra.mxu1 %vm130_vm3, %v4069_v62 }
0x4b3c   :  { %v4078_v5 = vpop.f32.mrf.mxu2 }
0x4b3e   :  { %v4072_v34 = vpop.f32.mrf.mxu0 }
0x4b3f   :  { %4538 = vmatmul.msk.f32.gmra.mxu1 %vm130_vm3, %v4072_v34 }
0x4b46   :  { %v4075_v2 = vpop.f32.mrf.mxu0 }
0x4b47   :  { %4539 = vmatmul.msk.f32.gmra.mxu1 %vm130_vm3, %v4075_v2  ;;  %v4240_v2 = vsub.f32 1.0, %v4239_v41 }
0x4b49   :  { %v4241_v20 = vmul.f32 %v4854_v14, %v4240_v2 }
0x4b4f   :  { %4540 = vmatmul.msk.f32.gmra.mxu1 %vm130_vm3, %v4078_v5 }
0x4bb4   :  { %v4113_v21 = vpop.f32.mrf.mxu1 }
0x4bb5   :  { %v4114_v44 = vadd.f32 %v4849_v63, %v4113_v21 }
0x4bb7   :  { %v4125_v26 = vmax.f32 %v4114_v44, 0.0 }
0x4bb9   :  { %4541 = vmatmul.msk.f32.vlgmr.msrb.gmra.mxu2 %vm95_vm2, %v4125_v26  ;;  %v4242_v26 = vadd.f32 %v4854_v14, %v4241_v20 }
0x4bbb   :  { %v4244_v19 = vsel %vm4243_vm0, %v4854_v14, %v4242_v26 }
0x4bbc   :  { %v4116_v22 = vpop.f32.mrf.mxu1 }
0x4bbd   :  { %v4117_v9 = vadd.f32 %v4849_v63, %v4116_v22 }
0x4bbf   :  { %v4126_v25 = vmax.f32 %v4117_v9, 0.0 }
0x4bc1   :  { %4542 = vmatmul.msk.f32.vlgmr.msra.gmra.mxu3 %vm95_vm2, %v4126_v25 }
0x4bc4   :  { %v4119_v28 = vpop.f32.mrf.mxu1 }
0x4bc5   :  { %v4120_v1 = vadd.f32 %v4849_v63, %v4119_v28 }
0x4bc7   :  { %v4127_v31 = vmax.f32 %v4120_v1, 0.0 }
0x4bc9   :  { %4543 = vmatmul.msk.f32.gmra.mxu3 %vm95_vm2, %v4127_v31 }
0x4bcc   :  { %v4122_v35 = vpop.f32.mrf.mxu1 }
0x4bcd   :  { %v4123_v32 = vadd.f32 %v4849_v63, %v4122_v35 }
0x4bcf   :  { %v4128_v38 = vmax.f32 %v4123_v32, 0.0 }
0x4bd1   :  { %4544 = vmatmul.msk.f32.gmra.mxu3 %vm95_vm2, %v4128_v38 }
0x4c3c   :  { %v4164_v39 = vpop.f32.mrf.mxu2 }
0x4c3d   :  { %v4165_v52 = vadd.f32 %v4850_v33, %v4164_v39 }
0x4c3f   :  { %4176 = vst [vmem:[#allocation8] sm:$0xff] %v4165_v52  ;;  %v4184_v48 = vsub.f32 %v4180_v43, %v4165_v52 }
0x4c41   :  { %v4188_v53 = vmul.f32 %v4184_v48, %v4184_v48 }
0x4c43   :  { %v4192_v56 = vsel %vm52_vm1, %v4188_v53, 0.0 }
0x4c44   :  { %v4167_v30 = vpop.f32.mrf.mxu3 }
0x4c45   :  { %v4168_v36 = vadd.f32 %v4850_v33, %v4167_v30 }
0x4c47   :  { %4177 = vst [vmem:[#allocation8 + $0x8] sm:$0xff] %v4168_v36  ;;  %v4185_v47 = vsub.f32 %v4181_v42, %v4168_v36 }
0x4c49   :  { %v4189_v54 = vmul.f32 %v4185_v47, %v4185_v47 }
0x4c4b   :  { %v4193_v61 = vsel %vm52_vm1, %v4189_v54, 0.0 }
0x4c4c   :  { %v4170_v46 = vpop.f32.mrf.mxu3  ;;  %v4194_v57 = vadd.f32 %v4193_v61, %v4192_v56 }
0x4c4d   :  { %v4171_v4 = vadd.f32 %v4850_v33, %v4170_v46 }
0x4c4f   :  { %4178 = vst [vmem:[#allocation8 + $0x10] sm:$0xff] %v4171_v4  ;;  %v4186_v51 = vsub.f32 %v4182_v40, %v4171_v4 }
0x4c51   :  { %v4190_v59 = vmul.f32 %v4186_v51, %v4186_v51 }
0x4c53   :  { %v4195_v49 = vsel %vm52_vm1, %v4190_v59, 0.0 }
0x4c54   :  { %v4173_v37 = vpop.f32.mrf.mxu3  ;;  %v4196_v0 = vadd.f32 %v4195_v49, %v4194_v57 }
0x4c55   :  { %v4174_v55 = vadd.f32 %v4850_v33, %v4173_v37 }
0x4c57   :  { %4179 = vst [vmem:[#allocation8 + $0x18] sm:$0xff] %v4174_v55  ;;  %v4187_v45 = vsub.f32 %v4183_v60, %v4174_v55 }
0x4c58   :  { %4261 = dma.vmem_to_hbm [thread:$0]  %s4254_s21, 512, %s4256_s2, [#allocation7], %s4965_s30, %s4965_s30, %s4966_s7  }
0x4c59   :  { %v4191_v7 = vmul.f32 %v4187_v45, %v4187_v45 }
0x4c5b   :  { %v4197_v3 = vsel %vm52_vm1, %v4191_v7, 0.0 }
0x4c5c   :  { %v4198_v6 = vadd.f32 %v4197_v3, %v4196_v0 }
0x4c5e   :  { %4199 = vadd.xlane.f32.xlu1 %v4198_v6 }
0x4c66   :  { %4228 = vadd.xlane.f32.xlu1 %v4227_v12 }
0x4cd1   :  { %v4200_v15 = vpop.xlane.xlu1 %4199 }
0x4cd2   :  { %v4201_v16 = vrot.slane %v4200_v15, 4 }
0x4cd4   :  { %v4202_v58 = vadd.f32 %v4201_v16, %v4200_v15 }
0x4cd6   :  { %v4203_v62 = vrot.slane %v4202_v58, 2 }
0x4cd8   :  { %v4204_v34 = vadd.f32 %v4203_v62, %v4202_v58 }
0x4cd9   :  { %v4229_v5 = vpop.xlane.xlu1 %4228 }
0x4cda   :  { %v4230_v10 = vrot.slane %v4229_v5, 4  ;;  %v4205_v17 = vrot.slane %v4204_v34, 1 }
0x4cdc   :  { %v4231_v18 = vadd.f32 %v4230_v10, %v4229_v5  ;;  %v4206_v63 = vadd.f32 %v4205_v17, %v4204_v34 }
0x4cde   :  { %v4232_v21 = vrot.slane %v4231_v18, 2  ;;  %4555 = vpush %v4206_v63 }
0x4ce0   :  { %v4233_v44 = vadd.f32 %v4232_v21, %v4231_v18 }
0x4ce2   :  { %v4234_v24 = vrot.slane %v4233_v44, 1 }
0x4ce4   :  { %v4235_v27 = vadd.f32 %v4234_v24, %v4233_v44 }
0x4ce6   :  { %4557 = vpush %v4235_v27 }
0x4ce7   :  { %4559 = vpush %v4244_v19 }
0x4d0f   :  { %s4556_s5 = spop %4555 }
0x4d10   :  { %s4208_s30 = smul.f32 100.0, %s4556_s5 }
0x4d12   :  { %s4209_s7 = sadd.f32 -354.21353, %s4208_s30 }
0x4d14   :  { %s4210_s24 = smul.f32 0.5, %s4209_s7 }
0x4d17   :  { %s4558_s27 = spop %4557 }
0x4d18   :  { %s4237_s4 = sadd.f32 %s4558_s27, %s4210_s24  ;;  %s4560_s8 = spop %4559 }
0x4d1a   :  { %s4246_s9 = smul.f32 %s4560_s8, %s4237_s4 }
0x4d1c   :  { %v4247_v29 = vstv %s4246_s9 }
0x4d1d   :  { %4248 = vst [vmem:[#allocation9] sm:$0x1] %v4247_v29 }
0x4d1e   :  { %4272 = dma.vmem_to_hbm [thread:$0]  %s4268_s26, 16, %s4270_s0, [#allocation10]  }
0x4d1f   :  { %4951 = dma.done.wait [#allocation7], 512  }
0x4d20   :  { %4952 = vsyncadd [#allocation7], 4294966784 }
0x4d21   :  { %4953 = dma.done.wait [#allocation10], 16  }
0x4d22   :  { %4954 = vsyncadd [#allocation10], 4294967280 }
0x4d23   :  { %4281 = vsyncpa [#allocation6], 1 }
0x4d24   :  { %4282 = vsyncpa [#allocation7], 1 }
0x4d25   :  { %4283 = vsyncpa [#allocation10], 1 }

</bundles_post_ra>
